<compile_context>
chip_gen: v6e
topology: v6e:2x2x1
jax: 0.10.0
libtpu: 0.0.40
codegen_flags: <defaults>
</compile_context>

<pallas_src>
import math
import functools

import jax
import jax.numpy as jnp
from jax.experimental import pallas as pl
from jax.experimental.pallas import tpu as pltpu


# ----------------------------------------------------------------------------
# Shared math helpers (used identically inside kernels and in the reference)
# ----------------------------------------------------------------------------
def _layernorm(v, w, b, eps=1e-5):
    mu = jnp.mean(v, axis=-1, keepdims=True)
    var = jnp.mean((v - mu) ** 2, axis=-1, keepdims=True)
    return (v - mu) * jax.lax.rsqrt(var + eps) * w + b


def _gelu_tanh(x):
    c = math.sqrt(2.0 / math.pi)
    return 0.5 * x * (1.0 + jnp.tanh(c * (x + 0.044715 * x * x * x)))


def _blocks_and_norm(x, bias, ln1w, ln1b, wq, wk, wv, wo, bo,
                     ln2w, ln2b, w1, b1, w2, b2, nw, nb,
                     *, num_heads, depth, recip_fn):
    """Transformer blocks + final LayerNorm on a flattened (B*N, D) matrix.

    `bias` is a (BN, BN) additive block-diagonal mask so tokens from
    different batch elements never attend to each other.  The weight
    containers may be Pallas refs or plain arrays (only integer / [...]
    indexing is used), so the exact same code is traced inside the kernel
    and in the pure-JAX reference.
    """
    bn, d = x.shape
    dh = d // num_heads
    scale = dh ** -0.5
    bf = jnp.bfloat16

    for l in range(depth):
        h = _layernorm(x, ln1w[l], ln1b[l]).astype(bf)
        attn = jnp.zeros((bn, d), jnp.float32)
        for hd in range(num_heads):
            idx = l * num_heads + hd
            q = jnp.dot(h, wq[idx], preferred_element_type=jnp.float32)
            k = jnp.dot(h, wk[idx], preferred_element_type=jnp.float32)
            v = jnp.dot(h, wv[idx], preferred_element_type=jnp.float32)
            # scores via dot_general contracting the last dims (no k.T)
            s = jax.lax.dot_general(
                q.astype(bf), k.astype(bf), (((1,), (1,)), ((), ())),
                preferred_element_type=jnp.float32)
            s = s * scale + bias
            s = s - jnp.max(s, axis=-1, keepdims=True)
            p = jnp.exp(s)
            p = p * recip_fn(jnp.sum(p, axis=-1, keepdims=True))
            o = jnp.dot(p.astype(bf), v.astype(bf),
                        preferred_element_type=jnp.float32)
            # accumulate o @ Wproj_head instead of concatenating heads
            attn = attn + jnp.dot(o.astype(bf), wo[idx],
                                  preferred_element_type=jnp.float32)
        x = x + attn + bo[l]

        h2 = _layernorm(x, ln2w[l], ln2b[l]).astype(bf)
        m = jnp.dot(h2, w1[l], preferred_element_type=jnp.float32) + b1[l]
        m = _gelu_tanh(m).astype(bf)
        m = jnp.dot(m, w2[l], preferred_element_type=jnp.float32) + b2[l]
        x = x + m

    return _layernorm(x, nw[...], nb[...])


# ----------------------------------------------------------------------------
# Pallas kernel 1: conv-stem GEMM  (A @ W + shift, optional ReLU)
# ----------------------------------------------------------------------------
def _mm_bias_kernel(a_ref, w_ref, bias_ref, o_ref, *, relu):
    y = jnp.dot(a_ref[...], w_ref[...], preferred_element_type=jnp.float32)
    y = y + bias_ref[...]
    if relu:
        y = jnp.maximum(y, 0.0)
    o_ref[...] = y.astype(o_ref.dtype)


def pallas_matmul_bias(a, w, bias, relu=False, out_dtype=jnp.float32, tm=512):
    m, k = a.shape
    _, n = w.shape
    tm = min(tm, m)
    if m % tm:
        tm = m  # shapes here are small; fall back to a single M tile
    a = a.astype(jnp.bfloat16)
    w = w.astype(jnp.bfloat16)
    bias = bias.reshape(1, n).astype(jnp.float32)
    return pl.pallas_call(
        functools.partial(_mm_bias_kernel, relu=relu),
        out_shape=jax.ShapeDtypeStruct((m, n), out_dtype),
        grid=(m // tm,),
        in_specs=[
            pl.BlockSpec((tm, k), lambda i: (i, 0)),   # K left at true size
            pl.BlockSpec((k, n), lambda i: (0, 0)),    # full weight, no pad
            pl.BlockSpec((1, n), lambda i: (0, 0)),
        ],
        out_specs=pl.BlockSpec((tm, n), lambda i: (i, 0)),
        compiler_params=pltpu.CompilerParams(dimension_semantics=("parallel",)),
    )(a, w, bias)


def plain_matmul_bias(a, w, bias, relu=False, out_dtype=jnp.float32):
    y = jnp.dot(a.astype(jnp.bfloat16), w.astype(jnp.bfloat16),
                preferred_element_type=jnp.float32) + bias.reshape(1, -1)
    if relu:
        y = jnp.maximum(y, 0.0)
    return y.astype(out_dtype)


# ----------------------------------------------------------------------------
# Pallas kernel 2: fused transformer
#   cls concat + pos add + all Blocks + final LayerNorm + feat_op selection
# ----------------------------------------------------------------------------
def _fused_vit_kernel(tok_ref, cls_ref, pos_ref, bias_ref,
                      ln1w, ln1b, wq, wk, wv, wo, bo,
                      ln2w, ln2b, w1, b1, w2, b2, nw, nb,
                      o_ref, xbuf,
                      *, num_heads, depth, batch, feat_op):
    npatch, d = tok_ref.shape[1], tok_ref.shape[2]
    n = npatch + 1

    # Assemble [cls | patch tokens] + pos_embed for the whole batch into a
    # single (B*N, D) VMEM buffer (no HBM round trip, no in-kernel concat).
    for bi in range(batch):
        xbuf[bi * n:bi * n + 1, :] = cls_ref[...] + pos_ref[0:1, :]
        xbuf[bi * n + 1:(bi + 1) * n, :] = tok_ref[bi] + pos_ref[1:n, :]

    xn = _blocks_and_norm(
        xbuf[...], bias_ref[...],
        ln1w, ln1b, wq, wk, wv, wo, bo, ln2w, ln2b, w1, b1, w2, b2, nw, nb,
        num_heads=num_heads, depth=depth,
        recip_fn=lambda v: pl.reciprocal(v, approx=True))

    if feat_op == "cls":
        for bi in range(batch):
            o_ref[bi:bi + 1, :] = xn[bi * n:bi * n + 1, :]
    else:  # pool
        for bi in range(batch):
            o_ref[bi:bi + 1, :] = jnp.mean(xn[bi * n + 1:(bi + 1) * n, :],
                                           axis=0, keepdims=True)


def _zero_map(nd, i):
    return (0,) * nd


def _block_diag_bias(batch, n):
    bn = batch * n
    bid = jnp.arange(bn) // n
    return jnp.where(bid[:, None] == bid[None, :], 0.0, -1e30).astype(jnp.float32)


def transformer_pallas(tokens, tr, *, num_heads, depth, feat_op):
    b, npatch, d = tokens.shape
    n = npatch + 1
    bias = _block_diag_bias(b, n)
    args = [tokens, tr["cls"], tr["pos"], bias,
            tr["ln1w"], tr["ln1b"], tr["wq"], tr["wk"], tr["wv"], tr["wo"],
            tr["bo"], tr["ln2w"], tr["ln2b"], tr["w1"], tr["b1"], tr["w2"],
            tr["b2"], tr["norm_w"], tr["norm_b"]]
    in_specs = [pl.BlockSpec(a.shape, functools.partial(_zero_map, a.ndim))
                for a in args]
    return pl.pallas_call(
        functools.partial(_fused_vit_kernel, num_heads=num_heads, depth=depth,
                          batch=b, feat_op=feat_op),
        out_shape=jax.ShapeDtypeStruct((b, d), jnp.float32),
        grid=(1,),
        in_specs=in_specs,
        out_specs=pl.BlockSpec((b, d), lambda i: (0, 0)),
        scratch_shapes=[pltpu.VMEM((b * n, d), jnp.float32)],
    )(*args)


def transformer_reference(tokens, tr, *, num_heads, depth, feat_op):
    b, npatch, d = tokens.shape
    n = npatch + 1
    rows = []
    for bi in range(b):
        rows.append(tr["cls"] + tr["pos"][0:1, :])
        rows.append(tokens[bi] + tr["pos"][1:, :])
    x = jnp.concatenate(rows, axis=0)
    bias = _block_diag_bias(b, n)
    xn = _blocks_and_norm(
        x, bias, tr["ln1w"], tr["ln1b"], tr["wq"], tr["wk"], tr["wv"], tr["wo"],
        tr["bo"], tr["ln2w"], tr["ln2b"], tr["w1"], tr["b1"], tr["w2"], tr["b2"],
        tr["norm_w"], tr["norm_b"],
        num_heads=num_heads, depth=depth, recip_fn=lambda v: 1.0 / v)
    if feat_op == "cls":
        return xn[jnp.arange(b) * n]
    return jnp.stack([jnp.mean(xn[bi * n + 1:(bi + 1) * n], axis=0)
                      for bi in range(b)])


# ----------------------------------------------------------------------------
# ConvStem (im2col glue in JAX; the GEMM hot path is the Pallas kernel above)
# ----------------------------------------------------------------------------
def im2col_3x3_s2(x):
    """x: (B, T, H, W, C) -> rows (B*T*Ho*Wo, 9*C); kernel=3, stride=2, pad=1."""
    b, t, h, w, c = x.shape
    xp = jnp.pad(x, ((0, 0), (0, 0), (1, 1), (1, 1), (0, 0)))
    ho = (h + 2 - 3) // 2 + 1
    wo = (w + 2 - 3) // 2 + 1
    cols = []
    for ki in range(3):
        for kj in range(3):
            cols.append(xp[:, :, ki:ki + 2 * ho:2, kj:kj + 2 * wo:2, :])
    patches = jnp.stack(cols, axis=4)  # (B, T, Ho, Wo, 9, C)
    return patches.reshape(b * t * ho * wo, 9 * c), (b, t, ho, wo)


def convstem_forward(x_ncthw, stem, matmul_fn, bn_eps=1e-5):
    # (B, C, T, H, W) -> (B, T, H, W, C); activations kept in bf16
    x = jnp.transpose(x_ncthw, (0, 2, 3, 4, 1)).astype(jnp.bfloat16)
    for (w_t, gamma, beta, rmean, rvar) in stem["convs"]:
        a, (b_, t_, ho, wo) = im2col_3x3_s2(x)
        cout, cin = w_t.shape[0], w_t.shape[1]
        # PyTorch weight (Cout, Cin, 1, 3, 3) -> (kh, kw, Cin, Cout) -> (9*Cin, Cout)
        w_mat = jnp.transpose(w_t[:, :, 0], (2, 3, 1, 0)).reshape(9 * cin, cout)
        scale = gamma * jax.lax.rsqrt(rvar + bn_eps)
        shift = beta - rmean * scale
        # BN scale folded into the weight on the host; kernel: A@W + shift, ReLU
        y = matmul_fn(a, w_mat * scale[None, :], shift, relu=True,
                      out_dtype=jnp.bfloat16)
        x = y.reshape(b_, t_, ho, wo, cout)

    w_f, b_f = stem["final"]                     # (Cout, Cin, tub, 1, 1), (Cout,)
    cout, cin, tub = w_f.shape[0], w_f.shape[1], w_f.shape[2]
    b_, t_, h_, w_, _ = x.shape
    t2 = t_ // tub
    xr = (x.reshape(b_, t2, tub, h_, w_, cin)
           .transpose(0, 1, 3, 4, 2, 5)
           .reshape(b_ * t2 * h_ * w_, tub * cin))
    w_mat = jnp.transpose(w_f[:, :, :, 0, 0], (2, 1, 0)).reshape(tub * cin, cout)
    y = matmul_fn(xr, w_mat, b_f, relu=False, out_dtype=jnp.float32)
    # == PyTorch proj(x).flatten(2).transpose(1, 2): token order (t, h, w)
    return y.reshape(b_, t2 * h_ * w_, cout)


# ----------------------------------------------------------------------------
# Full forward (Pallas and pure-JAX reference)
# ----------------------------------------------------------------------------
def forward_pallas(x_ncthw, params, num_heads, depth, feat_op="cls"):
    tokens = convstem_forward(x_ncthw, params["stem"], pallas_matmul_bias)
    return transformer_pallas(tokens, params["tr"], num_heads=num_heads,
                              depth=depth, feat_op=feat_op)


def forward_reference(x_ncthw, params, num_heads, depth, feat_op="cls"):
    tokens = convstem_forward(x_ncthw, params["stem"], plain_matmul_bias)
    return transformer_reference(tokens, params["tr"], num_heads=num_heads,
                                 depth=depth, feat_op=feat_op)


# ----------------------------------------------------------------------------
# Deterministic parameter initialization (shapes follow the PyTorch __init__),
# pre-packed into the kernel-friendly layout (per-head splits, depth-stacked,
# matmul weights in bf16).
# ----------------------------------------------------------------------------
def init_params(key, d, depth, num_heads, mlp_ratio, in_chans, tubelet,
                num_patches):
    keys = iter(jax.random.split(key, 256))

    def nrm(shape, std):
        return (std * jax.random.normal(next(keys), shape)).astype(jnp.float32)

    # ConvStem: 4 x [Conv3d(1,3,3)/s(1,2,2) no-bias, BN, ReLU] + Conv3d(tub,1,1)
    convs = []
    cin, cout = in_chans, d // 8
    for _ in range(4):
        w = nrm((cout, cin, 1, 3, 3), std=math.sqrt(2.0 / (cin * 9)))
        gamma = 1.0 + nrm((cout,), 0.05)
        beta = nrm((cout,), 0.05)
        rmean = jnp.zeros((cout,), jnp.float32)
        rvar = jnp.ones((cout,), jnp.float32)
        convs.append((w, gamma, beta, rmean, rvar))
        cin, cout = cout, cout * 2
    w_final = nrm((d, cin, tubelet, 1, 1), std=math.sqrt(1.0 / (cin * tubelet)))
    b_final = nrm((d,), 0.02)
    stem = dict(convs=convs, final=(w_final, b_final))

    # Transformer blocks (PyTorch Linear weights are (out, in); transpose for x@W;
    # q/k/v/proj additionally split per head on the host).
    dh = d // num_heads
    hidden = d * mlp_ratio
    ln1w, ln1b, ln2w, ln2b, bo = [], [], [], [], []
    wq, wk, wv, wo = [], [], [], []
    w1l, b1l, w2l, b2l = [], [], [], []
    for _ in range(depth):
        wqkv = nrm((3 * d, d), std=math.sqrt(2.0 / (4 * d))).T       # (D, 3D)
        wproj = nrm((d, d), std=math.sqrt(2.0 / (2 * d))).T          # (D, D)
        for h in range(num_heads):
            wq.append(wqkv[:, h * dh:(h + 1) * dh])
            wk.append(wqkv[:, d + h * dh:d + (h + 1) * dh])
            wv.append(wqkv[:, 2 * d + h * dh:2 * d + (h + 1) * dh])
            wo.append(wproj[h * dh:(h + 1) * dh, :])
        ln1w.append(jnp.ones((1, d), jnp.float32))
        ln1b.append(jnp.zeros((1, d), jnp.float32))
        ln2w.append(jnp.ones((1, d), jnp.float32))
        ln2b.append(jnp.zeros((1, d), jnp.float32))
        bo.append(jnp.zeros((1, d), jnp.float32))
        w1l.append(nrm((hidden, d), std=math.sqrt(2.0 / (d + hidden))).T)
        b1l.append(jnp.zeros((1, hidden), jnp.float32))
        w2l.append(nrm((d, hidden), std=math.sqrt(2.0 / (d + hidden))).T)
        b2l.append(jnp.zeros((1, d), jnp.float32))

    bf = jnp.bfloat16
    tr = dict(
        ln1w=jnp.stack(ln1w), ln1b=jnp.stack(ln1b),           # (depth, 1, D)
        wq=jnp.stack(wq).astype(bf),                          # (depth*H, D, dh)
        wk=jnp.stack(wk).astype(bf),
        wv=jnp.stack(wv).astype(bf),
        wo=jnp.stack(wo).astype(bf),                          # (depth*H, dh, D)
        bo=jnp.stack(bo),
        ln2w=jnp.stack(ln2w), ln2b=jnp.stack(ln2b),
        w1=jnp.stack(w1l).astype(bf),                         # (depth, D, hidden)
        b1=jnp.stack(b1l),
        w2=jnp.stack(w2l).astype(bf),                         # (depth, hidden, D)
        b2=jnp.stack(b2l),
        cls=nrm((1, d), 0.02),
        # NOTE: PyTorch leaves pos_embed at zeros; random here to exercise the add.
        pos=nrm((num_patches + 1, d), 0.02),
        norm_w=jnp.ones((1, d), jnp.float32),
        norm_b=jnp.zeros((1, d), jnp.float32),
    )
    return dict(stem=stem, tr=tr)


# ----------------------------------------------------------------------------
if __name__ == "__main__":
    # Small config consistent with the module:
    #   ConvStem requires patch_spatial == 16 and embed_dim % 8 == 0.
    B, C, T, H, W = 2, 1, 4, 32, 32
    embed_dim, depth, num_heads, mlp_ratio = 64, 2, 4, 4
    patch_spatial, patch_temporal = 16, 2
    num_patches = (H // patch_spatial) * (W // patch_spatial) * (T // patch_temporal)

    key = jax.random.PRNGKey(0)
    kx, kp = jax.random.split(key)
    x = jax.random.normal(kx, (B, C, T, H, W), jnp.float32)
    params = init_params(kp, embed_dim, depth, num_heads, mlp_ratio, C,
                         patch_temporal, num_patches)

    fwd = jax.jit(functools.partial(forward_pallas, num_heads=num_heads,
                                    depth=depth, feat_op="cls"))
    out = jax.block_until_ready(fwd(x, params))
    assert out.shape == (B, embed_dim), out.shape

    ref_fn = jax.jit(functools.partial(forward_reference, num_heads=num_heads,
                                       depth=depth, feat_op="cls"))
    ref = jax.block_until_ready(ref_fn(x, params))
    err = float(jnp.max(jnp.abs(out - ref)))
    assert err < 5e-2, f"pallas vs reference mismatch: {err}"

    print("KERNEL_OK")
</pallas_src>

<mosaic_0001>
module attributes {stable_mosaic.version = 11 : i64} {
  func.func @_mm_bias_kernel(%arg0: i32, %arg1: memref<512x9xbf16, #tpu.memory_space<vmem>>, %arg2: memref<9x8xbf16, #tpu.memory_space<vmem>>, %arg3: memref<1x8xf32, #tpu.memory_space<vmem>>, %arg4: memref<512x8xbf16, #tpu.memory_space<vmem>>) attributes {dimension_semantics = [#tpu.dimension_semantics<parallel>], iteration_bounds = array<i64: 4>, scalar_prefetch = 0 : i64, scratch_operands = 0 : i64, tpu.core_type = #tpu.core_type<tc>, window_params = [{transform_indices = @transform_0, window_bounds = array<i64: 512, 9>}, {pipeline_mode = #tpu.pipeline_mode<synchronous>, transform_indices = @transform_1, window_bounds = array<i64: 9, 8>}, {pipeline_mode = #tpu.pipeline_mode<synchronous>, transform_indices = @transform_2, window_bounds = array<i64: 1, 8>}, {transform_indices = @transform_3, window_bounds = array<i64: 512, 8>}]} {
    %c0 = arith.constant 0 : index
    %c0_0 = arith.constant 0 : index
    %0 = vector.load %arg1[%c0, %c0_0] : memref<512x9xbf16, #tpu.memory_space<vmem>>, vector<512x9xbf16>
    %c0_1 = arith.constant 0 : index
    %c0_2 = arith.constant 0 : index
    %1 = vector.load %arg2[%c0_1, %c0_2] : memref<9x8xbf16, #tpu.memory_space<vmem>>, vector<9x8xbf16>
    %cst = arith.constant dense<0.000000e+00> : vector<512x8xf32>
    %2 = tpu.matmul %0, %1, %cst {dimension_numbers = #tpu.dot_dimension_numbers<[1], [0], [0], [1], [0, 0, 1, 1], [], []>} : vector<512x9xbf16>, vector<9x8xbf16>, vector<512x8xf32> -> vector<512x8xf32>
    %c0_3 = arith.constant 0 : index
    %c0_4 = arith.constant 0 : index
    %3 = vector.load %arg3[%c0_3, %c0_4] : memref<1x8xf32, #tpu.memory_space<vmem>>, vector<1x8xf32>
    %4 = vector.broadcast %3 : vector<1x8xf32> to vector<512x8xf32>
    %5 = arith.addf %2, %4 : vector<512x8xf32>
    %cst_5 = arith.constant 0.000000e+00 : f32
    %6 = vector.broadcast %cst_5 : f32 to vector<512x8xf32>
    %7 = arith.maximumf %5, %6 : vector<512x8xf32>
    %8 = arith.truncf %7 : vector<512x8xf32> to vector<512x8xbf16>
    %c0_6 = arith.constant 0 : index
    %c0_7 = arith.constant 0 : index
    %9 = vector.load %arg4[%c0_6, %c0_7] : memref<512x8xbf16, #tpu.memory_space<vmem>>, vector<512x8xbf16>
    tpu.vector_store %arg4[%c0_6, %c0_7], %8 {strides = array<i32>} : memref<512x8xbf16, #tpu.memory_space<vmem>>, vector<512x8xbf16>,
    return
  }
  func.func @transform_0(%arg0: i32) -> (i32, i32) {
    %c0_i32 = arith.constant 0 : i32
    %c0_i32_0 = arith.constant 0 : i32
    return %arg0, %c0_i32 : i32, i32
  }
  func.func @transform_1(%arg0: i32) -> (i32, i32) {
    %c0_i32 = arith.constant 0 : i32
    %c0_i32_0 = arith.constant 0 : i32
    %c0_i32_1 = arith.constant 0 : i32
    return %c0_i32, %c0_i32_0 : i32, i32
  }
  func.func @transform_2(%arg0: i32) -> (i32, i32) {
    %c0_i32 = arith.constant 0 : i32
    %c0_i32_0 = arith.constant 0 : i32
    %c0_i32_1 = arith.constant 0 : i32
    return %c0_i32, %c0_i32_0 : i32, i32
  }
  func.func @transform_3(%arg0: i32) -> (i32, i32) {
    %c0_i32 = arith.constant 0 : i32
    %c0_i32_0 = arith.constant 0 : i32
    return %arg0, %c0_i32 : i32, i32
  }
}

module attributes {stable_mosaic.version = 11 : i64} {
  func.func @_mm_bias_kernel(%arg0: i32, %arg1: memref<512x72xbf16, #tpu.memory_space<vmem>>, %arg2: memref<72x16xbf16, #tpu.memory_space<vmem>>, %arg3: memref<1x16xf32, #tpu.memory_space<vmem>>, %arg4: memref<512x16xbf16, #tpu.memory_space<vmem>>) attributes {dimension_semantics = [#tpu.dimension_semantics<parallel>], iteration_bounds = array<i64: 1>, scalar_prefetch = 0 : i64, scratch_operands = 0 : i64, tpu.core_type = #tpu.core_type<tc>, window_params = [{transform_indices = @transform_0, window_bounds = array<i64: 512, 72>}, {pipeline_mode = #tpu.pipeline_mode<synchronous>, transform_indices = @transform_1, window_bounds = array<i64: 72, 16>}, {pipeline_mode = #tpu.pipeline_mode<synchronous>, transform_indices = @transform_2, window_bounds = array<i64: 1, 16>}, {transform_indices = @transform_3, window_bounds = array<i64: 512, 16>}]} {
    %c0 = arith.constant 0 : index
    %c0_0 = arith.constant 0 : index
    %0 = vector.load %arg1[%c0, %c0_0] : memref<512x72xbf16, #tpu.memory_space<vmem>>, vector<512x72xbf16>
    %c0_1 = arith.constant 0 : index
    %c0_2 = arith.constant 0 : index
    %1 = vector.load %arg2[%c0_1, %c0_2] : memref<72x16xbf16, #tpu.memory_space<vmem>>, vector<72x16xbf16>
    %cst = arith.constant dense<0.000000e+00> : vector<512x16xf32>
    %2 = tpu.matmul %0, %1, %cst {dimension_numbers = #tpu.dot_dimension_numbers<[1], [0], [0], [1], [0, 0, 1, 1], [], []>} : vector<512x72xbf16>, vector<72x16xbf16>, vector<512x16xf32> -> vector<512x16xf32>
    %c0_3 = arith.constant 0 : index
    %c0_4 = arith.constant 0 : index
    %3 = vector.load %arg3[%c0_3, %c0_4] : memref<1x16xf32, #tpu.memory_space<vmem>>, vector<1x16xf32>
    %4 = vector.broadcast %3 : vector<1x16xf32> to vector<512x16xf32>
    %5 = arith.addf %2, %4 : vector<512x16xf32>
    %cst_5 = arith.constant 0.000000e+00 : f32
    %6 = vector.broadcast %cst_5 : f32 to vector<512x16xf32>
    %7 = arith.maximumf %5, %6 : vector<512x16xf32>
    %8 = arith.truncf %7 : vector<512x16xf32> to vector<512x16xbf16>
    %c0_6 = arith.constant 0 : index
    %c0_7 = arith.constant 0 : index
    %9 = vector.load %arg4[%c0_6, %c0_7] : memref<512x16xbf16, #tpu.memory_space<vmem>>, vector<512x16xbf16>
    tpu.vector_store %arg4[%c0_6, %c0_7], %8 {strides = array<i32>} : memref<512x16xbf16, #tpu.memory_space<vmem>>, vector<512x16xbf16>,
    return
  }
  func.func @transform_0(%arg0: i32) -> (i32, i32) {
    %c0_i32 = arith.constant 0 : i32
    %c0_i32_0 = arith.constant 0 : i32
    return %arg0, %c0_i32 : i32, i32
  }
  func.func @transform_1(%arg0: i32) -> (i32, i32) {
    %c0_i32 = arith.constant 0 : i32
    %c0_i32_0 = arith.constant 0 : i32
    %c0_i32_1 = arith.constant 0 : i32
    return %c0_i32, %c0_i32_0 : i32, i32
  }
  func.func @transform_2(%arg0: i32) -> (i32, i32) {
    %c0_i32 = arith.constant 0 : i32
    %c0_i32_0 = arith.constant 0 : i32
    %c0_i32_1 = arith.constant 0 : i32
    return %c0_i32, %c0_i32_0 : i32, i32
  }
  func.func @transform_3(%arg0: i32) -> (i32, i32) {
    %c0_i32 = arith.constant 0 : i32
    %c0_i32_0 = arith.constant 0 : i32
    return %arg0, %c0_i32 : i32, i32
  }
}

module attributes {stable_mosaic.version = 11 : i64} {
  func.func @_mm_bias_kernel(%arg0: i32, %arg1: memref<128x144xbf16, #tpu.memory_space<vmem>>, %arg2: memref<144x32xbf16, #tpu.memory_space<vmem>>, %arg3: memref<1x32xf32, #tpu.memory_space<vmem>>, %arg4: memref<128x32xbf16, #tpu.memory_space<vmem>>) attributes {dimension_semantics = [#tpu.dimension_semantics<parallel>], iteration_bounds = array<i64: 1>, scalar_prefetch = 0 : i64, scratch_operands = 0 : i64, tpu.core_type = #tpu.core_type<tc>, window_params = [{transform_indices = @transform_0, window_bounds = array<i64: 128, 144>}, {pipeline_mode = #tpu.pipeline_mode<synchronous>, transform_indices = @transform_1, window_bounds = array<i64: 144, 32>}, {pipeline_mode = #tpu.pipeline_mode<synchronous>, transform_indices = @transform_2, window_bounds = array<i64: 1, 32>}, {transform_indices = @transform_3, window_bounds = array<i64: 128, 32>}]} {
    %c0 = arith.constant 0 : index
    %c0_0 = arith.constant 0 : index
    %0 = vector.load %arg1[%c0, %c0_0] : memref<128x144xbf16, #tpu.memory_space<vmem>>, vector<128x144xbf16>
    %c0_1 = arith.constant 0 : index
    %c0_2 = arith.constant 0 : index
    %1 = vector.load %arg2[%c0_1, %c0_2] : memref<144x32xbf16, #tpu.memory_space<vmem>>, vector<144x32xbf16>
    %cst = arith.constant dense<0.000000e+00> : vector<128x32xf32>
    %2 = tpu.matmul %0, %1, %cst {dimension_numbers = #tpu.dot_dimension_numbers<[1], [0], [0], [1], [0, 0, 1, 1], [], []>} : vector<128x144xbf16>, vector<144x32xbf16>, vector<128x32xf32> -> vector<128x32xf32>
    %c0_3 = arith.constant 0 : index
    %c0_4 = arith.constant 0 : index
    %3 = vector.load %arg3[%c0_3, %c0_4] : memref<1x32xf32, #tpu.memory_space<vmem>>, vector<1x32xf32>
    %4 = vector.broadcast %3 : vector<1x32xf32> to vector<128x32xf32>
    %5 = arith.addf %2, %4 : vector<128x32xf32>
    %cst_5 = arith.constant 0.000000e+00 : f32
    %6 = vector.broadcast %cst_5 : f32 to vector<128x32xf32>
    %7 = arith.maximumf %5, %6 : vector<128x32xf32>
    %8 = arith.truncf %7 : vector<128x32xf32> to vector<128x32xbf16>
    %c0_6 = arith.constant 0 : index
    %c0_7 = arith.constant 0 : index
    %9 = vector.load %arg4[%c0_6, %c0_7] : memref<128x32xbf16, #tpu.memory_space<vmem>>, vector<128x32xbf16>
    tpu.vector_store %arg4[%c0_6, %c0_7], %8 {strides = array<i32>} : memref<128x32xbf16, #tpu.memory_space<vmem>>, vector<128x32xbf16>,
    return
  }
  func.func @transform_0(%arg0: i32) -> (i32, i32) {
    %c0_i32 = arith.constant 0 : i32
    %c0_i32_0 = arith.constant 0 : i32
    return %arg0, %c0_i32 : i32, i32
  }
  func.func @transform_1(%arg0: i32) -> (i32, i32) {
    %c0_i32 = arith.constant 0 : i32
    %c0_i32_0 = arith.constant 0 : i32
    %c0_i32_1 = arith.constant 0 : i32
    return %c0_i32, %c0_i32_0 : i32, i32
  }
  func.func @transform_2(%arg0: i32) -> (i32, i32) {
    %c0_i32 = arith.constant 0 : i32
    %c0_i32_0 = arith.constant 0 : i32
    %c0_i32_1 = arith.constant 0 : i32
    return %c0_i32, %c0_i32_0 : i32, i32
  }
  func.func @transform_3(%arg0: i32) -> (i32, i32) {
    %c0_i32 = arith.constant 0 : i32
    %c0_i32_0 = arith.constant 0 : i32
    return %arg0, %c0_i32 : i32, i32
  }
}

module attributes {stable_mosaic.version = 11 : i64} {
  func.func @_mm_bias_kernel(%arg0: i32, %arg1: memref<32x288xbf16, #tpu.memory_space<vmem>>, %arg2: memref<288x64xbf16, #tpu.memory_space<vmem>>, %arg3: memref<1x64xf32, #tpu.memory_space<vmem>>, %arg4: memref<32x64xbf16, #tpu.memory_space<vmem>>) attributes {dimension_semantics = [#tpu.dimension_semantics<parallel>], iteration_bounds = array<i64: 1>, scalar_prefetch = 0 : i64, scratch_operands = 0 : i64, tpu.core_type = #tpu.core_type<tc>, window_params = [{transform_indices = @transform_0, window_bounds = array<i64: 32, 288>}, {pipeline_mode = #tpu.pipeline_mode<synchronous>, transform_indices = @transform_1, window_bounds = array<i64: 288, 64>}, {pipeline_mode = #tpu.pipeline_mode<synchronous>, transform_indices = @transform_2, window_bounds = array<i64: 1, 64>}, {transform_indices = @transform_3, window_bounds = array<i64: 32, 64>}]} {
    %c0 = arith.constant 0 : index
    %c0_0 = arith.constant 0 : index
    %0 = vector.load %arg1[%c0, %c0_0] : memref<32x288xbf16, #tpu.memory_space<vmem>>, vector<32x288xbf16>
    %c0_1 = arith.constant 0 : index
    %c0_2 = arith.constant 0 : index
    %1 = vector.load %arg2[%c0_1, %c0_2] : memref<288x64xbf16, #tpu.memory_space<vmem>>, vector<288x64xbf16>
    %cst = arith.constant dense<0.000000e+00> : vector<32x64xf32>
    %2 = tpu.matmul %0, %1, %cst {dimension_numbers = #tpu.dot_dimension_numbers<[1], [0], [0], [1], [0, 0, 1, 1], [], []>} : vector<32x288xbf16>, vector<288x64xbf16>, vector<32x64xf32> -> vector<32x64xf32>
    %c0_3 = arith.constant 0 : index
    %c0_4 = arith.constant 0 : index
    %3 = vector.load %arg3[%c0_3, %c0_4] : memref<1x64xf32, #tpu.memory_space<vmem>>, vector<1x64xf32>
    %4 = vector.broadcast %3 : vector<1x64xf32> to vector<32x64xf32>
    %5 = arith.addf %2, %4 : vector<32x64xf32>
    %cst_5 = arith.constant 0.000000e+00 : f32
    %6 = vector.broadcast %cst_5 : f32 to vector<32x64xf32>
    %7 = arith.maximumf %5, %6 : vector<32x64xf32>
    %8 = arith.truncf %7 : vector<32x64xf32> to vector<32x64xbf16>
    %c0_6 = arith.constant 0 : index
    %c0_7 = arith.constant 0 : index
    %9 = vector.load %arg4[%c0_6, %c0_7] : memref<32x64xbf16, #tpu.memory_space<vmem>>, vector<32x64xbf16>
    tpu.vector_store %arg4[%c0_6, %c0_7], %8 {strides = array<i32>} : memref<32x64xbf16, #tpu.memory_space<vmem>>, vector<32x64xbf16>,
    return
  }
  func.func @transform_0(%arg0: i32) -> (i32, i32) {
    %c0_i32 = arith.constant 0 : i32
    %c0_i32_0 = arith.constant 0 : i32
    return %arg0, %c0_i32 : i32, i32
  }
  func.func @transform_1(%arg0: i32) -> (i32, i32) {
    %c0_i32 = arith.constant 0 : i32
    %c0_i32_0 = arith.constant 0 : i32
    %c0_i32_1 = arith.constant 0 : i32
    return %c0_i32, %c0_i32_0 : i32, i32
  }
  func.func @transform_2(%arg0: i32) -> (i32, i32) {
    %c0_i32 = arith.constant 0 : i32
    %c0_i32_0 = arith.constant 0 : i32
    %c0_i32_1 = arith.constant 0 : i32
    return %c0_i32, %c0_i32_0 : i32, i32
  }
  func.func @transform_3(%arg0: i32) -> (i32, i32) {
    %c0_i32 = arith.constant 0 : i32
    %c0_i32_0 = arith.constant 0 : i32
    return %arg0, %c0_i32 : i32, i32
  }
}

module attributes {stable_mosaic.version = 11 : i64} {
  func.func @_mm_bias_kernel(%arg0: i32, %arg1: memref<16x128xbf16, #tpu.memory_space<vmem>>, %arg2: memref<128x64xbf16, #tpu.memory_space<vmem>>, %arg3: memref<1x64xf32, #tpu.memory_space<vmem>>, %arg4: memref<16x64xf32, #tpu.memory_space<vmem>>) attributes {dimension_semantics = [#tpu.dimension_semantics<parallel>], iteration_bounds = array<i64: 1>, scalar_prefetch = 0 : i64, scratch_operands = 0 : i64, tpu.core_type = #tpu.core_type<tc>, window_params = [{transform_indices = @transform_0, window_bounds = array<i64: 16, 128>}, {pipeline_mode = #tpu.pipeline_mode<synchronous>, transform_indices = @transform_1, window_bounds = array<i64: 128, 64>}, {pipeline_mode = #tpu.pipeline_mode<synchronous>, transform_indices = @transform_2, window_bounds = array<i64: 1, 64>}, {transform_indices = @transform_3, window_bounds = array<i64: 16, 64>}]} {
    %c0 = arith.constant 0 : index
    %c0_0 = arith.constant 0 : index
    %0 = vector.load %arg1[%c0, %c0_0] : memref<16x128xbf16, #tpu.memory_space<vmem>>, vector<16x128xbf16>
    %c0_1 = arith.constant 0 : index
    %c0_2 = arith.constant 0 : index
    %1 = vector.load %arg2[%c0_1, %c0_2] : memref<128x64xbf16, #tpu.memory_space<vmem>>, vector<128x64xbf16>
    %cst = arith.constant dense<0.000000e+00> : vector<16x64xf32>
    %2 = tpu.matmul %0, %1, %cst {dimension_numbers = #tpu.dot_dimension_numbers<[1], [0], [0], [1], [0, 0, 1, 1], [], []>} : vector<16x128xbf16>, vector<128x64xbf16>, vector<16x64xf32> -> vector<16x64xf32>
    %c0_3 = arith.constant 0 : index
    %c0_4 = arith.constant 0 : index
    %3 = vector.load %arg3[%c0_3, %c0_4] : memref<1x64xf32, #tpu.memory_space<vmem>>, vector<1x64xf32>
    %4 = vector.broadcast %3 : vector<1x64xf32> to vector<16x64xf32>
    %5 = arith.addf %2, %4 : vector<16x64xf32>
    %c0_5 = arith.constant 0 : index
    %c0_6 = arith.constant 0 : index
    %6 = vector.load %arg4[%c0_5, %c0_6] : memref<16x64xf32, #tpu.memory_space<vmem>>, vector<16x64xf32>
    tpu.vector_store %arg4[%c0_5, %c0_6], %5 {strides = array<i32>} : memref<16x64xf32, #tpu.memory_space<vmem>>, vector<16x64xf32>,
    return
  }
  func.func @transform_0(%arg0: i32) -> (i32, i32) {
    %c0_i32 = arith.constant 0 : i32
    %c0_i32_0 = arith.constant 0 : i32
    return %arg0, %c0_i32 : i32, i32
  }
  func.func @transform_1(%arg0: i32) -> (i32, i32) {
    %c0_i32 = arith.constant 0 : i32
    %c0_i32_0 = arith.constant 0 : i32
    %c0_i32_1 = arith.constant 0 : i32
    return %c0_i32, %c0_i32_0 : i32, i32
  }
  func.func @transform_2(%arg0: i32) -> (i32, i32) {
    %c0_i32 = arith.constant 0 : i32
    %c0_i32_0 = arith.constant 0 : i32
    %c0_i32_1 = arith.constant 0 : i32
    return %c0_i32, %c0_i32_0 : i32, i32
  }
  func.func @transform_3(%arg0: i32) -> (i32, i32) {
    %c0_i32 = arith.constant 0 : i32
    %c0_i32_0 = arith.constant 0 : i32
    return %arg0, %c0_i32 : i32, i32
  }
}

module attributes {stable_mosaic.version = 11 : i64} {
  func.func @_fused_vit_kernel(%arg0: i32, %arg1: memref<2x8x64xf32, #tpu.memory_space<vmem>>, %arg2: memref<1x64xf32, #tpu.memory_space<vmem>>, %arg3: memref<9x64xf32, #tpu.memory_space<vmem>>, %arg4: memref<18x18xf32, #tpu.memory_space<vmem>>, %arg5: memref<2x1x64xf32, #tpu.memory_space<vmem>>, %arg6: memref<2x1x64xf32, #tpu.memory_space<vmem>>, %arg7: memref<8x64x16xbf16, #tpu.memory_space<vmem>>, %arg8: memref<8x64x16xbf16, #tpu.memory_space<vmem>>, %arg9: memref<8x64x16xbf16, #tpu.memory_space<vmem>>, %arg10: memref<8x16x64xbf16, #tpu.memory_space<vmem>>, %arg11: memref<2x1x64xf32, #tpu.memory_space<vmem>>, %arg12: memref<2x1x64xf32, #tpu.memory_space<vmem>>, %arg13: memref<2x1x64xf32, #tpu.memory_space<vmem>>, %arg14: memref<2x64x256xbf16, #tpu.memory_space<vmem>>, %arg15: memref<2x1x256xf32, #tpu.memory_space<vmem>>, %arg16: memref<2x256x64xbf16, #tpu.memory_space<vmem>>, %arg17: memref<2x1x64xf32, #tpu.memory_space<vmem>>, %arg18: memref<1x64xf32, #tpu.memory_space<vmem>>, %arg19: memref<1x64xf32, #tpu.memory_space<vmem>>, %arg20: memref<2x64xf32, #tpu.memory_space<vmem>>, %arg21: memref<18x64xf32, #tpu.memory_space<vmem>>) attributes {dimension_semantics = [#tpu.dimension_semantics<arbitrary>], iteration_bounds = array<i64: 1>, scalar_prefetch = 0 : i64, scratch_operands = 1 : i64, tpu.core_type = #tpu.core_type<tc>, window_params = [{pipeline_mode = #tpu.pipeline_mode<synchronous>, transform_indices = @transform_0, window_bounds = array<i64: 2, 8, 64>}, {pipeline_mode = #tpu.pipeline_mode<synchronous>, transform_indices = @transform_1, window_bounds = array<i64: 1, 64>}, {pipeline_mode = #tpu.pipeline_mode<synchronous>, transform_indices = @transform_2, window_bounds = array<i64: 9, 64>}, {pipeline_mode = #tpu.pipeline_mode<synchronous>, transform_indices = @transform_3, window_bounds = array<i64: 18, 18>}, {pipeline_mode = #tpu.pipeline_mode<synchronous>, transform_indices = @transform_4, window_bounds = array<i64: 2, 1, 64>}, {pipeline_mode = #tpu.pipeline_mode<synchronous>, transform_indices = @transform_5, window_bounds = array<i64: 2, 1, 64>}, {pipeline_mode = #tpu.pipeline_mode<synchronous>, transform_indices = @transform_6, window_bounds = array<i64: 8, 64, 16>}, {pipeline_mode = #tpu.pipeline_mode<synchronous>, transform_indices = @transform_7, window_bounds = array<i64: 8, 64, 16>}, {pipeline_mode = #tpu.pipeline_mode<synchronous>, transform_indices = @transform_8, window_bounds = array<i64: 8, 64, 16>}, {pipeline_mode = #tpu.pipeline_mode<synchronous>, transform_indices = @transform_9, window_bounds = array<i64: 8, 16, 64>}, {pipeline_mode = #tpu.pipeline_mode<synchronous>, transform_indices = @transform_10, window_bounds = array<i64: 2, 1, 64>}, {pipeline_mode = #tpu.pipeline_mode<synchronous>, transform_indices = @transform_11, window_bounds = array<i64: 2, 1, 64>}, {pipeline_mode = #tpu.pipeline_mode<synchronous>, transform_indices = @transform_12, window_bounds = array<i64: 2, 1, 64>}, {pipeline_mode = #tpu.pipeline_mode<synchronous>, transform_indices = @transform_13, window_bounds = array<i64: 2, 64, 256>}, {pipeline_mode = #tpu.pipeline_mode<synchronous>, transform_indices = @transform_14, window_bounds = array<i64: 2, 1, 256>}, {pipeline_mode = #tpu.pipeline_mode<synchronous>, transform_indices = @transform_15, window_bounds = array<i64: 2, 256, 64>}, {pipeline_mode = #tpu.pipeline_mode<synchronous>, transform_indices = @transform_16, window_bounds = array<i64: 2, 1, 64>}, {pipeline_mode = #tpu.pipeline_mode<synchronous>, transform_indices = @transform_17, window_bounds = array<i64: 1, 64>}, {pipeline_mode = #tpu.pipeline_mode<synchronous>, transform_indices = @transform_18, window_bounds = array<i64: 1, 64>}, {pipeline_mode = #tpu.pipeline_mode<synchronous>, transform_indices = @transform_19, window_bounds = array<i64: 2, 64>}]} {
    %c0 = arith.constant 0 : index
    %c0_0 = arith.constant 0 : index
    %0 = vector.load %arg2[%c0, %c0_0] : memref<1x64xf32, #tpu.memory_space<vmem>>, vector<1x64xf32>
    %c0_1 = arith.constant 0 : index
    %c0_2 = arith.constant 0 : index
    %1 = vector.load %arg3[%c0_1, %c0_2] : memref<9x64xf32, #tpu.memory_space<vmem>>, vector<1x64xf32>
    %2 = arith.addf %0, %1 : vector<1x64xf32>
    %c0_3 = arith.constant 0 : index
    %c0_4 = arith.constant 0 : index
    %3 = vector.load %arg21[%c0_3, %c0_4] : memref<18x64xf32, #tpu.memory_space<vmem>>, vector<1x64xf32>
    tpu.vector_store %arg21[%c0_3, %c0_4], %2 {strides = array<i32>} : memref<18x64xf32, #tpu.memory_space<vmem>>, vector<1x64xf32>,
    %c0_5 = arith.constant 0 : index
    %c0_6 = arith.constant 0 : index
    %c0_7 = arith.constant 0 : index
    %4 = vector.load %arg1[%c0_5, %c0_6, %c0_7] : memref<2x8x64xf32, #tpu.memory_space<vmem>>, vector<1x8x64xf32>
    %5 = vector.shape_cast %4 : vector<1x8x64xf32> to vector<8x64xf32>
    %c1 = arith.constant 1 : index
    %c0_8 = arith.constant 0 : index
    %6 = vector.load %arg3[%c1, %c0_8] : memref<9x64xf32, #tpu.memory_space<vmem>>, vector<8x64xf32>
    %7 = arith.addf %5, %6 : vector<8x64xf32>
    %c1_9 = arith.constant 1 : index
    %c0_10 = arith.constant 0 : index
    %8 = vector.load %arg21[%c1_9, %c0_10] : memref<18x64xf32, #tpu.memory_space<vmem>>, vector<8x64xf32>
    tpu.vector_store %arg21[%c1_9, %c0_10], %7 {strides = array<i32>} : memref<18x64xf32, #tpu.memory_space<vmem>>, vector<8x64xf32>,
    %c0_11 = arith.constant 0 : index
    %c0_12 = arith.constant 0 : index
    %9 = vector.load %arg2[%c0_11, %c0_12] : memref<1x64xf32, #tpu.memory_space<vmem>>, vector<1x64xf32>
    %c0_13 = arith.constant 0 : index
    %c0_14 = arith.constant 0 : index
    %10 = vector.load %arg3[%c0_13, %c0_14] : memref<9x64xf32, #tpu.memory_space<vmem>>, vector<1x64xf32>
    %11 = arith.addf %9, %10 : vector<1x64xf32>
    %c9 = arith.constant 9 : index
    %c0_15 = arith.constant 0 : index
    %12 = vector.load %arg21[%c9, %c0_15] : memref<18x64xf32, #tpu.memory_space<vmem>>, vector<1x64xf32>
    tpu.vector_store %arg21[%c9, %c0_15], %11 {strides = array<i32>} : memref<18x64xf32, #tpu.memory_space<vmem>>, vector<1x64xf32>,
    %c1_16 = arith.constant 1 : index
    %c0_17 = arith.constant 0 : index
    %c0_18 = arith.constant 0 : index
    %13 = vector.load %arg1[%c1_16, %c0_17, %c0_18] : memref<2x8x64xf32, #tpu.memory_space<vmem>>, vector<1x8x64xf32>
    %14 = vector.shape_cast %13 : vector<1x8x64xf32> to vector<8x64xf32>
    %c1_19 = arith.constant 1 : index
    %c0_20 = arith.constant 0 : index
    %15 = vector.load %arg3[%c1_19, %c0_20] : memref<9x64xf32, #tpu.memory_space<vmem>>, vector<8x64xf32>
    %16 = arith.addf %14, %15 : vector<8x64xf32>
    %c10 = arith.constant 10 : index
    %c0_21 = arith.constant 0 : index
    %17 = vector.load %arg21[%c10, %c0_21] : memref<18x64xf32, #tpu.memory_space<vmem>>, vector<8x64xf32>
    tpu.vector_store %arg21[%c10, %c0_21], %16 {strides = array<i32>} : memref<18x64xf32, #tpu.memory_space<vmem>>, vector<8x64xf32>,
    %c0_22 = arith.constant 0 : index
    %c0_23 = arith.constant 0 : index
    %18 = vector.load %arg21[%c0_22, %c0_23] : memref<18x64xf32, #tpu.memory_space<vmem>>, vector<18x64xf32>
    %c0_24 = arith.constant 0 : index
    %c0_25 = arith.constant 0 : index
    %19 = vector.load %arg4[%c0_24, %c0_25] : memref<18x18xf32, #tpu.memory_space<vmem>>, vector<18x18xf32>
    %c0_26 = arith.constant 0 : index
    %c0_27 = arith.constant 0 : index
    %c0_28 = arith.constant 0 : index
    %20 = vector.load %arg5[%c0_26, %c0_27, %c0_28] : memref<2x1x64xf32, #tpu.memory_space<vmem>>, vector<1x1x64xf32>
    %21 = vector.shape_cast %20 : vector<1x1x64xf32> to vector<1x64xf32>
    %c0_29 = arith.constant 0 : index
    %c0_30 = arith.constant 0 : index
    %c0_31 = arith.constant 0 : index
    %22 = vector.load %arg6[%c0_29, %c0_30, %c0_31] : memref<2x1x64xf32, #tpu.memory_space<vmem>>, vector<1x1x64xf32>
    %23 = vector.shape_cast %22 : vector<1x1x64xf32> to vector<1x64xf32>
    %cst = arith.constant dense<0.000000e+00> : vector<18xf32>
    %24 = vector.multi_reduction <add>, %18, %cst [1] : vector<18x64xf32> to vector<18xf32>
    %25 = vector.shape_cast %24 : vector<18xf32> to vector<18x1xf32>
    %cst_32 = arith.constant 6.400000e+01 : f32
    %26 = vector.broadcast %cst_32 : f32 to vector<18x1xf32>
    %27 = arith.divf %25, %26 : vector<18x1xf32>
    %28 = vector.broadcast %27 : vector<18x1xf32> to vector<18x64xf32>
    %29 = arith.subf %18, %28 : vector<18x64xf32>
    %30 = arith.mulf %29, %29 : vector<18x64xf32>
    %cst_33 = arith.constant dense<0.000000e+00> : vector<18xf32>
    %31 = vector.multi_reduction <add>, %30, %cst_33 [1] : vector<18x64xf32> to vector<18xf32>
    %32 = vector.shape_cast %31 : vector<18xf32> to vector<18x1xf32>
    %cst_34 = arith.constant 6.400000e+01 : f32
    %33 = vector.broadcast %cst_34 : f32 to vector<18x1xf32>
    %34 = arith.divf %32, %33 : vector<18x1xf32>
    %35 = vector.broadcast %27 : vector<18x1xf32> to vector<18x64xf32>
    %36 = arith.subf %18, %35 : vector<18x64xf32>
    %cst_35 = arith.constant 9.99999974E-6 : f32
    %37 = vector.broadcast %cst_35 : f32 to vector<18x1xf32>
    %38 = arith.addf %34, %37 : vector<18x1xf32>
    %39 = math.rsqrt %38 : vector<18x1xf32>
    %40 = vector.broadcast %39 : vector<18x1xf32> to vector<18x64xf32>
    %41 = arith.mulf %36, %40 : vector<18x64xf32>
    %42 = vector.broadcast %21 : vector<1x64xf32> to vector<18x64xf32>
    %43 = arith.mulf %41, %42 : vector<18x64xf32>
    %44 = vector.broadcast %23 : vector<1x64xf32> to vector<18x64xf32>
    %45 = arith.addf %43, %44 : vector<18x64xf32>
    %46 = arith.truncf %45 : vector<18x64xf32> to vector<18x64xbf16>
    %cst_36 = arith.constant 0.000000e+00 : f32
    %47 = vector.broadcast %cst_36 : f32 to vector<18x64xf32>
    %c0_37 = arith.constant 0 : index
    %c0_38 = arith.constant 0 : index
    %c0_39 = arith.constant 0 : index
    %48 = vector.load %arg7[%c0_37, %c0_38, %c0_39] : memref<8x64x16xbf16, #tpu.memory_space<vmem>>, vector<1x64x16xbf16>
    %49 = vector.shape_cast %48 : vector<1x64x16xbf16> to vector<64x16xbf16>
    %cst_40 = arith.constant dense<0.000000e+00> : vector<18x16xf32>
    %50 = tpu.matmul %46, %49, %cst_40 {dimension_numbers = #tpu.dot_dimension_numbers<[1], [0], [0], [1], [0, 0, 1, 1], [], []>} : vector<18x64xbf16>, vector<64x16xbf16>, vector<18x16xf32> -> vector<18x16xf32>
    %c0_41 = arith.constant 0 : index
    %c0_42 = arith.constant 0 : index
    %c0_43 = arith.constant 0 : index
    %51 = vector.load %arg8[%c0_41, %c0_42, %c0_43] : memref<8x64x16xbf16, #tpu.memory_space<vmem>>, vector<1x64x16xbf16>
    %52 = vector.shape_cast %51 : vector<1x64x16xbf16> to vector<64x16xbf16>
    %cst_44 = arith.constant dense<0.000000e+00> : vector<18x16xf32>
    %53 = tpu.matmul %46, %52, %cst_44 {dimension_numbers = #tpu.dot_dimension_numbers<[1], [0], [0], [1], [0, 0, 1, 1], [], []>} : vector<18x64xbf16>, vector<64x16xbf16>, vector<18x16xf32> -> vector<18x16xf32>
    %c0_45 = arith.constant 0 : index
    %c0_46 = arith.constant 0 : index
    %c0_47 = arith.constant 0 : index
    %54 = vector.load %arg9[%c0_45, %c0_46, %c0_47] : memref<8x64x16xbf16, #tpu.memory_space<vmem>>, vector<1x64x16xbf16>
    %55 = vector.shape_cast %54 : vector<1x64x16xbf16> to vector<64x16xbf16>
    %cst_48 = arith.constant dense<0.000000e+00> : vector<18x16xf32>
    %56 = tpu.matmul %46, %55, %cst_48 {dimension_numbers = #tpu.dot_dimension_numbers<[1], [0], [0], [1], [0, 0, 1, 1], [], []>} : vector<18x64xbf16>, vector<64x16xbf16>, vector<18x16xf32> -> vector<18x16xf32>
    %57 = arith.truncf %50 : vector<18x16xf32> to vector<18x16xbf16>
    %58 = arith.truncf %53 : vector<18x16xf32> to vector<18x16xbf16>
    %cst_49 = arith.constant dense<0.000000e+00> : vector<18x18xf32>
    %59 = tpu.matmul %57, %58, %cst_49 {dimension_numbers = #tpu.dot_dimension_numbers<[1], [1], [0], [0], [0, 0, 1, 0], [], []>} : vector<18x16xbf16>, vector<18x16xbf16>, vector<18x18xf32> -> vector<18x18xf32>
    %cst_50 = arith.constant 2.500000e-01 : f32
    %60 = vector.broadcast %cst_50 : f32 to vector<18x18xf32>
    %61 = arith.mulf %59, %60 : vector<18x18xf32>
    %62 = arith.addf %61, %19 : vector<18x18xf32>
    %cst_51 = arith.constant dense<0xFF800000> : vector<18xf32>
    %63 = vector.multi_reduction <maximumf>, %62, %cst_51 [1] : vector<18x18xf32> to vector<18xf32>
    %64 = vector.shape_cast %63 : vector<18xf32> to vector<18x1xf32>
    %65 = vector.broadcast %64 : vector<18x1xf32> to vector<18x18xf32>
    %66 = arith.subf %62, %65 : vector<18x18xf32>
    %67 = math.exp %66 : vector<18x18xf32>
    %cst_52 = arith.constant dense<0.000000e+00> : vector<18xf32>
    %68 = vector.multi_reduction <add>, %67, %cst_52 [1] : vector<18x18xf32> to vector<18xf32>
    %69 = vector.shape_cast %68 : vector<18xf32> to vector<18x1xf32>
    %70 = tpu.reciprocal %69 {approx = true} : vector<18x1xf32> -> vector<18x1xf32>
    %71 = vector.broadcast %70 : vector<18x1xf32> to vector<18x18xf32>
    %72 = arith.mulf %67, %71 : vector<18x18xf32>
    %73 = arith.truncf %72 : vector<18x18xf32> to vector<18x18xbf16>
    %74 = arith.truncf %56 : vector<18x16xf32> to vector<18x16xbf16>
    %cst_53 = arith.constant dense<0.000000e+00> : vector<18x16xf32>
    %75 = tpu.matmul %73, %74, %cst_53 {dimension_numbers = #tpu.dot_dimension_numbers<[1], [0], [0], [1], [0, 0, 1, 1], [], []>} : vector<18x18xbf16>, vector<18x16xbf16>, vector<18x16xf32> -> vector<18x16xf32>
    %76 = arith.truncf %75 : vector<18x16xf32> to vector<18x16xbf16>
    %c0_54 = arith.constant 0 : index
    %c0_55 = arith.constant 0 : index
    %c0_56 = arith.constant 0 : index
    %77 = vector.load %arg10[%c0_54, %c0_55, %c0_56] : memref<8x16x64xbf16, #tpu.memory_space<vmem>>, vector<1x16x64xbf16>
    %78 = vector.shape_cast %77 : vector<1x16x64xbf16> to vector<16x64xbf16>
    %cst_57 = arith.constant dense<0.000000e+00> : vector<18x64xf32>
    %79 = tpu.matmul %76, %78, %cst_57 {dimension_numbers = #tpu.dot_dimension_numbers<[1], [0], [0], [1], [0, 0, 1, 1], [], []>} : vector<18x16xbf16>, vector<16x64xbf16>, vector<18x64xf32> -> vector<18x64xf32>
    %80 = arith.addf %47, %79 : vector<18x64xf32>
    %c1_58 = arith.constant 1 : index
    %c0_59 = arith.constant 0 : index
    %c0_60 = arith.constant 0 : index
    %81 = vector.load %arg7[%c1_58, %c0_59, %c0_60] : memref<8x64x16xbf16, #tpu.memory_space<vmem>>, vector<1x64x16xbf16>
    %82 = vector.shape_cast %81 : vector<1x64x16xbf16> to vector<64x16xbf16>
    %cst_61 = arith.constant dense<0.000000e+00> : vector<18x16xf32>
    %83 = tpu.matmul %46, %82, %cst_61 {dimension_numbers = #tpu.dot_dimension_numbers<[1], [0], [0], [1], [0, 0, 1, 1], [], []>} : vector<18x64xbf16>, vector<64x16xbf16>, vector<18x16xf32> -> vector<18x16xf32>
    %c1_62 = arith.constant 1 : index
    %c0_63 = arith.constant 0 : index
    %c0_64 = arith.constant 0 : index
    %84 = vector.load %arg8[%c1_62, %c0_63, %c0_64] : memref<8x64x16xbf16, #tpu.memory_space<vmem>>, vector<1x64x16xbf16>
    %85 = vector.shape_cast %84 : vector<1x64x16xbf16> to vector<64x16xbf16>
    %cst_65 = arith.constant dense<0.000000e+00> : vector<18x16xf32>
    %86 = tpu.matmul %46, %85, %cst_65 {dimension_numbers = #tpu.dot_dimension_numbers<[1], [0], [0], [1], [0, 0, 1, 1], [], []>} : vector<18x64xbf16>, vector<64x16xbf16>, vector<18x16xf32> -> vector<18x16xf32>
    %c1_66 = arith.constant 1 : index
    %c0_67 = arith.constant 0 : index
    %c0_68 = arith.constant 0 : index
    %87 = vector.load %arg9[%c1_66, %c0_67, %c0_68] : memref<8x64x16xbf16, #tpu.memory_space<vmem>>, vector<1x64x16xbf16>
    %88 = vector.shape_cast %87 : vector<1x64x16xbf16> to vector<64x16xbf16>
    %cst_69 = arith.constant dense<0.000000e+00> : vector<18x16xf32>
    %89 = tpu.matmul %46, %88, %cst_69 {dimension_numbers = #tpu.dot_dimension_numbers<[1], [0], [0], [1], [0, 0, 1, 1], [], []>} : vector<18x64xbf16>, vector<64x16xbf16>, vector<18x16xf32> -> vector<18x16xf32>
    %90 = arith.truncf %83 : vector<18x16xf32> to vector<18x16xbf16>
    %91 = arith.truncf %86 : vector<18x16xf32> to vector<18x16xbf16>
    %cst_70 = arith.constant dense<0.000000e+00> : vector<18x18xf32>
    %92 = tpu.matmul %90, %91, %cst_70 {dimension_numbers = #tpu.dot_dimension_numbers<[1], [1], [0], [0], [0, 0, 1, 0], [], []>} : vector<18x16xbf16>, vector<18x16xbf16>, vector<18x18xf32> -> vector<18x18xf32>
    %cst_71 = arith.constant 2.500000e-01 : f32
    %93 = vector.broadcast %cst_71 : f32 to vector<18x18xf32>
    %94 = arith.mulf %92, %93 : vector<18x18xf32>
    %95 = arith.addf %94, %19 : vector<18x18xf32>
    %cst_72 = arith.constant dense<0xFF800000> : vector<18xf32>
    %96 = vector.multi_reduction <maximumf>, %95, %cst_72 [1] : vector<18x18xf32> to vector<18xf32>
    %97 = vector.shape_cast %96 : vector<18xf32> to vector<18x1xf32>
    %98 = vector.broadcast %97 : vector<18x1xf32> to vector<18x18xf32>
    %99 = arith.subf %95, %98 : vector<18x18xf32>
    %100 = math.exp %99 : vector<18x18xf32>
    %cst_73 = arith.constant dense<0.000000e+00> : vector<18xf32>
    %101 = vector.multi_reduction <add>, %100, %cst_73 [1] : vector<18x18xf32> to vector<18xf32>
    %102 = vector.shape_cast %101 : vector<18xf32> to vector<18x1xf32>
    %103 = tpu.reciprocal %102 {approx = true} : vector<18x1xf32> -> vector<18x1xf32>
    %104 = vector.broadcast %103 : vector<18x1xf32> to vector<18x18xf32>
    %105 = arith.mulf %100, %104 : vector<18x18xf32>
    %106 = arith.truncf %105 : vector<18x18xf32> to vector<18x18xbf16>
    %107 = arith.truncf %89 : vector<18x16xf32> to vector<18x16xbf16>
    %cst_74 = arith.constant dense<0.000000e+00> : vector<18x16xf32>
    %108 = tpu.matmul %106, %107, %cst_74 {dimension_numbers = #tpu.dot_dimension_numbers<[1], [0], [0], [1], [0, 0, 1, 1], [], []>} : vector<18x18xbf16>, vector<18x16xbf16>, vector<18x16xf32> -> vector<18x16xf32>
    %109 = arith.truncf %108 : vector<18x16xf32> to vector<18x16xbf16>
    %c1_75 = arith.constant 1 : index
    %c0_76 = arith.constant 0 : index
    %c0_77 = arith.constant 0 : index
    %110 = vector.load %arg10[%c1_75, %c0_76, %c0_77] : memref<8x16x64xbf16, #tpu.memory_space<vmem>>, vector<1x16x64xbf16>
    %111 = vector.shape_cast %110 : vector<1x16x64xbf16> to vector<16x64xbf16>
    %cst_78 = arith.constant dense<0.000000e+00> : vector<18x64xf32>
    %112 = tpu.matmul %109, %111, %cst_78 {dimension_numbers = #tpu.dot_dimension_numbers<[1], [0], [0], [1], [0, 0, 1, 1], [], []>} : vector<18x16xbf16>, vector<16x64xbf16>, vector<18x64xf32> -> vector<18x64xf32>
    %113 = arith.addf %80, %112 : vector<18x64xf32>
    %c2 = arith.constant 2 : index
    %c0_79 = arith.constant 0 : index
    %c0_80 = arith.constant 0 : index
    %114 = vector.load %arg7[%c2, %c0_79, %c0_80] : memref<8x64x16xbf16, #tpu.memory_space<vmem>>, vector<1x64x16xbf16>
    %115 = vector.shape_cast %114 : vector<1x64x16xbf16> to vector<64x16xbf16>
    %cst_81 = arith.constant dense<0.000000e+00> : vector<18x16xf32>
    %116 = tpu.matmul %46, %115, %cst_81 {dimension_numbers = #tpu.dot_dimension_numbers<[1], [0], [0], [1], [0, 0, 1, 1], [], []>} : vector<18x64xbf16>, vector<64x16xbf16>, vector<18x16xf32> -> vector<18x16xf32>
    %c2_82 = arith.constant 2 : index
    %c0_83 = arith.constant 0 : index
    %c0_84 = arith.constant 0 : index
    %117 = vector.load %arg8[%c2_82, %c0_83, %c0_84] : memref<8x64x16xbf16, #tpu.memory_space<vmem>>, vector<1x64x16xbf16>
    %118 = vector.shape_cast %117 : vector<1x64x16xbf16> to vector<64x16xbf16>
    %cst_85 = arith.constant dense<0.000000e+00> : vector<18x16xf32>
    %119 = tpu.matmul %46, %118, %cst_85 {dimension_numbers = #tpu.dot_dimension_numbers<[1], [0], [0], [1], [0, 0, 1, 1], [], []>} : vector<18x64xbf16>, vector<64x16xbf16>, vector<18x16xf32> -> vector<18x16xf32>
    %c2_86 = arith.constant 2 : index
    %c0_87 = arith.constant 0 : index
    %c0_88 = arith.constant 0 : index
    %120 = vector.load %arg9[%c2_86, %c0_87, %c0_88] : memref<8x64x16xbf16, #tpu.memory_space<vmem>>, vector<1x64x16xbf16>
    %121 = vector.shape_cast %120 : vector<1x64x16xbf16> to vector<64x16xbf16>
    %cst_89 = arith.constant dense<0.000000e+00> : vector<18x16xf32>
    %122 = tpu.matmul %46, %121, %cst_89 {dimension_numbers = #tpu.dot_dimension_numbers<[1], [0], [0], [1], [0, 0, 1, 1], [], []>} : vector<18x64xbf16>, vector<64x16xbf16>, vector<18x16xf32> -> vector<18x16xf32>
    %123 = arith.truncf %116 : vector<18x16xf32> to vector<18x16xbf16>
    %124 = arith.truncf %119 : vector<18x16xf32> to vector<18x16xbf16>
    %cst_90 = arith.constant dense<0.000000e+00> : vector<18x18xf32>
    %125 = tpu.matmul %123, %124, %cst_90 {dimension_numbers = #tpu.dot_dimension_numbers<[1], [1], [0], [0], [0, 0, 1, 0], [], []>} : vector<18x16xbf16>, vector<18x16xbf16>, vector<18x18xf32> -> vector<18x18xf32>
    %cst_91 = arith.constant 2.500000e-01 : f32
    %126 = vector.broadcast %cst_91 : f32 to vector<18x18xf32>
    %127 = arith.mulf %125, %126 : vector<18x18xf32>
    %128 = arith.addf %127, %19 : vector<18x18xf32>
    %cst_92 = arith.constant dense<0xFF800000> : vector<18xf32>
    %129 = vector.multi_reduction <maximumf>, %128, %cst_92 [1] : vector<18x18xf32> to vector<18xf32>
    %130 = vector.shape_cast %129 : vector<18xf32> to vector<18x1xf32>
    %131 = vector.broadcast %130 : vector<18x1xf32> to vector<18x18xf32>
    %132 = arith.subf %128, %131 : vector<18x18xf32>
    %133 = math.exp %132 : vector<18x18xf32>
    %cst_93 = arith.constant dense<0.000000e+00> : vector<18xf32>
    %134 = vector.multi_reduction <add>, %133, %cst_93 [1] : vector<18x18xf32> to vector<18xf32>
    %135 = vector.shape_cast %134 : vector<18xf32> to vector<18x1xf32>
    %136 = tpu.reciprocal %135 {approx = true} : vector<18x1xf32> -> vector<18x1xf32>
    %137 = vector.broadcast %136 : vector<18x1xf32> to vector<18x18xf32>
    %138 = arith.mulf %133, %137 : vector<18x18xf32>
    %139 = arith.truncf %138 : vector<18x18xf32> to vector<18x18xbf16>
    %140 = arith.truncf %122 : vector<18x16xf32> to vector<18x16xbf16>
    %cst_94 = arith.constant dense<0.000000e+00> : vector<18x16xf32>
    %141 = tpu.matmul %139, %140, %cst_94 {dimension_numbers = #tpu.dot_dimension_numbers<[1], [0], [0], [1], [0, 0, 1, 1], [], []>} : vector<18x18xbf16>, vector<18x16xbf16>, vector<18x16xf32> -> vector<18x16xf32>
    %142 = arith.truncf %141 : vector<18x16xf32> to vector<18x16xbf16>
    %c2_95 = arith.constant 2 : index
    %c0_96 = arith.constant 0 : index
    %c0_97 = arith.constant 0 : index
    %143 = vector.load %arg10[%c2_95, %c0_96, %c0_97] : memref<8x16x64xbf16, #tpu.memory_space<vmem>>, vector<1x16x64xbf16>
    %144 = vector.shape_cast %143 : vector<1x16x64xbf16> to vector<16x64xbf16>
    %cst_98 = arith.constant dense<0.000000e+00> : vector<18x64xf32>
    %145 = tpu.matmul %142, %144, %cst_98 {dimension_numbers = #tpu.dot_dimension_numbers<[1], [0], [0], [1], [0, 0, 1, 1], [], []>} : vector<18x16xbf16>, vector<16x64xbf16>, vector<18x64xf32> -> vector<18x64xf32>
    %146 = arith.addf %113, %145 : vector<18x64xf32>
    %c3 = arith.constant 3 : index
    %c0_99 = arith.constant 0 : index
    %c0_100 = arith.constant 0 : index
    %147 = vector.load %arg7[%c3, %c0_99, %c0_100] : memref<8x64x16xbf16, #tpu.memory_space<vmem>>, vector<1x64x16xbf16>
    %148 = vector.shape_cast %147 : vector<1x64x16xbf16> to vector<64x16xbf16>
    %cst_101 = arith.constant dense<0.000000e+00> : vector<18x16xf32>
    %149 = tpu.matmul %46, %148, %cst_101 {dimension_numbers = #tpu.dot_dimension_numbers<[1], [0], [0], [1], [0, 0, 1, 1], [], []>} : vector<18x64xbf16>, vector<64x16xbf16>, vector<18x16xf32> -> vector<18x16xf32>
    %c3_102 = arith.constant 3 : index
    %c0_103 = arith.constant 0 : index
    %c0_104 = arith.constant 0 : index
    %150 = vector.load %arg8[%c3_102, %c0_103, %c0_104] : memref<8x64x16xbf16, #tpu.memory_space<vmem>>, vector<1x64x16xbf16>
    %151 = vector.shape_cast %150 : vector<1x64x16xbf16> to vector<64x16xbf16>
    %cst_105 = arith.constant dense<0.000000e+00> : vector<18x16xf32>
    %152 = tpu.matmul %46, %151, %cst_105 {dimension_numbers = #tpu.dot_dimension_numbers<[1], [0], [0], [1], [0, 0, 1, 1], [], []>} : vector<18x64xbf16>, vector<64x16xbf16>, vector<18x16xf32> -> vector<18x16xf32>
    %c3_106 = arith.constant 3 : index
    %c0_107 = arith.constant 0 : index
    %c0_108 = arith.constant 0 : index
    %153 = vector.load %arg9[%c3_106, %c0_107, %c0_108] : memref<8x64x16xbf16, #tpu.memory_space<vmem>>, vector<1x64x16xbf16>
    %154 = vector.shape_cast %153 : vector<1x64x16xbf16> to vector<64x16xbf16>
    %cst_109 = arith.constant dense<0.000000e+00> : vector<18x16xf32>
    %155 = tpu.matmul %46, %154, %cst_109 {dimension_numbers = #tpu.dot_dimension_numbers<[1], [0], [0], [1], [0, 0, 1, 1], [], []>} : vector<18x64xbf16>, vector<64x16xbf16>, vector<18x16xf32> -> vector<18x16xf32>
    %156 = arith.truncf %149 : vector<18x16xf32> to vector<18x16xbf16>
    %157 = arith.truncf %152 : vector<18x16xf32> to vector<18x16xbf16>
    %cst_110 = arith.constant dense<0.000000e+00> : vector<18x18xf32>
    %158 = tpu.matmul %156, %157, %cst_110 {dimension_numbers = #tpu.dot_dimension_numbers<[1], [1], [0], [0], [0, 0, 1, 0], [], []>} : vector<18x16xbf16>, vector<18x16xbf16>, vector<18x18xf32> -> vector<18x18xf32>
    %cst_111 = arith.constant 2.500000e-01 : f32
    %159 = vector.broadcast %cst_111 : f32 to vector<18x18xf32>
    %160 = arith.mulf %158, %159 : vector<18x18xf32>
    %161 = arith.addf %160, %19 : vector<18x18xf32>
    %cst_112 = arith.constant dense<0xFF800000> : vector<18xf32>
    %162 = vector.multi_reduction <maximumf>, %161, %cst_112 [1] : vector<18x18xf32> to vector<18xf32>
    %163 = vector.shape_cast %162 : vector<18xf32> to vector<18x1xf32>
    %164 = vector.broadcast %163 : vector<18x1xf32> to vector<18x18xf32>
    %165 = arith.subf %161, %164 : vector<18x18xf32>
    %166 = math.exp %165 : vector<18x18xf32>
    %cst_113 = arith.constant dense<0.000000e+00> : vector<18xf32>
    %167 = vector.multi_reduction <add>, %166, %cst_113 [1] : vector<18x18xf32> to vector<18xf32>
    %168 = vector.shape_cast %167 : vector<18xf32> to vector<18x1xf32>
    %169 = tpu.reciprocal %168 {approx = true} : vector<18x1xf32> -> vector<18x1xf32>
    %170 = vector.broadcast %169 : vector<18x1xf32> to vector<18x18xf32>
    %171 = arith.mulf %166, %170 : vector<18x18xf32>
    %172 = arith.truncf %171 : vector<18x18xf32> to vector<18x18xbf16>
    %173 = arith.truncf %155 : vector<18x16xf32> to vector<18x16xbf16>
    %cst_114 = arith.constant dense<0.000000e+00> : vector<18x16xf32>
    %174 = tpu.matmul %172, %173, %cst_114 {dimension_numbers = #tpu.dot_dimension_numbers<[1], [0], [0], [1], [0, 0, 1, 1], [], []>} : vector<18x18xbf16>, vector<18x16xbf16>, vector<18x16xf32> -> vector<18x16xf32>
    %175 = arith.truncf %174 : vector<18x16xf32> to vector<18x16xbf16>
    %c3_115 = arith.constant 3 : index
    %c0_116 = arith.constant 0 : index
    %c0_117 = arith.constant 0 : index
    %176 = vector.load %arg10[%c3_115, %c0_116, %c0_117] : memref<8x16x64xbf16, #tpu.memory_space<vmem>>, vector<1x16x64xbf16>
    %177 = vector.shape_cast %176 : vector<1x16x64xbf16> to vector<16x64xbf16>
    %cst_118 = arith.constant dense<0.000000e+00> : vector<18x64xf32>
    %178 = tpu.matmul %175, %177, %cst_118 {dimension_numbers = #tpu.dot_dimension_numbers<[1], [0], [0], [1], [0, 0, 1, 1], [], []>} : vector<18x16xbf16>, vector<16x64xbf16>, vector<18x64xf32> -> vector<18x64xf32>
    %179 = arith.addf %146, %178 : vector<18x64xf32>
    %180 = arith.addf %18, %179 : vector<18x64xf32>
    %c0_119 = arith.constant 0 : index
    %c0_120 = arith.constant 0 : index
    %c0_121 = arith.constant 0 : index
    %181 = vector.load %arg11[%c0_119, %c0_120, %c0_121] : memref<2x1x64xf32, #tpu.memory_space<vmem>>, vector<1x1x64xf32>
    %182 = vector.shape_cast %181 : vector<1x1x64xf32> to vector<1x64xf32>
    %183 = vector.broadcast %182 : vector<1x64xf32> to vector<18x64xf32>
    %184 = arith.addf %180, %183 : vector<18x64xf32>
    %c0_122 = arith.constant 0 : index
    %c0_123 = arith.constant 0 : index
    %c0_124 = arith.constant 0 : index
    %185 = vector.load %arg12[%c0_122, %c0_123, %c0_124] : memref<2x1x64xf32, #tpu.memory_space<vmem>>, vector<1x1x64xf32>
    %186 = vector.shape_cast %185 : vector<1x1x64xf32> to vector<1x64xf32>
    %c0_125 = arith.constant 0 : index
    %c0_126 = arith.constant 0 : index
    %c0_127 = arith.constant 0 : index
    %187 = vector.load %arg13[%c0_125, %c0_126, %c0_127] : memref<2x1x64xf32, #tpu.memory_space<vmem>>, vector<1x1x64xf32>
    %188 = vector.shape_cast %187 : vector<1x1x64xf32> to vector<1x64xf32>
    %cst_128 = arith.constant dense<0.000000e+00> : vector<18xf32>
    %189 = vector.multi_reduction <add>, %184, %cst_128 [1] : vector<18x64xf32> to vector<18xf32>
    %190 = vector.shape_cast %189 : vector<18xf32> to vector<18x1xf32>
    %cst_129 = arith.constant 6.400000e+01 : f32
    %191 = vector.broadcast %cst_129 : f32 to vector<18x1xf32>
    %192 = arith.divf %190, %191 : vector<18x1xf32>
    %193 = vector.broadcast %192 : vector<18x1xf32> to vector<18x64xf32>
    %194 = arith.subf %184, %193 : vector<18x64xf32>
    %195 = arith.mulf %194, %194 : vector<18x64xf32>
    %cst_130 = arith.constant dense<0.000000e+00> : vector<18xf32>
    %196 = vector.multi_reduction <add>, %195, %cst_130 [1] : vector<18x64xf32> to vector<18xf32>
    %197 = vector.shape_cast %196 : vector<18xf32> to vector<18x1xf32>
    %cst_131 = arith.constant 6.400000e+01 : f32
    %198 = vector.broadcast %cst_131 : f32 to vector<18x1xf32>
    %199 = arith.divf %197, %198 : vector<18x1xf32>
    %200 = vector.broadcast %192 : vector<18x1xf32> to vector<18x64xf32>
    %201 = arith.subf %184, %200 : vector<18x64xf32>
    %cst_132 = arith.constant 9.99999974E-6 : f32
    %202 = vector.broadcast %cst_132 : f32 to vector<18x1xf32>
    %203 = arith.addf %199, %202 : vector<18x1xf32>
    %204 = math.rsqrt %203 : vector<18x1xf32>
    %205 = vector.broadcast %204 : vector<18x1xf32> to vector<18x64xf32>
    %206 = arith.mulf %201, %205 : vector<18x64xf32>
    %207 = vector.broadcast %186 : vector<1x64xf32> to vector<18x64xf32>
    %208 = arith.mulf %206, %207 : vector<18x64xf32>
    %209 = vector.broadcast %188 : vector<1x64xf32> to vector<18x64xf32>
    %210 = arith.addf %208, %209 : vector<18x64xf32>
    %211 = arith.truncf %210 : vector<18x64xf32> to vector<18x64xbf16>
    %c0_133 = arith.constant 0 : index
    %c0_134 = arith.constant 0 : index
    %c0_135 = arith.constant 0 : index
    %212 = vector.load %arg14[%c0_133, %c0_134, %c0_135] : memref<2x64x256xbf16, #tpu.memory_space<vmem>>, vector<1x64x256xbf16>
    %213 = vector.shape_cast %212 : vector<1x64x256xbf16> to vector<64x256xbf16>
    %cst_136 = arith.constant dense<0.000000e+00> : vector<18x256xf32>
    %214 = tpu.matmul %211, %213, %cst_136 {dimension_numbers = #tpu.dot_dimension_numbers<[1], [0], [0], [1], [0, 0, 1, 1], [], []>} : vector<18x64xbf16>, vector<64x256xbf16>, vector<18x256xf32> -> vector<18x256xf32>
    %c0_137 = arith.constant 0 : index
    %c0_138 = arith.constant 0 : index
    %c0_139 = arith.constant 0 : index
    %215 = vector.load %arg15[%c0_137, %c0_138, %c0_139] : memref<2x1x256xf32, #tpu.memory_space<vmem>>, vector<1x1x256xf32>
    %216 = vector.shape_cast %215 : vector<1x1x256xf32> to vector<1x256xf32>
    %217 = vector.broadcast %216 : vector<1x256xf32> to vector<18x256xf32>
    %218 = arith.addf %214, %217 : vector<18x256xf32>
    %cst_140 = arith.constant 5.000000e-01 : f32
    %219 = vector.broadcast %cst_140 : f32 to vector<18x256xf32>
    %220 = arith.mulf %219, %218 : vector<18x256xf32>
    %cst_141 = arith.constant 4.471500e-02 : f32
    %221 = vector.broadcast %cst_141 : f32 to vector<18x256xf32>
    %222 = arith.mulf %221, %218 : vector<18x256xf32>
    %223 = arith.mulf %222, %218 : vector<18x256xf32>
    %224 = arith.mulf %223, %218 : vector<18x256xf32>
    %225 = arith.addf %218, %224 : vector<18x256xf32>
    %cst_142 = arith.constant 0.797884583 : f32
    %226 = vector.broadcast %cst_142 : f32 to vector<18x256xf32>
    %227 = arith.mulf %226, %225 : vector<18x256xf32>
    %228 = math.tanh %227 : vector<18x256xf32>
    %cst_143 = arith.constant 1.000000e+00 : f32
    %229 = vector.broadcast %cst_143 : f32 to vector<18x256xf32>
    %230 = arith.addf %229, %228 : vector<18x256xf32>
    %231 = arith.mulf %220, %230 : vector<18x256xf32>
    %232 = arith.truncf %231 : vector<18x256xf32> to vector<18x256xbf16>
    %c0_144 = arith.constant 0 : index
    %c0_145 = arith.constant 0 : index
    %c0_146 = arith.constant 0 : index
    %233 = vector.load %arg16[%c0_144, %c0_145, %c0_146] : memref<2x256x64xbf16, #tpu.memory_space<vmem>>, vector<1x256x64xbf16>
    %234 = vector.shape_cast %233 : vector<1x256x64xbf16> to vector<256x64xbf16>
    %cst_147 = arith.constant dense<0.000000e+00> : vector<18x64xf32>
    %235 = tpu.matmul %232, %234, %cst_147 {dimension_numbers = #tpu.dot_dimension_numbers<[1], [0], [0], [1], [0, 0, 1, 1], [], []>} : vector<18x256xbf16>, vector<256x64xbf16>, vector<18x64xf32> -> vector<18x64xf32>
    %c0_148 = arith.constant 0 : index
    %c0_149 = arith.constant 0 : index
    %c0_150 = arith.constant 0 : index
    %236 = vector.load %arg17[%c0_148, %c0_149, %c0_150] : memref<2x1x64xf32, #tpu.memory_space<vmem>>, vector<1x1x64xf32>
    %237 = vector.shape_cast %236 : vector<1x1x64xf32> to vector<1x64xf32>
    %238 = vector.broadcast %237 : vector<1x64xf32> to vector<18x64xf32>
    %239 = arith.addf %235, %238 : vector<18x64xf32>
    %240 = arith.addf %184, %239 : vector<18x64xf32>
    %c1_151 = arith.constant 1 : index
    %c0_152 = arith.constant 0 : index
    %c0_153 = arith.constant 0 : index
    %241 = vector.load %arg5[%c1_151, %c0_152, %c0_153] : memref<2x1x64xf32, #tpu.memory_space<vmem>>, vector<1x1x64xf32>
    %242 = vector.shape_cast %241 : vector<1x1x64xf32> to vector<1x64xf32>
    %c1_154 = arith.constant 1 : index
    %c0_155 = arith.constant 0 : index
    %c0_156 = arith.constant 0 : index
    %243 = vector.load %arg6[%c1_154, %c0_155, %c0_156] : memref<2x1x64xf32, #tpu.memory_space<vmem>>, vector<1x1x64xf32>
    %244 = vector.shape_cast %243 : vector<1x1x64xf32> to vector<1x64xf32>
    %cst_157 = arith.constant dense<0.000000e+00> : vector<18xf32>
    %245 = vector.multi_reduction <add>, %240, %cst_157 [1] : vector<18x64xf32> to vector<18xf32>
    %246 = vector.shape_cast %245 : vector<18xf32> to vector<18x1xf32>
    %cst_158 = arith.constant 6.400000e+01 : f32
    %247 = vector.broadcast %cst_158 : f32 to vector<18x1xf32>
    %248 = arith.divf %246, %247 : vector<18x1xf32>
    %249 = vector.broadcast %248 : vector<18x1xf32> to vector<18x64xf32>
    %250 = arith.subf %240, %249 : vector<18x64xf32>
    %251 = arith.mulf %250, %250 : vector<18x64xf32>
    %cst_159 = arith.constant dense<0.000000e+00> : vector<18xf32>
    %252 = vector.multi_reduction <add>, %251, %cst_159 [1] : vector<18x64xf32> to vector<18xf32>
    %253 = vector.shape_cast %252 : vector<18xf32> to vector<18x1xf32>
    %cst_160 = arith.constant 6.400000e+01 : f32
    %254 = vector.broadcast %cst_160 : f32 to vector<18x1xf32>
    %255 = arith.divf %253, %254 : vector<18x1xf32>
    %256 = vector.broadcast %248 : vector<18x1xf32> to vector<18x64xf32>
    %257 = arith.subf %240, %256 : vector<18x64xf32>
    %cst_161 = arith.constant 9.99999974E-6 : f32
    %258 = vector.broadcast %cst_161 : f32 to vector<18x1xf32>
    %259 = arith.addf %255, %258 : vector<18x1xf32>
    %260 = math.rsqrt %259 : vector<18x1xf32>
    %261 = vector.broadcast %260 : vector<18x1xf32> to vector<18x64xf32>
    %262 = arith.mulf %257, %261 : vector<18x64xf32>
    %263 = vector.broadcast %242 : vector<1x64xf32> to vector<18x64xf32>
    %264 = arith.mulf %262, %263 : vector<18x64xf32>
    %265 = vector.broadcast %244 : vector<1x64xf32> to vector<18x64xf32>
    %266 = arith.addf %264, %265 : vector<18x64xf32>
    %267 = arith.truncf %266 : vector<18x64xf32> to vector<18x64xbf16>
    %cst_162 = arith.constant 0.000000e+00 : f32
    %268 = vector.broadcast %cst_162 : f32 to vector<18x64xf32>
    %c4 = arith.constant 4 : index
    %c0_163 = arith.constant 0 : index
    %c0_164 = arith.constant 0 : index
    %269 = vector.load %arg7[%c4, %c0_163, %c0_164] : memref<8x64x16xbf16, #tpu.memory_space<vmem>>, vector<1x64x16xbf16>
    %270 = vector.shape_cast %269 : vector<1x64x16xbf16> to vector<64x16xbf16>
    %cst_165 = arith.constant dense<0.000000e+00> : vector<18x16xf32>
    %271 = tpu.matmul %267, %270, %cst_165 {dimension_numbers = #tpu.dot_dimension_numbers<[1], [0], [0], [1], [0, 0, 1, 1], [], []>} : vector<18x64xbf16>, vector<64x16xbf16>, vector<18x16xf32> -> vector<18x16xf32>
    %c4_166 = arith.constant 4 : index
    %c0_167 = arith.constant 0 : index
    %c0_168 = arith.constant 0 : index
    %272 = vector.load %arg8[%c4_166, %c0_167, %c0_168] : memref<8x64x16xbf16, #tpu.memory_space<vmem>>, vector<1x64x16xbf16>
    %273 = vector.shape_cast %272 : vector<1x64x16xbf16> to vector<64x16xbf16>
    %cst_169 = arith.constant dense<0.000000e+00> : vector<18x16xf32>
    %274 = tpu.matmul %267, %273, %cst_169 {dimension_numbers = #tpu.dot_dimension_numbers<[1], [0], [0], [1], [0, 0, 1, 1], [], []>} : vector<18x64xbf16>, vector<64x16xbf16>, vector<18x16xf32> -> vector<18x16xf32>
    %c4_170 = arith.constant 4 : index
    %c0_171 = arith.constant 0 : index
    %c0_172 = arith.constant 0 : index
    %275 = vector.load %arg9[%c4_170, %c0_171, %c0_172] : memref<8x64x16xbf16, #tpu.memory_space<vmem>>, vector<1x64x16xbf16>
    %276 = vector.shape_cast %275 : vector<1x64x16xbf16> to vector<64x16xbf16>
    %cst_173 = arith.constant dense<0.000000e+00> : vector<18x16xf32>
    %277 = tpu.matmul %267, %276, %cst_173 {dimension_numbers = #tpu.dot_dimension_numbers<[1], [0], [0], [1], [0, 0, 1, 1], [], []>} : vector<18x64xbf16>, vector<64x16xbf16>, vector<18x16xf32> -> vector<18x16xf32>
    %278 = arith.truncf %271 : vector<18x16xf32> to vector<18x16xbf16>
    %279 = arith.truncf %274 : vector<18x16xf32> to vector<18x16xbf16>
    %cst_174 = arith.constant dense<0.000000e+00> : vector<18x18xf32>
    %280 = tpu.matmul %278, %279, %cst_174 {dimension_numbers = #tpu.dot_dimension_numbers<[1], [1], [0], [0], [0, 0, 1, 0], [], []>} : vector<18x16xbf16>, vector<18x16xbf16>, vector<18x18xf32> -> vector<18x18xf32>
    %cst_175 = arith.constant 2.500000e-01 : f32
    %281 = vector.broadcast %cst_175 : f32 to vector<18x18xf32>
    %282 = arith.mulf %280, %281 : vector<18x18xf32>
    %283 = arith.addf %282, %19 : vector<18x18xf32>
    %cst_176 = arith.constant dense<0xFF800000> : vector<18xf32>
    %284 = vector.multi_reduction <maximumf>, %283, %cst_176 [1] : vector<18x18xf32> to vector<18xf32>
    %285 = vector.shape_cast %284 : vector<18xf32> to vector<18x1xf32>
    %286 = vector.broadcast %285 : vector<18x1xf32> to vector<18x18xf32>
    %287 = arith.subf %283, %286 : vector<18x18xf32>
    %288 = math.exp %287 : vector<18x18xf32>
    %cst_177 = arith.constant dense<0.000000e+00> : vector<18xf32>
    %289 = vector.multi_reduction <add>, %288, %cst_177 [1] : vector<18x18xf32> to vector<18xf32>
    %290 = vector.shape_cast %289 : vector<18xf32> to vector<18x1xf32>
    %291 = tpu.reciprocal %290 {approx = true} : vector<18x1xf32> -> vector<18x1xf32>
    %292 = vector.broadcast %291 : vector<18x1xf32> to vector<18x18xf32>
    %293 = arith.mulf %288, %292 : vector<18x18xf32>
    %294 = arith.truncf %293 : vector<18x18xf32> to vector<18x18xbf16>
    %295 = arith.truncf %277 : vector<18x16xf32> to vector<18x16xbf16>
    %cst_178 = arith.constant dense<0.000000e+00> : vector<18x16xf32>
    %296 = tpu.matmul %294, %295, %cst_178 {dimension_numbers = #tpu.dot_dimension_numbers<[1], [0], [0], [1], [0, 0, 1, 1], [], []>} : vector<18x18xbf16>, vector<18x16xbf16>, vector<18x16xf32> -> vector<18x16xf32>
    %297 = arith.truncf %296 : vector<18x16xf32> to vector<18x16xbf16>
    %c4_179 = arith.constant 4 : index
    %c0_180 = arith.constant 0 : index
    %c0_181 = arith.constant 0 : index
    %298 = vector.load %arg10[%c4_179, %c0_180, %c0_181] : memref<8x16x64xbf16, #tpu.memory_space<vmem>>, vector<1x16x64xbf16>
    %299 = vector.shape_cast %298 : vector<1x16x64xbf16> to vector<16x64xbf16>
    %cst_182 = arith.constant dense<0.000000e+00> : vector<18x64xf32>
    %300 = tpu.matmul %297, %299, %cst_182 {dimension_numbers = #tpu.dot_dimension_numbers<[1], [0], [0], [1], [0, 0, 1, 1], [], []>} : vector<18x16xbf16>, vector<16x64xbf16>, vector<18x64xf32> -> vector<18x64xf32>
    %301 = arith.addf %268, %300 : vector<18x64xf32>
    %c5 = arith.constant 5 : index
    %c0_183 = arith.constant 0 : index
    %c0_184 = arith.constant 0 : index
    %302 = vector.load %arg7[%c5, %c0_183, %c0_184] : memref<8x64x16xbf16, #tpu.memory_space<vmem>>, vector<1x64x16xbf16>
    %303 = vector.shape_cast %302 : vector<1x64x16xbf16> to vector<64x16xbf16>
    %cst_185 = arith.constant dense<0.000000e+00> : vector<18x16xf32>
    %304 = tpu.matmul %267, %303, %cst_185 {dimension_numbers = #tpu.dot_dimension_numbers<[1], [0], [0], [1], [0, 0, 1, 1], [], []>} : vector<18x64xbf16>, vector<64x16xbf16>, vector<18x16xf32> -> vector<18x16xf32>
    %c5_186 = arith.constant 5 : index
    %c0_187 = arith.constant 0 : index
    %c0_188 = arith.constant 0 : index
    %305 = vector.load %arg8[%c5_186, %c0_187, %c0_188] : memref<8x64x16xbf16, #tpu.memory_space<vmem>>, vector<1x64x16xbf16>
    %306 = vector.shape_cast %305 : vector<1x64x16xbf16> to vector<64x16xbf16>
    %cst_189 = arith.constant dense<0.000000e+00> : vector<18x16xf32>
    %307 = tpu.matmul %267, %306, %cst_189 {dimension_numbers = #tpu.dot_dimension_numbers<[1], [0], [0], [1], [0, 0, 1, 1], [], []>} : vector<18x64xbf16>, vector<64x16xbf16>, vector<18x16xf32> -> vector<18x16xf32>
    %c5_190 = arith.constant 5 : index
    %c0_191 = arith.constant 0 : index
    %c0_192 = arith.constant 0 : index
    %308 = vector.load %arg9[%c5_190, %c0_191, %c0_192] : memref<8x64x16xbf16, #tpu.memory_space<vmem>>, vector<1x64x16xbf16>
    %309 = vector.shape_cast %308 : vector<1x64x16xbf16> to vector<64x16xbf16>
    %cst_193 = arith.constant dense<0.000000e+00> : vector<18x16xf32>
    %310 = tpu.matmul %267, %309, %cst_193 {dimension_numbers = #tpu.dot_dimension_numbers<[1], [0], [0], [1], [0, 0, 1, 1], [], []>} : vector<18x64xbf16>, vector<64x16xbf16>, vector<18x16xf32> -> vector<18x16xf32>
    %311 = arith.truncf %304 : vector<18x16xf32> to vector<18x16xbf16>
    %312 = arith.truncf %307 : vector<18x16xf32> to vector<18x16xbf16>
    %cst_194 = arith.constant dense<0.000000e+00> : vector<18x18xf32>
    %313 = tpu.matmul %311, %312, %cst_194 {dimension_numbers = #tpu.dot_dimension_numbers<[1], [1], [0], [0], [0, 0, 1, 0], [], []>} : vector<18x16xbf16>, vector<18x16xbf16>, vector<18x18xf32> -> vector<18x18xf32>
    %cst_195 = arith.constant 2.500000e-01 : f32
    %314 = vector.broadcast %cst_195 : f32 to vector<18x18xf32>
    %315 = arith.mulf %313, %314 : vector<18x18xf32>
    %316 = arith.addf %315, %19 : vector<18x18xf32>
    %cst_196 = arith.constant dense<0xFF800000> : vector<18xf32>
    %317 = vector.multi_reduction <maximumf>, %316, %cst_196 [1] : vector<18x18xf32> to vector<18xf32>
    %318 = vector.shape_cast %317 : vector<18xf32> to vector<18x1xf32>
    %319 = vector.broadcast %318 : vector<18x1xf32> to vector<18x18xf32>
    %320 = arith.subf %316, %319 : vector<18x18xf32>
    %321 = math.exp %320 : vector<18x18xf32>
    %cst_197 = arith.constant dense<0.000000e+00> : vector<18xf32>
    %322 = vector.multi_reduction <add>, %321, %cst_197 [1] : vector<18x18xf32> to vector<18xf32>
    %323 = vector.shape_cast %322 : vector<18xf32> to vector<18x1xf32>
    %324 = tpu.reciprocal %323 {approx = true} : vector<18x1xf32> -> vector<18x1xf32>
    %325 = vector.broadcast %324 : vector<18x1xf32> to vector<18x18xf32>
    %326 = arith.mulf %321, %325 : vector<18x18xf32>
    %327 = arith.truncf %326 : vector<18x18xf32> to vector<18x18xbf16>
    %328 = arith.truncf %310 : vector<18x16xf32> to vector<18x16xbf16>
    %cst_198 = arith.constant dense<0.000000e+00> : vector<18x16xf32>
    %329 = tpu.matmul %327, %328, %cst_198 {dimension_numbers = #tpu.dot_dimension_numbers<[1], [0], [0], [1], [0, 0, 1, 1], [], []>} : vector<18x18xbf16>, vector<18x16xbf16>, vector<18x16xf32> -> vector<18x16xf32>
    %330 = arith.truncf %329 : vector<18x16xf32> to vector<18x16xbf16>
    %c5_199 = arith.constant 5 : index
    %c0_200 = arith.constant 0 : index
    %c0_201 = arith.constant 0 : index
    %331 = vector.load %arg10[%c5_199, %c0_200, %c0_201] : memref<8x16x64xbf16, #tpu.memory_space<vmem>>, vector<1x16x64xbf16>
    %332 = vector.shape_cast %331 : vector<1x16x64xbf16> to vector<16x64xbf16>
    %cst_202 = arith.constant dense<0.000000e+00> : vector<18x64xf32>
    %333 = tpu.matmul %330, %332, %cst_202 {dimension_numbers = #tpu.dot_dimension_numbers<[1], [0], [0], [1], [0, 0, 1, 1], [], []>} : vector<18x16xbf16>, vector<16x64xbf16>, vector<18x64xf32> -> vector<18x64xf32>
    %334 = arith.addf %301, %333 : vector<18x64xf32>
    %c6 = arith.constant 6 : index
    %c0_203 = arith.constant 0 : index
    %c0_204 = arith.constant 0 : index
    %335 = vector.load %arg7[%c6, %c0_203, %c0_204] : memref<8x64x16xbf16, #tpu.memory_space<vmem>>, vector<1x64x16xbf16>
    %336 = vector.shape_cast %335 : vector<1x64x16xbf16> to vector<64x16xbf16>
    %cst_205 = arith.constant dense<0.000000e+00> : vector<18x16xf32>
    %337 = tpu.matmul %267, %336, %cst_205 {dimension_numbers = #tpu.dot_dimension_numbers<[1], [0], [0], [1], [0, 0, 1, 1], [], []>} : vector<18x64xbf16>, vector<64x16xbf16>, vector<18x16xf32> -> vector<18x16xf32>
    %c6_206 = arith.constant 6 : index
    %c0_207 = arith.constant 0 : index
    %c0_208 = arith.constant 0 : index
    %338 = vector.load %arg8[%c6_206, %c0_207, %c0_208] : memref<8x64x16xbf16, #tpu.memory_space<vmem>>, vector<1x64x16xbf16>
    %339 = vector.shape_cast %338 : vector<1x64x16xbf16> to vector<64x16xbf16>
    %cst_209 = arith.constant dense<0.000000e+00> : vector<18x16xf32>
    %340 = tpu.matmul %267, %339, %cst_209 {dimension_numbers = #tpu.dot_dimension_numbers<[1], [0], [0], [1], [0, 0, 1, 1], [], []>} : vector<18x64xbf16>, vector<64x16xbf16>, vector<18x16xf32> -> vector<18x16xf32>
    %c6_210 = arith.constant 6 : index
    %c0_211 = arith.constant 0 : index
    %c0_212 = arith.constant 0 : index
    %341 = vector.load %arg9[%c6_210, %c0_211, %c0_212] : memref<8x64x16xbf16, #tpu.memory_space<vmem>>, vector<1x64x16xbf16>
    %342 = vector.shape_cast %341 : vector<1x64x16xbf16> to vector<64x16xbf16>
    %cst_213 = arith.constant dense<0.000000e+00> : vector<18x16xf32>
    %343 = tpu.matmul %267, %342, %cst_213 {dimension_numbers = #tpu.dot_dimension_numbers<[1], [0], [0], [1], [0, 0, 1, 1], [], []>} : vector<18x64xbf16>, vector<64x16xbf16>, vector<18x16xf32> -> vector<18x16xf32>
    %344 = arith.truncf %337 : vector<18x16xf32> to vector<18x16xbf16>
    %345 = arith.truncf %340 : vector<18x16xf32> to vector<18x16xbf16>
    %cst_214 = arith.constant dense<0.000000e+00> : vector<18x18xf32>
    %346 = tpu.matmul %344, %345, %cst_214 {dimension_numbers = #tpu.dot_dimension_numbers<[1], [1], [0], [0], [0, 0, 1, 0], [], []>} : vector<18x16xbf16>, vector<18x16xbf16>, vector<18x18xf32> -> vector<18x18xf32>
    %cst_215 = arith.constant 2.500000e-01 : f32
    %347 = vector.broadcast %cst_215 : f32 to vector<18x18xf32>
    %348 = arith.mulf %346, %347 : vector<18x18xf32>
    %349 = arith.addf %348, %19 : vector<18x18xf32>
    %cst_216 = arith.constant dense<0xFF800000> : vector<18xf32>
    %350 = vector.multi_reduction <maximumf>, %349, %cst_216 [1] : vector<18x18xf32> to vector<18xf32>
    %351 = vector.shape_cast %350 : vector<18xf32> to vector<18x1xf32>
    %352 = vector.broadcast %351 : vector<18x1xf32> to vector<18x18xf32>
    %353 = arith.subf %349, %352 : vector<18x18xf32>
    %354 = math.exp %353 : vector<18x18xf32>
    %cst_217 = arith.constant dense<0.000000e+00> : vector<18xf32>
    %355 = vector.multi_reduction <add>, %354, %cst_217 [1] : vector<18x18xf32> to vector<18xf32>
    %356 = vector.shape_cast %355 : vector<18xf32> to vector<18x1xf32>
    %357 = tpu.reciprocal %356 {approx = true} : vector<18x1xf32> -> vector<18x1xf32>
    %358 = vector.broadcast %357 : vector<18x1xf32> to vector<18x18xf32>
    %359 = arith.mulf %354, %358 : vector<18x18xf32>
    %360 = arith.truncf %359 : vector<18x18xf32> to vector<18x18xbf16>
    %361 = arith.truncf %343 : vector<18x16xf32> to vector<18x16xbf16>
    %cst_218 = arith.constant dense<0.000000e+00> : vector<18x16xf32>
    %362 = tpu.matmul %360, %361, %cst_218 {dimension_numbers = #tpu.dot_dimension_numbers<[1], [0], [0], [1], [0, 0, 1, 1], [], []>} : vector<18x18xbf16>, vector<18x16xbf16>, vector<18x16xf32> -> vector<18x16xf32>
    %363 = arith.truncf %362 : vector<18x16xf32> to vector<18x16xbf16>
    %c6_219 = arith.constant 6 : index
    %c0_220 = arith.constant 0 : index
    %c0_221 = arith.constant 0 : index
    %364 = vector.load %arg10[%c6_219, %c0_220, %c0_221] : memref<8x16x64xbf16, #tpu.memory_space<vmem>>, vector<1x16x64xbf16>
    %365 = vector.shape_cast %364 : vector<1x16x64xbf16> to vector<16x64xbf16>
    %cst_222 = arith.constant dense<0.000000e+00> : vector<18x64xf32>
    %366 = tpu.matmul %363, %365, %cst_222 {dimension_numbers = #tpu.dot_dimension_numbers<[1], [0], [0], [1], [0, 0, 1, 1], [], []>} : vector<18x16xbf16>, vector<16x64xbf16>, vector<18x64xf32> -> vector<18x64xf32>
    %367 = arith.addf %334, %366 : vector<18x64xf32>
    %c7 = arith.constant 7 : index
    %c0_223 = arith.constant 0 : index
    %c0_224 = arith.constant 0 : index
    %368 = vector.load %arg7[%c7, %c0_223, %c0_224] : memref<8x64x16xbf16, #tpu.memory_space<vmem>>, vector<1x64x16xbf16>
    %369 = vector.shape_cast %368 : vector<1x64x16xbf16> to vector<64x16xbf16>
    %cst_225 = arith.constant dense<0.000000e+00> : vector<18x16xf32>
    %370 = tpu.matmul %267, %369, %cst_225 {dimension_numbers = #tpu.dot_dimension_numbers<[1], [0], [0], [1], [0, 0, 1, 1], [], []>} : vector<18x64xbf16>, vector<64x16xbf16>, vector<18x16xf32> -> vector<18x16xf32>
    %c7_226 = arith.constant 7 : index
    %c0_227 = arith.constant 0 : index
    %c0_228 = arith.constant 0 : index
    %371 = vector.load %arg8[%c7_226, %c0_227, %c0_228] : memref<8x64x16xbf16, #tpu.memory_space<vmem>>, vector<1x64x16xbf16>
    %372 = vector.shape_cast %371 : vector<1x64x16xbf16> to vector<64x16xbf16>
    %cst_229 = arith.constant dense<0.000000e+00> : vector<18x16xf32>
    %373 = tpu.matmul %267, %372, %cst_229 {dimension_numbers = #tpu.dot_dimension_numbers<[1], [0], [0], [1], [0, 0, 1, 1], [], []>} : vector<18x64xbf16>, vector<64x16xbf16>, vector<18x16xf32> -> vector<18x16xf32>
    %c7_230 = arith.constant 7 : index
    %c0_231 = arith.constant 0 : index
    %c0_232 = arith.constant 0 : index
    %374 = vector.load %arg9[%c7_230, %c0_231, %c0_232] : memref<8x64x16xbf16, #tpu.memory_space<vmem>>, vector<1x64x16xbf16>
    %375 = vector.shape_cast %374 : vector<1x64x16xbf16> to vector<64x16xbf16>
    %cst_233 = arith.constant dense<0.000000e+00> : vector<18x16xf32>
    %376 = tpu.matmul %267, %375, %cst_233 {dimension_numbers = #tpu.dot_dimension_numbers<[1], [0], [0], [1], [0, 0, 1, 1], [], []>} : vector<18x64xbf16>, vector<64x16xbf16>, vector<18x16xf32> -> vector<18x16xf32>
    %377 = arith.truncf %370 : vector<18x16xf32> to vector<18x16xbf16>
    %378 = arith.truncf %373 : vector<18x16xf32> to vector<18x16xbf16>
    %cst_234 = arith.constant dense<0.000000e+00> : vector<18x18xf32>
    %379 = tpu.matmul %377, %378, %cst_234 {dimension_numbers = #tpu.dot_dimension_numbers<[1], [1], [0], [0], [0, 0, 1, 0], [], []>} : vector<18x16xbf16>, vector<18x16xbf16>, vector<18x18xf32> -> vector<18x18xf32>
    %cst_235 = arith.constant 2.500000e-01 : f32
    %380 = vector.broadcast %cst_235 : f32 to vector<18x18xf32>
    %381 = arith.mulf %379, %380 : vector<18x18xf32>
    %382 = arith.addf %381, %19 : vector<18x18xf32>
    %cst_236 = arith.constant dense<0xFF800000> : vector<18xf32>
    %383 = vector.multi_reduction <maximumf>, %382, %cst_236 [1] : vector<18x18xf32> to vector<18xf32>
    %384 = vector.shape_cast %383 : vector<18xf32> to vector<18x1xf32>
    %385 = vector.broadcast %384 : vector<18x1xf32> to vector<18x18xf32>
    %386 = arith.subf %382, %385 : vector<18x18xf32>
    %387 = math.exp %386 : vector<18x18xf32>
    %cst_237 = arith.constant dense<0.000000e+00> : vector<18xf32>
    %388 = vector.multi_reduction <add>, %387, %cst_237 [1] : vector<18x18xf32> to vector<18xf32>
    %389 = vector.shape_cast %388 : vector<18xf32> to vector<18x1xf32>
    %390 = tpu.reciprocal %389 {approx = true} : vector<18x1xf32> -> vector<18x1xf32>
    %391 = vector.broadcast %390 : vector<18x1xf32> to vector<18x18xf32>
    %392 = arith.mulf %387, %391 : vector<18x18xf32>
    %393 = arith.truncf %392 : vector<18x18xf32> to vector<18x18xbf16>
    %394 = arith.truncf %376 : vector<18x16xf32> to vector<18x16xbf16>
    %cst_238 = arith.constant dense<0.000000e+00> : vector<18x16xf32>
    %395 = tpu.matmul %393, %394, %cst_238 {dimension_numbers = #tpu.dot_dimension_numbers<[1], [0], [0], [1], [0, 0, 1, 1], [], []>} : vector<18x18xbf16>, vector<18x16xbf16>, vector<18x16xf32> -> vector<18x16xf32>
    %396 = arith.truncf %395 : vector<18x16xf32> to vector<18x16xbf16>
    %c7_239 = arith.constant 7 : index
    %c0_240 = arith.constant 0 : index
    %c0_241 = arith.constant 0 : index
    %397 = vector.load %arg10[%c7_239, %c0_240, %c0_241] : memref<8x16x64xbf16, #tpu.memory_space<vmem>>, vector<1x16x64xbf16>
    %398 = vector.shape_cast %397 : vector<1x16x64xbf16> to vector<16x64xbf16>
    %cst_242 = arith.constant dense<0.000000e+00> : vector<18x64xf32>
    %399 = tpu.matmul %396, %398, %cst_242 {dimension_numbers = #tpu.dot_dimension_numbers<[1], [0], [0], [1], [0, 0, 1, 1], [], []>} : vector<18x16xbf16>, vector<16x64xbf16>, vector<18x64xf32> -> vector<18x64xf32>
    %400 = arith.addf %367, %399 : vector<18x64xf32>
    %401 = arith.addf %240, %400 : vector<18x64xf32>
    %c1_243 = arith.constant 1 : index
    %c0_244 = arith.constant 0 : index
    %c0_245 = arith.constant 0 : index
    %402 = vector.load %arg11[%c1_243, %c0_244, %c0_245] : memref<2x1x64xf32, #tpu.memory_space<vmem>>, vector<1x1x64xf32>
    %403 = vector.shape_cast %402 : vector<1x1x64xf32> to vector<1x64xf32>
    %404 = vector.broadcast %403 : vector<1x64xf32> to vector<18x64xf32>
    %405 = arith.addf %401, %404 : vector<18x64xf32>
    %c1_246 = arith.constant 1 : index
    %c0_247 = arith.constant 0 : index
    %c0_248 = arith.constant 0 : index
    %406 = vector.load %arg12[%c1_246, %c0_247, %c0_248] : memref<2x1x64xf32, #tpu.memory_space<vmem>>, vector<1x1x64xf32>
    %407 = vector.shape_cast %406 : vector<1x1x64xf32> to vector<1x64xf32>
    %c1_249 = arith.constant 1 : index
    %c0_250 = arith.constant 0 : index
    %c0_251 = arith.constant 0 : index
    %408 = vector.load %arg13[%c1_249, %c0_250, %c0_251] : memref<2x1x64xf32, #tpu.memory_space<vmem>>, vector<1x1x64xf32>
    %409 = vector.shape_cast %408 : vector<1x1x64xf32> to vector<1x64xf32>
    %cst_252 = arith.constant dense<0.000000e+00> : vector<18xf32>
    %410 = vector.multi_reduction <add>, %405, %cst_252 [1] : vector<18x64xf32> to vector<18xf32>
    %411 = vector.shape_cast %410 : vector<18xf32> to vector<18x1xf32>
    %cst_253 = arith.constant 6.400000e+01 : f32
    %412 = vector.broadcast %cst_253 : f32 to vector<18x1xf32>
    %413 = arith.divf %411, %412 : vector<18x1xf32>
    %414 = vector.broadcast %413 : vector<18x1xf32> to vector<18x64xf32>
    %415 = arith.subf %405, %414 : vector<18x64xf32>
    %416 = arith.mulf %415, %415 : vector<18x64xf32>
    %cst_254 = arith.constant dense<0.000000e+00> : vector<18xf32>
    %417 = vector.multi_reduction <add>, %416, %cst_254 [1] : vector<18x64xf32> to vector<18xf32>
    %418 = vector.shape_cast %417 : vector<18xf32> to vector<18x1xf32>
    %cst_255 = arith.constant 6.400000e+01 : f32
    %419 = vector.broadcast %cst_255 : f32 to vector<18x1xf32>
    %420 = arith.divf %418, %419 : vector<18x1xf32>
    %421 = vector.broadcast %413 : vector<18x1xf32> to vector<18x64xf32>
    %422 = arith.subf %405, %421 : vector<18x64xf32>
    %cst_256 = arith.constant 9.99999974E-6 : f32
    %423 = vector.broadcast %cst_256 : f32 to vector<18x1xf32>
    %424 = arith.addf %420, %423 : vector<18x1xf32>
    %425 = math.rsqrt %424 : vector<18x1xf32>
    %426 = vector.broadcast %425 : vector<18x1xf32> to vector<18x64xf32>
    %427 = arith.mulf %422, %426 : vector<18x64xf32>
    %428 = vector.broadcast %407 : vector<1x64xf32> to vector<18x64xf32>
    %429 = arith.mulf %427, %428 : vector<18x64xf32>
    %430 = vector.broadcast %409 : vector<1x64xf32> to vector<18x64xf32>
    %431 = arith.addf %429, %430 : vector<18x64xf32>
    %432 = arith.truncf %431 : vector<18x64xf32> to vector<18x64xbf16>
    %c1_257 = arith.constant 1 : index
    %c0_258 = arith.constant 0 : index
    %c0_259 = arith.constant 0 : index
    %433 = vector.load %arg14[%c1_257, %c0_258, %c0_259] : memref<2x64x256xbf16, #tpu.memory_space<vmem>>, vector<1x64x256xbf16>
    %434 = vector.shape_cast %433 : vector<1x64x256xbf16> to vector<64x256xbf16>
    %cst_260 = arith.constant dense<0.000000e+00> : vector<18x256xf32>
    %435 = tpu.matmul %432, %434, %cst_260 {dimension_numbers = #tpu.dot_dimension_numbers<[1], [0], [0], [1], [0, 0, 1, 1], [], []>} : vector<18x64xbf16>, vector<64x256xbf16>, vector<18x256xf32> -> vector<18x256xf32>
    %c1_261 = arith.constant 1 : index
    %c0_262 = arith.constant 0 : index
    %c0_263 = arith.constant 0 : index
    %436 = vector.load %arg15[%c1_261, %c0_262, %c0_263] : memref<2x1x256xf32, #tpu.memory_space<vmem>>, vector<1x1x256xf32>
    %437 = vector.shape_cast %436 : vector<1x1x256xf32> to vector<1x256xf32>
    %438 = vector.broadcast %437 : vector<1x256xf32> to vector<18x256xf32>
    %439 = arith.addf %435, %438 : vector<18x256xf32>
    %cst_264 = arith.constant 5.000000e-01 : f32
    %440 = vector.broadcast %cst_264 : f32 to vector<18x256xf32>
    %441 = arith.mulf %440, %439 : vector<18x256xf32>
    %cst_265 = arith.constant 4.471500e-02 : f32
    %442 = vector.broadcast %cst_265 : f32 to vector<18x256xf32>
    %443 = arith.mulf %442, %439 : vector<18x256xf32>
    %444 = arith.mulf %443, %439 : vector<18x256xf32>
    %445 = arith.mulf %444, %439 : vector<18x256xf32>
    %446 = arith.addf %439, %445 : vector<18x256xf32>
    %cst_266 = arith.constant 0.797884583 : f32
    %447 = vector.broadcast %cst_266 : f32 to vector<18x256xf32>
    %448 = arith.mulf %447, %446 : vector<18x256xf32>
    %449 = math.tanh %448 : vector<18x256xf32>
    %cst_267 = arith.constant 1.000000e+00 : f32
    %450 = vector.broadcast %cst_267 : f32 to vector<18x256xf32>
    %451 = arith.addf %450, %449 : vector<18x256xf32>
    %452 = arith.mulf %441, %451 : vector<18x256xf32>
    %453 = arith.truncf %452 : vector<18x256xf32> to vector<18x256xbf16>
    %c1_268 = arith.constant 1 : index
    %c0_269 = arith.constant 0 : index
    %c0_270 = arith.constant 0 : index
    %454 = vector.load %arg16[%c1_268, %c0_269, %c0_270] : memref<2x256x64xbf16, #tpu.memory_space<vmem>>, vector<1x256x64xbf16>
    %455 = vector.shape_cast %454 : vector<1x256x64xbf16> to vector<256x64xbf16>
    %cst_271 = arith.constant dense<0.000000e+00> : vector<18x64xf32>
    %456 = tpu.matmul %453, %455, %cst_271 {dimension_numbers = #tpu.dot_dimension_numbers<[1], [0], [0], [1], [0, 0, 1, 1], [], []>} : vector<18x256xbf16>, vector<256x64xbf16>, vector<18x64xf32> -> vector<18x64xf32>
    %c1_272 = arith.constant 1 : index
    %c0_273 = arith.constant 0 : index
    %c0_274 = arith.constant 0 : index
    %457 = vector.load %arg17[%c1_272, %c0_273, %c0_274] : memref<2x1x64xf32, #tpu.memory_space<vmem>>, vector<1x1x64xf32>
    %458 = vector.shape_cast %457 : vector<1x1x64xf32> to vector<1x64xf32>
    %459 = vector.broadcast %458 : vector<1x64xf32> to vector<18x64xf32>
    %460 = arith.addf %456, %459 : vector<18x64xf32>
    %461 = arith.addf %405, %460 : vector<18x64xf32>
    %c0_275 = arith.constant 0 : index
    %c0_276 = arith.constant 0 : index
    %462 = vector.load %arg18[%c0_275, %c0_276] : memref<1x64xf32, #tpu.memory_space<vmem>>, vector<1x64xf32>
    %c0_277 = arith.constant 0 : index
    %c0_278 = arith.constant 0 : index
    %463 = vector.load %arg19[%c0_277, %c0_278] : memref<1x64xf32, #tpu.memory_space<vmem>>, vector<1x64xf32>
    %cst_279 = arith.constant dense<0.000000e+00> : vector<18xf32>
    %464 = vector.multi_reduction <add>, %461, %cst_279 [1] : vector<18x64xf32> to vector<18xf32>
    %465 = vector.shape_cast %464 : vector<18xf32> to vector<18x1xf32>
    %cst_280 = arith.constant 6.400000e+01 : f32
    %466 = vector.broadcast %cst_280 : f32 to vector<18x1xf32>
    %467 = arith.divf %465, %466 : vector<18x1xf32>
    %468 = vector.broadcast %467 : vector<18x1xf32> to vector<18x64xf32>
    %469 = arith.subf %461, %468 : vector<18x64xf32>
    %470 = arith.mulf %469, %469 : vector<18x64xf32>
    %cst_281 = arith.constant dense<0.000000e+00> : vector<18xf32>
    %471 = vector.multi_reduction <add>, %470, %cst_281 [1] : vector<18x64xf32> to vector<18xf32>
    %472 = vector.shape_cast %471 : vector<18xf32> to vector<18x1xf32>
    %cst_282 = arith.constant 6.400000e+01 : f32
    %473 = vector.broadcast %cst_282 : f32 to vector<18x1xf32>
    %474 = arith.divf %472, %473 : vector<18x1xf32>
    %475 = vector.broadcast %467 : vector<18x1xf32> to vector<18x64xf32>
    %476 = arith.subf %461, %475 : vector<18x64xf32>
    %cst_283 = arith.constant 9.99999974E-6 : f32
    %477 = vector.broadcast %cst_283 : f32 to vector<18x1xf32>
    %478 = arith.addf %474, %477 : vector<18x1xf32>
    %479 = math.rsqrt %478 : vector<18x1xf32>
    %480 = vector.broadcast %479 : vector<18x1xf32> to vector<18x64xf32>
    %481 = arith.mulf %476, %480 : vector<18x64xf32>
    %482 = vector.broadcast %462 : vector<1x64xf32> to vector<18x64xf32>
    %483 = arith.mulf %481, %482 : vector<18x64xf32>
    %484 = vector.broadcast %463 : vector<1x64xf32> to vector<18x64xf32>
    %485 = arith.addf %483, %484 : vector<18x64xf32>
    %486 = vector.extract_strided_slice %485 {offsets = [0, 0], sizes = [1, 64], strides = [1, 1]} : vector<18x64xf32> to vector<1x64xf32>
    %c0_284 = arith.constant 0 : index
    %c0_285 = arith.constant 0 : index
    %487 = vector.load %arg20[%c0_284, %c0_285] : memref<2x64xf32, #tpu.memory_space<vmem>>, vector<1x64xf32>
    tpu.vector_store %arg20[%c0_284, %c0_285], %486 {strides = array<i32>} : memref<2x64xf32, #tpu.memory_space<vmem>>, vector<1x64xf32>,
    %488 = vector.extract_strided_slice %485 {offsets = [9, 0], sizes = [1, 64], strides = [1, 1]} : vector<18x64xf32> to vector<1x64xf32>
    %c1_286 = arith.constant 1 : index
    %c0_287 = arith.constant 0 : index
    %489 = vector.load %arg20[%c1_286, %c0_287] : memref<2x64xf32, #tpu.memory_space<vmem>>, vector<1x64xf32>
    tpu.vector_store %arg20[%c1_286, %c0_287], %488 {strides = array<i32>} : memref<2x64xf32, #tpu.memory_space<vmem>>, vector<1x64xf32>,
    return
  }
  func.func @transform_0(%arg0: i32) -> (i32, i32, i32) {
    %c0_i32 = arith.constant 0 : i32
    %c0_i32_0 = arith.constant 0 : i32
    %c0_i32_1 = arith.constant 0 : i32
    %c0_i32_2 = arith.constant 0 : i32
    return %c0_i32, %c0_i32_0, %c0_i32_1 : i32, i32, i32
  }
  func.func @transform_1(%arg0: i32) -> (i32, i32) {
    %c0_i32 = arith.constant 0 : i32
    %c0_i32_0 = arith.constant 0 : i32
    %c0_i32_1 = arith.constant 0 : i32
    return %c0_i32, %c0_i32_0 : i32, i32
  }
  func.func @transform_2(%arg0: i32) -> (i32, i32) {
    %c0_i32 = arith.constant 0 : i32
    %c0_i32_0 = arith.constant 0 : i32
    %c0_i32_1 = arith.constant 0 : i32
    return %c0_i32, %c0_i32_0 : i32, i32
  }
  func.func @transform_3(%arg0: i32) -> (i32, i32) {
    %c0_i32 = arith.constant 0 : i32
    %c0_i32_0 = arith.constant 0 : i32
    %c0_i32_1 = arith.constant 0 : i32
    return %c0_i32, %c0_i32_0 : i32, i32
  }
  func.func @transform_4(%arg0: i32) -> (i32, i32, i32) {
    %c0_i32 = arith.constant 0 : i32
    %c0_i32_0 = arith.constant 0 : i32
    %c0_i32_1 = arith.constant 0 : i32
    %c0_i32_2 = arith.constant 0 : i32
    return %c0_i32, %c0_i32_0, %c0_i32_1 : i32, i32, i32
  }
  func.func @transform_5(%arg0: i32) -> (i32, i32, i32) {
    %c0_i32 = arith.constant 0 : i32
    %c0_i32_0 = arith.constant 0 : i32
    %c0_i32_1 = arith.constant 0 : i32
    %c0_i32_2 = arith.constant 0 : i32
    return %c0_i32, %c0_i32_0, %c0_i32_1 : i32, i32, i32
  }
  func.func @transform_6(%arg0: i32) -> (i32, i32, i32) {
    %c0_i32 = arith.constant 0 : i32
    %c0_i32_0 = arith.constant 0 : i32
    %c0_i32_1 = arith.constant 0 : i32
    %c0_i32_2 = arith.constant 0 : i32
    return %c0_i32, %c0_i32_0, %c0_i32_1 : i32, i32, i32
  }
  func.func @transform_7(%arg0: i32) -> (i32, i32, i32) {
    %c0_i32 = arith.constant 0 : i32
    %c0_i32_0 = arith.constant 0 : i32
    %c0_i32_1 = arith.constant 0 : i32
    %c0_i32_2 = arith.constant 0 : i32
    return %c0_i32, %c0_i32_0, %c0_i32_1 : i32, i32, i32
  }
  func.func @transform_8(%arg0: i32) -> (i32, i32, i32) {
    %c0_i32 = arith.constant 0 : i32
    %c0_i32_0 = arith.constant 0 : i32
    %c0_i32_1 = arith.constant 0 : i32
    %c0_i32_2 = arith.constant 0 : i32
    return %c0_i32, %c0_i32_0, %c0_i32_1 : i32, i32, i32
  }
  func.func @transform_9(%arg0: i32) -> (i32, i32, i32) {
    %c0_i32 = arith.constant 0 : i32
    %c0_i32_0 = arith.constant 0 : i32
    %c0_i32_1 = arith.constant 0 : i32
    %c0_i32_2 = arith.constant 0 : i32
    return %c0_i32, %c0_i32_0, %c0_i32_1 : i32, i32, i32
  }
  func.func @transform_10(%arg0: i32) -> (i32, i32, i32) {
    %c0_i32 = arith.constant 0 : i32
    %c0_i32_0 = arith.constant 0 : i32
    %c0_i32_1 = arith.constant 0 : i32
    %c0_i32_2 = arith.constant 0 : i32
    return %c0_i32, %c0_i32_0, %c0_i32_1 : i32, i32, i32
  }
  func.func @transform_11(%arg0: i32) -> (i32, i32, i32) {
    %c0_i32 = arith.constant 0 : i32
    %c0_i32_0 = arith.constant 0 : i32
    %c0_i32_1 = arith.constant 0 : i32
    %c0_i32_2 = arith.constant 0 : i32
    return %c0_i32, %c0_i32_0, %c0_i32_1 : i32, i32, i32
  }
  func.func @transform_12(%arg0: i32) -> (i32, i32, i32) {
    %c0_i32 = arith.constant 0 : i32
    %c0_i32_0 = arith.constant 0 : i32
    %c0_i32_1 = arith.constant 0 : i32
    %c0_i32_2 = arith.constant 0 : i32
    return %c0_i32, %c0_i32_0, %c0_i32_1 : i32, i32, i32
  }
  func.func @transform_13(%arg0: i32) -> (i32, i32, i32) {
    %c0_i32 = arith.constant 0 : i32
    %c0_i32_0 = arith.constant 0 : i32
    %c0_i32_1 = arith.constant 0 : i32
    %c0_i32_2 = arith.constant 0 : i32
    return %c0_i32, %c0_i32_0, %c0_i32_1 : i32, i32, i32
  }
  func.func @transform_14(%arg0: i32) -> (i32, i32, i32) {
    %c0_i32 = arith.constant 0 : i32
    %c0_i32_0 = arith.constant 0 : i32
    %c0_i32_1 = arith.constant 0 : i32
    %c0_i32_2 = arith.constant 0 : i32
    return %c0_i32, %c0_i32_0, %c0_i32_1 : i32, i32, i32
  }
  func.func @transform_15(%arg0: i32) -> (i32, i32, i32) {
    %c0_i32 = arith.constant 0 : i32
    %c0_i32_0 = arith.constant 0 : i32
    %c0_i32_1 = arith.constant 0 : i32
    %c0_i32_2 = arith.constant 0 : i32
    return %c0_i32, %c0_i32_0, %c0_i32_1 : i32, i32, i32
  }
  func.func @transform_16(%arg0: i32) -> (i32, i32, i32) {
    %c0_i32 = arith.constant 0 : i32
    %c0_i32_0 = arith.constant 0 : i32
    %c0_i32_1 = arith.constant 0 : i32
    %c0_i32_2 = arith.constant 0 : i32
    return %c0_i32, %c0_i32_0, %c0_i32_1 : i32, i32, i32
  }
  func.func @transform_17(%arg0: i32) -> (i32, i32) {
    %c0_i32 = arith.constant 0 : i32
    %c0_i32_0 = arith.constant 0 : i32
    %c0_i32_1 = arith.constant 0 : i32
    return %c0_i32, %c0_i32_0 : i32, i32
  }
  func.func @transform_18(%arg0: i32) -> (i32, i32) {
    %c0_i32 = arith.constant 0 : i32
    %c0_i32_0 = arith.constant 0 : i32
    %c0_i32_1 = arith.constant 0 : i32
    return %c0_i32, %c0_i32_0 : i32, i32
  }
  func.func @transform_19(%arg0: i32) -> (i32, i32) {
    %c0_i32 = arith.constant 0 : i32
    %c0_i32_0 = arith.constant 0 : i32
    %c0_i32_1 = arith.constant 0 : i32
    return %c0_i32, %c0_i32_0 : i32, i32
  }
}

</mosaic_0001>

<bundles_post_ra>
// kernel: forward_pallas.6
= control target key start
LH: loop header
LB: loop body
LE: loop exit
PB: predicated region body
PF: predicated region fallthrough
CT: control target
= control target key end

     0   :  { %s1624_s12 = smov 0   ;;  %s1916_s0 = inlined_call_operand.vmem [shape: bf16[2048,9], index: 0, kind: input, shape index: {}]   ;;  %s1917_s1 = inlined_call_operand.vmem [shape: bf16[9,8], index: 1, kind: input, shape index: {}]   ;;  %s1918_s2 = inlined_call_operand.vmem [shape: f32[1,8], index: 2, kind: input, shape index: {}]   ;;  %s1919_s3 = inlined_call_operand.vmem [shape: bf16[2048,8], index: 3, kind: output, shape index: {}]  }
   0x1 LB: > { %s1247_s13 = sadd.s32 4294967295, %s1601_s12   ;;  %p1251_p0 = scmp.ge.s32.totalorder %s1601_s12, 1  ;;  %s1601_s12 = sphi %s1624_s12, %s13_s12  }
   0x2   : > { %p138_p1 = scmp.lt.s32.totalorder %s1601_s12, 5 }
   0x4   : > { %p139_p2 = pnand %p1251_p0, %p138_p1 }
   0x5   : > { %s1252_s16 = sshll.u32 (!%p139_p2), %s1247_s13, 6 }
   0x6   : > { %142 = sbr.rel (%p139_p2) target bundleno = 283 (0x11b), region = 32  ;;  %p163_p3 = scmp.lt.s32.totalorder (!%p139_p2), %s1252_s16, 255 }
   0xb   : > { %v1562_v0 = vld [vmem:[%s1917_s1] sm:$0x1f]   ;;  %vm510_vm0 = vcmask 1043456   ;;  %vm511_vm1 = vcmask 1044480   ;;  %v1603_v1 = vmov 65535   ;;  %s1921_s16 = smov (!%p163_p3, %s1252_s16), 255 }
   0xc   : > { %v512_v2 = vsel %vm510_vm0, 4294967295, %v1603_v1  ;;  %s1253_s17 = sshll.u32 %s1921_s16, 2  ;;  %vm413_vm2 = vcmask 72704   ;;  %v1712_v37 = vld [vmem:[%s1918_s2] ss:$0 sm:$0xff]  ;;  %vm1126_vm3 = vcmask 60416  }
   0xd   : > { %v513_v3 = vsel %vm511_vm1, %v512_v2, 0  ;;  %s1643_s20 = scalar_lea.vmem %s1916_s0, %s1253_s17  ;;  %s1722_s25 = scalar_lea.vmem %s1919_s3, %s1253_s17 }
   0xe   : > { %v515_v4 = vand.u32 %v1562_v0, %v513_v3  ;;  %v1563_v5 = vld [vmem:[%s1643_s20] sm:$0xff]   ;;  %v1565_v7 = vld [vmem:[%s1643_s20 + $0x8] sm:$0xff]   ;;  %v1567_v9 = vld [vmem:[%s1643_s20 + $0x10] sm:$0xff]  }
   0xf   : > { %v1564_v6 = vld [vmem:[%s1643_s20 + $0x80] sm:$0xff]   ;;  %1487 = vmatprep.mubr.msk.bf16.mxu0 %vm413_vm2, %v1563_v5  ;;  %v1566_v8 = vld [vmem:[%s1643_s20 + $0x88] sm:$0xff]   ;;  %v1568_v10 = vld [vmem:[%s1643_s20 + $0x90] sm:$0xff]  }
  0x10   : > { %1485 = vmatprep.subr.bf16.mxu0 %v515_v4  ;;  %1551 = vmatprep.subr.bf16.mxu1 %v515_v4  ;;  %v1569_v11 = vld [vmem:[%s1643_s20 + $0x18] sm:$0xff]   ;;  %v1571_v13 = vld [vmem:[%s1643_s20 + $0x20] sm:$0xff]   ;;  %v1573_v15 = vld [vmem:[%s1643_s20 + $0x28] sm:$0xff]  }
  0x11   : > { %1486 = vmatpush3.bf16.msra.mxu0 %v515_v4  ;;  %1552 = vmatpush3.bf16.msra.mxu1 %v515_v4  ;;  %v1570_v12 = vld [vmem:[%s1643_s20 + $0x98] sm:$0xff]   ;;  %v1572_v14 = vld [vmem:[%s1643_s20 + $0xa0] sm:$0xff]   ;;  %v1574_v16 = vld [vmem:[%s1643_s20 + $0xa8] sm:$0xff]  }
  0x12   : > { %1519 = vmatprep.mubr.msk.bf16.mxu1 %vm413_vm2, %v1564_v6  ;;  %v1575_v17 = vld [vmem:[%s1643_s20 + $0x30] sm:$0xff]   ;;  %v1577_v19 = vld [vmem:[%s1643_s20 + $0x38] sm:$0xff]   ;;  %v1579_v21 = vld [vmem:[%s1643_s20 + $0x40] sm:$0xff]  }
  0x13   : > { %v1576_v18 = vld [vmem:[%s1643_s20 + $0xb0] sm:$0xff]   ;;  %v1578_v20 = vld [vmem:[%s1643_s20 + $0xb8] sm:$0xff]   ;;  %v1580_v22 = vld [vmem:[%s1643_s20 + $0xc0] sm:$0xff]  }
  0x14   : > { %1488 = vmatmul.mubr.msk.bf16.vlgmr.msra.gmra.mxu0 %vm413_vm2, %v1565_v7  ;;  %1520 = vmatmul.mubr.msk.bf16.vlgmr.msra.gmra.mxu1 %vm413_vm2, %v1566_v8  ;;  %v1581_v23 = vld [vmem:[%s1643_s20 + $0x48] sm:$0xff]   ;;  %v1583_v25 = vld [vmem:[%s1643_s20 + $0x50] sm:$0xff]   ;;  %v1585_v27 = vld [vmem:[%s1643_s20 + $0x58] sm:$0xff]  }
  0x15   : > { %1491 = vmatprep.mubr.msk.bf16.mxu0 %vm413_vm2, %v1567_v9  ;;  %1523 = vmatprep.mubr.msk.bf16.mxu1 %vm413_vm2, %v1568_v10  ;;  %v1582_v24 = vld [vmem:[%s1643_s20 + $0xc8] sm:$0xff]   ;;  %v1584_v26 = vld [vmem:[%s1643_s20 + $0xd0] sm:$0xff]   ;;  %v1586_v28 = vld [vmem:[%s1643_s20 + $0xd8] sm:$0xff]  }
  0x16   : > { %v1587_v29 = vld [vmem:[%s1643_s20 + $0x60] sm:$0xff]   ;;  %v1589_v31 = vld [vmem:[%s1643_s20 + $0x68] sm:$0xff]   ;;  %v1591_v33 = vld [vmem:[%s1643_s20 + $0x70] sm:$0xff]  }
  0x17   : > { %v1588_v30 = vld [vmem:[%s1643_s20 + $0xe0] sm:$0xff]   ;;  %v1590_v32 = vld [vmem:[%s1643_s20 + $0xe8] sm:$0xff]   ;;  %v1592_v34 = vld [vmem:[%s1643_s20 + $0xf0] sm:$0xff]  }
  0x18   : > { %v1593_v35 = vld [vmem:[%s1643_s20 + $0x78] sm:$0xff]  }
  0x19   : > { %v1594_v36 = vld [vmem:[%s1643_s20 + $0xf8] sm:$0xff]  }
  0x1c   : > { %1492 = vmatmul.mubr.msk.bf16.gmra.mxu0 %vm413_vm2, %v1569_v11  ;;  %1524 = vmatmul.mubr.msk.bf16.gmra.mxu1 %vm413_vm2, %v1570_v12 }
  0x1d   : > { %1495 = vmatprep.mubr.msk.bf16.mxu0 %vm413_vm2, %v1571_v13  ;;  %1527 = vmatprep.mubr.msk.bf16.mxu1 %vm413_vm2, %v1572_v14 }
  0x24   : > { %1496 = vmatmul.mubr.msk.bf16.gmra.mxu0 %vm413_vm2, %v1573_v15  ;;  %1528 = vmatmul.mubr.msk.bf16.gmra.mxu1 %vm413_vm2, %v1574_v16 }
  0x25   : > { %1499 = vmatprep.mubr.msk.bf16.mxu0 %vm413_vm2, %v1575_v17  ;;  %1531 = vmatprep.mubr.msk.bf16.mxu1 %vm413_vm2, %v1576_v18 }
  0x2c   : > { %1500 = vmatmul.mubr.msk.bf16.gmra.mxu0 %vm413_vm2, %v1577_v19  ;;  %1532 = vmatmul.mubr.msk.bf16.gmra.mxu1 %vm413_vm2, %v1578_v20 }
  0x2d   : > { %1503 = vmatprep.mubr.msk.bf16.mxu0 %vm413_vm2, %v1579_v21  ;;  %1535 = vmatprep.mubr.msk.bf16.mxu1 %vm413_vm2, %v1580_v22 }
  0x34   : > { %1504 = vmatmul.mubr.msk.bf16.gmra.mxu0 %vm413_vm2, %v1581_v23  ;;  %1536 = vmatmul.mubr.msk.bf16.gmra.mxu1 %vm413_vm2, %v1582_v24 }
  0x35   : > { %1507 = vmatprep.mubr.msk.bf16.mxu0 %vm413_vm2, %v1583_v25  ;;  %1539 = vmatprep.mubr.msk.bf16.mxu1 %vm413_vm2, %v1584_v26 }
  0x3c   : > { %1508 = vmatmul.mubr.msk.bf16.gmra.mxu0 %vm413_vm2, %v1585_v27  ;;  %1540 = vmatmul.mubr.msk.bf16.gmra.mxu1 %vm413_vm2, %v1586_v28 }
  0x3d   : > { %1511 = vmatprep.mubr.msk.bf16.mxu0 %vm413_vm2, %v1587_v29  ;;  %1543 = vmatprep.mubr.msk.bf16.mxu1 %vm413_vm2, %v1588_v30 }
  0x44   : > { %1512 = vmatmul.mubr.msk.bf16.gmra.mxu0 %vm413_vm2, %v1589_v31  ;;  %1544 = vmatmul.mubr.msk.bf16.gmra.mxu1 %vm413_vm2, %v1590_v32 }
  0x45   : > { %1515 = vmatprep.mubr.msk.bf16.mxu0 %vm413_vm2, %v1591_v33  ;;  %1547 = vmatprep.mubr.msk.bf16.mxu1 %vm413_vm2, %v1592_v34 }
  0x4c   : > { %1516 = vmatmul.mubr.msk.bf16.gmra.mxu0 %vm413_vm2, %v1593_v35  ;;  %1548 = vmatmul.mubr.msk.bf16.gmra.mxu1 %vm413_vm2, %v1594_v36 }
  0xd4   : > { %v1489_v38 = vpop.f32.mrf.mxu0  ;;  %v1521_v40 = vpop.f32.mrf.mxu1 }
  0xd5   : > { %v560_v39 = vadd.f32 %v1489_v38, %v1712_v37  ;;  %v688_v41 = vadd.f32 %v1521_v40, %v1712_v37 }
  0xd6   : > { %v551_v42 = vpop.f32.mrf.mxu0  ;;  %v679_v45 = vpop.f32.mrf.mxu1 }
  0xd7   : > { %v808_v43 = vmax.f32 %v560_v39, 0.0  ;;  %v552_v44 = vadd.f32 %v1712_v37, %v551_v42  ;;  %v840_v46 = vmax.f32 %v688_v41, 0.0  ;;  %v680_v47 = vadd.f32 %v1712_v37, %v679_v45 }
  0xd8   : > { %v1490_v48 = vpop.f32.mrf.mxu0  ;;  %v1522_v52 = vpop.f32.mrf.mxu1 }
  0xd9   : > { %v1390_v49 = vpack.c.bf16 %v808_v43, %v808_v43  ;;  %v806_v50 = vmax.f32 %v552_v44, 0.0  ;;  %v563_v51 = vadd.f32 %v1490_v48, %v1712_v37  ;;  %v1422_v53 = vpack.c.bf16 %v840_v46, %v840_v46 }
  0xda   : > { %v838_v54 = vmax.f32 %v680_v47, 0.0  ;;  %v691_v55 = vadd.f32 %v1522_v52, %v1712_v37  ;;  %v554_v56 = vpop.f32.mrf.mxu0  ;;  %v682_v60 = vpop.f32.mrf.mxu1 }
  0xdb   : > { %1129 = vst.msk [vmem:[%s1722_s25 + $0x8] sm:$0xf] %vm1126_vm3, %v1390_v49  ;;  %v1388_v57 = vpack.c.bf16 %v806_v50, %v806_v50  ;;  %v809_v58 = vmax.f32 %v563_v51, 0.0  ;;  %v555_v59 = vadd.f32 %v1712_v37, %v554_v56  ;;  %1161 = vst.msk [vmem:[%s1722_s25 + $0x88] sm:$0xf] %vm1126_vm3, %v1422_v53  ;;  %v683_v63 = vadd.f32 %v1712_v37, %v682_v60 }
  0xdc   : > { %v1420_v61 = vpack.c.bf16 %v838_v54, %v838_v54  ;;  %v841_v62 = vmax.f32 %v691_v55, 0.0  ;;  %v1493_v0 = vpop.f32.mrf.mxu0  ;;  %v1525_v4 = vpop.f32.mrf.mxu1 }
  0xdd   : > { %1127 = vst.msk [vmem:[%s1722_s25] sm:$0xf] %vm1126_vm3, %v1388_v57  ;;  %v1391_v1 = vpack.c.bf16 %v809_v58, %v809_v58  ;;  %v807_v2 = vmax.f32 %v555_v59, 0.0  ;;  %v576_v3 = vadd.f32 %v1493_v0, %v1712_v37  ;;  %v839_v6 = vmax.f32 %v683_v63, 0.0 }
  0xde   : > { %1159 = vst.msk [vmem:[%s1722_s25 + $0x80] sm:$0xf] %vm1126_vm3, %v1420_v61  ;;  %v1423_v5 = vpack.c.bf16 %v841_v62, %v841_v62  ;;  %v704_v7 = vadd.f32 %v1525_v4, %v1712_v37  ;;  %v567_v8 = vpop.f32.mrf.mxu0  ;;  %v695_v12 = vpop.f32.mrf.mxu1 }
  0xdf   : > { %1130 = vst.msk [vmem:[%s1722_s25 + $0xc] sm:$0xf] %vm1126_vm3, %v1391_v1  ;;  %v1389_v9 = vpack.c.bf16 %v807_v2, %v807_v2  ;;  %v812_v10 = vmax.f32 %v576_v3, 0.0  ;;  %v568_v11 = vadd.f32 %v1712_v37, %v567_v8  ;;  %v1421_v13 = vpack.c.bf16 %v839_v6, %v839_v6 }
  0xe0   : > { %1162 = vst.msk [vmem:[%s1722_s25 + $0x8c] sm:$0xf] %vm1126_vm3, %v1423_v5  ;;  %v844_v14 = vmax.f32 %v704_v7, 0.0  ;;  %v696_v15 = vadd.f32 %v1712_v37, %v695_v12  ;;  %v1494_v16 = vpop.f32.mrf.mxu0  ;;  %v1526_v20 = vpop.f32.mrf.mxu1 }
  0xe1   : > { %1128 = vst.msk [vmem:[%s1722_s25 + $0x4] sm:$0xf] %vm1126_vm3, %v1389_v9  ;;  %v1394_v17 = vpack.c.bf16 %v812_v10, %v812_v10  ;;  %v810_v18 = vmax.f32 %v568_v11, 0.0  ;;  %v579_v19 = vadd.f32 %v1494_v16, %v1712_v37  ;;  %1160 = vst.msk [vmem:[%s1722_s25 + $0x84] sm:$0xf] %vm1126_vm3, %v1421_v13  ;;  %v707_v23 = vadd.f32 %v1526_v20, %v1712_v37 }
  0xe2   : > { %v1426_v21 = vpack.c.bf16 %v844_v14, %v844_v14  ;;  %v842_v22 = vmax.f32 %v696_v15, 0.0  ;;  %v570_v24 = vpop.f32.mrf.mxu0  ;;  %v698_v28 = vpop.f32.mrf.mxu1 }
  0xe3   : > { %1133 = vst.msk [vmem:[%s1722_s25 + $0x18] sm:$0xf] %vm1126_vm3, %v1394_v17  ;;  %v1392_v25 = vpack.c.bf16 %v810_v18, %v810_v18  ;;  %v813_v26 = vmax.f32 %v579_v19, 0.0  ;;  %v571_v27 = vadd.f32 %v1712_v37, %v570_v24  ;;  %v845_v30 = vmax.f32 %v707_v23, 0.0 }
  0xe4   : > { %1165 = vst.msk [vmem:[%s1722_s25 + $0x98] sm:$0xf] %vm1126_vm3, %v1426_v21  ;;  %v1424_v29 = vpack.c.bf16 %v842_v22, %v842_v22  ;;  %v699_v31 = vadd.f32 %v1712_v37, %v698_v28  ;;  %v1497_v32 = vpop.f32.mrf.mxu0  ;;  %v1529_v36 = vpop.f32.mrf.mxu1 }
  0xe5   : > { %1131 = vst.msk [vmem:[%s1722_s25 + $0x10] sm:$0xf] %vm1126_vm3, %v1392_v25  ;;  %v1395_v33 = vpack.c.bf16 %v813_v26, %v813_v26  ;;  %v811_v34 = vmax.f32 %v571_v27, 0.0  ;;  %v592_v35 = vadd.f32 %v1497_v32, %v1712_v37  ;;  %v1427_v38 = vpack.c.bf16 %v845_v30, %v845_v30 }
  0xe6   : > { %1163 = vst.msk [vmem:[%s1722_s25 + $0x90] sm:$0xf] %vm1126_vm3, %v1424_v29  ;;  %v843_v39 = vmax.f32 %v699_v31, 0.0  ;;  %v720_v40 = vadd.f32 %v1529_v36, %v1712_v37  ;;  %v583_v41 = vpop.f32.mrf.mxu0  ;;  %v711_v45 = vpop.f32.mrf.mxu1 }
  0xe7   : > { %1134 = vst.msk [vmem:[%s1722_s25 + $0x1c] sm:$0xf] %vm1126_vm3, %v1395_v33  ;;  %v1393_v42 = vpack.c.bf16 %v811_v34, %v811_v34  ;;  %v816_v43 = vmax.f32 %v592_v35, 0.0  ;;  %v584_v44 = vadd.f32 %v1712_v37, %v583_v41  ;;  %1166 = vst.msk [vmem:[%s1722_s25 + $0x9c] sm:$0xf] %vm1126_vm3, %v1427_v38  ;;  %v712_v48 = vadd.f32 %v1712_v37, %v711_v45 }
  0xe8   : > { %v1425_v46 = vpack.c.bf16 %v843_v39, %v843_v39  ;;  %v848_v47 = vmax.f32 %v720_v40, 0.0  ;;  %v1498_v49 = vpop.f32.mrf.mxu0  ;;  %v1530_v53 = vpop.f32.mrf.mxu1 }
  0xe9   : > { %1132 = vst.msk [vmem:[%s1722_s25 + $0x14] sm:$0xf] %vm1126_vm3, %v1393_v42  ;;  %v1398_v50 = vpack.c.bf16 %v816_v43, %v816_v43  ;;  %v814_v51 = vmax.f32 %v584_v44, 0.0  ;;  %v595_v52 = vadd.f32 %v1498_v49, %v1712_v37  ;;  %v846_v55 = vmax.f32 %v712_v48, 0.0 }
  0xea   : > { %1164 = vst.msk [vmem:[%s1722_s25 + $0x94] sm:$0xf] %vm1126_vm3, %v1425_v46  ;;  %v1430_v54 = vpack.c.bf16 %v848_v47, %v848_v47  ;;  %v723_v56 = vadd.f32 %v1530_v53, %v1712_v37  ;;  %v586_v57 = vpop.f32.mrf.mxu0  ;;  %v714_v61 = vpop.f32.mrf.mxu1 }
  0xeb   : > { %1137 = vst.msk [vmem:[%s1722_s25 + $0x28] sm:$0xf] %vm1126_vm3, %v1398_v50  ;;  %v1396_v58 = vpack.c.bf16 %v814_v51, %v814_v51  ;;  %v817_v59 = vmax.f32 %v595_v52, 0.0  ;;  %v587_v60 = vadd.f32 %v1712_v37, %v586_v57  ;;  %v1428_v62 = vpack.c.bf16 %v846_v55, %v846_v55 }
  0xec   : > { %1169 = vst.msk [vmem:[%s1722_s25 + $0xa8] sm:$0xf] %vm1126_vm3, %v1430_v54  ;;  %v849_v63 = vmax.f32 %v723_v56, 0.0  ;;  %v715_v0 = vadd.f32 %v1712_v37, %v714_v61  ;;  %v1501_v1 = vpop.f32.mrf.mxu0  ;;  %v1533_v5 = vpop.f32.mrf.mxu1 }
  0xed   : > { %1135 = vst.msk [vmem:[%s1722_s25 + $0x20] sm:$0xf] %vm1126_vm3, %v1396_v58  ;;  %v1399_v2 = vpack.c.bf16 %v817_v59, %v817_v59  ;;  %v815_v3 = vmax.f32 %v587_v60, 0.0  ;;  %v608_v4 = vadd.f32 %v1501_v1, %v1712_v37  ;;  %1167 = vst.msk [vmem:[%s1722_s25 + $0xa0] sm:$0xf] %vm1126_vm3, %v1428_v62  ;;  %v736_v8 = vadd.f32 %v1533_v5, %v1712_v37 }
  0xee   : > { %v1431_v6 = vpack.c.bf16 %v849_v63, %v849_v63  ;;  %v847_v7 = vmax.f32 %v715_v0, 0.0  ;;  %v599_v9 = vpop.f32.mrf.mxu0  ;;  %v727_v13 = vpop.f32.mrf.mxu1 }
  0xef   : > { %1138 = vst.msk [vmem:[%s1722_s25 + $0x2c] sm:$0xf] %vm1126_vm3, %v1399_v2  ;;  %v1397_v10 = vpack.c.bf16 %v815_v3, %v815_v3  ;;  %v820_v11 = vmax.f32 %v608_v4, 0.0  ;;  %v600_v12 = vadd.f32 %v1712_v37, %v599_v9  ;;  %v852_v15 = vmax.f32 %v736_v8, 0.0 }
  0xf0   : > { %1170 = vst.msk [vmem:[%s1722_s25 + $0xac] sm:$0xf] %vm1126_vm3, %v1431_v6  ;;  %v1429_v14 = vpack.c.bf16 %v847_v7, %v847_v7  ;;  %v728_v16 = vadd.f32 %v1712_v37, %v727_v13  ;;  %v1502_v17 = vpop.f32.mrf.mxu0  ;;  %v1534_v21 = vpop.f32.mrf.mxu1 }
  0xf1   : > { %1136 = vst.msk [vmem:[%s1722_s25 + $0x24] sm:$0xf] %vm1126_vm3, %v1397_v10  ;;  %v1402_v18 = vpack.c.bf16 %v820_v11, %v820_v11  ;;  %v818_v19 = vmax.f32 %v600_v12, 0.0  ;;  %v611_v20 = vadd.f32 %v1502_v17, %v1712_v37  ;;  %v1434_v22 = vpack.c.bf16 %v852_v15, %v852_v15 }
  0xf2   : > { %1168 = vst.msk [vmem:[%s1722_s25 + $0xa4] sm:$0xf] %vm1126_vm3, %v1429_v14  ;;  %v850_v23 = vmax.f32 %v728_v16, 0.0  ;;  %v739_v24 = vadd.f32 %v1534_v21, %v1712_v37  ;;  %v602_v25 = vpop.f32.mrf.mxu0  ;;  %v730_v29 = vpop.f32.mrf.mxu1 }
  0xf3   : > { %1141 = vst.msk [vmem:[%s1722_s25 + $0x38] sm:$0xf] %vm1126_vm3, %v1402_v18  ;;  %v1400_v26 = vpack.c.bf16 %v818_v19, %v818_v19  ;;  %v821_v27 = vmax.f32 %v611_v20, 0.0  ;;  %v603_v28 = vadd.f32 %v1712_v37, %v602_v25  ;;  %1173 = vst.msk [vmem:[%s1722_s25 + $0xb8] sm:$0xf] %vm1126_vm3, %v1434_v22  ;;  %v731_v32 = vadd.f32 %v1712_v37, %v730_v29 }
  0xf4   : > { %v1432_v30 = vpack.c.bf16 %v850_v23, %v850_v23  ;;  %v853_v31 = vmax.f32 %v739_v24, 0.0  ;;  %v1505_v33 = vpop.f32.mrf.mxu0  ;;  %v1537_v38 = vpop.f32.mrf.mxu1 }
  0xf5   : > { %1139 = vst.msk [vmem:[%s1722_s25 + $0x30] sm:$0xf] %vm1126_vm3, %v1400_v26  ;;  %v1403_v34 = vpack.c.bf16 %v821_v27, %v821_v27  ;;  %v819_v35 = vmax.f32 %v603_v28, 0.0  ;;  %v624_v36 = vadd.f32 %v1505_v33, %v1712_v37  ;;  %v851_v40 = vmax.f32 %v731_v32, 0.0 }
  0xf6   : > { %1171 = vst.msk [vmem:[%s1722_s25 + $0xb0] sm:$0xf] %vm1126_vm3, %v1432_v30  ;;  %v1435_v39 = vpack.c.bf16 %v853_v31, %v853_v31  ;;  %v752_v41 = vadd.f32 %v1537_v38, %v1712_v37  ;;  %v615_v42 = vpop.f32.mrf.mxu0  ;;  %v743_v46 = vpop.f32.mrf.mxu1 }
  0xf7   : > { %1142 = vst.msk [vmem:[%s1722_s25 + $0x3c] sm:$0xf] %vm1126_vm3, %v1403_v34  ;;  %v1401_v43 = vpack.c.bf16 %v819_v35, %v819_v35  ;;  %v824_v44 = vmax.f32 %v624_v36, 0.0  ;;  %v616_v45 = vadd.f32 %v1712_v37, %v615_v42  ;;  %v1433_v47 = vpack.c.bf16 %v851_v40, %v851_v40 }
  0xf8   : > { %1174 = vst.msk [vmem:[%s1722_s25 + $0xbc] sm:$0xf] %vm1126_vm3, %v1435_v39  ;;  %v856_v48 = vmax.f32 %v752_v41, 0.0  ;;  %v744_v49 = vadd.f32 %v1712_v37, %v743_v46  ;;  %v1506_v50 = vpop.f32.mrf.mxu0  ;;  %v1538_v54 = vpop.f32.mrf.mxu1 }
  0xf9   : > { %1140 = vst.msk [vmem:[%s1722_s25 + $0x34] sm:$0xf] %vm1126_vm3, %v1401_v43  ;;  %v1406_v51 = vpack.c.bf16 %v824_v44, %v824_v44  ;;  %v822_v52 = vmax.f32 %v616_v45, 0.0  ;;  %v627_v53 = vadd.f32 %v1506_v50, %v1712_v37  ;;  %1172 = vst.msk [vmem:[%s1722_s25 + $0xb4] sm:$0xf] %vm1126_vm3, %v1433_v47  ;;  %v755_v57 = vadd.f32 %v1538_v54, %v1712_v37 }
  0xfa   : > { %v1438_v55 = vpack.c.bf16 %v856_v48, %v856_v48  ;;  %v854_v56 = vmax.f32 %v744_v49, 0.0  ;;  %v618_v58 = vpop.f32.mrf.mxu0  ;;  %v746_v62 = vpop.f32.mrf.mxu1 }
  0xfb   : > { %1145 = vst.msk [vmem:[%s1722_s25 + $0x48] sm:$0xf] %vm1126_vm3, %v1406_v51  ;;  %v1404_v59 = vpack.c.bf16 %v822_v52, %v822_v52  ;;  %v825_v60 = vmax.f32 %v627_v53, 0.0  ;;  %v619_v61 = vadd.f32 %v1712_v37, %v618_v58  ;;  %v857_v0 = vmax.f32 %v755_v57, 0.0 }
  0xfc   : > { %1177 = vst.msk [vmem:[%s1722_s25 + $0xc8] sm:$0xf] %vm1126_vm3, %v1438_v55  ;;  %v1436_v63 = vpack.c.bf16 %v854_v56, %v854_v56  ;;  %v747_v1 = vadd.f32 %v1712_v37, %v746_v62  ;;  %v1509_v2 = vpop.f32.mrf.mxu0  ;;  %v1541_v6 = vpop.f32.mrf.mxu1 }
  0xfd   : > { %1143 = vst.msk [vmem:[%s1722_s25 + $0x40] sm:$0xf] %vm1126_vm3, %v1404_v59  ;;  %v1407_v3 = vpack.c.bf16 %v825_v60, %v825_v60  ;;  %v823_v4 = vmax.f32 %v619_v61, 0.0  ;;  %v640_v5 = vadd.f32 %v1509_v2, %v1712_v37  ;;  %v1439_v7 = vpack.c.bf16 %v857_v0, %v857_v0 }
  0xfe   : > { %1175 = vst.msk [vmem:[%s1722_s25 + $0xc0] sm:$0xf] %vm1126_vm3, %v1436_v63  ;;  %v855_v8 = vmax.f32 %v747_v1, 0.0  ;;  %v768_v9 = vadd.f32 %v1541_v6, %v1712_v37  ;;  %v631_v10 = vpop.f32.mrf.mxu0  ;;  %v759_v14 = vpop.f32.mrf.mxu1 }
  0xff   : > { %1146 = vst.msk [vmem:[%s1722_s25 + $0x4c] sm:$0xf] %vm1126_vm3, %v1407_v3  ;;  %v1405_v11 = vpack.c.bf16 %v823_v4, %v823_v4  ;;  %v828_v12 = vmax.f32 %v640_v5, 0.0  ;;  %v632_v13 = vadd.f32 %v1712_v37, %v631_v10  ;;  %1178 = vst.msk [vmem:[%s1722_s25 + $0xcc] sm:$0xf] %vm1126_vm3, %v1439_v7  ;;  %v760_v17 = vadd.f32 %v1712_v37, %v759_v14 }
 0x100   : > { %v1437_v15 = vpack.c.bf16 %v855_v8, %v855_v8  ;;  %v860_v16 = vmax.f32 %v768_v9, 0.0  ;;  %v1510_v18 = vpop.f32.mrf.mxu0  ;;  %v1542_v22 = vpop.f32.mrf.mxu1 }
 0x101   : > { %1144 = vst.msk [vmem:[%s1722_s25 + $0x44] sm:$0xf] %vm1126_vm3, %v1405_v11  ;;  %v1410_v19 = vpack.c.bf16 %v828_v12, %v828_v12  ;;  %v826_v20 = vmax.f32 %v632_v13, 0.0  ;;  %v643_v21 = vadd.f32 %v1510_v18, %v1712_v37  ;;  %v858_v24 = vmax.f32 %v760_v17, 0.0 }
 0x102   : > { %1176 = vst.msk [vmem:[%s1722_s25 + $0xc4] sm:$0xf] %vm1126_vm3, %v1437_v15  ;;  %v1442_v23 = vpack.c.bf16 %v860_v16, %v860_v16  ;;  %v771_v25 = vadd.f32 %v1542_v22, %v1712_v37  ;;  %v634_v26 = vpop.f32.mrf.mxu0  ;;  %v762_v30 = vpop.f32.mrf.mxu1 }
 0x103   : > { %1149 = vst.msk [vmem:[%s1722_s25 + $0x58] sm:$0xf] %vm1126_vm3, %v1410_v19  ;;  %v1408_v27 = vpack.c.bf16 %v826_v20, %v826_v20  ;;  %v829_v28 = vmax.f32 %v643_v21, 0.0  ;;  %v635_v29 = vadd.f32 %v1712_v37, %v634_v26  ;;  %v1440_v31 = vpack.c.bf16 %v858_v24, %v858_v24 }
 0x104   : > { %1181 = vst.msk [vmem:[%s1722_s25 + $0xd8] sm:$0xf] %vm1126_vm3, %v1442_v23  ;;  %v861_v32 = vmax.f32 %v771_v25, 0.0  ;;  %v763_v33 = vadd.f32 %v1712_v37, %v762_v30  ;;  %v1513_v34 = vpop.f32.mrf.mxu0  ;;  %v1545_v39 = vpop.f32.mrf.mxu1 }
 0x105   : > { %1147 = vst.msk [vmem:[%s1722_s25 + $0x50] sm:$0xf] %vm1126_vm3, %v1408_v27  ;;  %v1411_v35 = vpack.c.bf16 %v829_v28, %v829_v28  ;;  %v827_v36 = vmax.f32 %v635_v29, 0.0  ;;  %v656_v38 = vadd.f32 %v1513_v34, %v1712_v37  ;;  %1179 = vst.msk [vmem:[%s1722_s25 + $0xd0] sm:$0xf] %vm1126_vm3, %v1440_v31  ;;  %v784_v42 = vadd.f32 %v1545_v39, %v1712_v37 }
 0x106   : > { %v1443_v40 = vpack.c.bf16 %v861_v32, %v861_v32  ;;  %v859_v41 = vmax.f32 %v763_v33, 0.0  ;;  %v647_v43 = vpop.f32.mrf.mxu0  ;;  %v775_v47 = vpop.f32.mrf.mxu1 }
 0x107   : > { %1150 = vst.msk [vmem:[%s1722_s25 + $0x5c] sm:$0xf] %vm1126_vm3, %v1411_v35  ;;  %v1409_v44 = vpack.c.bf16 %v827_v36, %v827_v36  ;;  %v832_v45 = vmax.f32 %v656_v38, 0.0  ;;  %v648_v46 = vadd.f32 %v1712_v37, %v647_v43  ;;  %v864_v49 = vmax.f32 %v784_v42, 0.0 }
 0x108   : > { %1182 = vst.msk [vmem:[%s1722_s25 + $0xdc] sm:$0xf] %vm1126_vm3, %v1443_v40  ;;  %v1441_v48 = vpack.c.bf16 %v859_v41, %v859_v41  ;;  %v776_v50 = vadd.f32 %v1712_v37, %v775_v47  ;;  %v1514_v51 = vpop.f32.mrf.mxu0  ;;  %v1546_v55 = vpop.f32.mrf.mxu1 }
 0x109   : > { %1148 = vst.msk [vmem:[%s1722_s25 + $0x54] sm:$0xf] %vm1126_vm3, %v1409_v44  ;;  %v1414_v52 = vpack.c.bf16 %v832_v45, %v832_v45  ;;  %v830_v53 = vmax.f32 %v648_v46, 0.0  ;;  %v659_v54 = vadd.f32 %v1514_v51, %v1712_v37  ;;  %v1446_v56 = vpack.c.bf16 %v864_v49, %v864_v49 }
 0x10a   : > { %1180 = vst.msk [vmem:[%s1722_s25 + $0xd4] sm:$0xf] %vm1126_vm3, %v1441_v48  ;;  %v862_v57 = vmax.f32 %v776_v50, 0.0  ;;  %v787_v58 = vadd.f32 %v1546_v55, %v1712_v37  ;;  %v650_v59 = vpop.f32.mrf.mxu0  ;;  %v778_v63 = vpop.f32.mrf.mxu1 }
 0x10b   : > { %1153 = vst.msk [vmem:[%s1722_s25 + $0x68] sm:$0xf] %vm1126_vm3, %v1414_v52  ;;  %v1412_v60 = vpack.c.bf16 %v830_v53, %v830_v53  ;;  %v833_v61 = vmax.f32 %v659_v54, 0.0  ;;  %v651_v62 = vadd.f32 %v1712_v37, %v650_v59  ;;  %1185 = vst.msk [vmem:[%s1722_s25 + $0xe8] sm:$0xf] %vm1126_vm3, %v1446_v56  ;;  %v779_v2 = vadd.f32 %v1712_v37, %v778_v63 }
 0x10c   : > { %v1444_v0 = vpack.c.bf16 %v862_v57, %v862_v57  ;;  %v865_v1 = vmax.f32 %v787_v58, 0.0  ;;  %v1517_v3 = vpop.f32.mrf.mxu0  ;;  %v1549_v7 = vpop.f32.mrf.mxu1 }
 0x10d   : > { %1151 = vst.msk [vmem:[%s1722_s25 + $0x60] sm:$0xf] %vm1126_vm3, %v1412_v60  ;;  %v1415_v4 = vpack.c.bf16 %v833_v61, %v833_v61  ;;  %v831_v5 = vmax.f32 %v651_v62, 0.0  ;;  %v672_v6 = vadd.f32 %v1517_v3, %v1712_v37  ;;  %v863_v9 = vmax.f32 %v779_v2, 0.0 }
 0x10e   : > { %1183 = vst.msk [vmem:[%s1722_s25 + $0xe0] sm:$0xf] %vm1126_vm3, %v1444_v0  ;;  %v1447_v8 = vpack.c.bf16 %v865_v1, %v865_v1  ;;  %v800_v10 = vadd.f32 %v1549_v7, %v1712_v37  ;;  %v663_v11 = vpop.f32.mrf.mxu0  ;;  %v791_v15 = vpop.f32.mrf.mxu1 }
 0x10f   : > { %1154 = vst.msk [vmem:[%s1722_s25 + $0x6c] sm:$0xf] %vm1126_vm3, %v1415_v4  ;;  %v1413_v12 = vpack.c.bf16 %v831_v5, %v831_v5  ;;  %v836_v13 = vmax.f32 %v672_v6, 0.0  ;;  %v664_v14 = vadd.f32 %v1712_v37, %v663_v11  ;;  %v1445_v16 = vpack.c.bf16 %v863_v9, %v863_v9 }
 0x110   : > { %1186 = vst.msk [vmem:[%s1722_s25 + $0xec] sm:$0xf] %vm1126_vm3, %v1447_v8  ;;  %v868_v17 = vmax.f32 %v800_v10, 0.0  ;;  %v792_v18 = vadd.f32 %v1712_v37, %v791_v15  ;;  %v1518_v19 = vpop.f32.mrf.mxu0  ;;  %v1550_v23 = vpop.f32.mrf.mxu1 }
 0x111   : > { %1152 = vst.msk [vmem:[%s1722_s25 + $0x64] sm:$0xf] %vm1126_vm3, %v1413_v12  ;;  %v1418_v20 = vpack.c.bf16 %v836_v13, %v836_v13  ;;  %v834_v21 = vmax.f32 %v664_v14, 0.0  ;;  %v675_v22 = vadd.f32 %v1518_v19, %v1712_v37  ;;  %1184 = vst.msk [vmem:[%s1722_s25 + $0xe4] sm:$0xf] %vm1126_vm3, %v1445_v16  ;;  %v803_v26 = vadd.f32 %v1550_v23, %v1712_v37 }
 0x112   : > { %v1450_v24 = vpack.c.bf16 %v868_v17, %v868_v17  ;;  %v866_v25 = vmax.f32 %v792_v18, 0.0  ;;  %v666_v27 = vpop.f32.mrf.mxu0  ;;  %v794_v31 = vpop.f32.mrf.mxu1 }
 0x113   : > { %1157 = vst.msk [vmem:[%s1722_s25 + $0x78] sm:$0xf] %vm1126_vm3, %v1418_v20  ;;  %v1416_v28 = vpack.c.bf16 %v834_v21, %v834_v21  ;;  %v837_v29 = vmax.f32 %v675_v22, 0.0  ;;  %v667_v30 = vadd.f32 %v1712_v37, %v666_v27  ;;  %v869_v33 = vmax.f32 %v803_v26, 0.0 }
 0x114   : > { %1189 = vst.msk [vmem:[%s1722_s25 + $0xf8] sm:$0xf] %vm1126_vm3, %v1450_v24  ;;  %v1448_v32 = vpack.c.bf16 %v866_v25, %v866_v25  ;;  %v795_v34 = vadd.f32 %v1712_v37, %v794_v31 }
 0x115   : > { %1155 = vst.msk [vmem:[%s1722_s25 + $0x70] sm:$0xf] %vm1126_vm3, %v1416_v28  ;;  %v1419_v35 = vpack.c.bf16 %v837_v29, %v837_v29  ;;  %v835_v36 = vmax.f32 %v667_v30, 0.0  ;;  %v1451_v38 = vpack.c.bf16 %v869_v33, %v869_v33 }
 0x116   : > { %1187 = vst.msk [vmem:[%s1722_s25 + $0xf0] sm:$0xf] %vm1126_vm3, %v1448_v32  ;;  %v867_v39 = vmax.f32 %v795_v34, 0.0 }
 0x117   : > { %1158 = vst.msk [vmem:[%s1722_s25 + $0x7c] sm:$0xf] %vm1126_vm3, %v1419_v35  ;;  %v1417_v40 = vpack.c.bf16 %v835_v36, %v835_v36  ;;  %1190 = vst.msk [vmem:[%s1722_s25 + $0xfc] sm:$0xf] %vm1126_vm3, %v1451_v38 }
 0x118   : > { %v1449_v41 = vpack.c.bf16 %v867_v39, %v867_v39 }
 0x119   : > { %1156 = vst.msk [vmem:[%s1722_s25 + $0x74] sm:$0xf] %vm1126_vm3, %v1417_v40 }
 0x11a   : > { %1188 = vst.msk [vmem:[%s1722_s25 + $0xf4] sm:$0xf] %vm1126_vm3, %v1449_v41 }
 0x11b PF: > { %s13_s12 = sadd.s32 1, %s1601_s12  }
 0x11c   : > { %p10_p4 = scmp.ge.s32.totalorder %s13_s12, 6  }
 0x11e   :  { %12 = sbr.rel (!%p10_p4) target bundleno = 1 (0x1), region = 62 }

// kernel: forward_pallas.7
= control target key start
LH: loop header
LB: loop body
LE: loop exit
PB: predicated region body
PF: predicated region fallthrough
CT: control target
= control target key end

     0   :  { %vm379_vm0 = vcmask 1043456   ;;  %vm282_vm1 = vcmask 588800   ;;  %vm992_vm2 = vcmask 125952   ;;  %s1907_s1 = inlined_call_operand.vmem [shape: bf16[72,16], index: 1, kind: input, shape index: {}]   ;;  %s1908_s0 = inlined_call_operand.vmem [shape: bf16[512,72], index: 0, kind: input, shape index: {}]   ;;  %s1909_s2 = inlined_call_operand.vmem [shape: f32[1,16], index: 2, kind: input, shape index: {}]   ;;  %s1910_s3 = inlined_call_operand.vmem [shape: bf16[512,16], index: 3, kind: output, shape index: {}]  }
   0x1   :  { %v1382_v0 = vld [vmem:[%s1907_s1 + $0x20] ss:$0 sps:$4 sm:$0xff]   ;;  %v1383_v1 = vld [vmem:[%s1907_s1 + $0x18] sm:$0xff]   ;;  %v1384_v3 = vld [vmem:[%s1907_s1 + $0x10] sm:$0xff]  }
   0x2   :  { %1380 = vmatprep.subr.msk.bf16.mxu0 %vm379_vm0, %v1382_v0  ;;  %1381 = vmatprep.subr.msk.bf16.mxu1 %vm379_vm0, %v1382_v0  ;;  %v381_v2 = vsel %vm379_vm0, %v1382_v0, 0  ;;  %v1387_v4 = vld [vmem:[%s1908_s0] sm:$0xff]   ;;  %v1385_v6 = vld [vmem:[%s1907_s1 + $0x8] sm:$0xff]   ;;  %v1391_v10 = vld [vmem:[%s1908_s0 + $0x10] sm:$0xff]  }
   0x3   :  { %1297 = vmatpush3.bf16.msra.mxu0 %v381_v2  ;;  %1375 = vmatpush3.bf16.msra.mxu1 %v381_v2  ;;  %v1388_v5 = vld [vmem:[%s1908_s0 + $0x80] sm:$0xff]   ;;  %v1389_v8 = vld [vmem:[%s1908_s0 + $0x8] sm:$0xff]   ;;  %v1392_v11 = vld [vmem:[%s1908_s0 + $0x90] sm:$0xff]  }
   0x4   :  { %1298 = vmatprep.subr.bf16.mxu0 %v1383_v1  ;;  %1371 = vmatprep.subr.bf16.mxu1 %v1383_v1  ;;  %v1386_v7 = vld [vmem:[%s1907_s1] sm:$0xff]   ;;  %v1390_v9 = vld [vmem:[%s1908_s0 + $0x88] sm:$0xff]   ;;  %v1393_v12 = vld [vmem:[%s1908_s0 + $0x18] sm:$0xff]  }
   0x5   :  { %1306 = vmatprep.mubr.msk.bf16.mxu0 %vm282_vm1, %v1387_v4  ;;  %1338 = vmatprep.mubr.msk.bf16.mxu1 %vm282_vm1, %v1388_v5  ;;  %v1394_v13 = vld [vmem:[%s1908_s0 + $0x98] sm:$0xff]   ;;  %v1395_v14 = vld [vmem:[%s1908_s0 + $0x20] sm:$0xff]   ;;  %v1397_v16 = vld [vmem:[%s1908_s0 + $0x28] sm:$0xff]  }
   0x6   :  { %v1396_v15 = vld [vmem:[%s1908_s0 + $0xa0] sm:$0xff]   ;;  %v1398_v17 = vld [vmem:[%s1908_s0 + $0xa8] sm:$0xff]   ;;  %v1399_v18 = vld [vmem:[%s1908_s0 + $0x30] sm:$0xff]  }
   0x7   :  { %1299 = vmatpush3.bf16.msra.mxu0 %v1383_v1  ;;  %1376 = vmatpush3.bf16.msra.mxu1 %v1383_v1  ;;  %v1400_v19 = vld [vmem:[%s1908_s0 + $0xb0] sm:$0xff]   ;;  %v1401_v20 = vld [vmem:[%s1908_s0 + $0x38] sm:$0xff]   ;;  %v1403_v22 = vld [vmem:[%s1908_s0 + $0x40] sm:$0xff]  }
   0x8   :  { %1300 = vmatprep.subr.bf16.mxu0 %v1384_v3  ;;  %1372 = vmatprep.subr.bf16.mxu1 %v1384_v3  ;;  %v1402_v21 = vld [vmem:[%s1908_s0 + $0xb8] sm:$0xff]   ;;  %v1404_v23 = vld [vmem:[%s1908_s0 + $0xc0] sm:$0xff]   ;;  %v1405_v24 = vld [vmem:[%s1908_s0 + $0x48] sm:$0xff]  }
   0x9   :  { %v1406_v25 = vld [vmem:[%s1908_s0 + $0xc8] sm:$0xff]   ;;  %v1407_v26 = vld [vmem:[%s1908_s0 + $0x50] sm:$0xff]   ;;  %v1409_v28 = vld [vmem:[%s1908_s0 + $0x58] sm:$0xff]  }
   0xa   :  { %v1408_v27 = vld [vmem:[%s1908_s0 + $0xd0] sm:$0xff]   ;;  %v1410_v29 = vld [vmem:[%s1908_s0 + $0xd8] sm:$0xff]   ;;  %v1411_v30 = vld [vmem:[%s1908_s0 + $0x60] sm:$0xff]  }
   0xb   :  { %1301 = vmatpush3.bf16.msra.mxu0 %v1384_v3  ;;  %1377 = vmatpush3.bf16.msra.mxu1 %v1384_v3  ;;  %v1412_v31 = vld [vmem:[%s1908_s0 + $0xe0] sm:$0xff]   ;;  %v1413_v32 = vld [vmem:[%s1908_s0 + $0x68] sm:$0xff]   ;;  %v1415_v34 = vld [vmem:[%s1908_s0 + $0x70] sm:$0xff]  }
   0xc   :  { %1302 = vmatprep.subr.bf16.mxu0 %v1385_v6  ;;  %1373 = vmatprep.subr.bf16.mxu1 %v1385_v6  ;;  %v1414_v33 = vld [vmem:[%s1908_s0 + $0xe8] sm:$0xff]   ;;  %v1416_v35 = vld [vmem:[%s1908_s0 + $0xf0] sm:$0xff]   ;;  %v1417_v36 = vld [vmem:[%s1908_s0 + $0x78] sm:$0xff]  }
   0xd   :  { %v1418_v37 = vld [vmem:[%s1908_s0 + $0xf8] sm:$0xff]   ;;  %v1585_v38 = vld [vmem:[%s1909_s2] ss:$0 sm:$0xff] }
   0xf   :  { %1303 = vmatpush3.bf16.msra.mxu0 %v1385_v6  ;;  %1378 = vmatpush3.bf16.msra.mxu1 %v1385_v6 }
  0x10   :  { %1304 = vmatprep.subr.bf16.mxu0 %v1386_v7  ;;  %1374 = vmatprep.subr.bf16.mxu1 %v1386_v7 }
  0x13   :  { %1305 = vmatpush3.bf16.msra.mxu0 %v1386_v7  ;;  %1379 = vmatpush3.bf16.msra.mxu1 %v1386_v7 }
  0x16   :  { %1307 = vmatmul.mubr.msk.bf16.vlgmr.msra.gmra.mxu0 %vm282_vm1, %v1389_v8  ;;  %1339 = vmatmul.mubr.msk.bf16.vlgmr.msra.gmra.mxu1 %vm282_vm1, %v1390_v9 }
  0x17   :  { %1310 = vmatprep.mubr.msk.bf16.mxu0 %vm282_vm1, %v1391_v10  ;;  %1342 = vmatprep.mubr.msk.bf16.mxu1 %vm282_vm1, %v1392_v11 }
  0x1e   :  { %1311 = vmatmul.mubr.msk.bf16.gmra.mxu0 %vm282_vm1, %v1393_v12  ;;  %1343 = vmatmul.mubr.msk.bf16.gmra.mxu1 %vm282_vm1, %v1394_v13 }
  0x1f   :  { %1314 = vmatprep.mubr.msk.bf16.mxu0 %vm282_vm1, %v1395_v14  ;;  %1346 = vmatprep.mubr.msk.bf16.mxu1 %vm282_vm1, %v1396_v15 }
  0x26   :  { %1315 = vmatmul.mubr.msk.bf16.gmra.mxu0 %vm282_vm1, %v1397_v16  ;;  %1347 = vmatmul.mubr.msk.bf16.gmra.mxu1 %vm282_vm1, %v1398_v17 }
  0x27   :  { %1318 = vmatprep.mubr.msk.bf16.mxu0 %vm282_vm1, %v1399_v18  ;;  %1350 = vmatprep.mubr.msk.bf16.mxu1 %vm282_vm1, %v1400_v19 }
  0x2e   :  { %1319 = vmatmul.mubr.msk.bf16.gmra.mxu0 %vm282_vm1, %v1401_v20  ;;  %1351 = vmatmul.mubr.msk.bf16.gmra.mxu1 %vm282_vm1, %v1402_v21 }
  0x2f   :  { %1322 = vmatprep.mubr.msk.bf16.mxu0 %vm282_vm1, %v1403_v22  ;;  %1354 = vmatprep.mubr.msk.bf16.mxu1 %vm282_vm1, %v1404_v23 }
  0x36   :  { %1323 = vmatmul.mubr.msk.bf16.gmra.mxu0 %vm282_vm1, %v1405_v24  ;;  %1355 = vmatmul.mubr.msk.bf16.gmra.mxu1 %vm282_vm1, %v1406_v25 }
  0x37   :  { %1326 = vmatprep.mubr.msk.bf16.mxu0 %vm282_vm1, %v1407_v26  ;;  %1358 = vmatprep.mubr.msk.bf16.mxu1 %vm282_vm1, %v1408_v27 }
  0x3e   :  { %1327 = vmatmul.mubr.msk.bf16.gmra.mxu0 %vm282_vm1, %v1409_v28  ;;  %1359 = vmatmul.mubr.msk.bf16.gmra.mxu1 %vm282_vm1, %v1410_v29 }
  0x3f   :  { %1330 = vmatprep.mubr.msk.bf16.mxu0 %vm282_vm1, %v1411_v30  ;;  %1362 = vmatprep.mubr.msk.bf16.mxu1 %vm282_vm1, %v1412_v31 }
  0x46   :  { %1331 = vmatmul.mubr.msk.bf16.gmra.mxu0 %vm282_vm1, %v1413_v32  ;;  %1363 = vmatmul.mubr.msk.bf16.gmra.mxu1 %vm282_vm1, %v1414_v33 }
  0x47   :  { %1334 = vmatprep.mubr.msk.bf16.mxu0 %vm282_vm1, %v1415_v34  ;;  %1366 = vmatprep.mubr.msk.bf16.mxu1 %vm282_vm1, %v1416_v35 }
  0x4e   :  { %1335 = vmatmul.mubr.msk.bf16.gmra.mxu0 %vm282_vm1, %v1417_v36  ;;  %1367 = vmatmul.mubr.msk.bf16.gmra.mxu1 %vm282_vm1, %v1418_v37 }
  0xd6   :  { %v1308_v39 = vpop.f32.mrf.mxu0  ;;  %v1340_v40 = vpop.f32.mrf.mxu1 }
  0xd7   :  { %v426_v41 = vadd.f32 %v1308_v39, %v1585_v38  ;;  %v554_v42 = vadd.f32 %v1340_v40, %v1585_v38 }
  0xd8   :  { %v417_v43 = vpop.f32.mrf.mxu0  ;;  %v545_v44 = vpop.f32.mrf.mxu1 }
  0xd9   :  { %v674_v45 = vmax.f32 %v426_v41, 0.0  ;;  %v706_v46 = vmax.f32 %v554_v42, 0.0  ;;  %v418_v47 = vadd.f32 %v1585_v38, %v417_v43  ;;  %v546_v48 = vadd.f32 %v1585_v38, %v545_v44 }
  0xda   :  { %v1309_v49 = vpop.f32.mrf.mxu0  ;;  %v1341_v50 = vpop.f32.mrf.mxu1 }
  0xdb   :  { %v1197_v51 = vpack.c.bf16 %v674_v45, %v674_v45  ;;  %v1229_v52 = vpack.c.bf16 %v706_v46, %v706_v46  ;;  %v672_v53 = vmax.f32 %v418_v47, 0.0  ;;  %v704_v54 = vmax.f32 %v546_v48, 0.0 }
  0xdc   :  { %v429_v55 = vadd.f32 %v1309_v49, %v1585_v38  ;;  %v557_v56 = vadd.f32 %v1341_v50, %v1585_v38  ;;  %v420_v57 = vpop.f32.mrf.mxu0  ;;  %v548_v58 = vpop.f32.mrf.mxu1 }
  0xdd   :  { %995 = vst.msk [vmem:[%s1910_s3 + $0x8] sm:$0xf] %vm992_vm2, %v1197_v51  ;;  %1027 = vst.msk [vmem:[%s1910_s3 + $0x88] sm:$0xf] %vm992_vm2, %v1229_v52  ;;  %v1195_v59 = vpack.c.bf16 %v672_v53, %v672_v53  ;;  %v1227_v60 = vpack.c.bf16 %v704_v54, %v704_v54  ;;  %v421_v61 = vadd.f32 %v1585_v38, %v420_v57 }
  0xde   :  { %v549_v62 = vadd.f32 %v1585_v38, %v548_v58  ;;  %v675_v63 = vmax.f32 %v429_v55, 0.0  ;;  %v707_v0 = vmax.f32 %v557_v56, 0.0  ;;  %v1312_v1 = vpop.f32.mrf.mxu0  ;;  %v1344_v2 = vpop.f32.mrf.mxu1 }
  0xdf   :  { %993 = vst.msk [vmem:[%s1910_s3] sm:$0xf] %vm992_vm2, %v1195_v59  ;;  %1025 = vst.msk [vmem:[%s1910_s3 + $0x80] sm:$0xf] %vm992_vm2, %v1227_v60  ;;  %v673_v3 = vmax.f32 %v421_v61, 0.0  ;;  %v442_v5 = vadd.f32 %v1312_v1, %v1585_v38  ;;  %v570_v6 = vadd.f32 %v1344_v2, %v1585_v38 }
  0xe0   :  { %v705_v4 = vmax.f32 %v549_v62, 0.0  ;;  %v1198_v7 = vpack.c.bf16 %v675_v63, %v675_v63  ;;  %v1230_v8 = vpack.c.bf16 %v707_v0, %v707_v0  ;;  %v433_v9 = vpop.f32.mrf.mxu0  ;;  %v561_v10 = vpop.f32.mrf.mxu1 }
  0xe1   :  { %v1196_v11 = vpack.c.bf16 %v673_v3, %v673_v3  ;;  %v678_v13 = vmax.f32 %v442_v5, 0.0  ;;  %v710_v14 = vmax.f32 %v570_v6, 0.0  ;;  %v434_v15 = vadd.f32 %v1585_v38, %v433_v9 }
  0xe2   :  { %v1228_v12 = vpack.c.bf16 %v705_v4, %v705_v4  ;;  %996 = vst.msk [vmem:[%s1910_s3 + $0xc] sm:$0xf] %vm992_vm2, %v1198_v7  ;;  %1028 = vst.msk [vmem:[%s1910_s3 + $0x8c] sm:$0xf] %vm992_vm2, %v1230_v8  ;;  %v562_v16 = vadd.f32 %v1585_v38, %v561_v10  ;;  %v1313_v17 = vpop.f32.mrf.mxu0  ;;  %v1345_v18 = vpop.f32.mrf.mxu1 }
  0xe3   :  { %994 = vst.msk [vmem:[%s1910_s3 + $0x4] sm:$0xf] %vm992_vm2, %v1196_v11  ;;  %v1201_v19 = vpack.c.bf16 %v678_v13, %v678_v13  ;;  %v1233_v20 = vpack.c.bf16 %v710_v14, %v710_v14  ;;  %v445_v21 = vadd.f32 %v1313_v17, %v1585_v38  ;;  %v573_v22 = vadd.f32 %v1345_v18, %v1585_v38 }
  0xe4   :  { %1026 = vst.msk [vmem:[%s1910_s3 + $0x84] sm:$0xf] %vm992_vm2, %v1228_v12  ;;  %v676_v23 = vmax.f32 %v434_v15, 0.0  ;;  %v708_v24 = vmax.f32 %v562_v16, 0.0  ;;  %v436_v25 = vpop.f32.mrf.mxu0  ;;  %v564_v26 = vpop.f32.mrf.mxu1 }
  0xe5   :  { %999 = vst.msk [vmem:[%s1910_s3 + $0x18] sm:$0xf] %vm992_vm2, %v1201_v19  ;;  %1031 = vst.msk [vmem:[%s1910_s3 + $0x98] sm:$0xf] %vm992_vm2, %v1233_v20  ;;  %v679_v27 = vmax.f32 %v445_v21, 0.0  ;;  %v711_v28 = vmax.f32 %v573_v22, 0.0  ;;  %v437_v29 = vadd.f32 %v1585_v38, %v436_v25  ;;  %v565_v30 = vadd.f32 %v1585_v38, %v564_v26 }
  0xe6   :  { %v1199_v31 = vpack.c.bf16 %v676_v23, %v676_v23  ;;  %v1231_v32 = vpack.c.bf16 %v708_v24, %v708_v24  ;;  %v1316_v33 = vpop.f32.mrf.mxu0  ;;  %v1348_v34 = vpop.f32.mrf.mxu1 }
  0xe7   :  { %v1202_v35 = vpack.c.bf16 %v679_v27, %v679_v27  ;;  %v1234_v36 = vpack.c.bf16 %v711_v28, %v711_v28  ;;  %v677_v37 = vmax.f32 %v437_v29, 0.0  ;;  %v709_v39 = vmax.f32 %v565_v30, 0.0 }
  0xe8   :  { %997 = vst.msk [vmem:[%s1910_s3 + $0x10] sm:$0xf] %vm992_vm2, %v1199_v31  ;;  %1029 = vst.msk [vmem:[%s1910_s3 + $0x90] sm:$0xf] %vm992_vm2, %v1231_v32  ;;  %v458_v40 = vadd.f32 %v1316_v33, %v1585_v38  ;;  %v586_v41 = vadd.f32 %v1348_v34, %v1585_v38  ;;  %v449_v42 = vpop.f32.mrf.mxu0  ;;  %v577_v43 = vpop.f32.mrf.mxu1 }
  0xe9   :  { %1000 = vst.msk [vmem:[%s1910_s3 + $0x1c] sm:$0xf] %vm992_vm2, %v1202_v35  ;;  %1032 = vst.msk [vmem:[%s1910_s3 + $0x9c] sm:$0xf] %vm992_vm2, %v1234_v36  ;;  %v1200_v44 = vpack.c.bf16 %v677_v37, %v677_v37  ;;  %v1232_v45 = vpack.c.bf16 %v709_v39, %v709_v39  ;;  %v450_v46 = vadd.f32 %v1585_v38, %v449_v42 }
  0xea   :  { %v578_v47 = vadd.f32 %v1585_v38, %v577_v43  ;;  %v682_v48 = vmax.f32 %v458_v40, 0.0  ;;  %v714_v49 = vmax.f32 %v586_v41, 0.0  ;;  %v1317_v50 = vpop.f32.mrf.mxu0  ;;  %v1349_v51 = vpop.f32.mrf.mxu1 }
  0xeb   :  { %998 = vst.msk [vmem:[%s1910_s3 + $0x14] sm:$0xf] %vm992_vm2, %v1200_v44  ;;  %1030 = vst.msk [vmem:[%s1910_s3 + $0x94] sm:$0xf] %vm992_vm2, %v1232_v45  ;;  %v680_v52 = vmax.f32 %v450_v46, 0.0  ;;  %v461_v54 = vadd.f32 %v1317_v50, %v1585_v38  ;;  %v589_v55 = vadd.f32 %v1349_v51, %v1585_v38 }
  0xec   :  { %v712_v53 = vmax.f32 %v578_v47, 0.0  ;;  %v1205_v56 = vpack.c.bf16 %v682_v48, %v682_v48  ;;  %v1237_v57 = vpack.c.bf16 %v714_v49, %v714_v49  ;;  %v452_v58 = vpop.f32.mrf.mxu0  ;;  %v580_v59 = vpop.f32.mrf.mxu1 }
  0xed   :  { %v1203_v60 = vpack.c.bf16 %v680_v52, %v680_v52  ;;  %v683_v62 = vmax.f32 %v461_v54, 0.0  ;;  %v715_v63 = vmax.f32 %v589_v55, 0.0  ;;  %v453_v0 = vadd.f32 %v1585_v38, %v452_v58 }
  0xee   :  { %v1235_v61 = vpack.c.bf16 %v712_v53, %v712_v53  ;;  %1003 = vst.msk [vmem:[%s1910_s3 + $0x28] sm:$0xf] %vm992_vm2, %v1205_v56  ;;  %1035 = vst.msk [vmem:[%s1910_s3 + $0xa8] sm:$0xf] %vm992_vm2, %v1237_v57  ;;  %v581_v1 = vadd.f32 %v1585_v38, %v580_v59  ;;  %v1320_v2 = vpop.f32.mrf.mxu0  ;;  %v1352_v3 = vpop.f32.mrf.mxu1 }
  0xef   :  { %1001 = vst.msk [vmem:[%s1910_s3 + $0x20] sm:$0xf] %vm992_vm2, %v1203_v60  ;;  %v1206_v4 = vpack.c.bf16 %v683_v62, %v683_v62  ;;  %v1238_v5 = vpack.c.bf16 %v715_v63, %v715_v63  ;;  %v474_v6 = vadd.f32 %v1320_v2, %v1585_v38  ;;  %v602_v7 = vadd.f32 %v1352_v3, %v1585_v38 }
  0xf0   :  { %1033 = vst.msk [vmem:[%s1910_s3 + $0xa0] sm:$0xf] %vm992_vm2, %v1235_v61  ;;  %v681_v8 = vmax.f32 %v453_v0, 0.0  ;;  %v713_v9 = vmax.f32 %v581_v1, 0.0  ;;  %v465_v10 = vpop.f32.mrf.mxu0  ;;  %v593_v11 = vpop.f32.mrf.mxu1 }
  0xf1   :  { %1004 = vst.msk [vmem:[%s1910_s3 + $0x2c] sm:$0xf] %vm992_vm2, %v1206_v4  ;;  %1036 = vst.msk [vmem:[%s1910_s3 + $0xac] sm:$0xf] %vm992_vm2, %v1238_v5  ;;  %v686_v12 = vmax.f32 %v474_v6, 0.0  ;;  %v718_v13 = vmax.f32 %v602_v7, 0.0  ;;  %v466_v14 = vadd.f32 %v1585_v38, %v465_v10  ;;  %v594_v15 = vadd.f32 %v1585_v38, %v593_v11 }
  0xf2   :  { %v1204_v16 = vpack.c.bf16 %v681_v8, %v681_v8  ;;  %v1236_v17 = vpack.c.bf16 %v713_v9, %v713_v9  ;;  %v1321_v18 = vpop.f32.mrf.mxu0  ;;  %v1353_v19 = vpop.f32.mrf.mxu1 }
  0xf3   :  { %v1209_v20 = vpack.c.bf16 %v686_v12, %v686_v12  ;;  %v1241_v21 = vpack.c.bf16 %v718_v13, %v718_v13  ;;  %v684_v22 = vmax.f32 %v466_v14, 0.0  ;;  %v716_v23 = vmax.f32 %v594_v15, 0.0 }
  0xf4   :  { %1002 = vst.msk [vmem:[%s1910_s3 + $0x24] sm:$0xf] %vm992_vm2, %v1204_v16  ;;  %1034 = vst.msk [vmem:[%s1910_s3 + $0xa4] sm:$0xf] %vm992_vm2, %v1236_v17  ;;  %v477_v24 = vadd.f32 %v1321_v18, %v1585_v38  ;;  %v605_v25 = vadd.f32 %v1353_v19, %v1585_v38  ;;  %v468_v26 = vpop.f32.mrf.mxu0  ;;  %v596_v27 = vpop.f32.mrf.mxu1 }
  0xf5   :  { %1007 = vst.msk [vmem:[%s1910_s3 + $0x38] sm:$0xf] %vm992_vm2, %v1209_v20  ;;  %1039 = vst.msk [vmem:[%s1910_s3 + $0xb8] sm:$0xf] %vm992_vm2, %v1241_v21  ;;  %v1207_v28 = vpack.c.bf16 %v684_v22, %v684_v22  ;;  %v1239_v29 = vpack.c.bf16 %v716_v23, %v716_v23  ;;  %v469_v30 = vadd.f32 %v1585_v38, %v468_v26 }
  0xf6   :  { %v597_v31 = vadd.f32 %v1585_v38, %v596_v27  ;;  %v687_v32 = vmax.f32 %v477_v24, 0.0  ;;  %v719_v33 = vmax.f32 %v605_v25, 0.0  ;;  %v1324_v34 = vpop.f32.mrf.mxu0  ;;  %v1356_v35 = vpop.f32.mrf.mxu1 }
  0xf7   :  { %1005 = vst.msk [vmem:[%s1910_s3 + $0x30] sm:$0xf] %vm992_vm2, %v1207_v28  ;;  %1037 = vst.msk [vmem:[%s1910_s3 + $0xb0] sm:$0xf] %vm992_vm2, %v1239_v29  ;;  %v685_v36 = vmax.f32 %v469_v30, 0.0  ;;  %v490_v39 = vadd.f32 %v1324_v34, %v1585_v38  ;;  %v618_v40 = vadd.f32 %v1356_v35, %v1585_v38 }
  0xf8   :  { %v717_v37 = vmax.f32 %v597_v31, 0.0  ;;  %v1210_v41 = vpack.c.bf16 %v687_v32, %v687_v32  ;;  %v1242_v42 = vpack.c.bf16 %v719_v33, %v719_v33  ;;  %v481_v43 = vpop.f32.mrf.mxu0  ;;  %v609_v44 = vpop.f32.mrf.mxu1 }
  0xf9   :  { %v1208_v45 = vpack.c.bf16 %v685_v36, %v685_v36  ;;  %v690_v47 = vmax.f32 %v490_v39, 0.0  ;;  %v722_v48 = vmax.f32 %v618_v40, 0.0  ;;  %v482_v49 = vadd.f32 %v1585_v38, %v481_v43 }
  0xfa   :  { %v1240_v46 = vpack.c.bf16 %v717_v37, %v717_v37  ;;  %1008 = vst.msk [vmem:[%s1910_s3 + $0x3c] sm:$0xf] %vm992_vm2, %v1210_v41  ;;  %1040 = vst.msk [vmem:[%s1910_s3 + $0xbc] sm:$0xf] %vm992_vm2, %v1242_v42  ;;  %v610_v50 = vadd.f32 %v1585_v38, %v609_v44  ;;  %v1325_v51 = vpop.f32.mrf.mxu0  ;;  %v1357_v52 = vpop.f32.mrf.mxu1 }
  0xfb   :  { %1006 = vst.msk [vmem:[%s1910_s3 + $0x34] sm:$0xf] %vm992_vm2, %v1208_v45  ;;  %v1213_v53 = vpack.c.bf16 %v690_v47, %v690_v47  ;;  %v1245_v54 = vpack.c.bf16 %v722_v48, %v722_v48  ;;  %v493_v55 = vadd.f32 %v1325_v51, %v1585_v38  ;;  %v621_v56 = vadd.f32 %v1357_v52, %v1585_v38 }
  0xfc   :  { %1038 = vst.msk [vmem:[%s1910_s3 + $0xb4] sm:$0xf] %vm992_vm2, %v1240_v46  ;;  %v688_v57 = vmax.f32 %v482_v49, 0.0  ;;  %v720_v58 = vmax.f32 %v610_v50, 0.0  ;;  %v484_v59 = vpop.f32.mrf.mxu0  ;;  %v612_v60 = vpop.f32.mrf.mxu1 }
  0xfd   :  { %1011 = vst.msk [vmem:[%s1910_s3 + $0x48] sm:$0xf] %vm992_vm2, %v1213_v53  ;;  %1043 = vst.msk [vmem:[%s1910_s3 + $0xc8] sm:$0xf] %vm992_vm2, %v1245_v54  ;;  %v691_v61 = vmax.f32 %v493_v55, 0.0  ;;  %v723_v62 = vmax.f32 %v621_v56, 0.0  ;;  %v485_v63 = vadd.f32 %v1585_v38, %v484_v59  ;;  %v613_v0 = vadd.f32 %v1585_v38, %v612_v60 }
  0xfe   :  { %v1211_v1 = vpack.c.bf16 %v688_v57, %v688_v57  ;;  %v1243_v2 = vpack.c.bf16 %v720_v58, %v720_v58  ;;  %v1328_v3 = vpop.f32.mrf.mxu0  ;;  %v1360_v4 = vpop.f32.mrf.mxu1 }
  0xff   :  { %v1214_v5 = vpack.c.bf16 %v691_v61, %v691_v61  ;;  %v1246_v6 = vpack.c.bf16 %v723_v62, %v723_v62  ;;  %v689_v7 = vmax.f32 %v485_v63, 0.0  ;;  %v721_v8 = vmax.f32 %v613_v0, 0.0 }
 0x100   :  { %1009 = vst.msk [vmem:[%s1910_s3 + $0x40] sm:$0xf] %vm992_vm2, %v1211_v1  ;;  %1041 = vst.msk [vmem:[%s1910_s3 + $0xc0] sm:$0xf] %vm992_vm2, %v1243_v2  ;;  %v506_v9 = vadd.f32 %v1328_v3, %v1585_v38  ;;  %v634_v10 = vadd.f32 %v1360_v4, %v1585_v38  ;;  %v497_v11 = vpop.f32.mrf.mxu0  ;;  %v625_v12 = vpop.f32.mrf.mxu1 }
 0x101   :  { %1012 = vst.msk [vmem:[%s1910_s3 + $0x4c] sm:$0xf] %vm992_vm2, %v1214_v5  ;;  %1044 = vst.msk [vmem:[%s1910_s3 + $0xcc] sm:$0xf] %vm992_vm2, %v1246_v6  ;;  %v1212_v13 = vpack.c.bf16 %v689_v7, %v689_v7  ;;  %v1244_v14 = vpack.c.bf16 %v721_v8, %v721_v8  ;;  %v498_v15 = vadd.f32 %v1585_v38, %v497_v11 }
 0x102   :  { %v626_v16 = vadd.f32 %v1585_v38, %v625_v12  ;;  %v694_v17 = vmax.f32 %v506_v9, 0.0  ;;  %v726_v18 = vmax.f32 %v634_v10, 0.0  ;;  %v1329_v19 = vpop.f32.mrf.mxu0  ;;  %v1361_v20 = vpop.f32.mrf.mxu1 }
 0x103   :  { %1010 = vst.msk [vmem:[%s1910_s3 + $0x44] sm:$0xf] %vm992_vm2, %v1212_v13  ;;  %1042 = vst.msk [vmem:[%s1910_s3 + $0xc4] sm:$0xf] %vm992_vm2, %v1244_v14  ;;  %v692_v21 = vmax.f32 %v498_v15, 0.0  ;;  %v509_v23 = vadd.f32 %v1329_v19, %v1585_v38  ;;  %v637_v24 = vadd.f32 %v1361_v20, %v1585_v38 }
 0x104   :  { %v724_v22 = vmax.f32 %v626_v16, 0.0  ;;  %v1217_v25 = vpack.c.bf16 %v694_v17, %v694_v17  ;;  %v1249_v26 = vpack.c.bf16 %v726_v18, %v726_v18  ;;  %v500_v27 = vpop.f32.mrf.mxu0  ;;  %v628_v28 = vpop.f32.mrf.mxu1 }
 0x105   :  { %v1215_v29 = vpack.c.bf16 %v692_v21, %v692_v21  ;;  %v695_v31 = vmax.f32 %v509_v23, 0.0  ;;  %v727_v32 = vmax.f32 %v637_v24, 0.0  ;;  %v501_v33 = vadd.f32 %v1585_v38, %v500_v27 }
 0x106   :  { %v1247_v30 = vpack.c.bf16 %v724_v22, %v724_v22  ;;  %1015 = vst.msk [vmem:[%s1910_s3 + $0x58] sm:$0xf] %vm992_vm2, %v1217_v25  ;;  %1047 = vst.msk [vmem:[%s1910_s3 + $0xd8] sm:$0xf] %vm992_vm2, %v1249_v26  ;;  %v629_v34 = vadd.f32 %v1585_v38, %v628_v28  ;;  %v1332_v35 = vpop.f32.mrf.mxu0  ;;  %v1364_v36 = vpop.f32.mrf.mxu1 }
 0x107   :  { %1013 = vst.msk [vmem:[%s1910_s3 + $0x50] sm:$0xf] %vm992_vm2, %v1215_v29  ;;  %v1218_v37 = vpack.c.bf16 %v695_v31, %v695_v31  ;;  %v1250_v39 = vpack.c.bf16 %v727_v32, %v727_v32  ;;  %v522_v40 = vadd.f32 %v1332_v35, %v1585_v38  ;;  %v650_v41 = vadd.f32 %v1364_v36, %v1585_v38 }
 0x108   :  { %1045 = vst.msk [vmem:[%s1910_s3 + $0xd0] sm:$0xf] %vm992_vm2, %v1247_v30  ;;  %v693_v42 = vmax.f32 %v501_v33, 0.0  ;;  %v725_v43 = vmax.f32 %v629_v34, 0.0  ;;  %v513_v44 = vpop.f32.mrf.mxu0  ;;  %v641_v45 = vpop.f32.mrf.mxu1 }
 0x109   :  { %1016 = vst.msk [vmem:[%s1910_s3 + $0x5c] sm:$0xf] %vm992_vm2, %v1218_v37  ;;  %1048 = vst.msk [vmem:[%s1910_s3 + $0xdc] sm:$0xf] %vm992_vm2, %v1250_v39  ;;  %v698_v46 = vmax.f32 %v522_v40, 0.0  ;;  %v730_v47 = vmax.f32 %v650_v41, 0.0  ;;  %v514_v48 = vadd.f32 %v1585_v38, %v513_v44  ;;  %v642_v49 = vadd.f32 %v1585_v38, %v641_v45 }
 0x10a   :  { %v1216_v50 = vpack.c.bf16 %v693_v42, %v693_v42  ;;  %v1248_v51 = vpack.c.bf16 %v725_v43, %v725_v43  ;;  %v1333_v52 = vpop.f32.mrf.mxu0  ;;  %v1365_v53 = vpop.f32.mrf.mxu1 }
 0x10b   :  { %v1221_v54 = vpack.c.bf16 %v698_v46, %v698_v46  ;;  %v1253_v55 = vpack.c.bf16 %v730_v47, %v730_v47  ;;  %v696_v56 = vmax.f32 %v514_v48, 0.0  ;;  %v728_v57 = vmax.f32 %v642_v49, 0.0 }
 0x10c   :  { %1014 = vst.msk [vmem:[%s1910_s3 + $0x54] sm:$0xf] %vm992_vm2, %v1216_v50  ;;  %1046 = vst.msk [vmem:[%s1910_s3 + $0xd4] sm:$0xf] %vm992_vm2, %v1248_v51  ;;  %v525_v58 = vadd.f32 %v1333_v52, %v1585_v38  ;;  %v653_v59 = vadd.f32 %v1365_v53, %v1585_v38  ;;  %v516_v60 = vpop.f32.mrf.mxu0  ;;  %v644_v61 = vpop.f32.mrf.mxu1 }
 0x10d   :  { %1019 = vst.msk [vmem:[%s1910_s3 + $0x68] sm:$0xf] %vm992_vm2, %v1221_v54  ;;  %1051 = vst.msk [vmem:[%s1910_s3 + $0xe8] sm:$0xf] %vm992_vm2, %v1253_v55  ;;  %v1219_v62 = vpack.c.bf16 %v696_v56, %v696_v56  ;;  %v1251_v63 = vpack.c.bf16 %v728_v57, %v728_v57  ;;  %v517_v0 = vadd.f32 %v1585_v38, %v516_v60 }
 0x10e   :  { %v645_v1 = vadd.f32 %v1585_v38, %v644_v61  ;;  %v699_v2 = vmax.f32 %v525_v58, 0.0  ;;  %v731_v3 = vmax.f32 %v653_v59, 0.0  ;;  %v1336_v4 = vpop.f32.mrf.mxu0  ;;  %v1368_v5 = vpop.f32.mrf.mxu1 }
 0x10f   :  { %1017 = vst.msk [vmem:[%s1910_s3 + $0x60] sm:$0xf] %vm992_vm2, %v1219_v62  ;;  %1049 = vst.msk [vmem:[%s1910_s3 + $0xe0] sm:$0xf] %vm992_vm2, %v1251_v63  ;;  %v697_v6 = vmax.f32 %v517_v0, 0.0  ;;  %v538_v8 = vadd.f32 %v1336_v4, %v1585_v38  ;;  %v666_v9 = vadd.f32 %v1368_v5, %v1585_v38 }
 0x110   :  { %v729_v7 = vmax.f32 %v645_v1, 0.0  ;;  %v1222_v10 = vpack.c.bf16 %v699_v2, %v699_v2  ;;  %v1254_v11 = vpack.c.bf16 %v731_v3, %v731_v3  ;;  %v529_v12 = vpop.f32.mrf.mxu0  ;;  %v657_v13 = vpop.f32.mrf.mxu1 }
 0x111   :  { %v1220_v14 = vpack.c.bf16 %v697_v6, %v697_v6  ;;  %v702_v16 = vmax.f32 %v538_v8, 0.0  ;;  %v734_v17 = vmax.f32 %v666_v9, 0.0  ;;  %v530_v18 = vadd.f32 %v1585_v38, %v529_v12 }
 0x112   :  { %v1252_v15 = vpack.c.bf16 %v729_v7, %v729_v7  ;;  %1020 = vst.msk [vmem:[%s1910_s3 + $0x6c] sm:$0xf] %vm992_vm2, %v1222_v10  ;;  %1052 = vst.msk [vmem:[%s1910_s3 + $0xec] sm:$0xf] %vm992_vm2, %v1254_v11  ;;  %v658_v19 = vadd.f32 %v1585_v38, %v657_v13  ;;  %v1337_v20 = vpop.f32.mrf.mxu0  ;;  %v1369_v21 = vpop.f32.mrf.mxu1 }
 0x113   :  { %1018 = vst.msk [vmem:[%s1910_s3 + $0x64] sm:$0xf] %vm992_vm2, %v1220_v14  ;;  %v1225_v22 = vpack.c.bf16 %v702_v16, %v702_v16  ;;  %v1257_v23 = vpack.c.bf16 %v734_v17, %v734_v17  ;;  %v541_v24 = vadd.f32 %v1337_v20, %v1585_v38  ;;  %v669_v25 = vadd.f32 %v1369_v21, %v1585_v38 }
 0x114   :  { %1050 = vst.msk [vmem:[%s1910_s3 + $0xe4] sm:$0xf] %vm992_vm2, %v1252_v15  ;;  %v700_v26 = vmax.f32 %v530_v18, 0.0  ;;  %v732_v27 = vmax.f32 %v658_v19, 0.0  ;;  %v532_v28 = vpop.f32.mrf.mxu0  ;;  %v660_v29 = vpop.f32.mrf.mxu1 }
 0x115   :  { %1023 = vst.msk [vmem:[%s1910_s3 + $0x78] sm:$0xf] %vm992_vm2, %v1225_v22  ;;  %1055 = vst.msk [vmem:[%s1910_s3 + $0xf8] sm:$0xf] %vm992_vm2, %v1257_v23  ;;  %v703_v30 = vmax.f32 %v541_v24, 0.0  ;;  %v735_v31 = vmax.f32 %v669_v25, 0.0  ;;  %v533_v32 = vadd.f32 %v1585_v38, %v532_v28  ;;  %v661_v33 = vadd.f32 %v1585_v38, %v660_v29 }
 0x116   :  { %v1223_v34 = vpack.c.bf16 %v700_v26, %v700_v26  ;;  %v1255_v35 = vpack.c.bf16 %v732_v27, %v732_v27 }
 0x117   :  { %v1226_v36 = vpack.c.bf16 %v703_v30, %v703_v30  ;;  %v1258_v37 = vpack.c.bf16 %v735_v31, %v735_v31  ;;  %v701_v39 = vmax.f32 %v533_v32, 0.0  ;;  %v733_v40 = vmax.f32 %v661_v33, 0.0 }
 0x118   :  { %1021 = vst.msk [vmem:[%s1910_s3 + $0x70] sm:$0xf] %vm992_vm2, %v1223_v34  ;;  %1053 = vst.msk [vmem:[%s1910_s3 + $0xf0] sm:$0xf] %vm992_vm2, %v1255_v35 }
 0x119   :  { %1024 = vst.msk [vmem:[%s1910_s3 + $0x7c] sm:$0xf] %vm992_vm2, %v1226_v36  ;;  %1056 = vst.msk [vmem:[%s1910_s3 + $0xfc] sm:$0xf] %vm992_vm2, %v1258_v37  ;;  %v1224_v38 = vpack.c.bf16 %v701_v39, %v701_v39  ;;  %v1256_v41 = vpack.c.bf16 %v733_v40, %v733_v40 }
 0x11b   :  { %1022 = vst.msk [vmem:[%s1910_s3 + $0x74] sm:$0xf] %vm992_vm2, %v1224_v38  ;;  %1054 = vst.msk [vmem:[%s1910_s3 + $0xf4] sm:$0xf] %vm992_vm2, %v1256_v41 }

// kernel: forward_pallas.8
= control target key start
LH: loop header
LB: loop body
LE: loop exit
PB: predicated region body
PF: predicated region fallthrough
CT: control target
= control target key end

     0   :  { %v523_v0 = vmov 0   ;;  %vm182_vm0 = vcmask 130048   ;;  %vm384_vm1 = vcmask 257024   ;;  %s712_s1 = inlined_call_operand.vmem [shape: bf16[144,32], index: 1, kind: input, shape index: {}]   ;;  %s713_s0 = inlined_call_operand.vmem [shape: bf16[128,144], index: 0, kind: input, shape index: {}]   ;;  %s714_s2 = inlined_call_operand.vmem [shape: f32[1,32], index: 2, kind: input, shape index: {}]   ;;  %s715_s3 = inlined_call_operand.vmem [shape: bf16[128,32], index: 3, kind: output, shape index: {}]  }
   0x1   :  { %207 = vmatprep.subr.bf16.mxu0 %v523_v0  ;;  %471 = vmatprep.subr.bf16.mxu1 %v523_v0  ;;  %v490_v1 = vld [vmem:[%s712_s1 + $0x38] sm:$0xff]   ;;  %v491_v2 = vld [vmem:[%s712_s1 + $0x30] sm:$0xff]   ;;  %v492_v3 = vld [vmem:[%s712_s1 + $0x28] sm:$0xff]  }
   0x2   :  { %208 = vmatpush1.bf16.msra.mxu0 %v490_v1  ;;  %480 = vmatpush1.bf16.msra.mxu1 %v490_v1  ;;  %v493_v4 = vld [vmem:[%s712_s1 + $0x20] sm:$0xff]   ;;  %v494_v7 = vld [vmem:[%s712_s1 + $0x18] sm:$0xff]   ;;  %v495_v8 = vld [vmem:[%s712_s1 + $0x10] sm:$0xff]  }
   0x3   :  { %209 = vmatprep.subr.bf16.mxu0 %v523_v0  ;;  %472 = vmatprep.subr.bf16.mxu1 %v523_v0  ;;  %v501_v5 = vld [vmem:[%s713_s0 + $0x4] ss:$8 sps:$4 sm:$0xff]   ;;  %v499_v12 = vld [vmem:[%s713_s0] ss:$8 sps:$4 sm:$0xff]   ;;  %v505_v14 = vld [vmem:[%s713_s0 + $0x14] ss:$8 sps:$4 sm:$0xff]  }
   0x4   :  { %v504_v6 = vld [vmem:[%s713_s0 + $0x44] ss:$8 sps:$4 sm:$0xff]   ;;  %431 = vmatprep.mubr.msk.bf16.mxu0 %vm182_vm0, %v501_v5  ;;  %v502_v13 = vld [vmem:[%s713_s0 + $0x40] ss:$8 sps:$4 sm:$0xff]   ;;  %v507_v15 = vld [vmem:[%s713_s0 + $0x54] ss:$8 sps:$4 sm:$0xff]  }
   0x5   :  { %435 = vmatprep.mubr.msk.bf16.mxu1 %vm182_vm0, %v504_v6  ;;  %v496_v9 = vld [vmem:[%s712_s1 + $0x8] sm:$0xff]   ;;  %v497_v10 = vld [vmem:[%s712_s1] sm:$0xff]   ;;  %v509_v16 = vld [vmem:[%s713_s0 + $0x10] ss:$8 sps:$4 sm:$0xff]  }
   0x6   :  { %210 = vmatpush1.bf16.msra.mxu0 %v491_v2  ;;  %481 = vmatpush1.bf16.msra.mxu1 %v491_v2  ;;  %v498_v11 = vld [vmem:[%s712_s1 + $0x40] sm:$0xff]   ;;  %v510_v17 = vld [vmem:[%s713_s0 + $0x50] ss:$8 sps:$4 sm:$0xff]   ;;  %v517_v22 = vld [vmem:[%s713_s0 + $0x34] ss:$8 sps:$4 sm:$0xff]  }
   0x7   :  { %211 = vmatprep.subr.bf16.mxu0 %v523_v0  ;;  %473 = vmatprep.subr.bf16.mxu1 %v523_v0  ;;  %v511_v18 = vld [vmem:[%s713_s0 + $0x24] ss:$8 sps:$4 sm:$0xff]   ;;  %v515_v20 = vld [vmem:[%s713_s0 + $0x20] ss:$8 sps:$4 sm:$0xff]   ;;  %v519_v23 = vld [vmem:[%s713_s0 + $0x74] ss:$8 sps:$4 sm:$0xff]  }
   0x8   :  { %v513_v19 = vld [vmem:[%s713_s0 + $0x64] ss:$8 sps:$4 sm:$0xff]   ;;  %v516_v21 = vld [vmem:[%s713_s0 + $0x60] ss:$8 sps:$4 sm:$0xff]   ;;  %v521_v24 = vld [vmem:[%s713_s0 + $0x30] ss:$8 sps:$4 sm:$0xff]  }
   0x9   :  { %v522_v25 = vld [vmem:[%s713_s0 + $0x70] ss:$8 sps:$4 sm:$0xff]   ;;  %v630_v26 = vld [vmem:[%s714_s2] ss:$0 sm:$0xff] }
   0xa   :  { %212 = vmatpush1.bf16.msra.mxu0 %v492_v3  ;;  %482 = vmatpush1.bf16.msra.mxu1 %v492_v3 }
   0xb   :  { %213 = vmatprep.subr.bf16.mxu0 %v523_v0  ;;  %474 = vmatprep.subr.bf16.mxu1 %v523_v0 }
   0xe   :  { %214 = vmatpush1.bf16.msra.mxu0 %v493_v4  ;;  %483 = vmatpush1.bf16.msra.mxu1 %v493_v4 }
   0xf   :  { %215 = vmatprep.subr.bf16.mxu0 %v523_v0  ;;  %475 = vmatprep.subr.bf16.mxu1 %v523_v0 }
  0x12   :  { %216 = vmatpush1.bf16.msra.mxu0 %v494_v7  ;;  %484 = vmatpush1.bf16.msra.mxu1 %v494_v7 }
  0x13   :  { %217 = vmatprep.subr.bf16.mxu0 %v523_v0  ;;  %476 = vmatprep.subr.bf16.mxu1 %v523_v0 }
  0x16   :  { %218 = vmatpush1.bf16.msra.mxu0 %v495_v8  ;;  %485 = vmatpush1.bf16.msra.mxu1 %v495_v8 }
  0x17   :  { %219 = vmatprep.subr.bf16.mxu0 %v523_v0  ;;  %477 = vmatprep.subr.bf16.mxu1 %v523_v0 }
  0x1a   :  { %220 = vmatpush1.bf16.msra.mxu0 %v496_v9  ;;  %486 = vmatpush1.bf16.msra.mxu1 %v496_v9 }
  0x1b   :  { %221 = vmatprep.subr.bf16.mxu0 %v523_v0  ;;  %478 = vmatprep.subr.bf16.mxu1 %v523_v0 }
  0x1e   :  { %222 = vmatpush1.bf16.msra.mxu0 %v497_v10  ;;  %487 = vmatpush1.bf16.msra.mxu1 %v497_v10 }
  0x1f   :  { %237 = vmatprep.subr.bf16.mxu0 %v523_v0  ;;  %479 = vmatprep.subr.bf16.mxu1 %v523_v0 }
  0x22   :  { %238 = vmatpush2.bf16.msra.mxu0 %v498_v11  ;;  %488 = vmatpush2.bf16.msra.mxu1 %v498_v11 }
  0x25   :  { %240 = vmatmul.mubr.bf16.vlgmr.msra.gmra.mxu0 %v499_v12  ;;  %272 = vmatmul.mubr.bf16.vlgmr.msra.gmra.mxu1 %v502_v13 }
  0x26   :  { %432 = vmatprep.mubr.msk.bf16.mxu0 %vm182_vm0, %v505_v14  ;;  %436 = vmatprep.mubr.msk.bf16.mxu1 %vm182_vm0, %v507_v15 }
  0x2d   :  { %248 = vmatmul.mubr.bf16.gmra.mxu0 %v509_v16  ;;  %280 = vmatmul.mubr.bf16.gmra.mxu1 %v510_v17 }
  0x2e   :  { %433 = vmatprep.mubr.msk.bf16.mxu0 %vm182_vm0, %v511_v18  ;;  %437 = vmatprep.mubr.msk.bf16.mxu1 %vm182_vm0, %v513_v19 }
  0x35   :  { %256 = vmatmul.mubr.bf16.gmra.mxu0 %v515_v20  ;;  %288 = vmatmul.mubr.bf16.gmra.mxu1 %v516_v21 }
  0x36   :  { %434 = vmatprep.mubr.msk.bf16.mxu0 %vm182_vm0, %v517_v22  ;;  %438 = vmatprep.mubr.msk.bf16.mxu1 %vm182_vm0, %v519_v23 }
  0x3d   :  { %264 = vmatmul.mubr.bf16.gmra.mxu0 %v521_v24  ;;  %296 = vmatmul.mubr.bf16.gmra.mxu1 %v522_v25 }
  0xe5   :  { %v241_v27 = vpop.f32.mrf.mxu0  ;;  %v273_v28 = vpop.f32.mrf.mxu1 }
  0xe6   :  { %v242_v29 = vadd.f32 %v630_v26, %v241_v27  ;;  %v274_v30 = vadd.f32 %v630_v26, %v273_v28 }
  0xe7   :  { %v243_v31 = vpop.f32.mrf.mxu0  ;;  %v275_v32 = vpop.f32.mrf.mxu1 }
  0xe8   :  { %v304_v33 = vmax.f32 %v242_v29, 0.0  ;;  %v312_v34 = vmax.f32 %v274_v30, 0.0 }
  0xe9   :  { %v244_v35 = vpop.f32.mrf.mxu0  ;;  %v276_v36 = vpop.f32.mrf.mxu1 }
  0xea   :  { %v455_v37 = vpack.c.bf16 %v304_v33, %v304_v33  ;;  %v463_v38 = vpack.c.bf16 %v312_v34, %v312_v34  ;;  %v245_v39 = vadd.f32 %v630_v26, %v244_v35  ;;  %v277_v40 = vadd.f32 %v630_v26, %v276_v36 }
  0xeb   :  { %v246_v41 = vpop.f32.mrf.mxu0  ;;  %v278_v42 = vpop.f32.mrf.mxu1 }
  0xec   :  { %385 = vst.msk [vmem:[%s715_s3] sm:$0xf] %vm384_vm1, %v455_v37  ;;  %393 = vst.msk [vmem:[%s715_s3 + $0x20] sm:$0xf] %vm384_vm1, %v463_v38  ;;  %v305_v43 = vmax.f32 %v245_v39, 0.0  ;;  %v313_v44 = vmax.f32 %v277_v40, 0.0 }
  0xed   :  { %v249_v45 = vpop.f32.mrf.mxu0  ;;  %v281_v46 = vpop.f32.mrf.mxu1 }
  0xee   :  { %v456_v47 = vpack.c.bf16 %v305_v43, %v305_v43  ;;  %v464_v48 = vpack.c.bf16 %v313_v44, %v313_v44  ;;  %v250_v49 = vadd.f32 %v630_v26, %v249_v45  ;;  %v282_v50 = vadd.f32 %v630_v26, %v281_v46 }
  0xef   :  { %v251_v51 = vpop.f32.mrf.mxu0  ;;  %v283_v52 = vpop.f32.mrf.mxu1 }
  0xf0   :  { %386 = vst.msk [vmem:[%s715_s3 + $0x4] sm:$0xf] %vm384_vm1, %v456_v47  ;;  %394 = vst.msk [vmem:[%s715_s3 + $0x24] sm:$0xf] %vm384_vm1, %v464_v48  ;;  %v306_v53 = vmax.f32 %v250_v49, 0.0  ;;  %v314_v54 = vmax.f32 %v282_v50, 0.0 }
  0xf1   :  { %v252_v55 = vpop.f32.mrf.mxu0  ;;  %v284_v56 = vpop.f32.mrf.mxu1 }
  0xf2   :  { %v457_v57 = vpack.c.bf16 %v306_v53, %v306_v53  ;;  %v465_v58 = vpack.c.bf16 %v314_v54, %v314_v54  ;;  %v253_v59 = vadd.f32 %v630_v26, %v252_v55  ;;  %v285_v60 = vadd.f32 %v630_v26, %v284_v56 }
  0xf3   :  { %v254_v61 = vpop.f32.mrf.mxu0  ;;  %v286_v62 = vpop.f32.mrf.mxu1 }
  0xf4   :  { %387 = vst.msk [vmem:[%s715_s3 + $0x8] sm:$0xf] %vm384_vm1, %v457_v57  ;;  %395 = vst.msk [vmem:[%s715_s3 + $0x28] sm:$0xf] %vm384_vm1, %v465_v58  ;;  %v307_v63 = vmax.f32 %v253_v59, 0.0  ;;  %v315_v0 = vmax.f32 %v285_v60, 0.0 }
  0xf5   :  { %v257_v1 = vpop.f32.mrf.mxu0  ;;  %v289_v2 = vpop.f32.mrf.mxu1 }
  0xf6   :  { %v458_v3 = vpack.c.bf16 %v307_v63, %v307_v63  ;;  %v466_v4 = vpack.c.bf16 %v315_v0, %v315_v0  ;;  %v258_v5 = vadd.f32 %v630_v26, %v257_v1  ;;  %v290_v6 = vadd.f32 %v630_v26, %v289_v2 }
  0xf7   :  { %v259_v7 = vpop.f32.mrf.mxu0  ;;  %v291_v8 = vpop.f32.mrf.mxu1 }
  0xf8   :  { %388 = vst.msk [vmem:[%s715_s3 + $0xc] sm:$0xf] %vm384_vm1, %v458_v3  ;;  %396 = vst.msk [vmem:[%s715_s3 + $0x2c] sm:$0xf] %vm384_vm1, %v466_v4  ;;  %v308_v9 = vmax.f32 %v258_v5, 0.0  ;;  %v316_v10 = vmax.f32 %v290_v6, 0.0 }
  0xf9   :  { %v260_v11 = vpop.f32.mrf.mxu0  ;;  %v292_v12 = vpop.f32.mrf.mxu1 }
  0xfa   :  { %v459_v13 = vpack.c.bf16 %v308_v9, %v308_v9  ;;  %v467_v14 = vpack.c.bf16 %v316_v10, %v316_v10  ;;  %v261_v15 = vadd.f32 %v630_v26, %v260_v11  ;;  %v293_v16 = vadd.f32 %v630_v26, %v292_v12 }
  0xfb   :  { %v262_v17 = vpop.f32.mrf.mxu0  ;;  %v294_v18 = vpop.f32.mrf.mxu1 }
  0xfc   :  { %389 = vst.msk [vmem:[%s715_s3 + $0x10] sm:$0xf] %vm384_vm1, %v459_v13  ;;  %397 = vst.msk [vmem:[%s715_s3 + $0x30] sm:$0xf] %vm384_vm1, %v467_v14  ;;  %v309_v19 = vmax.f32 %v261_v15, 0.0  ;;  %v317_v20 = vmax.f32 %v293_v16, 0.0 }
  0xfd   :  { %v265_v21 = vpop.f32.mrf.mxu0  ;;  %v297_v22 = vpop.f32.mrf.mxu1 }
  0xfe   :  { %v460_v23 = vpack.c.bf16 %v309_v19, %v309_v19  ;;  %v468_v24 = vpack.c.bf16 %v317_v20, %v317_v20  ;;  %v266_v25 = vadd.f32 %v630_v26, %v265_v21  ;;  %v298_v27 = vadd.f32 %v630_v26, %v297_v22 }
  0xff   :  { %v267_v28 = vpop.f32.mrf.mxu0  ;;  %v299_v29 = vpop.f32.mrf.mxu1 }
 0x100   :  { %390 = vst.msk [vmem:[%s715_s3 + $0x14] sm:$0xf] %vm384_vm1, %v460_v23  ;;  %398 = vst.msk [vmem:[%s715_s3 + $0x34] sm:$0xf] %vm384_vm1, %v468_v24  ;;  %v310_v30 = vmax.f32 %v266_v25, 0.0  ;;  %v318_v31 = vmax.f32 %v298_v27, 0.0 }
 0x101   :  { %v268_v32 = vpop.f32.mrf.mxu0  ;;  %v300_v33 = vpop.f32.mrf.mxu1 }
 0x102   :  { %v461_v34 = vpack.c.bf16 %v310_v30, %v310_v30  ;;  %v469_v35 = vpack.c.bf16 %v318_v31, %v318_v31  ;;  %v269_v36 = vadd.f32 %v630_v26, %v268_v32  ;;  %v301_v37 = vadd.f32 %v630_v26, %v300_v33 }
 0x103   :  { %v270_v38 = vpop.f32.mrf.mxu0  ;;  %v302_v39 = vpop.f32.mrf.mxu1 }
 0x104   :  { %391 = vst.msk [vmem:[%s715_s3 + $0x18] sm:$0xf] %vm384_vm1, %v461_v34  ;;  %399 = vst.msk [vmem:[%s715_s3 + $0x38] sm:$0xf] %vm384_vm1, %v469_v35  ;;  %v311_v40 = vmax.f32 %v269_v36, 0.0  ;;  %v319_v41 = vmax.f32 %v301_v37, 0.0 }
 0x106   :  { %v462_v42 = vpack.c.bf16 %v311_v40, %v311_v40  ;;  %v470_v43 = vpack.c.bf16 %v319_v41, %v319_v41 }
 0x108   :  { %392 = vst.msk [vmem:[%s715_s3 + $0x1c] sm:$0xf] %vm384_vm1, %v462_v42  ;;  %400 = vst.msk [vmem:[%s715_s3 + $0x3c] sm:$0xf] %vm384_vm1, %v470_v43 }

// kernel: forward_pallas.9
= control target key start
LH: loop header
LB: loop body
LE: loop exit
PB: predicated region body
PF: predicated region fallthrough
CT: control target
= control target key end

     0   :  { %vm204_vm0 = vcmask 261120   ;;  %vm329_vm1 = vcmask 519168   ;;  %s550_s1 = inlined_call_operand.vmem [shape: bf16[288,64], index: 1, kind: input, shape index: {}]   ;;  %s551_s0 = inlined_call_operand.vmem [shape: bf16[32,288], index: 0, kind: input, shape index: {}]   ;;  %s552_s2 = inlined_call_operand.vmem [shape: f32[1,64], index: 2, kind: input, shape index: {}]   ;;  %s553_s3 = inlined_call_operand.vmem [shape: bf16[32,64], index: 3, kind: output, shape index: {}]  }
   0x1   :  { %v413_v0 = vld [vmem:[%s550_s1 + $0x78] sm:$0xff]   ;;  %v415_v2 = vld [vmem:[%s550_s1 + $0x70] sm:$0xff]   ;;  %v417_v4 = vld [vmem:[%s550_s1 + $0x68] sm:$0xff]  }
   0x2   :  { %v414_v1 = vld [vmem:[%s550_s1 + $0x38] sm:$0xff]   ;;  %373 = vmatprep.subr.bf16.mxu0 %v413_v0  ;;  %v416_v3 = vld [vmem:[%s550_s1 + $0x30] sm:$0xff]   ;;  %v418_v5 = vld [vmem:[%s550_s1 + $0x28] sm:$0xff]  }
   0x3   :  { %374 = vmatpush3.bf16.msra.mxu0 %v414_v1  ;;  %v419_v6 = vld [vmem:[%s550_s1 + $0x60] sm:$0xff]   ;;  %v421_v8 = vld [vmem:[%s550_s1 + $0x58] sm:$0xff]   ;;  %v428_v10 = vld [vmem:[%s550_s1 + $0x88] sm:$0xff]  }
   0x4   :  { %375 = vmatprep.subr.bf16.mxu0 %v415_v2  ;;  %v420_v7 = vld [vmem:[%s550_s1 + $0x20] sm:$0xff]   ;;  %v422_v9 = vld [vmem:[%s550_s1 + $0x18] sm:$0xff]   ;;  %v423_v11 = vld [vmem:[%s550_s1 + $0x50] sm:$0xff]   ;;  %405 = vmatprep.subr.bf16.mxu1 %v428_v10 }
   0x5   :  { %v424_v12 = vld [vmem:[%s550_s1 + $0x10] sm:$0xff]   ;;  %v425_v13 = vld [vmem:[%s550_s1 + $0x48] sm:$0xff]   ;;  %406 = vmatpush3.bf16.msra.mxu1 %v428_v10  ;;  %v433_v15 = vld [vmem:[%s550_s1 + $0x80] sm:$0xff]  }
   0x6   :  { %v432_v14 = vld [vmem:[%s551_s0 + $0x4] ss:$12 sps:$4 sm:$0xff]   ;;  %v434_v16 = vld [vmem:[%s551_s0 + $0x8] ss:$12 sps:$4 sm:$0xff]   ;;  %407 = vmatprep.subr.bf16.mxu1 %v433_v15  ;;  %v435_v17 = vld [vmem:[%s551_s0 + $0x20] ss:$12 sps:$4 sm:$0xff]  }
   0x7   :  { %376 = vmatpush3.bf16.msra.mxu0 %v416_v3  ;;  %243 = vmatprep.mubr.bf16.mxu0 %v432_v14  ;;  %v426_v18 = vld [vmem:[%s550_s1 + $0x8] sm:$0xff]   ;;  %v427_v19 = vld [vmem:[%s550_s1 + $0x40] sm:$0xff]  }
   0x8   :  { %377 = vmatprep.subr.bf16.mxu0 %v417_v4  ;;  %409 = vmatprep.mubr.msk.bf16.mxu1 %vm204_vm0, %v434_v16  ;;  %v429_v20 = vld [vmem:[%s550_s1] sm:$0xff]   ;;  %v436_v22 = vld [vmem:[%s551_s0 + $0x1c] ss:$12 sps:$4 sm:$0xff]  }
   0x9   :  { %408 = vmatpush3.bf16.msra.mxu1 %v433_v15  ;;  %v430_v21 = vld [vmem:[%s551_s0] ss:$12 sps:$4 sm:$0xff]   ;;  %v438_v23 = vld [vmem:[%s551_s0 + $0x18] ss:$12 sps:$4 sm:$0xff]  }
   0xa   :  { %v338_v28 = vld [vmem:[%s552_s2] ss:$0 sm:$0xff] }
   0xb   :  { %378 = vmatpush3.bf16.msra.mxu0 %v418_v5 }
   0xc   :  { %379 = vmatprep.subr.bf16.mxu0 %v419_v6  ;;  %410 = vmatmul.mubr.msk.bf16.vlgmr.msra.gmra.mxu1 %vm204_vm0, %v435_v17 }
   0xf   :  { %380 = vmatpush3.bf16.msra.mxu0 %v420_v7 }
  0x10   :  { %381 = vmatprep.subr.bf16.mxu0 %v421_v8 }
  0x13   :  { %382 = vmatpush3.bf16.msra.mxu0 %v422_v9 }
  0x14   :  { %383 = vmatprep.subr.bf16.mxu0 %v423_v11 }
  0x17   :  { %384 = vmatpush3.bf16.msra.mxu0 %v424_v12 }
  0x18   :  { %385 = vmatprep.subr.bf16.mxu0 %v425_v13 }
  0x1b   :  { %386 = vmatpush3.bf16.msra.mxu0 %v426_v18 }
  0x1c   :  { %387 = vmatprep.subr.bf16.mxu0 %v427_v19 }
  0x1f   :  { %388 = vmatpush3.bf16.msra.mxu0 %v429_v20 }
  0x22   :  { %244 = vmatmul.mubr.bf16.vlgmr.msra.gmra.mxu0 %v430_v21 }
  0x23   :  { %251 = vmatprep.mubr.bf16.mxu0 %v436_v22 }
  0x2a   :  { %252 = vmatmul.mubr.bf16.gmra.mxu0 %v438_v23 }
  0xcc   :  { %v411_v24 = vpop.f32.mrf.mxu1 }
  0xce   :  { %v294_v26 = vpop.f32.mrf.mxu1 }
  0xd0   :  { %v412_v31 = vpop.f32.mrf.mxu1 }
  0xd2   :  { %v297_v37 = vpop.f32.mrf.mxu1 }
  0xe2   :  { %v389_v25 = vpop.f32.mrf.mxu0 }
  0xe4   :  { %v390_v27 = vpop.f32.mrf.mxu0 }
  0xe5   :  { %v391_v29 = vadd.f32 %v390_v27, %v389_v25 }
  0xe6   :  { %v392_v30 = vpop.f32.mrf.mxu0 }
  0xe7   :  { %v246_v32 = vadd.f32 %v391_v29, %v338_v28 }
  0xe8   :  { %v393_v33 = vpop.f32.mrf.mxu0 }
  0xe9   :  { %v394_v34 = vadd.f32 %v393_v33, %v392_v30  ;;  %v295_v35 = vadd.f32 %v294_v26, %v246_v32 }
  0xea   :  { %v395_v36 = vpop.f32.mrf.mxu0 }
  0xeb   :  { %v309_v38 = vmax.f32 %v295_v35, 0.0  ;;  %v249_v39 = vadd.f32 %v394_v34, %v338_v28 }
  0xec   :  { %v396_v40 = vpop.f32.mrf.mxu0 }
  0xed   :  { %v369_v41 = vpack.c.bf16 %v309_v38, %v309_v38  ;;  %v397_v42 = vadd.f32 %v396_v40, %v395_v36  ;;  %v298_v43 = vadd.f32 %v297_v37, %v249_v39 }
  0xee   :  { %v398_v44 = vpop.f32.mrf.mxu0 }
  0xef   :  { %330 = vst.msk [vmem:[%s553_s3] sm:$0xf] %vm329_vm1, %v369_v41  ;;  %v254_v45 = vadd.f32 %v397_v42, %v338_v28  ;;  %v310_v46 = vmax.f32 %v298_v43, 0.0 }
  0xf0   :  { %v399_v47 = vpop.f32.mrf.mxu0 }
  0xf1   :  { %v303_v48 = vadd.f32 %v411_v24, %v254_v45  ;;  %v370_v49 = vpack.c.bf16 %v310_v46, %v310_v46  ;;  %v400_v50 = vadd.f32 %v399_v47, %v398_v44 }
  0xf3   :  { %v311_v51 = vmax.f32 %v303_v48, 0.0  ;;  %331 = vst.msk [vmem:[%s553_s3 + $0x4] sm:$0xf] %vm329_vm1, %v370_v49  ;;  %v257_v52 = vadd.f32 %v400_v50, %v338_v28 }
  0xf5   :  { %v371_v53 = vpack.c.bf16 %v311_v51, %v311_v51  ;;  %v306_v54 = vadd.f32 %v412_v31, %v257_v52 }
  0xf7   :  { %332 = vst.msk [vmem:[%s553_s3 + $0x8] sm:$0xf] %vm329_vm1, %v371_v53  ;;  %v312_v55 = vmax.f32 %v306_v54, 0.0 }
  0xf9   :  { %v372_v56 = vpack.c.bf16 %v312_v55, %v312_v55 }
  0xfb   :  { %333 = vst.msk [vmem:[%s553_s3 + $0xc] sm:$0xf] %vm329_vm1, %v372_v56 }

// kernel: forward_pallas.10
= control target key start
LH: loop header
LB: loop body
LE: loop exit
PB: predicated region body
PF: predicated region fallthrough
CT: control target
= control target key end

     0   :  { %v192_v0 = vmov 0.0   ;;  %vm193_vm0 = vmmov 0   ;;  %vm135_vm1 = vcmask 523264   ;;  %s250_s1 = inlined_call_operand.vmem [shape: bf16[128,64], index: 1, kind: input, shape index: {}]   ;;  %s251_s0 = inlined_call_operand.vmem [shape: bf16[16,128], index: 0, kind: input, shape index: {}]   ;;  %s252_s2 = inlined_call_operand.vmem [shape: f32[1,64], index: 2, kind: input, shape index: {}]   ;;  %s253_s3 = inlined_call_operand.vmem [shape: f32[16,64], index: 3, kind: output, shape index: {}]  }
   0x1   :  { %161 = vmatprep.subr.bf16.mxu0 %v192_v0  ;;  %v183_v1 = vld [vmem:[%s250_s1 + $0x38] sm:$0xff]   ;;  %177 = vmatprep.mubr.msk.bf16.mxu0 %vm193_vm0, %v192_v0  ;;  %v184_v2 = vld [vmem:[%s250_s1 + $0x30] sm:$0xff]   ;;  %v185_v3 = vld [vmem:[%s250_s1 + $0x28] sm:$0xff]  }
   0x2   :  { %162 = vmatpush3.bf16.msra.mxu0 %v183_v1  ;;  %v186_v4 = vld [vmem:[%s250_s1 + $0x20] sm:$0xff]   ;;  %v187_v5 = vld [vmem:[%s250_s1 + $0x18] sm:$0xff]   ;;  %v188_v6 = vld [vmem:[%s250_s1 + $0x10] sm:$0xff]  }
   0x3   :  { %163 = vmatprep.subr.bf16.mxu0 %v192_v0  ;;  %v189_v7 = vld [vmem:[%s250_s1 + $0x8] sm:$0xff]   ;;  %v190_v8 = vld [vmem:[%s250_s1] sm:$0xff]  }
   0x4   :  { %v191_v9 = vld [vmem:[%s251_s0] sm:$0xff]  }
   0x5   :  { %v142_v10 = vld [vmem:[%s252_s2] ss:$0 sm:$0xff] }
   0x6   :  { %164 = vmatpush3.bf16.msra.mxu0 %v184_v2 }
   0x7   :  { %165 = vmatprep.subr.bf16.mxu0 %v192_v0 }
   0xa   :  { %166 = vmatpush3.bf16.msra.mxu0 %v185_v3 }
   0xb   :  { %167 = vmatprep.subr.bf16.mxu0 %v192_v0 }
   0xe   :  { %168 = vmatpush3.bf16.msra.mxu0 %v186_v4 }
   0xf   :  { %169 = vmatprep.subr.bf16.mxu0 %v192_v0 }
  0x12   :  { %170 = vmatpush3.bf16.msra.mxu0 %v187_v5 }
  0x13   :  { %171 = vmatprep.subr.bf16.mxu0 %v192_v0 }
  0x16   :  { %172 = vmatpush3.bf16.msra.mxu0 %v188_v6 }
  0x17   :  { %173 = vmatprep.subr.bf16.mxu0 %v192_v0 }
  0x1a   :  { %174 = vmatpush3.bf16.msra.mxu0 %v189_v7 }
  0x1b   :  { %175 = vmatprep.subr.bf16.mxu0 %v192_v0 }
  0x1e   :  { %176 = vmatpush3.bf16.msra.mxu0 %v190_v8 }
  0x21   :  { %178 = vmatmul.mubr.bf16.vlgmr.msra.gmra.mxu0 %v191_v9 }
  0xe1   :  { %v128_v11 = vpop.f32.mrf.mxu0 }
  0xe2   :  { %v129_v12 = vadd.f32 %v142_v10, %v128_v11 }
  0xe3   :  { %v179_v13 = vpop.f32.mrf.mxu0 }
  0xe4   :  { %136 = vst.msk [vmem:[%s253_s3] sm:$0xff] %vm135_vm1, %v129_v12 }
  0xe5   :  { %v131_v14 = vpop.f32.mrf.mxu0 }
  0xe6   :  { %v132_v15 = vadd.f32 %v142_v10, %v131_v14 }
  0xe7   :  { %v180_v16 = vpop.f32.mrf.mxu0 }
  0xe8   :  { %137 = vst.msk [vmem:[%s253_s3 + $0x8] sm:$0xff] %vm135_vm1, %v132_v15 }

// kernel: forward_pallas.11
= control target key start
LH: loop header
LB: loop body
LE: loop exit
PB: predicated region body
PF: predicated region fallthrough
CT: control target
= control target key end

     0   :  { %s7664_s0 = inlined_call_operand.vmem [shape: f32[2,8,64], index: 0, kind: input, shape index: {}]   ;;  %s7665_s1 = inlined_call_operand.vmem [shape: f32[1,64], index: 1, kind: input, shape index: {}]   ;;  %s7666_s2 = inlined_call_operand.vmem [shape: f32[9,64], index: 2, kind: input, shape index: {}]   ;;  %s7667_s3 = inlined_call_operand.vmem [shape: f32[18,18], index: 3, kind: input, shape index: {}]   ;;  %s7668_s4 = inlined_call_operand.vmem [shape: f32[2,1,64], index: 4, kind: input, shape index: {}]   ;;  %s7669_s5 = inlined_call_operand.vmem [shape: f32[2,1,64], index: 5, kind: input, shape index: {}]   ;;  %s7670_s6 = inlined_call_operand.vmem [shape: bf16[8,64,16], index: 6, kind: input, shape index: {}]   ;;  %s7671_s7 = inlined_call_operand.vmem [shape: bf16[8,64,16], index: 7, kind: input, shape index: {}]   ;;  %s7672_s8 = inlined_call_operand.vmem [shape: bf16[8,64,16], index: 8, kind: input, shape index: {}]   ;;  %s7673_s9 = inlined_call_operand.vmem [shape: bf16[8,16,64], index: 9, kind: input, shape index: {}]   ;;  %s7674_s10 = inlined_call_operand.vmem [shape: f32[2,1,64], index: 10, kind: input, shape index: {}]   ;;  %s7675_s11 = inlined_call_operand.vmem [shape: f32[2,1,64], index: 11, kind: input, shape index: {}]   ;;  %s7676_s12 = inlined_call_operand.vmem [shape: f32[2,1,64], index: 12, kind: input, shape index: {}]   ;;  %s7677_s13 = inlined_call_operand.vmem [shape: bf16[2,64,256], index: 13, kind: input, shape index: {}]   ;;  %s7678_s14 = inlined_call_operand.vmem [shape: f32[2,1,256], index: 14, kind: input, shape index: {}]   ;;  %s7679_s15 = inlined_call_operand.vmem [shape: bf16[2,256,64], index: 15, kind: input, shape index: {}]   ;;  %s7680_s16 = inlined_call_operand.vmem [shape: f32[2,1,64], index: 16, kind: input, shape index: {}]   ;;  %s7681_s17 = inlined_call_operand.vmem [shape: f32[1,64], index: 17, kind: input, shape index: {}]   ;;  %s7682_s18 = inlined_call_operand.vmem [shape: f32[1,64], index: 18, kind: input, shape index: {}]   ;;  %s7683_s19 = inlined_call_operand.hbm [shape: f32[2,64], index: 19, kind: output, shape index: {}]  }
   0x1   :  { %7689 = sst [smem:[#allocation6_spill]] %s7664_s0 }
   0x2   :  { %7690 = sst [smem:[#allocation7_spill]] %s7665_s1 }
   0x3   :  { %7691 = sst [smem:[#allocation8_spill]] %s7666_s2 }
   0x4   :  { %7692 = sst [smem:[#allocation9_spill]] %s7667_s3 }
   0x5   :  { %7693 = sst [smem:[#allocation10_spill]] %s7678_s14 }
   0x6   :  { %s7694_s20 = sld [smem:[#allocation7_spill]]  ;;  %vm67_vm0 = vcmask 516096   ;;  %vm72_vm1 = vcmask 523264   ;;  %vm97_vm2 = vcmask 517120  }
   0x7   :  { %s7695_s14 = sld [smem:[#allocation8_spill]] }
   0x8   :  { %s7696_s23 = sld [smem:[#allocation6_spill]] }
   0xc   :  { %v64_v0 = vld [vmem:[%s7694_s20] sm:$0x1] }
   0xd   :  { %v65_v1 = vld [vmem:[%s7695_s14] sm:$0x1]  ;;  %v70_v4 = vld [vmem:[%s7695_s14 + $0x1] sm:$0xff] }
   0xe   :  { %v69_v2 = vld [vmem:[%s7696_s23] sm:$0xff]  ;;  %v66_v3 = vadd.f32 %v65_v1, %v64_v0  ;;  %v4951_v5 = vld [vmem:[%s7696_s23 + $0x8] sm:$0xff] }
   0xf   :  { %v74_v6 = vld [vmem:[%s7694_s20] sm:$0x1]  ;;  %v71_v7 = vadd.f32 %v70_v4, %v69_v2  ;;  %v81_v8 = vadd.f32 %v4951_v5, %v70_v4 }
  0x10   :  { %v75_v9 = vld [vmem:[%s7695_s14] sm:$0x1]  ;;  %68 = vst.msk [vmem:[#allocation2] sm:$0x1] %vm67_vm0, %v66_v3 }
  0x11   :  { %v76_v10 = vadd.f32 %v75_v9, %v74_v6  ;;  %73 = vst.msk [vmem:[#allocation2 + $0x1] sm:$0xff] %vm72_vm1, %v71_v7  ;;  %82 = vst.msk [vmem:[#allocation2 + $0xa] sm:$0xff] %vm72_vm1, %v81_v8 }
  0x13   :  { %77 = vst.msk [vmem:[#allocation2 + $0x9] sm:$0x1] %vm67_vm0, %v76_v10 }
  0x18   :  { %v83_v11 = vld [vmem:[#allocation2] sm:$0xff]  ;;  %v85_v12 = vld [vmem:[#allocation2 + $0x10] sm:$0x3] }
  0x19   :  { %v91_v13 = vsel %vm72_vm1, %v83_v11, 0.0  ;;  %v98_v14 = vsel %vm97_vm2, %v85_v12, 0.0 }
  0x1a   :  { %v84_v15 = vld [vmem:[#allocation2 + $0x8] sm:$0xff]  ;;  %92 = vadd.xlane.f32.xlu0 %v91_v13  ;;  %99 = vadd.xlane.f32.xlu1 %v98_v14 }
  0x1b   :  { %v94_v16 = vsel %vm72_vm1, %v84_v15, 0.0 }
  0x1e   :  { %95 = vadd.xlane.f32.xlu0 %v94_v16 }
  0x1f   :  { %24 = vsyncpa [#allocation4], 0  ;;  %v6225_v32 = vld [vmem:[%s7670_s6 + $0x18] sm:$0xff]   ;;  %v6227_v34 = vld [vmem:[%s7670_s6 + $0x10] sm:$0xff]   ;;  %vm402_vm3 = vcmask 130048   ;;  %vm514_vm4 = vcmask 1040384  }
  0x20   :  { %v6226_v33 = vld [vmem:[%s7671_s7 + $0x18] sm:$0xff]   ;;  %5735 = vmatprep.subr.bf16.mxu0 %v6225_v32  ;;  %v6228_v35 = vld [vmem:[%s7671_s7 + $0x10] sm:$0xff]   ;;  %v6229_v36 = vld [vmem:[%s7670_s6 + $0x8] sm:$0xff]   ;;  %s7697_s29 = sld [smem:[#allocation9_spill]]  ;;  %vm469_vm5 = vcmask 146432   ;;  %vm476_vm6 = vcmask 140288  }
  0x21   :  { %5736 = vmatpush3.bf16.msra.mxu0 %v6225_v32  ;;  %5747 = vmatprep.subr.bf16.mxu1 %v6226_v33  ;;  %v6230_v37 = vld [vmem:[%s7671_s7 + $0x8] sm:$0xff]   ;;  %v6231_v38 = vld [vmem:[%s7670_s6] sm:$0xff]   ;;  %v6233_v40 = vld [vmem:[%s7672_s8 + $0x18] sm:$0xff]   ;;  %s7698_s21 = sld [smem:[#allocation10_spill]]  ;;  %s6562_s24 = smov [#allocation3]   ;;  %vm4935_vm7 = vcmask 517121  }
  0x22   :  { %5748 = vmatpush3.bf16.msra.mxu1 %v6226_v33  ;;  %5737 = vmatprep.subr.bf16.mxu0 %v6227_v34  ;;  %v6232_v39 = vld [vmem:[%s7671_s7] sm:$0xff]   ;;  %v6234_v2 = vld [vmem:[%s7672_s8 + $0x10] sm:$0xff]   ;;  %v6235_v3 = vld [vmem:[%s7672_s8 + $0x8] sm:$0xff]   ;;  %s4943_s25 = sshll.u32 %s6562_s24, 4  ;;  %s4944_s25 = int_to_ptr.vmem [resolvable:$true] %s4943_s25 }
  0x23   :  { %5749 = vmatprep.subr.bf16.mxu1 %v6228_v35  ;;  %v4952_v52 = vld [vmem:[%s7668_s4] ss:$0 sm:$0xff]  ;;  %v6243_v32 = vld [vmem:[%s7672_s8 + $0x28] sm:$0xff]   ;;  %s6539_s3 = scalar_lea.vmem %s4944_s25, 32  ;;  %p6544_p1 = scmp.lt.s32.totalorder %s4944_s25, %s4944_s25 }
  0x24   :  { %v4953_v58 = vld [vmem:[%s7669_s5] ss:$0 sm:$0xff]  ;;  %p6540_p0 = scmp.ne.s32.totalorder %s4944_s25, %s6539_s3  ;;  %p6545_p2 = scmp.lt.s32.totalorder %s6539_s3, %s6539_s3 }
  0x25   :  { %5738 = vmatpush3.bf16.msra.mxu0 %v6227_v34  ;;  %v6236_v4 = vld [vmem:[%s7672_s8] sm:$0xff]  }
  0x26   :  { %5750 = vmatpush3.bf16.msra.mxu1 %v6228_v35  ;;  %5739 = vmatprep.subr.bf16.mxu0 %v6229_v36  ;;  %v6244_v33 = vld [vmem:[%s7672_s8 + $0x20] sm:$0xff]   ;;  %p6546_p3 = por %p6545_p2, %p6544_p1 }
  0x27   :  { %5751 = vmatprep.subr.bf16.mxu1 %v6230_v37 }
  0x28   :  { %p6547_p4 = pnand %p6546_p3, %p6540_p0 }
  0x29   :  { %5740 = vmatpush3.bf16.msra.mxu0 %v6229_v36  ;;  %v6795_v36 = vld [vmem:[%s7697_s29] sm:$0xff] }
  0x2a   :  { %5752 = vmatpush3.bf16.msra.mxu1 %v6230_v37  ;;  %5741 = vmatprep.subr.bf16.mxu0 %v6231_v38 }
  0x2b   :  { %5753 = vmatprep.subr.bf16.mxu1 %v6232_v39 }
  0x2d   :  { %5742 = vmatpush3.bf16.msra.mxu0 %v6231_v38 }
  0x2e   :  { %5754 = vmatpush3.bf16.msra.mxu1 %v6232_v39  ;;  %5759 = vmatprep.subr.bf16.mxu0 %v6233_v40 }
  0xa3   :  { %v93_v17 = vpop.xlane.xlu0 %92  ;;  %v100_v18 = vpop.xlane.xlu1 %99 }
  0xa4   :  { %v102_v19 = vmul.f32 0.015625, %v93_v17  ;;  %v104_v20 = vmul.f32 0.015625, %v100_v18  ;;  %v6237_v17 = vld [vmem:[%s7670_s6 + $0x38] sm:$0xff]  }
  0xa6   :  { %v105_v21 = vsub.f32 %v83_v11, %v102_v19  ;;  %v107_v22 = vsub.f32 %v85_v12, %v104_v20 }
  0xa7   :  { %v96_v23 = vpop.xlane.xlu0 %95 }
  0xa8   :  { %v103_v24 = vmul.f32 0.015625, %v96_v23  ;;  %v108_v25 = vmul.f32 %v105_v21, %v105_v21  ;;  %v110_v26 = vmul.f32 %v107_v22, %v107_v22 }
  0xaa   :  { %v106_v27 = vsub.f32 %v84_v15, %v103_v24  ;;  %v111_v28 = vsel %vm72_vm1, %v108_v25, 0.0  ;;  %v117_v29 = vsel %vm97_vm2, %v110_v26, 0.0  ;;  %v6239_v26 = vld [vmem:[%s7670_s6 + $0x28] sm:$0xff]  }
  0xab   :  { %112 = vadd.xlane.f32.xlu1 %v111_v28 }
  0xac   :  { %v109_v30 = vmul.f32 %v106_v27, %v106_v27 }
  0xae   :  { %v114_v31 = vsel %vm72_vm1, %v109_v30, 0.0  ;;  %v6241_v30 = vld [vmem:[%s7672_s8 + $0x38] sm:$0xff]  }
  0xaf   :  { %118 = vadd.xlane.f32.xlu1 %v117_v29  ;;  %115 = vadd.xlane.f32.xlu0 %v114_v31  ;;  %v6240_v29 = vld [vmem:[%s7670_s6 + $0x20] sm:$0xff]   ;;  %v6242_v31 = vld [vmem:[%s7672_s8 + $0x30] sm:$0xff]  }
 0x134   :  { %v113_v41 = vpop.xlane.xlu1 %112 }
 0x135   :  { %v120_v42 = vmul.f32 0.015625, %v113_v41 }
 0x137   :  { %v123_v43 = vadd.f32 1e-05, %v120_v42 }
 0x138   :  { %v119_v44 = vpop.xlane.xlu1 %118  ;;  %v116_v45 = vpop.xlane.xlu0 %115 }
 0x139   :  { %6385 = vrsqrt.f32 %v123_v43  ;;  %v122_v46 = vmul.f32 0.015625, %v119_v44  ;;  %v121_v47 = vmul.f32 0.015625, %v116_v45  ;;  %v6806_v43 = vld [vmem:[%s7697_s29 + $0x8] sm:$0xff] }
 0x13b   :  { %v125_v48 = vadd.f32 1e-05, %v122_v46  ;;  %v124_v49 = vadd.f32 1e-05, %v121_v47 }
 0x13d   :  { %6387 = vrsqrt.f32 %v125_v48 }
 0x13e   :  { %6389 = vrsqrt.f32 %v124_v49 }
 0x146   :  { %v6386_v50 = vpop.eup %6385 }
 0x147   :  { %v129_v51 = vmul.f32 %v6386_v50, %v105_v21 }
 0x149   :  { %v138_v56 = vmul.f32 %v4952_v52, %v129_v51 }
 0x14a   :  { %v6388_v53 = vpop.eup %6387 }
 0x14b   :  { %v6390_v54 = vpop.eup %6389  ;;  %v131_v55 = vmul.f32 %v6388_v53, %v107_v22  ;;  %v147_v62 = vadd.f32 %v4953_v58, %v138_v56  ;;  %v6238_v22 = vld [vmem:[%s7670_s6 + $0x30] sm:$0xff]  }
 0x14c   :  { %v130_v57 = vmul.f32 %v6390_v54, %v106_v27 }
 0x14d   :  { %v140_v59 = vmul.f32 %v4952_v52, %v131_v55 }
 0x14e   :  { %v139_v60 = vmul.f32 %v4952_v52, %v130_v57 }
 0x14f   :  { %v149_v61 = vadd.f32 %v4953_v58, %v140_v59 }
 0x150   :  { %v148_v63 = vadd.f32 %v4953_v58, %v139_v60 }
 0x151   :  { %v6727_v0 = vpack.c.bf16 %v149_v61, %v149_v61 }
 0x152   :  { %v6729_v1 = vpack.c.bf16 %v148_v63, %v147_v62 }
 0x154   :  { %5743 = vmatprep.mubr.msk.bf16.mxu0 %vm72_vm1, %v6729_v1  ;;  %5755 = vmatprep.mubr.msk.bf16.mxu1 %vm72_vm1, %v6729_v1 }
 0x155   :  { %5744 = vmatmul.mubr.msk.bf16.vlgmr.msra.gmra.mxu0 %vm72_vm1, %v6727_v0  ;;  %5756 = vmatmul.mubr.msk.bf16.vlgmr.msra.gmra.mxu1 %vm72_vm1, %v6727_v0 }
 0x156   :  { %5760 = vmatpush3.bf16.msra.mxu0 %v6233_v40  ;;  %5767 = vmatprep.mubr.msk.bf16.mxu0 %vm72_vm1, %v6729_v1  ;;  %v6800_v40 = vld [vmem:[%s7697_s29 + $0x10] sm:$0x3] }
 0x157   :  { %5761 = vmatprep.subr.bf16.mxu0 %v6234_v2 }
 0x15a   :  { %5762 = vmatpush3.bf16.msra.mxu0 %v6234_v2 }
 0x15b   :  { %5763 = vmatprep.subr.bf16.mxu0 %v6235_v3 }
 0x15e   :  { %5764 = vmatpush3.bf16.msra.mxu0 %v6235_v3 }
 0x15f   :  { %5765 = vmatprep.subr.bf16.mxu0 %v6236_v4 }
 0x162   :  { %5766 = vmatpush3.bf16.msra.mxu0 %v6236_v4 }
 0x165   :  { %5768 = vmatmul.mubr.msk.bf16.vlgmr.msra.gmra.mxu0 %vm72_vm1, %v6727_v0 }
 0x215   :  { %v5745_v5 = vpop.f32.mrf.mxu0  ;;  %v5757_v6 = vpop.f32.mrf.mxu1 }
 0x216   :  { %v401_v7 = vpack.c.bf16 %v5757_v6, %v5757_v6  ;;  %v399_v20 = vpack.c.bf16 %v5745_v5, %v5745_v5 }
 0x217   :  { %v224_v8 = vpop.f32.mrf.mxu0  ;;  %v304_v9 = vpop.f32.mrf.mxu1 }
 0x218   :  { %v413_v10 = vsel %vm402_vm3, %v401_v7, 0  ;;  %6199 = vmatprep.subr.msk.bf16.mxu1 %vm402_vm3, %v401_v7 }
 0x219   :  { %v5746_v11 = vpop.f32.mrf.mxu0  ;;  %v5758_v12 = vpop.f32.mrf.mxu1  ;;  %5772 = vmatpush3.bf16.xpose.msra.mxu1 %v413_v10 }
 0x21a   :  { %v6245_v11 = vld [vmem:[%s7671_s7 + $0x38] sm:$0xff]  }
 0x21b   :  { %v227_v13 = vpop.f32.mrf.mxu0  ;;  %v307_v14 = vpop.f32.mrf.mxu1 }
 0x21c   :  { %v398_v15 = vpack.c.bf16 %v227_v13, %v224_v8  ;;  %v400_v16 = vpack.c.bf16 %v307_v14, %v304_v9 }
 0x21e   :  { %6200 = vmatprep.subr.msk.bf16.mxu1 %vm402_vm3, %v400_v16  ;;  %5775 = vmatprep.mubr.msk.bf16.mxu1 %vm402_vm3, %v398_v15  ;;  %v410_v18 = vsel %vm402_vm3, %v400_v16, 0 }
 0x221   :  { %5774 = vmatpush3.bf16.xpose.msra.mxu1 %v410_v18 }
 0x222   :  { %5787 = vmatprep.subr.bf16.mxu1 %v6237_v17 }
 0x225   :  { %v5769_v19 = vpop.f32.mrf.mxu0 }
 0x226   :  { %v507_v21 = vpack.c.bf16 %v5769_v19, %v5769_v19 }
 0x227   :  { %v384_v23 = vpop.f32.mrf.mxu0 }
 0x228   :  { %v516_v24 = vsel %vm514_vm4, %v507_v21, 0  ;;  %6201 = vmatprep.subr.msk.bf16.mxu0 %vm514_vm4, %v507_v21  ;;  %5776 = vmatmul.mubr.msk.bf16.vlgmr.msra.gmra.mxu1 %vm402_vm3, %v399_v20 }
 0x229   :  { %v5770_v25 = vpop.f32.mrf.mxu0  ;;  %5780 = vmatpush3.bf16.msra.mxu0 %v516_v24  ;;  %5788 = vmatpush3.bf16.msra.mxu1 %v6237_v17  ;;  %v6247_v24 = vld [vmem:[%s7671_s7 + $0x28] sm:$0xff]  }
 0x22a   :  { %5795 = vmatprep.mubr.msk.bf16.mxu1 %vm72_vm1, %v6729_v1  ;;  %5789 = vmatprep.subr.bf16.mxu1 %v6238_v22  ;;  %v6248_v25 = vld [vmem:[%s7671_s7 + $0x20] sm:$0xff]  }
 0x22b   :  { %v387_v27 = vpop.f32.mrf.mxu0 }
 0x22c   :  { %v506_v28 = vpack.c.bf16 %v387_v27, %v384_v23  ;;  %v6246_v23 = vld [vmem:[%s7671_s7 + $0x30] sm:$0xff]   ;;  %v6250_v27 = vld [vmem:[%s7671_s7 + $0x58] sm:$0xff]  }
 0x22d   :  { %5790 = vmatpush3.bf16.msra.mxu1 %v6238_v22 }
 0x22e   :  { %5781 = vmatprep.subr.bf16.mxu0 %v506_v28  ;;  %5791 = vmatprep.subr.bf16.mxu1 %v6239_v26 }
 0x22f   :  { %5782 = vmatpush3.bf16.msra.mxu0 %v506_v28 }
 0x230   :  { %5799 = vmatprep.subr.bf16.mxu0 %v6245_v11 }
 0x231   :  { %5792 = vmatpush3.bf16.msra.mxu1 %v6239_v26  ;;  %v6249_v26 = vld [vmem:[%s7673_s9] sm:$0xff]  }
 0x232   :  { %5793 = vmatprep.subr.bf16.mxu1 %v6240_v29 }
 0x235   :  { %5794 = vmatpush3.bf16.msra.mxu1 %v6240_v29 }
 0x236   :  { %5811 = vmatprep.subr.bf16.mxu1 %v6241_v30 }
 0x238   :  { %5796 = vmatmul.mubr.msk.bf16.vlgmr.msra.gmra.mxu1 %vm72_vm1, %v6727_v0 }
 0x239   :  { %5812 = vmatpush3.bf16.msra.mxu1 %v6241_v30  ;;  %5819 = vmatprep.mubr.msk.bf16.mxu1 %vm72_vm1, %v6729_v1 }
 0x23a   :  { %5813 = vmatprep.subr.bf16.mxu1 %v6242_v31 }
 0x23d   :  { %5814 = vmatpush3.bf16.msra.mxu1 %v6242_v31 }
 0x23e   :  { %5815 = vmatprep.subr.bf16.mxu1 %v6243_v32 }
 0x241   :  { %5816 = vmatpush3.bf16.msra.mxu1 %v6243_v32 }
 0x242   :  { %5817 = vmatprep.subr.bf16.mxu1 %v6244_v33 }
 0x245   :  { %5818 = vmatpush3.bf16.msra.mxu1 %v6244_v33 }
 0x246   :  { %5845 = vmatprep.subr.bf16.mxu1 %v6249_v26 }
 0x248   :  { %5820 = vmatmul.mubr.msk.bf16.vlgmr.msra.gmra.mxu1 %vm72_vm1, %v6727_v0 }
 0x249   :  { %5846 = vmatpush3.bf16.msra.mxu1 %v6249_v26 }
 0x24a   :  { %5863 = vmatprep.subr.bf16.mxu1 %v6250_v27 }
 0x2e8   :  { %v5777_v34 = vpop.f32.mrf.mxu1 }
 0x2e9   :  { %v465_v37 = vmul.f32 0.25, %v5777_v34  ;;  %v6251_v34 = vld [vmem:[%s7671_s7 + $0x50] sm:$0xff]  }
 0x2ea   :  { %v449_v35 = vpop.f32.mrf.mxu1 }
 0x2eb   :  { %v463_v38 = vmul.f32 0.25, %v449_v35  ;;  %v468_v46 = vadd.f32 %v465_v37, %v6800_v40  ;;  %v6252_v35 = vld [vmem:[%s7671_s7 + $0x48] sm:$0xff]  }
 0x2ec   :  { %v5778_v39 = vpop.f32.mrf.mxu1 }
 0x2ed   :  { %v466_v41 = vadd.f32 %v463_v38, %v6795_v36  ;;  %v477_v48 = vsel %vm476_vm6, %v468_v46, -inf  ;;  %v6253_v38 = vld [vmem:[%s7671_s7 + $0x40] sm:$0xff]  }
 0x2ee   :  { %v452_v42 = vpop.f32.mrf.mxu1 }
 0x2ef   :  { %v464_v44 = vmul.f32 0.25, %v452_v42  ;;  %v470_v45 = vsel %vm469_vm5, %v466_v41, -inf }
 0x2f0   :  { %471 = vmax.xlane.f32.xlu0 %v470_v45 }
 0x2f1   :  { %v467_v47 = vadd.f32 %v464_v44, %v6806_v43 }
 0x2f3   :  { %v473_v49 = vsel %vm469_vm5, %v467_v47, -inf }
 0x2f4   :  { %478 = vmax.xlane.f32.xlu0 %v477_v48  ;;  %474 = vmax.xlane.f32.xlu1 %v473_v49 }
 0x2f8   :  { %v6813_v50 = vpop.f32.mrf.mxu1 }
 0x2fa   :  { %v637_v51 = vpop.f32.mrf.mxu1 }
 0x2fc   :  { %v5798_v52 = vpop.f32.mrf.mxu1 }
 0x2fe   :  { %v640_v53 = vpop.f32.mrf.mxu1 }
 0x2ff   :  { %v813_v54 = vpack.c.bf16 %v640_v53, %v637_v51  ;;  %v814_v51 = vpack.c.bf16 %v6813_v50, %v6813_v50 }
 0x308   :  { %v6815_v55 = vpop.f32.mrf.mxu1 }
 0x30a   :  { %v6817_v56 = vpop.f32.mrf.mxu1 }
 0x30c   :  { %v5822_v57 = vpop.f32.mrf.mxu1 }
 0x30e   :  { %v802_v49 = vpop.f32.mrf.mxu1 }
 0x30f   :  { %v918_v53 = vpack.c.bf16 %v802_v49, %v6817_v56 }
 0x379   :  { %v472_v58 = vpop.xlane.xlu0 %471 }
 0x37a   :  { %v480_v59 = vsub.f32 %v466_v41, %v472_v58 }
 0x37c   :  { %v483_v60 = vmul.f32 1.442695, %v480_v59 }
 0x37d   :  { %v479_v61 = vpop.xlane.xlu0 %478  ;;  %v475_v62 = vpop.xlane.xlu1 %474 }
 0x37e   :  { %6391 = vpow2.f32 %v483_v60  ;;  %v482_v63 = vsub.f32 %v468_v46, %v479_v61  ;;  %v481_v2 = vsub.f32 %v467_v47, %v475_v62  ;;  %v919_v47 = vpack.c.bf16 %v6815_v55, %v6815_v55 }
 0x380   :  { %v487_v3 = vmul.f32 1.442695, %v482_v63  ;;  %v485_v4 = vmul.f32 1.442695, %v481_v2  ;;  %v927_v52 = vsel %vm514_vm4, %v919_v47, 0 }
 0x382   :  { %6393 = vpow2.f32 %v487_v3 }
 0x383   :  { %6395 = vpow2.f32 %v485_v4 }
 0x38b   :  { %v6392_v5 = vpop.eup %6391 }
 0x38c   :  { %v489_v6 = vsel %vm469_vm5, %v6392_v5, 0.0 }
 0x38d   :  { %490 = vadd.xlane.f32.xlu1 %v489_v6 }
 0x38f   :  { %v6394_v7 = vpop.eup %6393 }
 0x390   :  { %v6396_v8 = vpop.eup %6395  ;;  %v495_v9 = vsel %vm476_vm6, %v6394_v7, 0.0 }
 0x391   :  { %496 = vadd.xlane.f32.xlu1 %v495_v9  ;;  %v492_v10 = vsel %vm469_vm5, %v6396_v8, 0.0 }
 0x392   :  { %493 = vadd.xlane.f32.xlu0 %v492_v10 }
 0x416   :  { %v491_v12 = vpop.xlane.xlu1 %490 }
 0x417   :  { %6397 = vrcp.f32 %v491_v12 }
 0x41a   :  { %v497_v13 = vpop.xlane.xlu1 %496 }
 0x41b   :  { %v494_v14 = vpop.xlane.xlu0 %493  ;;  %6399 = vrcp.f32 %v497_v13 }
 0x41c   :  { %6401 = vrcp.f32 %v494_v14 }
 0x424   :  { %v6398_v15 = vpop.eup %6397 }
 0x425   :  { %v501_v19 = vmul.f32 %v6398_v15, %v6392_v5 }
 0x428   :  { %v6400_v16 = vpop.eup %6399 }
 0x429   :  { %v6402_v17 = vpop.eup %6401  ;;  %v503_v18 = vmul.f32 %v6400_v16, %v6394_v7 }
 0x42a   :  { %v502_v20 = vmul.f32 %v6402_v17, %v6396_v8 }
 0x42b   :  { %v505_v21 = vpack.c.bf16 %v503_v18, %v503_v18 }
 0x42c   :  { %v504_v22 = vpack.c.bf16 %v502_v20, %v501_v19 }
 0x42e   :  { %5783 = vmatprep.mubr.msk.bf16.mxu0 %vm469_vm5, %v504_v22 }
 0x42f   :  { %5784 = vmatmul.mubr.msk.bf16.vlgmr.msra.gmra.mxu0 %vm469_vm5, %v505_v21 }
 0x430   :  { %5800 = vmatpush3.bf16.msra.mxu0 %v6245_v11  ;;  %5807 = vmatprep.mubr.msk.bf16.mxu0 %vm72_vm1, %v6729_v1 }
 0x431   :  { %5801 = vmatprep.subr.bf16.mxu0 %v6246_v23 }
 0x434   :  { %5802 = vmatpush3.bf16.msra.mxu0 %v6246_v23 }
 0x435   :  { %5803 = vmatprep.subr.bf16.mxu0 %v6247_v24 }
 0x438   :  { %5804 = vmatpush3.bf16.msra.mxu0 %v6247_v24 }
 0x439   :  { %5805 = vmatprep.subr.bf16.mxu0 %v6248_v25 }
 0x43c   :  { %5806 = vmatpush3.bf16.msra.mxu0 %v6248_v25 }
 0x43f   :  { %5808 = vmatmul.mubr.msk.bf16.vlgmr.msra.gmra.mxu0 %vm72_vm1, %v6727_v0 }
 0x440   :  { %5827 = vmatprep.mubr.msk.bf16.mxu0 %vm402_vm3, %v813_v54 }
 0x4ef   :  { %v5785_v28 = vpop.f32.mrf.mxu0 }
 0x4f0   :  { %v567_v33 = vpack.c.bf16 %v5785_v28, %v5785_v28 }
 0x4f1   :  { %v552_v29 = vpop.f32.mrf.mxu0 }
 0x4f3   :  { %v5786_v30 = vpop.f32.mrf.mxu0 }
 0x4f5   :  { %v555_v31 = vpop.f32.mrf.mxu0 }
 0x4f6   :  { %v566_v32 = vpack.c.bf16 %v555_v31, %v552_v29 }
 0x4f8   :  { %5847 = vmatprep.mubr.msk.bf16.mxu1 %vm402_vm3, %v566_v32 }
 0x4f9   :  { %5848 = vmatmul.mubr.msk.bf16.vlgmr.msra.gmra.mxu1 %vm402_vm3, %v567_v33 }
 0x4fa   :  { %5864 = vmatpush3.bf16.msra.mxu1 %v6250_v27  ;;  %5871 = vmatprep.mubr.msk.bf16.mxu1 %vm72_vm1, %v6729_v1 }
 0x4fb   :  { %5865 = vmatprep.subr.bf16.mxu1 %v6251_v34 }
 0x4fe   :  { %5866 = vmatpush3.bf16.msra.mxu1 %v6251_v34 }
 0x4ff   :  { %v5809_v37 = vpop.f32.mrf.mxu0  ;;  %5867 = vmatprep.subr.bf16.mxu1 %v6252_v35 }
 0x500   :  { %v816_v39 = vpack.c.bf16 %v5809_v37, %v5809_v37 }
 0x501   :  { %v718_v41 = vpop.f32.mrf.mxu0 }
 0x502   :  { %v827_v42 = vsel %vm402_vm3, %v816_v39, 0  ;;  %6202 = vmatprep.subr.msk.bf16.mxu0 %vm402_vm3, %v816_v39  ;;  %5868 = vmatpush3.bf16.msra.mxu1 %v6252_v35 }
 0x503   :  { %v5810_v44 = vpop.f32.mrf.mxu0  ;;  %5824 = vmatpush3.bf16.xpose.msra.mxu0 %v827_v42  ;;  %5869 = vmatprep.subr.bf16.mxu1 %v6253_v38 }
 0x505   :  { %v721_v45 = vpop.f32.mrf.mxu0 }
 0x506   :  { %v815_v46 = vpack.c.bf16 %v721_v45, %v718_v41  ;;  %5870 = vmatpush3.bf16.msra.mxu1 %v6253_v38  ;;  %v6254_v45 = vld [vmem:[%s7673_s9 + $0x8] sm:$0xff]  }
 0x508   :  { %6203 = vmatprep.subr.msk.bf16.mxu0 %vm402_vm3, %v815_v46  ;;  %v824_v48 = vsel %vm402_vm3, %v815_v46, 0  ;;  %v6255_v46 = vld [vmem:[%s7670_s6 + $0x58] sm:$0xff]  }
 0x509   :  { %5872 = vmatmul.mubr.msk.bf16.vlgmr.msra.gmra.mxu1 %vm72_vm1, %v6727_v0 }
 0x50b   :  { %5826 = vmatpush3.bf16.xpose.msra.mxu0 %v824_v48 }
 0x50c   :  { %6204 = vmatprep.subr.msk.bf16.mxu0 %vm514_vm4, %v919_v47 }
 0x512   :  { %5828 = vmatmul.mubr.msk.bf16.vlgmr.msra.gmra.mxu0 %vm402_vm3, %v814_v51 }
 0x513   :  { %5832 = vmatpush3.bf16.msra.mxu0 %v927_v52 }
 0x514   :  { %5833 = vmatprep.subr.bf16.mxu0 %v918_v53 }
 0x517   :  { %5834 = vmatpush3.bf16.msra.mxu0 %v918_v53 }
 0x518   :  { %5839 = vmatprep.subr.bf16.mxu0 %v6254_v45 }
 0x5b9   :  { %v6874_v54 = vpop.f32.mrf.mxu1 }
 0x5bb   :  { %v6876_v55 = vpop.f32.mrf.mxu1 }
 0x5bd   :  { %v5850_v57 = vpop.f32.mrf.mxu1 }
 0x5be   :  { %v6256_v57 = vld [vmem:[%s7670_s6 + $0x50] sm:$0xff]  }
 0x5bf   :  { %v6878_v58 = vpop.f32.mrf.mxu1 }
 0x5c9   :  { %v5873_v59 = vpop.f32.mrf.mxu1 }
 0x5ca   :  { %v1348_v60 = vpack.c.bf16 %v5873_v59, %v5873_v59  ;;  %v6257_v59 = vld [vmem:[%s7670_s6 + $0x48] sm:$0xff]  }
 0x5cb   :  { %v1250_v61 = vpop.f32.mrf.mxu1 }
 0x5cc   :  { %v1359_v50 = vsel %vm402_vm3, %v1348_v60, 0  ;;  %6205 = vmatprep.subr.msk.bf16.mxu1 %vm402_vm3, %v1348_v60  ;;  %v6258_v60 = vld [vmem:[%s7670_s6 + $0x40] sm:$0xff]  }
 0x5cd   :  { %v5874_v56 = vpop.f32.mrf.mxu1  ;;  %5888 = vmatpush3.bf16.xpose.msra.mxu1 %v1359_v50  ;;  %v6260_v50 = vld [vmem:[%s7672_s8 + $0x50] sm:$0xff]  }
 0x5ce   :  { %v6261_v56 = vld [vmem:[%s7672_s8 + $0x48] sm:$0xff]  }
 0x5cf   :  { %v1253_v62 = vpop.f32.mrf.mxu1 }
 0x5d0   :  { %v1347_v63 = vpack.c.bf16 %v1253_v62, %v1250_v61  ;;  %v6259_v61 = vld [vmem:[%s7672_s8 + $0x58] sm:$0xff]   ;;  %v6262_v62 = vld [vmem:[%s7672_s8 + $0x40] sm:$0xff]  }
 0x5d2   :  { %v5829_v2 = vpop.f32.mrf.mxu0  ;;  %6206 = vmatprep.subr.msk.bf16.mxu1 %vm402_vm3, %v1347_v63  ;;  %v1356_v3 = vsel %vm402_vm3, %v1347_v63, 0 }
 0x5d3   :  { %v879_v5 = vmul.f32 0.25, %v5829_v2 }
 0x5d4   :  { %v863_v4 = vpop.f32.mrf.mxu0 }
 0x5d5   :  { %v877_v6 = vmul.f32 0.25, %v863_v4  ;;  %5890 = vmatpush3.bf16.xpose.msra.mxu1 %v1356_v3  ;;  %v882_v12 = vadd.f32 %v879_v5, %v6800_v40 }
 0x5d6   :  { %v5830_v7 = vpop.f32.mrf.mxu0 }
 0x5d7   :  { %v880_v8 = vadd.f32 %v877_v6, %v6795_v36  ;;  %v889_v14 = vsel %vm476_vm6, %v882_v12, -inf }
 0x5d8   :  { %v866_v9 = vpop.f32.mrf.mxu0 }
 0x5d9   :  { %v878_v10 = vmul.f32 0.25, %v866_v9  ;;  %v883_v11 = vsel %vm469_vm5, %v880_v8, -inf }
 0x5da   :  { %884 = vmax.xlane.f32.xlu0 %v883_v11 }
 0x5db   :  { %v881_v13 = vadd.f32 %v878_v10, %v6806_v43 }
 0x5dd   :  { %v886_v15 = vsel %vm469_vm5, %v881_v13, -inf }
 0x5de   :  { %890 = vmax.xlane.f32.xlu0 %v889_v14  ;;  %887 = vmax.xlane.f32.xlu1 %v886_v15 }
 0x663   :  { %v885_v16 = vpop.xlane.xlu0 %884 }
 0x664   :  { %v892_v17 = vsub.f32 %v880_v8, %v885_v16 }
 0x666   :  { %v895_v18 = vmul.f32 1.442695, %v892_v17 }
 0x667   :  { %v891_v19 = vpop.xlane.xlu0 %890  ;;  %v888_v20 = vpop.xlane.xlu1 %887 }
 0x668   :  { %6403 = vpow2.f32 %v895_v18  ;;  %v894_v21 = vsub.f32 %v882_v12, %v891_v19  ;;  %v893_v22 = vsub.f32 %v881_v13, %v888_v20 }
 0x66a   :  { %v899_v23 = vmul.f32 1.442695, %v894_v21  ;;  %v897_v24 = vmul.f32 1.442695, %v893_v22 }
 0x66c   :  { %6405 = vpow2.f32 %v899_v23 }
 0x66d   :  { %6407 = vpow2.f32 %v897_v24 }
 0x675   :  { %v6404_v25 = vpop.eup %6403 }
 0x676   :  { %v901_v26 = vsel %vm469_vm5, %v6404_v25, 0.0 }
 0x677   :  { %902 = vadd.xlane.f32.xlu1 %v901_v26 }
 0x679   :  { %v6406_v27 = vpop.eup %6405 }
 0x67a   :  { %v6408_v28 = vpop.eup %6407  ;;  %v907_v29 = vsel %vm476_vm6, %v6406_v27, 0.0 }
 0x67b   :  { %908 = vadd.xlane.f32.xlu1 %v907_v29  ;;  %v904_v30 = vsel %vm469_vm5, %v6408_v28, 0.0 }
 0x67c   :  { %905 = vadd.xlane.f32.xlu0 %v904_v30 }
 0x700   :  { %v903_v31 = vpop.xlane.xlu1 %902 }
 0x701   :  { %6409 = vrcp.f32 %v903_v31 }
 0x704   :  { %v909_v32 = vpop.xlane.xlu1 %908 }
 0x705   :  { %v906_v33 = vpop.xlane.xlu0 %905  ;;  %6411 = vrcp.f32 %v909_v32 }
 0x706   :  { %6413 = vrcp.f32 %v906_v33 }
 0x70e   :  { %v6410_v34 = vpop.eup %6409 }
 0x70f   :  { %v913_v39 = vmul.f32 %v6410_v34, %v6404_v25 }
 0x712   :  { %v6412_v35 = vpop.eup %6411 }
 0x713   :  { %v6414_v37 = vpop.eup %6413  ;;  %v915_v38 = vmul.f32 %v6412_v35, %v6406_v27 }
 0x714   :  { %v914_v41 = vmul.f32 %v6414_v37, %v6408_v28 }
 0x715   :  { %v917_v42 = vpack.c.bf16 %v915_v38, %v915_v38 }
 0x716   :  { %v916_v44 = vpack.c.bf16 %v914_v41, %v913_v39 }
 0x718   :  { %5835 = vmatprep.mubr.msk.bf16.mxu0 %vm469_vm5, %v916_v44 }
 0x719   :  { %5836 = vmatmul.mubr.msk.bf16.vlgmr.msra.gmra.mxu0 %vm469_vm5, %v917_v42 }
 0x71a   :  { %5840 = vmatpush3.bf16.msra.mxu0 %v6254_v45 }
 0x71b   :  { %5851 = vmatprep.subr.bf16.mxu0 %v6255_v46 }
 0x7d9   :  { %v5837_v47 = vpop.f32.mrf.mxu0 }
 0x7da   :  { %v978_v53 = vpack.c.bf16 %v5837_v47, %v5837_v47 }
 0x7db   :  { %v963_v48 = vpop.f32.mrf.mxu0 }
 0x7dd   :  { %v5838_v49 = vpop.f32.mrf.mxu0 }
 0x7de   :  { %v6263_v49 = vld [vmem:[%s7670_s6 + $0x78] sm:$0xff]  }
 0x7df   :  { %v966_v51 = vpop.f32.mrf.mxu0 }
 0x7e0   :  { %v977_v52 = vpack.c.bf16 %v966_v51, %v963_v48 }
 0x7e2   :  { %5841 = vmatprep.mubr.msk.bf16.mxu0 %vm402_vm3, %v977_v52 }
 0x7e3   :  { %5842 = vmatmul.mubr.msk.bf16.vlgmr.msra.gmra.mxu0 %vm402_vm3, %v978_v53 }
 0x7e4   :  { %5852 = vmatpush3.bf16.msra.mxu0 %v6255_v46  ;;  %5859 = vmatprep.mubr.msk.bf16.mxu0 %vm72_vm1, %v6729_v1 }
 0x7e5   :  { %5853 = vmatprep.subr.bf16.mxu0 %v6256_v57 }
 0x7e8   :  { %5854 = vmatpush3.bf16.msra.mxu0 %v6256_v57 }
 0x7e9   :  { %5855 = vmatprep.subr.bf16.mxu0 %v6257_v59 }
 0x7ec   :  { %5856 = vmatpush3.bf16.msra.mxu0 %v6257_v59 }
 0x7ed   :  { %5857 = vmatprep.subr.bf16.mxu0 %v6258_v60 }
 0x7f0   :  { %5858 = vmatpush3.bf16.msra.mxu0 %v6258_v60 }
 0x7f1   :  { %5875 = vmatprep.subr.bf16.mxu0 %v6259_v61 }
 0x7f3   :  { %5860 = vmatmul.mubr.msk.bf16.vlgmr.msra.gmra.mxu0 %vm72_vm1, %v6727_v0 }
 0x7f4   :  { %5876 = vmatpush3.bf16.msra.mxu0 %v6259_v61  ;;  %5883 = vmatprep.mubr.msk.bf16.mxu0 %vm72_vm1, %v6729_v1 }
 0x7f5   :  { %5877 = vmatprep.subr.bf16.mxu0 %v6260_v50 }
 0x7f8   :  { %5878 = vmatpush3.bf16.msra.mxu0 %v6260_v50 }
 0x7f9   :  { %5879 = vmatprep.subr.bf16.mxu0 %v6261_v56 }
 0x7fc   :  { %5880 = vmatpush3.bf16.msra.mxu0 %v6261_v56 }
 0x7fd   :  { %5881 = vmatprep.subr.bf16.mxu0 %v6262_v62 }
 0x800   :  { %5882 = vmatpush3.bf16.msra.mxu0 %v6262_v62 }
 0x803   :  { %5884 = vmatmul.mubr.msk.bf16.vlgmr.msra.gmra.mxu0 %vm72_vm1, %v6727_v0 }
 0x8a3   :  { %v6932_v63 = vpop.f32.mrf.mxu0 }
 0x8a5   :  { %v6934_v2 = vpop.f32.mrf.mxu0 }
 0x8a7   :  { %v5844_v3 = vpop.f32.mrf.mxu0 }
 0x8a9   :  { %v6936_v4 = vpop.f32.mrf.mxu0 }
 0x8b3   :  { %v5861_v5 = vpop.f32.mrf.mxu0 }
 0x8b4   :  { %v1346_v10 = vpack.c.bf16 %v5861_v5, %v5861_v5  ;;  %v6264_v5 = vld [vmem:[%s7670_s6 + $0x70] sm:$0xff]  }
 0x8b5   :  { %v1169_v6 = vpop.f32.mrf.mxu0 }
 0x8b7   :  { %v5862_v7 = vpop.f32.mrf.mxu0 }
 0x8b8   :  { %v6266_v7 = vld [vmem:[%s7670_s6 + $0x60] sm:$0xff]  }
 0x8b9   :  { %v1172_v8 = vpop.f32.mrf.mxu0 }
 0x8ba   :  { %v1345_v9 = vpack.c.bf16 %v1172_v8, %v1169_v6  ;;  %v6265_v6 = vld [vmem:[%s7670_s6 + $0x68] sm:$0xff]   ;;  %v6267_v8 = vld [vmem:[%s7672_s8 + $0x78] sm:$0xff]  }
 0x8bc   :  { %5891 = vmatprep.mubr.msk.bf16.mxu1 %vm402_vm3, %v1345_v9  ;;  %v6268_v9 = vld [vmem:[%s7672_s8 + $0x70] sm:$0xff]  }
 0x8bd   :  { %5892 = vmatmul.mubr.msk.bf16.vlgmr.msra.gmra.mxu1 %vm402_vm3, %v1346_v10  ;;  %v6269_v10 = vld [vmem:[%s7672_s8 + $0x68] sm:$0xff]  }
 0x8c3   :  { %v5885_v11 = vpop.f32.mrf.mxu0 }
 0x8c4   :  { %v1451_v12 = vpack.c.bf16 %v5885_v11, %v5885_v11  ;;  %v6270_v11 = vld [vmem:[%s7672_s8 + $0x60] sm:$0xff]  }
 0x8c5   :  { %v1331_v13 = vpop.f32.mrf.mxu0 }
 0x8c6   :  { %v1459_v14 = vsel %vm514_vm4, %v1451_v12, 0  ;;  %6207 = vmatprep.subr.msk.bf16.mxu0 %vm514_vm4, %v1451_v12  ;;  %v6271_v12 = vld [vmem:[%s7673_s9 + $0x10] sm:$0xff]  }
 0x8c7   :  { %v5886_v15 = vpop.f32.mrf.mxu0  ;;  %5896 = vmatpush3.bf16.msra.mxu0 %v1459_v14  ;;  %5903 = vmatprep.subr.bf16.mxu1 %v6271_v12 }
 0x8c8   :  { %5904 = vmatpush3.bf16.msra.mxu1 %v6271_v12 }
 0x8c9   :  { %v1334_v16 = vpop.f32.mrf.mxu0 }
 0x8ca   :  { %v1450_v17 = vpack.c.bf16 %v1334_v16, %v1331_v13  ;;  %v6272_v13 = vld [vmem:[%s7671_s7 + $0x78] sm:$0xff]  }
 0x8cb   :  { %5921 = vmatprep.subr.bf16.mxu1 %v6272_v13 }
 0x8cc   :  { %5897 = vmatprep.subr.bf16.mxu0 %v1450_v17 }
 0x8cd   :  { %5898 = vmatpush3.bf16.msra.mxu0 %v1450_v17 }
 0x8ce   :  { %5909 = vmatprep.subr.bf16.mxu0 %v6263_v49 }
 0x97d   :  { %v5893_v18 = vpop.f32.mrf.mxu1 }
 0x97e   :  { %v1411_v20 = vmul.f32 0.25, %v5893_v18 }
 0x97f   :  { %v1395_v19 = vpop.f32.mrf.mxu1 }
 0x980   :  { %v1409_v21 = vmul.f32 0.25, %v1395_v19  ;;  %v1414_v27 = vadd.f32 %v1411_v20, %v6800_v40  ;;  %v6273_v20 = vld [vmem:[%s7671_s7 + $0x70] sm:$0xff]  }
 0x981   :  { %v5894_v22 = vpop.f32.mrf.mxu1 }
 0x982   :  { %v1412_v23 = vadd.f32 %v1409_v21, %v6795_v36  ;;  %v1421_v29 = vsel %vm476_vm6, %v1414_v27, -inf  ;;  %v6274_v21 = vld [vmem:[%s7671_s7 + $0x68] sm:$0xff]  }
 0x983   :  { %v1398_v24 = vpop.f32.mrf.mxu1 }
 0x984   :  { %v1410_v25 = vmul.f32 0.25, %v1398_v24  ;;  %v1415_v26 = vsel %vm469_vm5, %v1412_v23, -inf }
 0x985   :  { %1416 = vmax.xlane.f32.xlu0 %v1415_v26 }
 0x986   :  { %v1413_v28 = vadd.f32 %v1410_v25, %v6806_v43 }
 0x988   :  { %v1418_v30 = vsel %vm469_vm5, %v1413_v28, -inf }
 0x989   :  { %1422 = vmax.xlane.f32.xlu0 %v1421_v29  ;;  %1419 = vmax.xlane.f32.xlu1 %v1418_v30 }
 0xa0e   :  { %v1417_v31 = vpop.xlane.xlu0 %1416 }
 0xa0f   :  { %v1424_v32 = vsub.f32 %v1412_v23, %v1417_v31  ;;  %v6275_v23 = vld [vmem:[%s7671_s7 + $0x60] sm:$0xff]  }
 0xa11   :  { %v1427_v33 = vmul.f32 1.442695, %v1424_v32 }
 0xa12   :  { %v1423_v34 = vpop.xlane.xlu0 %1422  ;;  %v1420_v35 = vpop.xlane.xlu1 %1419 }
 0xa13   :  { %6415 = vpow2.f32 %v1427_v33  ;;  %v1426_v37 = vsub.f32 %v1414_v27, %v1423_v34  ;;  %v1425_v38 = vsub.f32 %v1413_v28, %v1420_v35  ;;  %v1097_v34 = vadd.f32 %v6874_v54, %v6932_v63 }
 0xa15   :  { %v1431_v39 = vmul.f32 1.442695, %v1426_v37  ;;  %v1429_v41 = vmul.f32 1.442695, %v1425_v38 }
 0xa17   :  { %6417 = vpow2.f32 %v1431_v39 }
 0xa18   :  { %6419 = vpow2.f32 %v1429_v41 }
 0xa20   :  { %v6416_v42 = vpop.eup %6415 }
 0xa21   :  { %v1433_v44 = vsel %vm469_vm5, %v6416_v42, 0.0 }
 0xa22   :  { %1434 = vadd.xlane.f32.xlu1 %v1433_v44 }
 0xa24   :  { %v6418_v45 = vpop.eup %6417 }
 0xa25   :  { %v6420_v46 = vpop.eup %6419  ;;  %v1439_v47 = vsel %vm476_vm6, %v6418_v45, 0.0 }
 0xa26   :  { %1440 = vadd.xlane.f32.xlu1 %v1439_v47  ;;  %v1436_v48 = vsel %vm469_vm5, %v6420_v46, 0.0 }
 0xa27   :  { %1437 = vadd.xlane.f32.xlu0 %v1436_v48 }
 0xaab   :  { %v1435_v51 = vpop.xlane.xlu1 %1434 }
 0xaac   :  { %6421 = vrcp.f32 %v1435_v51 }
 0xaaf   :  { %v1441_v52 = vpop.xlane.xlu1 %1440 }
 0xab0   :  { %v1438_v53 = vpop.xlane.xlu0 %1437  ;;  %6423 = vrcp.f32 %v1441_v52 }
 0xab1   :  { %6425 = vrcp.f32 %v1438_v53 }
 0xab9   :  { %v6422_v57 = vpop.eup %6421 }
 0xaba   :  { %v1445_v50 = vmul.f32 %v6422_v57, %v6416_v42  ;;  %v1092_v42 = vadd.f32 %v6878_v58, %v6936_v4 }
 0xabd   :  { %v6424_v59 = vpop.eup %6423 }
 0xabe   :  { %v6426_v60 = vpop.eup %6425  ;;  %v1447_v61 = vmul.f32 %v6424_v59, %v6418_v45 }
 0xabf   :  { %v1446_v56 = vmul.f32 %v6426_v60, %v6420_v46 }
 0xac0   :  { %v1449_v62 = vpack.c.bf16 %v1447_v61, %v1447_v61 }
 0xac1   :  { %v1448_v3 = vpack.c.bf16 %v1446_v56, %v1445_v50 }
 0xac3   :  { %5899 = vmatprep.mubr.msk.bf16.mxu0 %vm469_vm5, %v1448_v3 }
 0xac4   :  { %5900 = vmatmul.mubr.msk.bf16.vlgmr.msra.gmra.mxu0 %vm469_vm5, %v1449_v62 }
 0xac5   :  { %5910 = vmatpush3.bf16.msra.mxu0 %v6263_v49  ;;  %5917 = vmatprep.mubr.msk.bf16.mxu0 %vm72_vm1, %v6729_v1 }
 0xac6   :  { %5911 = vmatprep.subr.bf16.mxu0 %v6264_v5 }
 0xac9   :  { %5912 = vmatpush3.bf16.msra.mxu0 %v6264_v5 }
 0xaca   :  { %5913 = vmatprep.subr.bf16.mxu0 %v6265_v6 }
 0xacd   :  { %5914 = vmatpush3.bf16.msra.mxu0 %v6265_v6 }
 0xace   :  { %5915 = vmatprep.subr.bf16.mxu0 %v6266_v7 }
 0xad1   :  { %5916 = vmatpush3.bf16.msra.mxu0 %v6266_v7 }
 0xad2   :  { %5933 = vmatprep.subr.bf16.mxu0 %v6267_v8 }
 0xad4   :  { %5918 = vmatmul.mubr.msk.bf16.vlgmr.msra.gmra.mxu0 %vm72_vm1, %v6727_v0 }
 0xad5   :  { %5934 = vmatpush3.bf16.msra.mxu0 %v6267_v8  ;;  %5941 = vmatprep.mubr.msk.bf16.mxu0 %vm72_vm1, %v6729_v1 }
 0xad6   :  { %5935 = vmatprep.subr.bf16.mxu0 %v6268_v9 }
 0xad9   :  { %5936 = vmatpush3.bf16.msra.mxu0 %v6268_v9 }
 0xada   :  { %5937 = vmatprep.subr.bf16.mxu0 %v6269_v10 }
 0xadd   :  { %5938 = vmatpush3.bf16.msra.mxu0 %v6269_v10 }
 0xade   :  { %5939 = vmatprep.subr.bf16.mxu0 %v6270_v11 }
 0xae1   :  { %5940 = vmatpush3.bf16.msra.mxu0 %v6270_v11 }
 0xae4   :  { %5942 = vmatmul.mubr.msk.bf16.vlgmr.msra.gmra.mxu0 %vm72_vm1, %v6727_v0 }
 0xb84   :  { %v5901_v14 = vpop.f32.mrf.mxu0 }
 0xb85   :  { %v1510_v19 = vpack.c.bf16 %v5901_v14, %v5901_v14 }
 0xb86   :  { %v1495_v15 = vpop.f32.mrf.mxu0 }
 0xb88   :  { %v5902_v16 = vpop.f32.mrf.mxu0 }
 0xb8a   :  { %v1498_v17 = vpop.f32.mrf.mxu0 }
 0xb8b   :  { %v1509_v18 = vpack.c.bf16 %v1498_v17, %v1495_v15 }
 0xb8d   :  { %5905 = vmatprep.mubr.msk.bf16.mxu1 %vm402_vm3, %v1509_v18 }
 0xb8e   :  { %5906 = vmatmul.mubr.msk.bf16.vlgmr.msra.gmra.mxu1 %vm402_vm3, %v1510_v19 }
 0xb8f   :  { %5922 = vmatpush3.bf16.msra.mxu1 %v6272_v13  ;;  %5929 = vmatprep.mubr.msk.bf16.mxu1 %vm72_vm1, %v6729_v1 }
 0xb90   :  { %5923 = vmatprep.subr.bf16.mxu1 %v6273_v20 }
 0xb93   :  { %5924 = vmatpush3.bf16.msra.mxu1 %v6273_v20 }
 0xb94   :  { %v5919_v22 = vpop.f32.mrf.mxu0  ;;  %5925 = vmatprep.subr.bf16.mxu1 %v6274_v21 }
 0xb95   :  { %v1821_v58 = vpack.c.bf16 %v5919_v22, %v5919_v22 }
 0xb96   :  { %v1644_v24 = vpop.f32.mrf.mxu0 }
 0xb97   :  { %5926 = vmatpush3.bf16.msra.mxu1 %v6274_v21 }
 0xb98   :  { %v5920_v25 = vpop.f32.mrf.mxu0  ;;  %5927 = vmatprep.subr.bf16.mxu1 %v6275_v23 }
 0xb9a   :  { %v1647_v26 = vpop.f32.mrf.mxu0 }
 0xb9b   :  { %5928 = vmatpush3.bf16.msra.mxu1 %v6275_v23  ;;  %v1820_v27 = vpack.c.bf16 %v1647_v26, %v1644_v24 }
 0xb9e   :  { %5930 = vmatmul.mubr.msk.bf16.vlgmr.msra.gmra.mxu1 %vm72_vm1, %v6727_v0  ;;  %v1089_v0 = vadd.f32 %v6876_v55, %v6934_v2 }
 0xb9f   :  { %5949 = vmatprep.mubr.msk.bf16.mxu1 %vm402_vm3, %v1820_v27 }
 0xba4   :  { %v5943_v1 = vpop.f32.mrf.mxu0 }
 0xba5   :  { %v1926_v28 = vpack.c.bf16 %v5943_v1, %v5943_v1 }
 0xba6   :  { %v1806_v29 = vpop.f32.mrf.mxu0 }
 0xba7   :  { %v1934_v30 = vsel %vm514_vm4, %v1926_v28, 0  ;;  %6210 = vmatprep.subr.msk.bf16.mxu0 %vm514_vm4, %v1926_v28  ;;  %v6276_v28 = vld [vmem:[%s7673_s9 + $0x18] sm:$0xff]  }
 0xba8   :  { %v5944_v31 = vpop.f32.mrf.mxu0  ;;  %5954 = vmatpush3.bf16.msra.mxu0 %v1934_v30 }
 0xbaa   :  { %v1809_v32 = vpop.f32.mrf.mxu0 }
 0xbab   :  { %v1925_v33 = vpack.c.bf16 %v1809_v32, %v1806_v29 }
 0xbad   :  { %5955 = vmatprep.subr.bf16.mxu0 %v1925_v33 }
 0xbae   :  { %5956 = vmatpush3.bf16.msra.mxu0 %v1925_v33 }
 0xc4e   :  { %v5907_v35 = vpop.f32.mrf.mxu1 }
 0xc4f   :  { %v7013_v37 = vadd.f32 %v5907_v35, %v1097_v34 }
 0xc50   :  { %v1560_v38 = vpop.f32.mrf.mxu1 }
 0xc51   :  { %v7015_v39 = vadd.f32 %v1560_v38, %v1089_v0 }
 0xc52   :  { %v5908_v41 = vpop.f32.mrf.mxu1 }
 0xc54   :  { %v1563_v44 = vpop.f32.mrf.mxu1 }
 0xc55   :  { %v7019_v45 = vadd.f32 %v1563_v44, %v1092_v42  ;;  %v6533_v44 = vld [vmem:[#allocation2 + $0x10] sm:$0x3] }
 0xc5e   :  { %v5931_v46 = vpop.f32.mrf.mxu1 }
 0xc5f   :  { %v1823_v47 = vpack.c.bf16 %v5931_v46, %v5931_v46 }
 0xc60   :  { %v1725_v48 = vpop.f32.mrf.mxu1 }
 0xc61   :  { %v1834_v54 = vsel %vm402_vm3, %v1823_v47, 0  ;;  %6208 = vmatprep.subr.msk.bf16.mxu1 %vm402_vm3, %v1823_v47  ;;  %v6534_v47 = vld [vmem:[#allocation2] sm:$0xff] }
 0xc62   :  { %v5932_v55 = vpop.f32.mrf.mxu1  ;;  %5946 = vmatpush3.bf16.xpose.msra.mxu1 %v1834_v54  ;;  %v5132_v54 = vld [vmem:[%s7674_s10] ss:$0 sm:$0xff] }
 0xc64   :  { %v1728_v63 = vpop.f32.mrf.mxu1 }
 0xc65   :  { %v1822_v2 = vpack.c.bf16 %v1728_v63, %v1725_v48 }
 0xc67   :  { %6209 = vmatprep.subr.msk.bf16.mxu1 %vm402_vm3, %v1822_v2  ;;  %v1831_v49 = vsel %vm402_vm3, %v1822_v2, 0 }
 0xc6a   :  { %5948 = vmatpush3.bf16.xpose.msra.mxu1 %v1831_v49 }
 0xc6b   :  { %5961 = vmatprep.subr.bf16.mxu1 %v6276_v28 }
 0xc71   :  { %5950 = vmatmul.mubr.msk.bf16.vlgmr.msra.gmra.mxu1 %vm402_vm3, %v1821_v58 }
 0xc72   :  { %5962 = vmatpush3.bf16.msra.mxu1 %v6276_v28 }
 0xd31   :  { %v5951_v4 = vpop.f32.mrf.mxu1 }
 0xd32   :  { %v1886_v52 = vmul.f32 0.25, %v5951_v4 }
 0xd33   :  { %v1870_v51 = vpop.f32.mrf.mxu1 }
 0xd34   :  { %v1884_v53 = vmul.f32 0.25, %v1870_v51  ;;  %v1889_v56 = vadd.f32 %v1886_v52, %v6800_v40 }
 0xd35   :  { %v5952_v57 = vpop.f32.mrf.mxu1 }
 0xd36   :  { %v1887_v59 = vadd.f32 %v1884_v53, %v6795_v36  ;;  %v1896_v3 = vsel %vm476_vm6, %v1889_v56, -inf }
 0xd37   :  { %v1873_v60 = vpop.f32.mrf.mxu1 }
 0xd38   :  { %v1885_v61 = vmul.f32 0.25, %v1873_v60  ;;  %v1890_v50 = vsel %vm469_vm5, %v1887_v59, -inf }
 0xd39   :  { %1891 = vmax.xlane.f32.xlu0 %v1890_v50 }
 0xd3a   :  { %v1888_v62 = vadd.f32 %v1885_v61, %v6806_v43 }
 0xd3c   :  { %v1893_v5 = vsel %vm469_vm5, %v1888_v62, -inf }
 0xd3d   :  { %1897 = vmax.xlane.f32.xlu0 %v1896_v3  ;;  %1894 = vmax.xlane.f32.xlu1 %v1893_v5 }
 0xdc2   :  { %v1892_v6 = vpop.xlane.xlu0 %1891 }
 0xdc3   :  { %v1899_v7 = vsub.f32 %v1887_v59, %v1892_v6 }
 0xdc5   :  { %v1902_v8 = vmul.f32 1.442695, %v1899_v7 }
 0xdc6   :  { %v1898_v9 = vpop.xlane.xlu0 %1897  ;;  %v1895_v36 = vpop.xlane.xlu1 %1894 }
 0xdc7   :  { %6427 = vpow2.f32 %v1902_v8  ;;  %v1901_v10 = vsub.f32 %v1889_v56, %v1898_v9  ;;  %v1900_v11 = vsub.f32 %v1888_v62, %v1895_v36  ;;  %v6279_v36 = vld [vmem:[%s7677_s13 + $0x34] ss:$8 sps:$4 sm:$0xff]  }
 0xdc8   :  { %2200 = vmatprep.subr.bf16.mxu0 %v6279_v36 }
 0xdc9   :  { %v1906_v12 = vmul.f32 1.442695, %v1901_v10  ;;  %v1904_v13 = vmul.f32 1.442695, %v1900_v11  ;;  %v6277_v10 = vld [vmem:[%s7677_s13 + $0x30] ss:$8 sps:$4 sm:$0xff]  }
 0xdca   :  { %v6282_v11 = vld [vmem:[%s7677_s13 + $0x24] ss:$8 sps:$4 sm:$0xff]  }
 0xdcb   :  { %6429 = vpow2.f32 %v1906_v12  ;;  %v6280_v12 = vld [vmem:[%s7677_s13 + $0x20] ss:$8 sps:$4 sm:$0xff]  }
 0xdcc   :  { %6431 = vpow2.f32 %v1904_v13  ;;  %v6285_v13 = vld [vmem:[%s7677_s13 + $0x14] ss:$8 sps:$4 sm:$0xff]  }
 0xdd4   :  { %v6428_v40 = vpop.eup %6427 }
 0xdd5   :  { %v1908_v43 = vsel %vm469_vm5, %v6428_v40, 0.0 }
 0xdd6   :  { %1909 = vadd.xlane.f32.xlu1 %v1908_v43  ;;  %v6288_v43 = vld [vmem:[%s7677_s13 + $0x4] ss:$8 sps:$4 sm:$0xff]  }
 0xdd8   :  { %v6430_v14 = vpop.eup %6429 }
 0xdd9   :  { %v6432_v15 = vpop.eup %6431  ;;  %v1914_v16 = vsel %vm476_vm6, %v6430_v14, 0.0 }
 0xdda   :  { %1915 = vadd.xlane.f32.xlu1 %v1914_v16  ;;  %v1911_v17 = vsel %vm469_vm5, %v6432_v15, 0.0 }
 0xddb   :  { %1912 = vadd.xlane.f32.xlu0 %v1911_v17 }
 0xe5f   :  { %v1910_v18 = vpop.xlane.xlu1 %1909 }
 0xe60   :  { %6433 = vrcp.f32 %v1910_v18 }
 0xe63   :  { %v1916_v19 = vpop.xlane.xlu1 %1915 }
 0xe64   :  { %v1913_v20 = vpop.xlane.xlu0 %1912  ;;  %6435 = vrcp.f32 %v1916_v19 }
 0xe65   :  { %6437 = vrcp.f32 %v1913_v20 }
 0xe6d   :  { %v6434_v21 = vpop.eup %6433 }
 0xe6e   :  { %v1920_v25 = vmul.f32 %v6434_v21, %v6428_v40  ;;  %v6283_v40 = vld [vmem:[%s7677_s13 + $0x10] ss:$8 sps:$4 sm:$0xff]  }
 0xe71   :  { %v6436_v22 = vpop.eup %6435 }
 0xe72   :  { %v6438_v23 = vpop.eup %6437  ;;  %v1922_v24 = vmul.f32 %v6436_v22, %v6430_v14  ;;  %v6286_v14 = vld [vmem:[%s7677_s13] ss:$8 sps:$4 sm:$0xff]  }
 0xe73   :  { %v1921_v26 = vmul.f32 %v6438_v23, %v6432_v15  ;;  %v6561_v15 = vmov 0  }
 0xe74   :  { %v1924_v27 = vpack.c.bf16 %v1922_v24, %v1922_v24 }
 0xe75   :  { %v1923_v1 = vpack.c.bf16 %v1921_v26, %v1920_v25 }
 0xe77   :  { %5957 = vmatprep.mubr.msk.bf16.mxu0 %vm469_vm5, %v1923_v1 }
 0xe78   :  { %5958 = vmatmul.mubr.msk.bf16.vlgmr.msra.gmra.mxu0 %vm469_vm5, %v1924_v27  ;;  %v5133_v27 = vld [vmem:[%s7675_s11] ss:$0 sm:$0xff] }
 0xe79   :  { %2201 = vmatpush1.bf16.msra.mxu0 %v6277_v10  ;;  %2224 = vmatprep.mubr.bf16.mxu0 %v6561_v15 }
 0xe7a   :  { %2202 = vmatprep.subr.bf16.mxu0 %v6282_v11 }
 0xe7d   :  { %2203 = vmatpush1.bf16.msra.mxu0 %v6280_v12 }
 0xe7e   :  { %2204 = vmatprep.subr.bf16.mxu0 %v6285_v13 }
 0xe81   :  { %2205 = vmatpush1.bf16.msra.mxu0 %v6283_v40 }
 0xe82   :  { %2206 = vmatprep.subr.bf16.mxu0 %v6288_v43 }
 0xe85   :  { %2207 = vmatpush1.bf16.msra.mxu0 %v6286_v14 }
 0xf38   :  { %v5959_v29 = vpop.f32.mrf.mxu0 }
 0xf39   :  { %v1985_v34 = vpack.c.bf16 %v5959_v29, %v5959_v29 }
 0xf3a   :  { %v1970_v30 = vpop.f32.mrf.mxu0 }
 0xf3c   :  { %v5960_v31 = vpop.f32.mrf.mxu0 }
 0xf3d   :  { %v5134_v31 = vld [vmem:[%s7676_s12] ss:$0 sm:$0xff] }
 0xf3e   :  { %v1973_v32 = vpop.f32.mrf.mxu0 }
 0xf3f   :  { %v1984_v33 = vpack.c.bf16 %v1973_v32, %v1970_v30 }
 0xf41   :  { %5963 = vmatprep.mubr.msk.bf16.mxu1 %vm402_vm3, %v1984_v33 }
 0xf42   :  { %5964 = vmatmul.mubr.msk.bf16.vlgmr.msra.gmra.mxu1 %vm402_vm3, %v1985_v34 }
0x1002   :  { %v5965_v35 = vpop.f32.mrf.mxu1 }
0x1003   :  { %v2051_v0 = vadd.f32 %v5965_v35, %v7013_v37  ;;  %v6535_v37 = vld [vmem:[#allocation2 + $0x8] sm:$0xff] }
0x1004   :  { %v2035_v38 = vpop.f32.mrf.mxu1 }
0x1005   :  { %v2049_v41 = vadd.f32 %v2035_v38, %v7015_v39  ;;  %v2054_v46 = vadd.f32 %v6533_v44, %v2051_v0  ;;  %v6289_v44 = vld [vmem:[%s7679_s15 + $0x78] sm:$0xff]  }
0x1006   :  { %v5966_v42 = vpop.f32.mrf.mxu1  ;;  %5563 = vmatprep.subr.bf16.mxu1 %v6289_v44 }
0x1007   :  { %v2052_v48 = vadd.f32 %v6534_v47, %v2049_v41  ;;  %v7050_v49 = vadd.f32 %v5132_v54, %v2054_v46  ;;  %v6290_v46 = vld [vmem:[%s7679_s15 + $0x38] sm:$0xff]   ;;  %v6291_v47 = vld [vmem:[%s7679_s15 + $0x70] sm:$0xff]  }
0x1008   :  { %v2038_v55 = vpop.f32.mrf.mxu1  ;;  %5564 = vmatpush3.bf16.msra.mxu1 %v6290_v46 }
0x1009   :  { %v7047_v63 = vadd.f32 %v5132_v54, %v2052_v48  ;;  %v2050_v2 = vadd.f32 %v2038_v55, %v7019_v45  ;;  %v2073_v52 = vsel %vm97_vm2, %v7050_v49, 0.0  ;;  %v6292_v48 = vld [vmem:[%s7679_s15 + $0x30] sm:$0xff]   ;;  %5565 = vmatprep.subr.bf16.mxu1 %v6291_v47  ;;  %v6294_v55 = vld [vmem:[%s7679_s15 + $0x28] sm:$0xff]  }
0x100b   :  { %v2053_v58 = vadd.f32 %v6535_v37, %v2050_v2  ;;  %v2067_v39 = vsel %vm72_vm1, %v7047_v63, 0.0  ;;  %v6295_v2 = vld [vmem:[%s7679_s15 + $0x60] sm:$0xff]  }
0x100c   :  { %2068 = vadd.xlane.f32.xlu0 %v2067_v39  ;;  %5566 = vmatpush3.bf16.msra.mxu1 %v6292_v48  ;;  %v6296_v37 = vld [vmem:[%s7679_s15 + $0x20] sm:$0xff]   ;;  %v6298_v39 = vld [vmem:[%s7679_s15 + $0x18] sm:$0xff]  }
0x100d   :  { %v7054_v4 = vadd.f32 %v5132_v54, %v2053_v58  ;;  %v6293_v54 = vld [vmem:[%s7679_s15 + $0x68] sm:$0xff]   ;;  %v6297_v58 = vld [vmem:[%s7679_s15 + $0x58] sm:$0xff]  }
0x100e   :  { %5567 = vmatprep.subr.bf16.mxu1 %v6293_v54 }
0x100f   :  { %v2070_v51 = vsel %vm72_vm1, %v7054_v4, 0.0 }
0x1010   :  { %2071 = vadd.xlane.f32.xlu1 %v2070_v51  ;;  %2074 = vadd.xlane.f32.xlu0 %v2073_v52  ;;  %v6299_v51 = vld [vmem:[%s7679_s15 + $0x50] sm:$0xff]  }
0x1011   :  { %5568 = vmatpush3.bf16.msra.mxu1 %v6294_v55  ;;  %v6300_v52 = vld [vmem:[%s7679_s15 + $0x10] sm:$0xff]  }
0x1012   :  { %5569 = vmatprep.subr.bf16.mxu1 %v6295_v2 }
0x1015   :  { %5570 = vmatpush3.bf16.msra.mxu1 %v6296_v37 }
0x1016   :  { %5571 = vmatprep.subr.bf16.mxu1 %v6297_v58 }
0x1019   :  { %5572 = vmatpush3.bf16.msra.mxu1 %v6298_v39 }
0x101a   :  { %5573 = vmatprep.subr.bf16.mxu1 %v6299_v51 }
0x101d   :  { %5574 = vmatpush3.bf16.msra.mxu1 %v6300_v52 }
0x1095   :  { %v2069_v53 = vpop.xlane.xlu0 %2068 }
0x1096   :  { %v2076_v45 = vmul.f32 0.015625, %v2069_v53  ;;  %v6301_v53 = vld [vmem:[%s7679_s15 + $0x48] sm:$0xff]  }
0x1097   :  { %5575 = vmatprep.subr.bf16.mxu1 %v6301_v53 }
0x1098   :  { %v2079_v57 = vsub.f32 %v7047_v63, %v2076_v45  ;;  %v6302_v45 = vld [vmem:[%s7679_s15 + $0x8] sm:$0xff]  }
0x1099   :  { %v2072_v59 = vpop.xlane.xlu1 %2071  ;;  %v2075_v60 = vpop.xlane.xlu0 %2074  ;;  %5576 = vmatpush3.bf16.msra.mxu1 %v6302_v45 }
0x109a   :  { %v2077_v61 = vmul.f32 0.015625, %v2072_v59  ;;  %v2078_v50 = vmul.f32 0.015625, %v2075_v60  ;;  %v2082_v56 = vmul.f32 %v2079_v57, %v2079_v57  ;;  %v6304_v59 = vld [vmem:[%s7679_s15] sm:$0xff]   ;;  %v2136_v60 = vlaneseq }
0x109c   :  { %v2080_v62 = vsub.f32 %v7054_v4, %v2077_v61  ;;  %v2081_v3 = vsub.f32 %v7050_v49, %v2078_v50  ;;  %v2085_v5 = vsel %vm72_vm1, %v2082_v56, 0.0  ;;  %v7148_v61 = vshrl.u32 %v2136_v60, 7  ;;  %v2134_v56 = vld [vmem:[%s7698_s21] sm:$0x3] }
0x109d   :  { %2086 = vadd.xlane.f32.xlu1 %v2085_v5 }
0x109e   :  { %v2083_v6 = vmul.f32 %v2080_v62, %v2080_v62  ;;  %v2084_v7 = vmul.f32 %v2081_v3, %v2081_v3  ;;  %v2138_v50 = vsub.s32 0, %v7148_v61 }
0x10a0   :  { %v2088_v8 = vsel %vm72_vm1, %v2083_v6, 0.0  ;;  %v2091_v9 = vsel %vm97_vm2, %v2084_v7, 0.0 }
0x10a1   :  { %2089 = vadd.xlane.f32.xlu0 %v2088_v8  ;;  %2092 = vadd.xlane.f32.xlu1 %v2091_v9 }
0x1126   :  { %v2087_v16 = vpop.xlane.xlu1 %2086 }
0x1127   :  { %v2094_v17 = vmul.f32 0.015625, %v2087_v16 }
0x1129   :  { %v2097_v18 = vadd.f32 1e-05, %v2094_v17 }
0x112a   :  { %v2093_v19 = vpop.xlane.xlu1 %2092  ;;  %v2090_v20 = vpop.xlane.xlu0 %2089 }
0x112b   :  { %6439 = vrsqrt.f32 %v2097_v18  ;;  %v2096_v21 = vmul.f32 0.015625, %v2093_v19  ;;  %v2095_v22 = vmul.f32 0.015625, %v2090_v20 }
0x112d   :  { %v2099_v23 = vadd.f32 1e-05, %v2096_v21  ;;  %v2098_v24 = vadd.f32 1e-05, %v2095_v22 }
0x112f   :  { %6441 = vrsqrt.f32 %v2099_v23 }
0x1130   :  { %6443 = vrsqrt.f32 %v2098_v24 }
0x1138   :  { %v6440_v25 = vpop.eup %6439 }
0x1139   :  { %v2103_v26 = vmul.f32 %v6440_v25, %v2079_v57  ;;  %v6303_v57 = vld [vmem:[%s7679_s15 + $0x40] sm:$0xff]  }
0x113a   :  { %5577 = vmatprep.subr.bf16.mxu1 %v6303_v57 }
0x113b   :  { %v2112_v30 = vmul.f32 %v5133_v27, %v2103_v26  ;;  %5578 = vmatpush3.bf16.msra.mxu1 %v6304_v59 }
0x113c   :  { %v6442_v1 = vpop.eup %6441 }
0x113d   :  { %v6444_v28 = vpop.eup %6443  ;;  %v2105_v33 = vmul.f32 %v6442_v1, %v2081_v3  ;;  %v2121_v34 = vadd.f32 %v5134_v31, %v2112_v30  ;;  %v2139_v3 = vrot.slane %v2134_v56, %v2138_v50 }
0x113e   :  { %v2104_v29 = vmul.f32 %v6444_v28, %v2080_v62  ;;  %v2142_v62 = vsub.s32 1, %v7148_v61 }
0x113f   :  { %v2114_v38 = vmul.f32 %v5133_v27, %v2105_v33 }
0x1140   :  { %v2113_v32 = vmul.f32 %v5133_v27, %v2104_v29  ;;  %v2143_v5 = vrot.slane %v2134_v56, %v2142_v62 }
0x1141   :  { %v2123_v41 = vadd.f32 %v5134_v31, %v2114_v38 }
0x1142   :  { %v2122_v35 = vadd.f32 %v5134_v31, %v2113_v32 }
0x1143   :  { %v2125_v42 = vpack.c.bf16 %v2123_v41, %v2123_v41 }
0x1144   :  { %v2124_v0 = vpack.c.bf16 %v2122_v35, %v2121_v34 }
0x1146   :  { %5143 = vmatmul.mubr.msk.bf16.vlgmr.msra.gmra.mxu0 %vm72_vm1, %v2124_v0 }
0x1147   :  { %2234 = vmatprep.mubr.bf16.mxu0 %v6561_v15 }
0x114e   :  { %5144 = vmatmul.mubr.msk.bf16.gmra.mxu0 %vm72_vm1, %v2125_v42 }
0x1206   :  { %v2226_v6 = vpop.f32.mrf.mxu0 }
0x1207   :  { %v2227_v7 = vadd.f32 %v2226_v6, %v2139_v3 }
0x1208   :  { %v2228_v8 = vpop.f32.mrf.mxu0 }
0x1209   :  { %v2249_v9 = vmul.f32 0.044715, %v2227_v7  ;;  %v2229_v36 = vadd.f32 %v2228_v8, %v2143_v5 }
0x120a   :  { %v2230_v10 = vpop.f32.mrf.mxu0 }
0x120b   :  { %v2255_v11 = vmul.f32 %v2249_v9, %v2227_v7  ;;  %v2250_v12 = vmul.f32 0.044715, %v2229_v36  ;;  %v2231_v13 = vadd.f32 %v2230_v10, %v2139_v3  ;;  %v2244_v59 = vmul.f32 0.5, %v2229_v36 }
0x120c   :  { %v2232_v40 = vpop.f32.mrf.mxu0 }
0x120d   :  { %v2261_v43 = vmul.f32 %v2255_v11, %v2227_v7  ;;  %v2256_v14 = vmul.f32 %v2250_v12, %v2229_v36  ;;  %v2251_v16 = vmul.f32 0.044715, %v2231_v13  ;;  %v2233_v17 = vadd.f32 %v2232_v40, %v2143_v5 }
0x120e   :  { %v2236_v18 = vpop.f32.mrf.mxu0  ;;  %v2245_v45 = vmul.f32 0.5, %v2231_v13 }
0x120f   :  { %v2267_v19 = vadd.f32 %v2261_v43, %v2227_v7  ;;  %v2262_v20 = vmul.f32 %v2256_v14, %v2229_v36  ;;  %v2257_v21 = vmul.f32 %v2251_v16, %v2231_v13  ;;  %v2252_v22 = vmul.f32 0.044715, %v2233_v17 }
0x1210   :  { %v2237_v23 = vadd.f32 %v2236_v18, %v2139_v3  ;;  %v2238_v24 = vpop.f32.mrf.mxu0  ;;  %v2246_v60 = vmul.f32 0.5, %v2233_v17  ;;  %v2243_v3 = vmul.f32 0.5, %v2227_v7 }
0x1211   :  { %v2273_v25 = vmul.f32 0.7978846, %v2267_v19  ;;  %v2263_v26 = vmul.f32 %v2257_v21, %v2231_v13  ;;  %v2258_v27 = vmul.f32 %v2252_v22, %v2233_v17  ;;  %v2239_v1 = vadd.f32 %v2238_v24, %v2143_v5 }
0x1212   :  { %v2253_v28 = vmul.f32 0.044715, %v2237_v23  ;;  %v2240_v29 = vpop.f32.mrf.mxu0  ;;  %v2268_v30 = vadd.f32 %v2262_v20, %v2229_v36  ;;  %v5145_v20 = vld [vmem:[%s7680_s16] ss:$0 sm:$0xff] }
0x1213   :  { %v2269_v31 = vadd.f32 %v2263_v26, %v2231_v13  ;;  %v2264_v32 = vmul.f32 %v2258_v27, %v2233_v17  ;;  %v2254_v33 = vmul.f32 0.044715, %v2239_v1  ;;  %6445 = vtanh.f32 %v2273_v25 }
0x1214   :  { %v2259_v34 = vmul.f32 %v2253_v28, %v2237_v23  ;;  %v2241_v35 = vpop.f32.mrf.mxu0  ;;  %v2274_v0 = vmul.f32 0.7978846, %v2268_v30  ;;  %v2248_v40 = vmul.f32 0.5, %v2239_v1  ;;  %v2247_v13 = vmul.f32 0.5, %v2237_v23 }
0x1215   :  { %v2275_v38 = vmul.f32 0.7978846, %v2269_v31  ;;  %v2260_v41 = vmul.f32 %v2254_v33, %v2239_v1  ;;  %v2270_v42 = vadd.f32 %v2264_v32, %v2233_v17 }
0x1216   :  { %6447 = vtanh.f32 %v2274_v0  ;;  %v2265_v44 = vmul.f32 %v2259_v34, %v2237_v23 }
0x1217   :  { %6449 = vtanh.f32 %v2275_v38  ;;  %v2276_v46 = vmul.f32 0.7978846, %v2270_v42  ;;  %v2266_v47 = vmul.f32 %v2260_v41, %v2239_v1 }
0x1218   :  { %v2271_v48 = vadd.f32 %v2265_v44, %v2237_v23 }
0x1219   :  { %6451 = vtanh.f32 %v2276_v46  ;;  %v2272_v54 = vadd.f32 %v2266_v47, %v2239_v1 }
0x121a   :  { %v2277_v55 = vmul.f32 0.7978846, %v2271_v48 }
0x121b   :  { %v2278_v2 = vmul.f32 0.7978846, %v2272_v54 }
0x121c   :  { %6453 = vtanh.f32 %v2277_v55 }
0x121d   :  { %6455 = vtanh.f32 %v2278_v2 }
0x1220   :  { %v6446_v37 = vpop.eup %6445 }
0x1221   :  { %v2285_v57 = vadd.f32 1.0, %v6446_v37 }
0x1223   :  { %v6448_v58 = vpop.eup %6447  ;;  %v2291_v11 = vmul.f32 %v2285_v57, %v2243_v3  ;;  %v6308_v57 = vld [vmem:[%s7672_s8 + $0x90] sm:$0xff]   ;;  %v6312_v3 = vld [vmem:[%s7672_s8 + $0x80] sm:$0xff]  }
0x1224   :  { %v6450_v39 = vpop.eup %6449  ;;  %v2286_v51 = vadd.f32 1.0, %v6448_v58 }
0x1225   :  { %v2287_v52 = vadd.f32 1.0, %v6450_v39 }
0x1226   :  { %v6452_v53 = vpop.eup %6451  ;;  %v2292_v8 = vmul.f32 %v2286_v51, %v2244_v59  ;;  %v6309_v59 = vld [vmem:[%s7670_s6 + $0x88] sm:$0xff]  }
0x1227   :  { %v2288_v56 = vadd.f32 1.0, %v6452_v53  ;;  %v2293_v5 = vmul.f32 %v2287_v52, %v2245_v45  ;;  %v6305_v52 = vld [vmem:[%s7670_s6 + $0x98] sm:$0xff]   ;;  %v6307_v45 = vld [vmem:[%s7670_s6 + $0x90] sm:$0xff]  }
0x1228   :  { %v6306_v53 = vld [vmem:[%s7672_s8 + $0x98] sm:$0xff]   ;;  %5967 = vmatprep.subr.bf16.mxu0 %v6305_v52 }
0x1229   :  { %v6454_v6 = vpop.eup %6453  ;;  %v2294_v9 = vmul.f32 %v2288_v56, %v2246_v60  ;;  %v2297_v14 = vpack.c.bf16 %v2293_v5, %v2291_v11  ;;  %5968 = vmatpush3.bf16.msra.mxu0 %v6305_v52  ;;  %5991 = vmatprep.subr.bf16.mxu1 %v6306_v53  ;;  %v6310_v60 = vld [vmem:[%s7672_s8 + $0x88] sm:$0xff]   ;;  %v6311_v56 = vld [vmem:[%s7670_s6 + $0x80] sm:$0xff]   ;;  %v6313_v5 = vld [vmem:[%s7671_s7 + $0x98] sm:$0xff]  }
0x122a   :  { %v6456_v10 = vpop.eup %6455  ;;  %v2289_v16 = vadd.f32 1.0, %v6454_v6  ;;  %5969 = vmatprep.subr.bf16.mxu0 %v6307_v45 }
0x122b   :  { %v2298_v12 = vpack.c.bf16 %v2294_v9, %v2292_v8  ;;  %v2290_v43 = vadd.f32 1.0, %v6456_v10 }
0x122c   :  { %v2295_v36 = vmul.f32 %v2289_v16, %v2247_v13  ;;  %v5164_v13 = vld [vmem:[%s7668_s4 + $0x1] ss:$0 sm:$0xff] }
0x122d   :  { %2468 = vmatprep.mubr.bf16.mxu1 %v2298_v12  ;;  %v2296_v18 = vmul.f32 %v2290_v43, %v2248_v40  ;;  %5970 = vmatpush3.bf16.msra.mxu0 %v6307_v45  ;;  %v6318_v45 = vld [vmem:[%s7671_s7 + $0xb0] sm:$0xff]  }
0x122e   :  { %2469 = vmatmul.mubr.bf16.vlgmr.msra.gmra.mxu1 %v2297_v14  ;;  %v2299_v17 = vpack.c.bf16 %v2295_v36, %v2295_v36  ;;  %5971 = vmatprep.subr.bf16.mxu0 %v6309_v59 }
0x122f   :  { %v2300_v19 = vpack.c.bf16 %v2296_v18, %v2296_v18  ;;  %5992 = vmatpush3.bf16.msra.mxu1 %v6306_v53 }
0x1230   :  { %5993 = vmatprep.subr.bf16.mxu1 %v6308_v57 }
0x1231   :  { %2476 = vmatprep.mubr.bf16.mxu1 %v2300_v19  ;;  %5972 = vmatpush3.bf16.msra.mxu0 %v6309_v59  ;;  %v6320_v59 = vld [vmem:[%s7671_s7 + $0xa0] sm:$0xff]  }
0x1232   :  { %5973 = vmatprep.subr.bf16.mxu0 %v6311_v56 }
0x1233   :  { %5994 = vmatpush3.bf16.msra.mxu1 %v6308_v57  ;;  %v6319_v57 = vld [vmem:[%s7671_s7 + $0xa8] sm:$0xff]  }
0x1234   :  { %5995 = vmatprep.subr.bf16.mxu1 %v6310_v60 }
0x1235   :  { %5974 = vmatpush3.bf16.msra.mxu0 %v6311_v56 }
0x1236   :  { %2477 = vmatmul.mubr.bf16.gmra.mxu1 %v2299_v17  ;;  %5979 = vmatprep.subr.bf16.mxu0 %v6313_v5 }
0x1237   :  { %5996 = vmatpush3.bf16.msra.mxu1 %v6310_v60 }
0x1238   :  { %5997 = vmatprep.subr.bf16.mxu1 %v6312_v3 }
0x123b   :  { %5998 = vmatpush3.bf16.msra.mxu1 %v6312_v3 }
0x12ee   :  { %v5579_v7 = vpop.f32.mrf.mxu1 }
0x12f0   :  { %v5580_v21 = vpop.f32.mrf.mxu1 }
0x12f1   :  { %v5581_v22 = vadd.f32 %v5580_v21, %v5579_v7  ;;  %v5165_v7 = vld [vmem:[%s7669_s5 + $0x1] ss:$0 sm:$0xff] }
0x12f2   :  { %v5582_v24 = vpop.f32.mrf.mxu1 }
0x12f3   :  { %v2471_v25 = vadd.f32 %v5581_v22, %v5145_v20 }
0x12f4   :  { %v5583_v26 = vpop.f32.mrf.mxu1 }
0x12f5   :  { %v7163_v27 = vadd.f32 %v2471_v25, %v7047_v63  ;;  %v5584_v1 = vadd.f32 %v5583_v26, %v5582_v24 }
0x12f6   :  { %v5585_v23 = vpop.f32.mrf.mxu1 }
0x12f7   :  { %v2474_v28 = vadd.f32 %v5584_v1, %v5145_v20  ;;  %v2491_v29 = vsel %vm72_vm1, %v7163_v27, 0.0 }
0x12f8   :  { %v5586_v30 = vpop.f32.mrf.mxu1  ;;  %2492 = vadd.xlane.f32.xlu0 %v2491_v29  ;;  %v6314_v29 = vld [vmem:[%s7671_s7 + $0x90] sm:$0xff]  }
0x12f9   :  { %v7168_v31 = vadd.f32 %v2474_v28, %v7054_v4  ;;  %v5587_v32 = vadd.f32 %v5586_v30, %v5585_v23  ;;  %v6315_v30 = vld [vmem:[%s7671_s7 + $0x88] sm:$0xff]  }
0x12fa   :  { %v5588_v33 = vpop.f32.mrf.mxu1 }
0x12fb   :  { %v2479_v34 = vadd.f32 %v5587_v32, %v5145_v20  ;;  %v2494_v35 = vsel %vm72_vm1, %v7168_v31, 0.0  ;;  %v6316_v32 = vld [vmem:[%s7671_s7 + $0x80] sm:$0xff]  }
0x12fc   :  { %v5589_v0 = vpop.f32.mrf.mxu1  ;;  %2495 = vadd.xlane.f32.xlu1 %v2494_v35 }
0x12fd   :  { %v7173_v63 = vadd.f32 %v2479_v34, %v7050_v49 }
0x12ff   :  { %v2497_v38 = vsel %vm97_vm2, %v7173_v63, 0.0 }
0x1300   :  { %2498 = vadd.xlane.f32.xlu0 %v2497_v38 }
0x1381   :  { %v2493_v41 = vpop.xlane.xlu0 %2492 }
0x1382   :  { %v2500_v42 = vmul.f32 0.015625, %v2493_v41 }
0x1384   :  { %v2503_v4 = vsub.f32 %v7163_v27, %v2500_v42 }
0x1385   :  { %v2496_v44 = vpop.xlane.xlu1 %2495 }
0x1386   :  { %v2501_v46 = vmul.f32 0.015625, %v2496_v44  ;;  %v2506_v47 = vmul.f32 %v2503_v4, %v2503_v4 }
0x1388   :  { %v2504_v48 = vsub.f32 %v7168_v31, %v2501_v46  ;;  %v2509_v54 = vsel %vm72_vm1, %v2506_v47, 0.0 }
0x1389   :  { %2510 = vadd.xlane.f32.xlu1 %v2509_v54  ;;  %v2499_v55 = vpop.xlane.xlu0 %2498 }
0x138a   :  { %v2502_v2 = vmul.f32 0.015625, %v2499_v55  ;;  %v2507_v49 = vmul.f32 %v2504_v48, %v2504_v48 }
0x138c   :  { %v2505_v37 = vsub.f32 %v7173_v63, %v2502_v2  ;;  %v2512_v58 = vsel %vm72_vm1, %v2507_v49, 0.0 }
0x138d   :  { %2513 = vadd.xlane.f32.xlu0 %v2512_v58 }
0x138e   :  { %v2508_v39 = vmul.f32 %v2505_v37, %v2505_v37 }
0x1390   :  { %v2515_v51 = vsel %vm97_vm2, %v2508_v39, 0.0 }
0x1391   :  { %2516 = vadd.xlane.f32.xlu1 %v2515_v51  ;;  %v6317_v51 = vld [vmem:[%s7671_s7 + $0xb8] sm:$0xff]  }
0x1412   :  { %v2511_v6 = vpop.xlane.xlu1 %2510 }
0x1413   :  { %v2518_v8 = vmul.f32 0.015625, %v2511_v6 }
0x1415   :  { %v2521_v9 = vadd.f32 1e-05, %v2518_v8  ;;  %v7268_v8 = vld [vmem:[%s7697_s29] sm:$0xff] }
0x1416   :  { %v2514_v10 = vpop.xlane.xlu0 %2513 }
0x1417   :  { %6457 = vrsqrt.f32 %v2521_v9  ;;  %v2519_v11 = vmul.f32 0.015625, %v2514_v10 }
0x1419   :  { %v2522_v12 = vadd.f32 1e-05, %v2519_v11 }
0x141a   :  { %v2517_v40 = vpop.xlane.xlu1 %2516 }
0x141b   :  { %6459 = vrsqrt.f32 %v2522_v12  ;;  %v2520_v43 = vmul.f32 0.015625, %v2517_v40  ;;  %v7275_v40 = vld [vmem:[%s7697_s29 + $0x10] sm:$0x3] }
0x141d   :  { %v2523_v14 = vadd.f32 1e-05, %v2520_v43 }
0x141f   :  { %6461 = vrsqrt.f32 %v2523_v14  ;;  %v7281_v14 = vld [vmem:[%s7697_s29 + $0x8] sm:$0xff] }
0x1424   :  { %v6458_v16 = vpop.eup %6457 }
0x1425   :  { %v2527_v18 = vmul.f32 %v6458_v16, %v2503_v4 }
0x1427   :  { %v2536_v36 = vmul.f32 %v5164_v13, %v2527_v18 }
0x1428   :  { %v6460_v19 = vpop.eup %6459 }
0x1429   :  { %v2528_v17 = vmul.f32 %v6460_v19, %v2504_v48  ;;  %v2545_v22 = vadd.f32 %v5165_v7, %v2536_v36 }
0x142b   :  { %v2537_v20 = vmul.f32 %v5164_v13, %v2528_v17 }
0x142c   :  { %v6462_v21 = vpop.eup %6461 }
0x142d   :  { %v2546_v24 = vadd.f32 %v5165_v7, %v2537_v20  ;;  %v2529_v25 = vmul.f32 %v6462_v21, %v2505_v37 }
0x142f   :  { %v7216_v26 = vpack.c.bf16 %v2546_v24, %v2545_v22  ;;  %v2538_v1 = vmul.f32 %v5164_v13, %v2529_v25 }
0x1431   :  { %v2547_v23 = vadd.f32 %v5165_v7, %v2538_v1  ;;  %5975 = vmatprep.mubr.msk.bf16.mxu0 %vm72_vm1, %v7216_v26  ;;  %5999 = vmatprep.mubr.msk.bf16.mxu1 %vm72_vm1, %v7216_v26 }
0x1433   :  { %v7222_v28 = vpack.c.bf16 %v2547_v23, %v2547_v23 }
0x1435   :  { %5976 = vmatmul.mubr.msk.bf16.vlgmr.msra.gmra.mxu0 %vm72_vm1, %v7222_v28  ;;  %6000 = vmatmul.mubr.msk.bf16.vlgmr.msra.gmra.mxu1 %vm72_vm1, %v7222_v28 }
0x1436   :  { %5980 = vmatpush3.bf16.msra.mxu0 %v6313_v5  ;;  %5987 = vmatprep.mubr.msk.bf16.mxu0 %vm72_vm1, %v7216_v26 }
0x1437   :  { %5981 = vmatprep.subr.bf16.mxu0 %v6314_v29 }
0x143a   :  { %5982 = vmatpush3.bf16.msra.mxu0 %v6314_v29 }
0x143b   :  { %5983 = vmatprep.subr.bf16.mxu0 %v6315_v30 }
0x143e   :  { %5984 = vmatpush3.bf16.msra.mxu0 %v6315_v30 }
0x143f   :  { %5985 = vmatprep.subr.bf16.mxu0 %v6316_v32 }
0x1442   :  { %5986 = vmatpush3.bf16.msra.mxu0 %v6316_v32 }
0x1445   :  { %5988 = vmatmul.mubr.msk.bf16.vlgmr.msra.gmra.mxu0 %vm72_vm1, %v7222_v28 }
0x14f5   :  { %v5977_v33 = vpop.f32.mrf.mxu0  ;;  %v6001_v34 = vpop.f32.mrf.mxu1 }
0x14f6   :  { %v2905_v35 = vpack.c.bf16 %v6001_v34, %v6001_v34  ;;  %v2800_v53 = vpack.c.bf16 %v5977_v33, %v5977_v33 }
0x14f7   :  { %v2623_v0 = vpop.f32.mrf.mxu0  ;;  %v2785_v38 = vpop.f32.mrf.mxu1 }
0x14f8   :  { %v2913_v41 = vsel %vm514_vm4, %v2905_v35, 0  ;;  %6213 = vmatprep.subr.msk.bf16.mxu1 %vm514_vm4, %v2905_v35 }
0x14f9   :  { %v5978_v42 = vpop.f32.mrf.mxu0  ;;  %v6002_v4 = vpop.f32.mrf.mxu1  ;;  %6012 = vmatpush3.bf16.msra.mxu1 %v2913_v41 }
0x14fb   :  { %v2626_v44 = vpop.f32.mrf.mxu0  ;;  %v2788_v46 = vpop.f32.mrf.mxu1 }
0x14fc   :  { %v2799_v47 = vpack.c.bf16 %v2626_v44, %v2623_v0  ;;  %v2904_v48 = vpack.c.bf16 %v2788_v46, %v2785_v38  ;;  %v6321_v46 = vld [vmem:[%s7670_s6 + $0xb8] sm:$0xff]  }
0x14fe   :  { %6007 = vmatprep.mubr.msk.bf16.mxu0 %vm402_vm3, %v2799_v47  ;;  %6013 = vmatprep.subr.bf16.mxu1 %v2904_v48 }
0x14ff   :  { %6014 = vmatpush3.bf16.msra.mxu1 %v2904_v48 }
0x1500   :  { %6019 = vmatprep.subr.bf16.mxu1 %v6321_v46 }
0x1505   :  { %v5989_v54 = vpop.f32.mrf.mxu0 }
0x1506   :  { %v2802_v55 = vpack.c.bf16 %v5989_v54, %v5989_v54 }
0x1507   :  { %v2704_v2 = vpop.f32.mrf.mxu0 }
0x1508   :  { %v2813_v49 = vsel %vm402_vm3, %v2802_v55, 0  ;;  %6211 = vmatprep.subr.msk.bf16.mxu0 %vm402_vm3, %v2802_v55 }
0x1509   :  { %v5990_v37 = vpop.f32.mrf.mxu0  ;;  %6004 = vmatpush3.bf16.xpose.msra.mxu0 %v2813_v49 }
0x150b   :  { %v2707_v58 = vpop.f32.mrf.mxu0 }
0x150c   :  { %v2801_v39 = vpack.c.bf16 %v2707_v58, %v2704_v2 }
0x150e   :  { %6212 = vmatprep.subr.msk.bf16.mxu0 %vm402_vm3, %v2801_v39  ;;  %v2810_v52 = vsel %vm402_vm3, %v2801_v39, 0 }
0x1511   :  { %6006 = vmatpush3.bf16.xpose.msra.mxu0 %v2810_v52 }
0x1512   :  { %6031 = vmatprep.subr.bf16.mxu0 %v6317_v51 }
0x1518   :  { %6008 = vmatmul.mubr.msk.bf16.vlgmr.msra.gmra.mxu0 %vm402_vm3, %v2800_v53  ;;  %v6322_v53 = vld [vmem:[%s7670_s6 + $0xb0] sm:$0xff]  }
0x1519   :  { %6032 = vmatpush3.bf16.msra.mxu0 %v6317_v51  ;;  %6039 = vmatprep.mubr.msk.bf16.mxu0 %vm72_vm1, %v7216_v26 }
0x151a   :  { %6033 = vmatprep.subr.bf16.mxu0 %v6318_v45 }
0x151d   :  { %6034 = vmatpush3.bf16.msra.mxu0 %v6318_v45  ;;  %v6323_v45 = vld [vmem:[%s7670_s6 + $0xa8] sm:$0xff]  }
0x151e   :  { %6035 = vmatprep.subr.bf16.mxu0 %v6319_v57 }
0x1521   :  { %6036 = vmatpush3.bf16.msra.mxu0 %v6319_v57  ;;  %v6324_v57 = vld [vmem:[%s7670_s6 + $0xa0] sm:$0xff]  }
0x1522   :  { %6037 = vmatprep.subr.bf16.mxu0 %v6320_v59 }
0x1525   :  { %6038 = vmatpush3.bf16.msra.mxu0 %v6320_v59  ;;  %v6325_v59 = vld [vmem:[%s7672_s8 + $0xb8] sm:$0xff]  }
0x1528   :  { %6040 = vmatmul.mubr.msk.bf16.vlgmr.msra.gmra.mxu0 %vm72_vm1, %v7222_v28 }
0x15d8   :  { %v6009_v60 = vpop.f32.mrf.mxu0 }
0x15d9   :  { %v2865_v3 = vmul.f32 0.25, %v6009_v60  ;;  %v6326_v60 = vld [vmem:[%s7672_s8 + $0xb0] sm:$0xff]  }
0x15da   :  { %v2849_v56 = vpop.f32.mrf.mxu0 }
0x15db   :  { %v2863_v5 = vmul.f32 0.25, %v2849_v56  ;;  %v2868_v43 = vadd.f32 %v7275_v40, %v2865_v3  ;;  %v6327_v56 = vld [vmem:[%s7672_s8 + $0xa8] sm:$0xff]   ;;  %v6328_v3 = vld [vmem:[%s7672_s8 + $0xa0] sm:$0xff]  }
0x15dc   :  { %v6010_v6 = vpop.f32.mrf.mxu0 }
0x15dd   :  { %v2866_v9 = vadd.f32 %v7268_v8, %v2863_v5  ;;  %v2875_v18 = vsel %vm476_vm6, %v2868_v43, -inf }
0x15de   :  { %v2852_v10 = vpop.f32.mrf.mxu0 }
0x15df   :  { %v2864_v11 = vmul.f32 0.25, %v2852_v10  ;;  %v2869_v12 = vsel %vm469_vm5, %v2866_v9, -inf }
0x15e0   :  { %2870 = vmax.xlane.f32.xlu0 %v2869_v12 }
0x15e1   :  { %v2867_v16 = vadd.f32 %v7281_v14, %v2864_v11 }
0x15e3   :  { %v2872_v13 = vsel %vm469_vm5, %v2867_v16, -inf }
0x15e4   :  { %2876 = vmax.xlane.f32.xlu0 %v2875_v18  ;;  %2873 = vmax.xlane.f32.xlu1 %v2872_v13 }
0x15e8   :  { %v6041_v19 = vpop.f32.mrf.mxu0 }
0x15e9   :  { %v3214_v36 = vpack.c.bf16 %v6041_v19, %v6041_v19 }
0x15ea   :  { %v3116_v17 = vpop.f32.mrf.mxu0 }
0x15eb   :  { %v3225_v7 = vsel %vm402_vm3, %v3214_v36, 0  ;;  %6214 = vmatprep.subr.msk.bf16.mxu0 %vm402_vm3, %v3214_v36 }
0x15ec   :  { %v6042_v20 = vpop.f32.mrf.mxu0  ;;  %6056 = vmatpush3.bf16.xpose.msra.mxu0 %v3225_v7 }
0x15ee   :  { %v3119_v21 = vpop.f32.mrf.mxu0 }
0x15ef   :  { %v3213_v22 = vpack.c.bf16 %v3119_v21, %v3116_v17 }
0x15f1   :  { %6215 = vmatprep.subr.msk.bf16.mxu0 %vm402_vm3, %v3213_v22  ;;  %v3222_v24 = vsel %vm402_vm3, %v3213_v22, 0 }
0x15f4   :  { %6058 = vmatpush3.bf16.xpose.msra.mxu0 %v3222_v24 }
0x1669   :  { %v2871_v25 = vpop.xlane.xlu0 %2870 }
0x166a   :  { %v2878_v1 = vsub.f32 %v2866_v9, %v2871_v25 }
0x166c   :  { %v2881_v23 = vmul.f32 1.442695, %v2878_v1 }
0x166d   :  { %v2877_v29 = vpop.xlane.xlu0 %2876  ;;  %v2874_v30 = vpop.xlane.xlu1 %2873 }
0x166e   :  { %6463 = vpow2.f32 %v2881_v23  ;;  %v2880_v32 = vsub.f32 %v2868_v43, %v2877_v29  ;;  %v2879_v33 = vsub.f32 %v2867_v16, %v2874_v30 }
0x1670   :  { %v2885_v34 = vmul.f32 1.442695, %v2880_v32  ;;  %v2883_v35 = vmul.f32 1.442695, %v2879_v33 }
0x1672   :  { %6465 = vpow2.f32 %v2885_v34 }
0x1673   :  { %6467 = vpow2.f32 %v2883_v35 }
0x167b   :  { %v6464_v0 = vpop.eup %6463 }
0x167c   :  { %v2887_v38 = vsel %vm469_vm5, %v6464_v0, 0.0 }
0x167d   :  { %2888 = vadd.xlane.f32.xlu1 %v2887_v38 }
0x167f   :  { %v6466_v41 = vpop.eup %6465 }
0x1680   :  { %v6468_v42 = vpop.eup %6467  ;;  %v2893_v4 = vsel %vm476_vm6, %v6466_v41, 0.0 }
0x1681   :  { %2894 = vadd.xlane.f32.xlu1 %v2893_v4  ;;  %v2890_v44 = vsel %vm469_vm5, %v6468_v42, 0.0 }
0x1682   :  { %2891 = vadd.xlane.f32.xlu0 %v2890_v44 }
0x1706   :  { %v2889_v47 = vpop.xlane.xlu1 %2888 }
0x1707   :  { %6469 = vrcp.f32 %v2889_v47 }
0x170a   :  { %v2895_v48 = vpop.xlane.xlu1 %2894 }
0x170b   :  { %v2892_v54 = vpop.xlane.xlu0 %2891  ;;  %6471 = vrcp.f32 %v2895_v48 }
0x170c   :  { %6473 = vrcp.f32 %v2892_v54 }
0x1714   :  { %v6470_v55 = vpop.eup %6469 }
0x1715   :  { %v2899_v58 = vmul.f32 %v6470_v55, %v6464_v0 }
0x1718   :  { %v6472_v2 = vpop.eup %6471 }
0x1719   :  { %v6474_v49 = vpop.eup %6473  ;;  %v2901_v37 = vmul.f32 %v6472_v2, %v6466_v41 }
0x171a   :  { %v2900_v39 = vmul.f32 %v6474_v49, %v6468_v42 }
0x171b   :  { %v2903_v51 = vpack.c.bf16 %v2901_v37, %v2901_v37 }
0x171c   :  { %v2902_v52 = vpack.c.bf16 %v2900_v39, %v2899_v58 }
0x171e   :  { %6015 = vmatprep.mubr.msk.bf16.mxu1 %vm469_vm5, %v2902_v52 }
0x171f   :  { %6016 = vmatmul.mubr.msk.bf16.vlgmr.msra.gmra.mxu1 %vm469_vm5, %v2903_v51 }
0x1720   :  { %6020 = vmatpush3.bf16.msra.mxu1 %v6321_v46  ;;  %6027 = vmatprep.mubr.msk.bf16.mxu1 %vm72_vm1, %v7216_v26 }
0x1721   :  { %6021 = vmatprep.subr.bf16.mxu1 %v6322_v53 }
0x1724   :  { %6022 = vmatpush3.bf16.msra.mxu1 %v6322_v53 }
0x1725   :  { %6023 = vmatprep.subr.bf16.mxu1 %v6323_v45 }
0x1728   :  { %6024 = vmatpush3.bf16.msra.mxu1 %v6323_v45  ;;  %v6329_v45 = vld [vmem:[%s7673_s9 + $0x20] sm:$0xff]  }
0x1729   :  { %6025 = vmatprep.subr.bf16.mxu1 %v6324_v57 }
0x172c   :  { %6026 = vmatpush3.bf16.msra.mxu1 %v6324_v57 }
0x172d   :  { %6043 = vmatprep.subr.bf16.mxu1 %v6325_v59 }
0x172f   :  { %6028 = vmatmul.mubr.msk.bf16.vlgmr.msra.gmra.mxu1 %vm72_vm1, %v7222_v28 }
0x1730   :  { %6044 = vmatpush3.bf16.msra.mxu1 %v6325_v59  ;;  %6051 = vmatprep.mubr.msk.bf16.mxu1 %vm72_vm1, %v7216_v26 }
0x1731   :  { %6045 = vmatprep.subr.bf16.mxu1 %v6326_v60 }
0x1734   :  { %6046 = vmatpush3.bf16.msra.mxu1 %v6326_v60 }
0x1735   :  { %6047 = vmatprep.subr.bf16.mxu1 %v6327_v56 }
0x1738   :  { %6048 = vmatpush3.bf16.msra.mxu1 %v6327_v56 }
0x1739   :  { %6049 = vmatprep.subr.bf16.mxu1 %v6328_v3 }
0x173c   :  { %6050 = vmatpush3.bf16.msra.mxu1 %v6328_v3 }
0x173f   :  { %6052 = vmatmul.mubr.msk.bf16.vlgmr.msra.gmra.mxu1 %vm72_vm1, %v7222_v28 }
0x17df   :  { %v7327_v5 = vpop.f32.mrf.mxu1 }
0x17e1   :  { %v7329_v6 = vpop.f32.mrf.mxu1 }
0x17e3   :  { %v6018_v9 = vpop.f32.mrf.mxu1 }
0x17e5   :  { %v7331_v10 = vpop.f32.mrf.mxu1 }
0x17e6   :  { %v2963_v11 = vpack.c.bf16 %v7331_v10, %v7329_v6  ;;  %v6332_v6 = vld [vmem:[%s7671_s7 + $0xc8] sm:$0xff]  }
0x17e7   :  { %v6334_v10 = vld [vmem:[%s7673_s9 + $0x28] sm:$0xff]  }
0x17e8   :  { %6071 = vmatprep.subr.bf16.mxu0 %v6334_v10 }
0x17ef   :  { %v6029_v12 = vpop.f32.mrf.mxu1 }
0x17f0   :  { %v3212_v19 = vpack.c.bf16 %v6029_v12, %v6029_v12 }
0x17f1   :  { %v3035_v43 = vpop.f32.mrf.mxu1 }
0x17f3   :  { %v6030_v16 = vpop.f32.mrf.mxu1 }
0x17f5   :  { %v3038_v18 = vpop.f32.mrf.mxu1 }
0x17f6   :  { %v3211_v13 = vpack.c.bf16 %v3038_v18, %v3035_v43 }
0x17f8   :  { %6059 = vmatprep.mubr.msk.bf16.mxu0 %vm402_vm3, %v3211_v13 }
0x17f9   :  { %6060 = vmatmul.mubr.msk.bf16.vlgmr.msra.gmra.mxu0 %vm402_vm3, %v3212_v19  ;;  %v6330_v19 = vld [vmem:[%s7671_s7 + $0xd8] sm:$0xff]  }
0x17fa   :  { %6072 = vmatpush3.bf16.msra.mxu0 %v6334_v10 }
0x17ff   :  { %v6053_v36 = vpop.f32.mrf.mxu1 }
0x1800   :  { %v3317_v17 = vpack.c.bf16 %v6053_v36, %v6053_v36  ;;  %v2964_v36 = vpack.c.bf16 %v7327_v5, %v7327_v5  ;;  %v6333_v5 = vld [vmem:[%s7671_s7 + $0xc0] sm:$0xff]  }
0x1801   :  { %v3197_v7 = vpop.f32.mrf.mxu1 }
0x1802   :  { %v3325_v20 = vsel %vm514_vm4, %v3317_v17, 0  ;;  %6216 = vmatprep.subr.msk.bf16.mxu1 %vm514_vm4, %v3317_v17  ;;  %v6331_v17 = vld [vmem:[%s7671_s7 + $0xd0] sm:$0xff]  }
0x1803   :  { %v6054_v21 = vpop.f32.mrf.mxu1  ;;  %6064 = vmatpush3.bf16.msra.mxu1 %v3325_v20 }
0x1805   :  { %v3200_v22 = vpop.f32.mrf.mxu1 }
0x1806   :  { %v3316_v24 = vpack.c.bf16 %v3200_v22, %v3197_v7 }
0x1808   :  { %6065 = vmatprep.subr.bf16.mxu1 %v3316_v24 }
0x1809   :  { %6066 = vmatpush3.bf16.msra.mxu1 %v3316_v24 }
0x180a   :  { %6077 = vmatprep.subr.bf16.mxu1 %v6329_v45 }
0x18b9   :  { %v6061_v25 = vpop.f32.mrf.mxu0 }
0x18ba   :  { %v3277_v23 = vmul.f32 0.25, %v6061_v25 }
0x18bb   :  { %v3261_v1 = vpop.f32.mrf.mxu0 }
0x18bc   :  { %v3275_v29 = vmul.f32 0.25, %v3261_v1  ;;  %v3280_v0 = vadd.f32 %v7275_v40, %v3277_v23  ;;  %v6336_v23 = vld [vmem:[%s7670_s6 + $0xd0] sm:$0xff]  }
0x18bd   :  { %v6062_v30 = vpop.f32.mrf.mxu0 }
0x18be   :  { %v3278_v32 = vadd.f32 %v7268_v8, %v3275_v29  ;;  %v3287_v41 = vsel %vm476_vm6, %v3280_v0, -inf }
0x18bf   :  { %v3264_v33 = vpop.f32.mrf.mxu0 }
0x18c0   :  { %v3276_v34 = vmul.f32 0.25, %v3264_v33  ;;  %v3281_v35 = vsel %vm469_vm5, %v3278_v32, -inf  ;;  %v6338_v33 = vld [vmem:[%s7670_s6 + $0xc0] sm:$0xff]  }
0x18c1   :  { %3282 = vmax.xlane.f32.xlu0 %v3281_v35 }
0x18c2   :  { %v3279_v38 = vadd.f32 %v7281_v14, %v3276_v34  ;;  %v6339_v34 = vld [vmem:[%s7672_s8 + $0xd8] sm:$0xff]  }
0x18c4   :  { %v3284_v42 = vsel %vm469_vm5, %v3279_v38, -inf }
0x18c5   :  { %3288 = vmax.xlane.f32.xlu0 %v3287_v41  ;;  %3285 = vmax.xlane.f32.xlu1 %v3284_v42 }
0x194a   :  { %v3283_v4 = vpop.xlane.xlu0 %3282 }
0x194b   :  { %v3290_v44 = vsub.f32 %v3278_v32, %v3283_v4  ;;  %v6337_v32 = vld [vmem:[%s7670_s6 + $0xc8] sm:$0xff]  }
0x194d   :  { %v3293_v46 = vmul.f32 1.442695, %v3290_v44 }
0x194e   :  { %v3289_v47 = vpop.xlane.xlu0 %3288  ;;  %v3286_v48 = vpop.xlane.xlu1 %3285 }
0x194f   :  { %6475 = vpow2.f32 %v3293_v46  ;;  %v3292_v54 = vsub.f32 %v3280_v0, %v3289_v47  ;;  %v3291_v55 = vsub.f32 %v3279_v38, %v3286_v48  ;;  %v6340_v38 = vld [vmem:[%s7672_s8 + $0xd0] sm:$0xff]   ;;  %v6341_v46 = vld [vmem:[%s7672_s8 + $0xc8] sm:$0xff]  }
0x1951   :  { %v3297_v2 = vmul.f32 1.442695, %v3292_v54  ;;  %v3295_v49 = vmul.f32 1.442695, %v3291_v55  ;;  %v6342_v54 = vld [vmem:[%s7672_s8 + $0xc0] sm:$0xff]  }
0x1953   :  { %6477 = vpow2.f32 %v3297_v2 }
0x1954   :  { %6479 = vpow2.f32 %v3295_v49 }
0x195c   :  { %v6476_v37 = vpop.eup %6475 }
0x195d   :  { %v3299_v58 = vsel %vm469_vm5, %v6476_v37, 0.0 }
0x195e   :  { %3300 = vadd.xlane.f32.xlu1 %v3299_v58 }
0x1960   :  { %v6478_v39 = vpop.eup %6477 }
0x1961   :  { %v6480_v51 = vpop.eup %6479  ;;  %v3305_v52 = vsel %vm476_vm6, %v6478_v39, 0.0 }
0x1962   :  { %3306 = vadd.xlane.f32.xlu1 %v3305_v52  ;;  %v3302_v53 = vsel %vm469_vm5, %v6480_v51, 0.0 }
0x1963   :  { %3303 = vadd.xlane.f32.xlu0 %v3302_v53 }
0x19e7   :  { %v3301_v57 = vpop.xlane.xlu1 %3300 }
0x19e8   :  { %6481 = vrcp.f32 %v3301_v57 }
0x19eb   :  { %v3307_v59 = vpop.xlane.xlu1 %3306 }
0x19ec   :  { %v3304_v60 = vpop.xlane.xlu0 %3303  ;;  %6483 = vrcp.f32 %v3307_v59 }
0x19ed   :  { %6485 = vrcp.f32 %v3304_v60 }
0x19f5   :  { %v6482_v56 = vpop.eup %6481 }
0x19f6   :  { %v3311_v43 = vmul.f32 %v6482_v56, %v6476_v37 }
0x19f9   :  { %v6484_v3 = vpop.eup %6483 }
0x19fa   :  { %v6486_v9 = vpop.eup %6485  ;;  %v3313_v12 = vmul.f32 %v6484_v3, %v6478_v39 }
0x19fb   :  { %v3312_v16 = vmul.f32 %v6486_v9, %v6480_v51 }
0x19fc   :  { %v3315_v18 = vpack.c.bf16 %v3313_v12, %v3313_v12 }
0x19fd   :  { %v3314_v13 = vpack.c.bf16 %v3312_v16, %v3311_v43 }
0x19ff   :  { %6067 = vmatprep.mubr.msk.bf16.mxu1 %vm469_vm5, %v3314_v13 }
0x1a00   :  { %6068 = vmatmul.mubr.msk.bf16.vlgmr.msra.gmra.mxu1 %vm469_vm5, %v3315_v18 }
0x1a01   :  { %6079 = vmatprep.mubr.msk.bf16.mxu1 %vm402_vm3, %v2963_v11  ;;  %6078 = vmatpush3.bf16.msra.mxu1 %v6329_v45  ;;  %v6335_v11 = vld [vmem:[%s7670_s6 + $0xd8] sm:$0xff]  }
0x1a02   :  { %6095 = vmatprep.subr.bf16.mxu1 %v6330_v19  ;;  %6083 = vmatprep.subr.bf16.mxu0 %v6335_v11 }
0x1a08   :  { %6080 = vmatmul.mubr.msk.bf16.vlgmr.msra.gmra.mxu1 %vm402_vm3, %v2964_v36 }
0x1a09   :  { %6096 = vmatpush3.bf16.msra.mxu1 %v6330_v19  ;;  %6103 = vmatprep.mubr.msk.bf16.mxu1 %vm72_vm1, %v7216_v26 }
0x1a0a   :  { %6097 = vmatprep.subr.bf16.mxu1 %v6331_v17 }
0x1a0d   :  { %6098 = vmatpush3.bf16.msra.mxu1 %v6331_v17 }
0x1a0e   :  { %6099 = vmatprep.subr.bf16.mxu1 %v6332_v6 }
0x1a11   :  { %6100 = vmatpush3.bf16.msra.mxu1 %v6332_v6 }
0x1a12   :  { %6101 = vmatprep.subr.bf16.mxu1 %v6333_v5 }
0x1a15   :  { %6102 = vmatpush3.bf16.msra.mxu1 %v6333_v5 }
0x1a18   :  { %6104 = vmatmul.mubr.msk.bf16.vlgmr.msra.gmra.mxu1 %vm72_vm1, %v7222_v28 }
0x1ac0   :  { %v6069_v7 = vpop.f32.mrf.mxu1 }
0x1ac1   :  { %v3376_v25 = vpack.c.bf16 %v6069_v7, %v6069_v7 }
0x1ac2   :  { %v3361_v20 = vpop.f32.mrf.mxu1 }
0x1ac4   :  { %v6070_v21 = vpop.f32.mrf.mxu1 }
0x1ac6   :  { %v3364_v22 = vpop.f32.mrf.mxu1 }
0x1ac7   :  { %v3375_v24 = vpack.c.bf16 %v3364_v22, %v3361_v20 }
0x1ac8   :  { %v7382_v1 = vpop.f32.mrf.mxu1 }
0x1ac9   :  { %6073 = vmatprep.mubr.msk.bf16.mxu0 %vm402_vm3, %v3375_v24 }
0x1aca   :  { %6074 = vmatmul.mubr.msk.bf16.vlgmr.msra.gmra.mxu0 %vm402_vm3, %v3376_v25  ;;  %v7389_v29 = vpop.f32.mrf.mxu1 }
0x1acb   :  { %6084 = vmatpush3.bf16.msra.mxu0 %v6335_v11  ;;  %6091 = vmatprep.mubr.msk.bf16.mxu0 %vm72_vm1, %v7216_v26 }
0x1acc   :  { %v6082_v30 = vpop.f32.mrf.mxu1  ;;  %6085 = vmatprep.subr.bf16.mxu0 %v6336_v23 }
0x1ace   :  { %v7402_v35 = vpop.f32.mrf.mxu1 }
0x1acf   :  { %6086 = vmatpush3.bf16.msra.mxu0 %v6336_v23 }
0x1ad0   :  { %6087 = vmatprep.subr.bf16.mxu0 %v6337_v32 }
0x1ad3   :  { %6088 = vmatpush3.bf16.msra.mxu0 %v6337_v32 }
0x1ad4   :  { %6089 = vmatprep.subr.bf16.mxu0 %v6338_v33 }
0x1ad7   :  { %6090 = vmatpush3.bf16.msra.mxu0 %v6338_v33 }
0x1ad8   :  { %v6105_v0 = vpop.f32.mrf.mxu1  ;;  %6107 = vmatprep.subr.bf16.mxu0 %v6339_v34 }
0x1ad9   :  { %v3746_v41 = vpack.c.bf16 %v6105_v0, %v6105_v0 }
0x1ada   :  { %6092 = vmatmul.mubr.msk.bf16.vlgmr.msra.gmra.mxu0 %vm72_vm1, %v7222_v28  ;;  %v3648_v42 = vpop.f32.mrf.mxu1 }
0x1adb   :  { %v3757_v4 = vsel %vm402_vm3, %v3746_v41, 0  ;;  %6108 = vmatpush3.bf16.msra.mxu0 %v6339_v34  ;;  %6115 = vmatprep.mubr.msk.bf16.mxu0 %vm72_vm1, %v7216_v26 }
0x1adc   :  { %6217 = vmatprep.subr.msk.bf16.mxu1 %vm402_vm3, %v3746_v41  ;;  %v6106_v44 = vpop.f32.mrf.mxu1  ;;  %6109 = vmatprep.subr.bf16.mxu0 %v6340_v38 }
0x1add   :  { %6120 = vmatpush3.bf16.xpose.msra.mxu1 %v3757_v4 }
0x1ade   :  { %v3651_v47 = vpop.f32.mrf.mxu1 }
0x1adf   :  { %v3745_v48 = vpack.c.bf16 %v3651_v47, %v3648_v42  ;;  %6110 = vmatpush3.bf16.msra.mxu0 %v6340_v38  ;;  %v6343_v47 = vld [vmem:[%s7670_s6 + $0xf8] sm:$0xff]  }
0x1ae0   :  { %6111 = vmatprep.subr.bf16.mxu0 %v6341_v46 }
0x1ae1   :  { %6218 = vmatprep.subr.msk.bf16.mxu1 %vm402_vm3, %v3745_v48  ;;  %v3754_v55 = vsel %vm402_vm3, %v3745_v48, 0 }
0x1ae3   :  { %6112 = vmatpush3.bf16.msra.mxu0 %v6341_v46 }
0x1ae4   :  { %6113 = vmatprep.subr.bf16.mxu0 %v6342_v54 }
0x1ae5   :  { %6122 = vmatpush3.bf16.xpose.msra.mxu1 %v3754_v55 }
0x1ae7   :  { %6114 = vmatpush3.bf16.msra.mxu0 %v6342_v54 }
0x1aea   :  { %6116 = vmatmul.mubr.msk.bf16.vlgmr.msra.gmra.mxu0 %vm72_vm1, %v7222_v28 }
0x1b8a   :  { %v7423_v2 = vpop.f32.mrf.mxu0 }
0x1b8c   :  { %v7425_v49 = vpop.f32.mrf.mxu0 }
0x1b8e   :  { %v6076_v37 = vpop.f32.mrf.mxu0 }
0x1b90   :  { %v7427_v58 = vpop.f32.mrf.mxu0 }
0x1b9a   :  { %v6093_v39 = vpop.f32.mrf.mxu0 }
0x1b9b   :  { %v3744_v57 = vpack.c.bf16 %v6093_v39, %v6093_v39 }
0x1b9c   :  { %v3567_v51 = vpop.f32.mrf.mxu0 }
0x1b9e   :  { %v6094_v52 = vpop.f32.mrf.mxu0 }
0x1ba0   :  { %v3570_v53 = vpop.f32.mrf.mxu0 }
0x1ba1   :  { %v3743_v45 = vpack.c.bf16 %v3570_v53, %v3567_v51 }
0x1ba3   :  { %6123 = vmatprep.mubr.msk.bf16.mxu1 %vm402_vm3, %v3743_v45 }
0x1ba4   :  { %6124 = vmatmul.mubr.msk.bf16.vlgmr.msra.gmra.mxu1 %vm402_vm3, %v3744_v57 }
0x1baa   :  { %v6117_v59 = vpop.f32.mrf.mxu0 }
0x1bab   :  { %v3849_v60 = vpack.c.bf16 %v6117_v59, %v6117_v59 }
0x1bac   :  { %v3729_v56 = vpop.f32.mrf.mxu0 }
0x1bad   :  { %v3857_v3 = vsel %vm514_vm4, %v3849_v60, 0  ;;  %6219 = vmatprep.subr.msk.bf16.mxu0 %vm514_vm4, %v3849_v60  ;;  %v6344_v60 = vld [vmem:[%s7670_s6 + $0xf0] sm:$0xff]  }
0x1bae   :  { %v6118_v9 = vpop.f32.mrf.mxu0  ;;  %6128 = vmatpush3.bf16.msra.mxu0 %v3857_v3  ;;  %v6346_v3 = vld [vmem:[%s7670_s6 + $0xe0] sm:$0xff]  }
0x1baf   :  { %v6347_v9 = vld [vmem:[%s7672_s8 + $0xf8] sm:$0xff]  }
0x1bb0   :  { %v3732_v12 = vpop.f32.mrf.mxu0 }
0x1bb1   :  { %v3848_v43 = vpack.c.bf16 %v3732_v12, %v3729_v56  ;;  %v6345_v56 = vld [vmem:[%s7670_s6 + $0xe8] sm:$0xff]   ;;  %v6348_v12 = vld [vmem:[%s7672_s8 + $0xf0] sm:$0xff]  }
0x1bb3   :  { %6129 = vmatprep.subr.bf16.mxu0 %v3848_v43 }
0x1bb4   :  { %6130 = vmatpush3.bf16.msra.mxu0 %v3848_v43  ;;  %v6349_v43 = vld [vmem:[%s7672_s8 + $0xe8] sm:$0xff]  }
0x1bb5   :  { %6141 = vmatprep.subr.bf16.mxu0 %v6343_v47 }
0x1c64   :  { %v6125_v16 = vpop.f32.mrf.mxu1 }
0x1c65   :  { %v3809_v13 = vmul.f32 0.25, %v6125_v16  ;;  %v6350_v16 = vld [vmem:[%s7672_s8 + $0xe0] sm:$0xff]  }
0x1c66   :  { %v3793_v18 = vpop.f32.mrf.mxu1 }
0x1c67   :  { %v3807_v19 = vmul.f32 0.25, %v3793_v18  ;;  %v3812_v11 = vadd.f32 %v7275_v40, %v3809_v13  ;;  %v6351_v18 = vld [vmem:[%s7673_s9 + $0x30] sm:$0xff]   ;;  %v6352_v13 = vld [vmem:[%s7671_s7 + $0xf8] sm:$0xff]  }
0x1c68   :  { %v6126_v36 = vpop.f32.mrf.mxu1  ;;  %6135 = vmatprep.subr.bf16.mxu1 %v6351_v18 }
0x1c69   :  { %v3810_v17 = vadd.f32 %v7268_v8, %v3807_v19  ;;  %v3819_v20 = vsel %vm476_vm6, %v3812_v11, -inf  ;;  %6136 = vmatpush3.bf16.msra.mxu1 %v6351_v18 }
0x1c6a   :  { %v3796_v6 = vpop.f32.mrf.mxu1  ;;  %6153 = vmatprep.subr.bf16.mxu1 %v6352_v13 }
0x1c6b   :  { %v3808_v5 = vmul.f32 0.25, %v3796_v6  ;;  %v3813_v10 = vsel %vm469_vm5, %v3810_v17, -inf }
0x1c6c   :  { %3814 = vmax.xlane.f32.xlu0 %v3813_v10 }
0x1c6d   :  { %v3811_v7 = vadd.f32 %v7281_v14, %v3808_v5 }
0x1c6f   :  { %v3816_v21 = vsel %vm469_vm5, %v3811_v7, -inf }
0x1c70   :  { %3820 = vmax.xlane.f32.xlu0 %v3819_v20  ;;  %3817 = vmax.xlane.f32.xlu1 %v3816_v21  ;;  %v6355_v21 = vld [vmem:[%s7671_s7 + $0xe0] sm:$0xff]  }
0x1cf5   :  { %v3815_v22 = vpop.xlane.xlu0 %3814 }
0x1cf6   :  { %v3822_v24 = vsub.f32 %v3810_v17, %v3815_v22 }
0x1cf8   :  { %v3825_v25 = vmul.f32 1.442695, %v3822_v24 }
0x1cf9   :  { %v3821_v23 = vpop.xlane.xlu0 %3820  ;;  %v3818_v30 = vpop.xlane.xlu1 %3817 }
0x1cfa   :  { %6487 = vpow2.f32 %v3825_v25  ;;  %v3824_v32 = vsub.f32 %v3812_v11, %v3821_v23  ;;  %v3823_v33 = vsub.f32 %v3811_v7, %v3818_v30  ;;  %v6353_v11 = vld [vmem:[%s7671_s7 + $0xf0] sm:$0xff]   ;;  %v6354_v7 = vld [vmem:[%s7671_s7 + $0xe8] sm:$0xff]  }
0x1cfc   :  { %v3829_v34 = vmul.f32 1.442695, %v3824_v32  ;;  %v3827_v0 = vmul.f32 1.442695, %v3823_v33 }
0x1cfe   :  { %6489 = vpow2.f32 %v3829_v34 }
0x1cff   :  { %6491 = vpow2.f32 %v3827_v0 }
0x1d07   :  { %v6488_v38 = vpop.eup %6487 }
0x1d08   :  { %v3831_v41 = vsel %vm469_vm5, %v6488_v38, 0.0 }
0x1d09   :  { %3832 = vadd.xlane.f32.xlu1 %v3831_v41  ;;  %v3495_v41 = vadd.f32 %v7382_v1, %v7423_v2 }
0x1d0b   :  { %v6490_v42 = vpop.eup %6489 }
0x1d0c   :  { %v6492_v4 = vpop.eup %6491  ;;  %v3837_v44 = vsel %vm476_vm6, %v6490_v42, 0.0 }
0x1d0d   :  { %3838 = vadd.xlane.f32.xlu1 %v3837_v44  ;;  %v3834_v46 = vsel %vm469_vm5, %v6492_v4, 0.0 }
0x1d0e   :  { %3835 = vadd.xlane.f32.xlu0 %v3834_v46 }
0x1d92   :  { %v3833_v48 = vpop.xlane.xlu1 %3832 }
0x1d93   :  { %6493 = vrcp.f32 %v3833_v48  ;;  %v3490_v48 = vadd.f32 %v7402_v35, %v7427_v58 }
0x1d96   :  { %v3839_v54 = vpop.xlane.xlu1 %3838 }
0x1d97   :  { %v3836_v55 = vpop.xlane.xlu0 %3835  ;;  %6495 = vrcp.f32 %v3839_v54 }
0x1d98   :  { %6497 = vrcp.f32 %v3836_v55 }
0x1da0   :  { %v6494_v37 = vpop.eup %6493 }
0x1da1   :  { %v3843_v53 = vmul.f32 %v6494_v37, %v6488_v38 }
0x1da4   :  { %v6496_v39 = vpop.eup %6495 }
0x1da5   :  { %v6498_v51 = vpop.eup %6497  ;;  %v3845_v52 = vmul.f32 %v6496_v39, %v6490_v42 }
0x1da6   :  { %v3844_v45 = vmul.f32 %v6498_v51, %v6492_v4 }
0x1da7   :  { %v3847_v57 = vpack.c.bf16 %v3845_v52, %v3845_v52 }
0x1da8   :  { %v3846_v59 = vpack.c.bf16 %v3844_v45, %v3843_v53 }
0x1daa   :  { %6131 = vmatprep.mubr.msk.bf16.mxu0 %vm469_vm5, %v3846_v59 }
0x1dab   :  { %6132 = vmatmul.mubr.msk.bf16.vlgmr.msra.gmra.mxu0 %vm469_vm5, %v3847_v57 }
0x1dac   :  { %6142 = vmatpush3.bf16.msra.mxu0 %v6343_v47  ;;  %6149 = vmatprep.mubr.msk.bf16.mxu0 %vm72_vm1, %v7216_v26 }
0x1dad   :  { %6143 = vmatprep.subr.bf16.mxu0 %v6344_v60 }
0x1db0   :  { %6144 = vmatpush3.bf16.msra.mxu0 %v6344_v60 }
0x1db1   :  { %6145 = vmatprep.subr.bf16.mxu0 %v6345_v56 }
0x1db4   :  { %6146 = vmatpush3.bf16.msra.mxu0 %v6345_v56 }
0x1db5   :  { %6147 = vmatprep.subr.bf16.mxu0 %v6346_v3 }
0x1db8   :  { %6148 = vmatpush3.bf16.msra.mxu0 %v6346_v3 }
0x1db9   :  { %6165 = vmatprep.subr.bf16.mxu0 %v6347_v9 }
0x1dbb   :  { %6150 = vmatmul.mubr.msk.bf16.vlgmr.msra.gmra.mxu0 %vm72_vm1, %v7222_v28 }
0x1dbc   :  { %6166 = vmatpush3.bf16.msra.mxu0 %v6347_v9  ;;  %6173 = vmatprep.mubr.msk.bf16.mxu0 %vm72_vm1, %v7216_v26 }
0x1dbd   :  { %6167 = vmatprep.subr.bf16.mxu0 %v6348_v12 }
0x1dc0   :  { %6168 = vmatpush3.bf16.msra.mxu0 %v6348_v12 }
0x1dc1   :  { %6169 = vmatprep.subr.bf16.mxu0 %v6349_v43 }
0x1dc4   :  { %6170 = vmatpush3.bf16.msra.mxu0 %v6349_v43 }
0x1dc5   :  { %6171 = vmatprep.subr.bf16.mxu0 %v6350_v16 }
0x1dc8   :  { %6172 = vmatpush3.bf16.msra.mxu0 %v6350_v16 }
0x1dcb   :  { %6174 = vmatmul.mubr.msk.bf16.vlgmr.msra.gmra.mxu0 %vm72_vm1, %v7222_v28 }
0x1e6b   :  { %v6133_v19 = vpop.f32.mrf.mxu0 }
0x1e6c   :  { %v3908_v10 = vpack.c.bf16 %v6133_v19, %v6133_v19 }
0x1e6d   :  { %v3893_v36 = vpop.f32.mrf.mxu0 }
0x1e6f   :  { %v6134_v17 = vpop.f32.mrf.mxu0 }
0x1e71   :  { %v3896_v6 = vpop.f32.mrf.mxu0 }
0x1e72   :  { %v3907_v5 = vpack.c.bf16 %v3896_v6, %v3893_v36 }
0x1e74   :  { %6137 = vmatprep.mubr.msk.bf16.mxu1 %vm402_vm3, %v3907_v5 }
0x1e75   :  { %6138 = vmatmul.mubr.msk.bf16.vlgmr.msra.gmra.mxu1 %vm402_vm3, %v3908_v10 }
0x1e76   :  { %6154 = vmatpush3.bf16.msra.mxu1 %v6352_v13  ;;  %6161 = vmatprep.mubr.msk.bf16.mxu1 %vm72_vm1, %v7216_v26 }
0x1e77   :  { %6155 = vmatprep.subr.bf16.mxu1 %v6353_v11 }
0x1e7a   :  { %6156 = vmatpush3.bf16.msra.mxu1 %v6353_v11 }
0x1e7b   :  { %v6151_v20 = vpop.f32.mrf.mxu0  ;;  %6157 = vmatprep.subr.bf16.mxu1 %v6354_v7 }
0x1e7c   :  { %v4219_v35 = vpack.c.bf16 %v6151_v20, %v6151_v20 }
0x1e7d   :  { %v4042_v22 = vpop.f32.mrf.mxu0 }
0x1e7e   :  { %6158 = vmatpush3.bf16.msra.mxu1 %v6354_v7 }
0x1e7f   :  { %v6152_v24 = vpop.f32.mrf.mxu0  ;;  %6159 = vmatprep.subr.bf16.mxu1 %v6355_v21 }
0x1e81   :  { %v4045_v25 = vpop.f32.mrf.mxu0 }
0x1e82   :  { %6160 = vmatpush3.bf16.msra.mxu1 %v6355_v21  ;;  %v4218_v23 = vpack.c.bf16 %v4045_v25, %v4042_v22 }
0x1e85   :  { %6162 = vmatmul.mubr.msk.bf16.vlgmr.msra.gmra.mxu1 %vm72_vm1, %v7222_v28  ;;  %v3487_v28 = vadd.f32 %v7389_v29, %v7425_v49 }
0x1e86   :  { %6181 = vmatprep.mubr.msk.bf16.mxu1 %vm402_vm3, %v4218_v23 }
0x1e8b   :  { %v6175_v26 = vpop.f32.mrf.mxu0 }
0x1e8c   :  { %v4324_v30 = vpack.c.bf16 %v6175_v26, %v6175_v26 }
0x1e8d   :  { %v4204_v32 = vpop.f32.mrf.mxu0 }
0x1e8e   :  { %v4332_v33 = vsel %vm514_vm4, %v4324_v30, 0  ;;  %6222 = vmatprep.subr.msk.bf16.mxu0 %vm514_vm4, %v4324_v30 }
0x1e8f   :  { %v6176_v34 = vpop.f32.mrf.mxu0  ;;  %6186 = vmatpush3.bf16.msra.mxu0 %v4332_v33 }
0x1e91   :  { %v4207_v0 = vpop.f32.mrf.mxu0 }
0x1e92   :  { %v4323_v38 = vpack.c.bf16 %v4207_v0, %v4204_v32 }
0x1e94   :  { %6187 = vmatprep.subr.bf16.mxu0 %v4323_v38 }
0x1e95   :  { %6188 = vmatpush3.bf16.msra.mxu0 %v4323_v38 }
0x1f35   :  { %v6139_v42 = vpop.f32.mrf.mxu1 }
0x1f36   :  { %v7504_v4 = vadd.f32 %v6139_v42, %v3495_v41  ;;  %v6356_v42 = vld [vmem:[%s7673_s9 + $0x38] sm:$0xff]  }
0x1f37   :  { %v3958_v44 = vpop.f32.mrf.mxu1 }
0x1f38   :  { %v7506_v46 = vadd.f32 %v3958_v44, %v3487_v28 }
0x1f39   :  { %v6140_v47 = vpop.f32.mrf.mxu1 }
0x1f3b   :  { %v3961_v54 = vpop.f32.mrf.mxu1 }
0x1f3c   :  { %v7510_v55 = vadd.f32 %v3961_v54, %v3490_v48 }
0x1f45   :  { %v6163_v37 = vpop.f32.mrf.mxu1 }
0x1f46   :  { %v4221_v39 = vpack.c.bf16 %v6163_v37, %v6163_v37 }
0x1f47   :  { %v4123_v51 = vpop.f32.mrf.mxu1 }
0x1f48   :  { %v4232_v1 = vsel %vm402_vm3, %v4221_v39, 0  ;;  %6220 = vmatprep.subr.msk.bf16.mxu1 %vm402_vm3, %v4221_v39 }
0x1f49   :  { %v6164_v29 = vpop.f32.mrf.mxu1  ;;  %6178 = vmatpush3.bf16.xpose.msra.mxu1 %v4232_v1 }
0x1f4a   :  { %v5371_v29 = vld [vmem:[%s7674_s10 + $0x1] ss:$0 sm:$0xff] }
0x1f4b   :  { %v4126_v2 = vpop.f32.mrf.mxu1 }
0x1f4c   :  { %v4220_v49 = vpack.c.bf16 %v4126_v2, %v4123_v51 }
0x1f4e   :  { %6221 = vmatprep.subr.msk.bf16.mxu1 %vm402_vm3, %v4220_v49  ;;  %v4229_v52 = vsel %vm402_vm3, %v4220_v49, 0 }
0x1f51   :  { %6180 = vmatpush3.bf16.xpose.msra.mxu1 %v4229_v52 }
0x1f52   :  { %6193 = vmatprep.subr.bf16.mxu1 %v6356_v42 }
0x1f58   :  { %6182 = vmatmul.mubr.msk.bf16.vlgmr.msra.gmra.mxu1 %vm402_vm3, %v4219_v35 }
0x1f59   :  { %6194 = vmatpush3.bf16.msra.mxu1 %v6356_v42 }
0x2018   :  { %v6183_v58 = vpop.f32.mrf.mxu1 }
0x2019   :  { %v4284_v45 = vmul.f32 0.25, %v6183_v58 }
0x201a   :  { %v4268_v53 = vpop.f32.mrf.mxu1 }
0x201b   :  { %v4282_v57 = vmul.f32 0.25, %v4268_v53  ;;  %v4287_v12 = vadd.f32 %v7275_v40, %v4284_v45 }
0x201c   :  { %v6184_v59 = vpop.f32.mrf.mxu1 }
0x201d   :  { %v4285_v60 = vadd.f32 %v7268_v8, %v4282_v57  ;;  %v4294_v16 = vsel %vm476_vm6, %v4287_v12, -inf }
0x201e   :  { %v4271_v56 = vpop.f32.mrf.mxu1 }
0x201f   :  { %v4283_v3 = vmul.f32 0.25, %v4271_v56  ;;  %v4288_v9 = vsel %vm469_vm5, %v4285_v60, -inf }
0x2020   :  { %4289 = vmax.xlane.f32.xlu0 %v4288_v9 }
0x2021   :  { %v4286_v43 = vadd.f32 %v7281_v14, %v4283_v3 }
0x2023   :  { %v4291_v18 = vsel %vm469_vm5, %v4286_v43, -inf }
0x2024   :  { %4295 = vmax.xlane.f32.xlu0 %v4294_v16  ;;  %4292 = vmax.xlane.f32.xlu1 %v4291_v18 }
0x20a9   :  { %v4290_v13 = vpop.xlane.xlu0 %4289 }
0x20aa   :  { %v4297_v19 = vsub.f32 %v4285_v60, %v4290_v13  ;;  %v6359_v13 = vld [vmem:[%s7677_s13 + $0x74] ss:$8 sps:$4 sm:$0xff]  }
0x20ab   :  { %4603 = vmatprep.subr.bf16.mxu0 %v6359_v13 }
0x20ac   :  { %v4300_v36 = vmul.f32 1.442695, %v4297_v19  ;;  %v6357_v19 = vld [vmem:[%s7677_s13 + $0x70] ss:$8 sps:$4 sm:$0xff]  }
0x20ad   :  { %v4296_v17 = vpop.xlane.xlu0 %4295  ;;  %v4293_v8 = vpop.xlane.xlu1 %4292 }
0x20ae   :  { %6499 = vpow2.f32 %v4300_v36  ;;  %v4299_v6 = vsub.f32 %v4287_v12, %v4296_v17  ;;  %v4298_v5 = vsub.f32 %v4286_v43, %v4293_v8  ;;  %v6362_v36 = vld [vmem:[%s7677_s13 + $0x64] ss:$8 sps:$4 sm:$0xff]   ;;  %v6360_v17 = vld [vmem:[%s7677_s13 + $0x60] ss:$8 sps:$4 sm:$0xff]   ;;  %v6365_v8 = vld [vmem:[%s7677_s13 + $0x54] ss:$8 sps:$4 sm:$0xff]  }
0x20b0   :  { %v4304_v10 = vmul.f32 1.442695, %v4299_v6  ;;  %v4302_v11 = vmul.f32 1.442695, %v4298_v5  ;;  %v6363_v6 = vld [vmem:[%s7677_s13 + $0x50] ss:$8 sps:$4 sm:$0xff]  }
0x20b1   :  { %v6368_v5 = vld [vmem:[%s7677_s13 + $0x44] ss:$8 sps:$4 sm:$0xff]  }
0x20b2   :  { %6501 = vpow2.f32 %v4304_v10  ;;  %v6366_v10 = vld [vmem:[%s7677_s13 + $0x40] ss:$8 sps:$4 sm:$0xff]  }
0x20b3   :  { %6503 = vpow2.f32 %v4302_v11 }
0x20bb   :  { %v6500_v40 = vpop.eup %6499 }
0x20bc   :  { %v4306_v14 = vsel %vm469_vm5, %v6500_v40, 0.0 }
0x20bd   :  { %4307 = vadd.xlane.f32.xlu1 %v4306_v14 }
0x20bf   :  { %v6502_v7 = vpop.eup %6501 }
0x20c0   :  { %v6504_v20 = vpop.eup %6503  ;;  %v4312_v21 = vsel %vm476_vm6, %v6502_v7, 0.0 }
0x20c1   :  { %4313 = vadd.xlane.f32.xlu1 %v4312_v21  ;;  %v4309_v22 = vsel %vm469_vm5, %v6504_v20, 0.0 }
0x20c2   :  { %4310 = vadd.xlane.f32.xlu0 %v4309_v22 }
0x2146   :  { %v4308_v24 = vpop.xlane.xlu1 %4307 }
0x2147   :  { %6505 = vrcp.f32 %v4308_v24 }
0x214a   :  { %v4314_v25 = vpop.xlane.xlu1 %4313 }
0x214b   :  { %v4311_v23 = vpop.xlane.xlu0 %4310  ;;  %6507 = vrcp.f32 %v4314_v25 }
0x214c   :  { %6509 = vrcp.f32 %v4311_v23 }
0x2154   :  { %v6506_v26 = vpop.eup %6505 }
0x2155   :  { %v4318_v34 = vmul.f32 %v6506_v26, %v6500_v40 }
0x2158   :  { %v6508_v30 = vpop.eup %6507 }
0x2159   :  { %v6510_v32 = vpop.eup %6509  ;;  %v4320_v33 = vmul.f32 %v6508_v30, %v6502_v7 }
0x215a   :  { %v4319_v0 = vmul.f32 %v6510_v32, %v6504_v20 }
0x215b   :  { %v4322_v38 = vpack.c.bf16 %v4320_v33, %v4320_v33  ;;  %v5374_v33 = vld [vmem:[%s7675_s11 + $0x1] ss:$0 sm:$0xff] }
0x215c   :  { %v4321_v41 = vpack.c.bf16 %v4319_v0, %v4318_v34 }
0x215e   :  { %6189 = vmatprep.mubr.msk.bf16.mxu0 %vm469_vm5, %v4321_v41  ;;  %v5375_v41 = vld [vmem:[%s7676_s12 + $0x1] ss:$0 sm:$0xff] }
0x215f   :  { %6190 = vmatmul.mubr.msk.bf16.vlgmr.msra.gmra.mxu0 %vm469_vm5, %v4322_v38 }
0x2160   :  { %4627 = vmatprep.mubr.bf16.mxu0 %v6561_v15  ;;  %4604 = vmatpush1.bf16.msra.mxu0 %v6357_v19 }
0x2161   :  { %4605 = vmatprep.subr.bf16.mxu0 %v6362_v36 }
0x2164   :  { %4606 = vmatpush1.bf16.msra.mxu0 %v6360_v17 }
0x2165   :  { %4607 = vmatprep.subr.bf16.mxu0 %v6365_v8 }
0x2168   :  { %4608 = vmatpush1.bf16.msra.mxu0 %v6363_v6 }
0x2169   :  { %4609 = vmatprep.subr.bf16.mxu0 %v6368_v5 }
0x216c   :  { %4610 = vmatpush1.bf16.msra.mxu0 %v6366_v10 }
0x221f   :  { %v6191_v28 = vpop.f32.mrf.mxu0 }
0x2220   :  { %v4383_v37 = vpack.c.bf16 %v6191_v28, %v6191_v28 }
0x2221   :  { %v4368_v44 = vpop.f32.mrf.mxu0 }
0x2223   :  { %v6192_v47 = vpop.f32.mrf.mxu0 }
0x2225   :  { %v4371_v48 = vpop.f32.mrf.mxu0 }
0x2226   :  { %v4382_v54 = vpack.c.bf16 %v4371_v48, %v4368_v44  ;;  %v6369_v48 = vld [vmem:[%s7679_s15 + $0xf8] sm:$0xff]  }
0x2227   :  { %5707 = vmatprep.subr.bf16.mxu1 %v6369_v48 }
0x2228   :  { %6195 = vmatprep.mubr.msk.bf16.mxu1 %vm402_vm3, %v4382_v54  ;;  %v6370_v54 = vld [vmem:[%s7679_s15 + $0xb8] sm:$0xff]  }
0x2229   :  { %6196 = vmatmul.mubr.msk.bf16.vlgmr.msra.gmra.mxu1 %vm402_vm3, %v4383_v37  ;;  %v6371_v37 = vld [vmem:[%s7679_s15 + $0xf0] sm:$0xff]  }
0x222a   :  { %5708 = vmatpush3.bf16.msra.mxu1 %v6370_v54 }
0x222b   :  { %5709 = vmatprep.subr.bf16.mxu1 %v6371_v37 }
0x22e9   :  { %v6197_v39 = vpop.f32.mrf.mxu1 }
0x22ea   :  { %v4449_v51 = vadd.f32 %v6197_v39, %v7504_v4  ;;  %v6372_v39 = vld [vmem:[%s7679_s15 + $0xb0] sm:$0xff]  }
0x22eb   :  { %v4433_v1 = vpop.f32.mrf.mxu1  ;;  %5710 = vmatpush3.bf16.msra.mxu1 %v6372_v39 }
0x22ec   :  { %v4452_v2 = vadd.f32 %v4449_v51, %v7173_v63  ;;  %v4447_v49 = vadd.f32 %v4433_v1, %v7506_v46  ;;  %v6374_v51 = vld [vmem:[%s7679_s15 + $0xa8] sm:$0xff]   ;;  %v6375_v1 = vld [vmem:[%s7679_s15 + $0xe0] sm:$0xff]  }
0x22ed   :  { %v6198_v52 = vpop.f32.mrf.mxu1 }
0x22ee   :  { %v4450_v35 = vadd.f32 %v4447_v49, %v7163_v27  ;;  %v4463_v58 = vadd.f32 %v5371_v29, %v4452_v2  ;;  %v6377_v2 = vld [vmem:[%s7679_s15 + $0xd8] sm:$0xff]   ;;  %v6379_v52 = vld [vmem:[%s7679_s15 + $0xd0] sm:$0xff]  }
0x22ef   :  { %v4436_v53 = vpop.f32.mrf.mxu1  ;;  %v6378_v49 = vld [vmem:[%s7679_s15 + $0x98] sm:$0xff]  }
0x22f0   :  { %v7541_v45 = vadd.f32 %v5371_v29, %v4450_v35  ;;  %v4448_v57 = vadd.f32 %v4436_v53, %v7510_v55  ;;  %v4474_v18 = vsel %vm97_vm2, %v4463_v58, 0.0  ;;  %v6380_v35 = vld [vmem:[%s7679_s15 + $0x90] sm:$0xff]   ;;  %v6382_v53 = vld [vmem:[%s7679_s15 + $0x88] sm:$0xff]  }
0x22f2   :  { %v4451_v4 = vadd.f32 %v4448_v57, %v7168_v31  ;;  %v4468_v59 = vsel %vm72_vm1, %v7541_v45, 0.0  ;;  %v6383_v57 = vld [vmem:[%s7679_s15 + $0xc0] sm:$0xff]  }
0x22f3   :  { %4469 = vadd.xlane.f32.xlu0 %v4468_v59 }
0x22f4   :  { %v7547_v60 = vadd.f32 %v5371_v29, %v4451_v4  ;;  %v6376_v29 = vld [vmem:[%s7679_s15 + $0xa0] sm:$0xff]  }
0x22f5   :  { %v6384_v4 = vld [vmem:[%s7679_s15 + $0x80] sm:$0xff]  }
0x22f6   :  { %v4471_v63 = vsel %vm72_vm1, %v7547_v60, 0.0 }
0x22f7   :  { %4472 = vadd.xlane.f32.xlu1 %v4471_v63 }
0x237c   :  { %v4470_v46 = vpop.xlane.xlu0 %4469 }
0x237d   :  { %v4477_v27 = vmul.f32 0.015625, %v4470_v46 }
0x237f   :  { %v4480_v56 = vsub.f32 %v7541_v45, %v4477_v27 }
0x2380   :  { %v4473_v3 = vpop.xlane.xlu1 %4472 }
0x2381   :  { %v4478_v9 = vmul.f32 0.015625, %v4473_v3  ;;  %v4483_v12 = vmul.f32 %v4480_v56, %v4480_v56 }
0x2383   :  { %v4481_v55 = vsub.f32 %v7547_v60, %v4478_v9  ;;  %v4486_v31 = vsel %vm72_vm1, %v4483_v12, 0.0 }
0x2384   :  { %4487 = vadd.xlane.f32.xlu0 %v4486_v31 }
0x2385   :  { %v4484_v43 = vmul.f32 %v4481_v55, %v4481_v55 }
0x2387   :  { %v4489_v16 = vsel %vm72_vm1, %v4484_v43, 0.0 }
0x2388   :  { %4490 = vadd.xlane.f32.xlu1 %v4489_v16  ;;  %4475 = vadd.xlane.f32.xlu0 %v4474_v18 }
0x240d   :  { %v4488_v11 = vpop.xlane.xlu0 %4487 }
0x240e   :  { %v4495_v40 = vmul.f32 0.015625, %v4488_v11 }
0x2410   :  { %v4498_v14 = vadd.f32 1e-05, %v4495_v40 }
0x2411   :  { %v4491_v7 = vpop.xlane.xlu1 %4490  ;;  %v4476_v20 = vpop.xlane.xlu0 %4475 }
0x2412   :  { %6511 = vrsqrt.f32 %v4498_v14  ;;  %v4496_v21 = vmul.f32 0.015625, %v4491_v7  ;;  %v4479_v22 = vmul.f32 0.015625, %v4476_v20 }
0x2414   :  { %v4499_v24 = vadd.f32 1e-05, %v4496_v21  ;;  %v4482_v25 = vsub.f32 %v4463_v58, %v4479_v22  ;;  %v6381_v58 = vld [vmem:[%s7679_s15 + $0xc8] sm:$0xff]  }
0x2416   :  { %6513 = vrsqrt.f32 %v4499_v24  ;;  %v4485_v23 = vmul.f32 %v4482_v25, %v4482_v25 }
0x2418   :  { %v4492_v26 = vsel %vm97_vm2, %v4485_v23, 0.0 }
0x2419   :  { %4493 = vadd.xlane.f32.xlu1 %v4492_v26 }
0x241f   :  { %v6512_v30 = vpop.eup %6511 }
0x2420   :  { %v4504_v32 = vmul.f32 %v6512_v30, %v4480_v56 }
0x2422   :  { %v4513_v38 = vmul.f32 %v5374_v33, %v4504_v32 }
0x2423   :  { %v6514_v34 = vpop.eup %6513 }
0x2424   :  { %v4505_v0 = vmul.f32 %v6514_v34, %v4481_v55  ;;  %v4522_v28 = vadd.f32 %v5375_v41, %v4513_v38  ;;  %v5384_v55 = vld [vmem:[%s7698_s21 + $0x2] sm:$0x3] }
0x2425   :  { %v4542_v31 = vrot.slane %v5384_v55, %v2138_v50  ;;  %v4546_v43 = vrot.slane %v5384_v55, %v2142_v62 }
0x2426   :  { %v4514_v42 = vmul.f32 %v5374_v33, %v4505_v0 }
0x2428   :  { %v4523_v44 = vadd.f32 %v5375_v41, %v4514_v42 }
0x242a   :  { %v4525_v47 = vpack.c.bf16 %v4523_v44, %v4522_v28 }
0x242c   :  { %5393 = vmatmul.mubr.msk.bf16.vlgmr.msra.gmra.mxu0 %vm72_vm1, %v4525_v47 }
0x242d   :  { %4637 = vmatprep.mubr.bf16.mxu0 %v6561_v15  ;;  %v6373_v15 = vld [vmem:[%s7679_s15 + $0xe8] sm:$0xff]  }
0x242e   :  { %5711 = vmatprep.subr.bf16.mxu1 %v6373_v15 }
0x242f   :  { %5712 = vmatpush3.bf16.msra.mxu1 %v6374_v51 }
0x2430   :  { %5713 = vmatprep.subr.bf16.mxu1 %v6375_v1 }
0x2433   :  { %5714 = vmatpush3.bf16.msra.mxu1 %v6376_v29 }
0x2434   :  { %5715 = vmatprep.subr.bf16.mxu1 %v6377_v2 }
0x2437   :  { %5716 = vmatpush3.bf16.msra.mxu1 %v6378_v49 }
0x2438   :  { %5717 = vmatprep.subr.bf16.mxu1 %v6379_v52 }
0x243b   :  { %5718 = vmatpush3.bf16.msra.mxu1 %v6380_v35 }
0x243c   :  { %5719 = vmatprep.subr.bf16.mxu1 %v6381_v58 }
0x243f   :  { %5720 = vmatpush3.bf16.msra.mxu1 %v6382_v53 }
0x2440   :  { %5721 = vmatprep.subr.bf16.mxu1 %v6383_v57 }
0x2443   :  { %5722 = vmatpush3.bf16.msra.mxu1 %v6384_v4 }
0x24a2   :  { %v4494_v59 = vpop.xlane.xlu1 %4493 }
0x24a3   :  { %v4497_v63 = vmul.f32 0.015625, %v4494_v59 }
0x24a5   :  { %v4500_v46 = vadd.f32 1e-05, %v4497_v63 }
0x24a7   :  { %6515 = vrsqrt.f32 %v4500_v46 }
0x24b4   :  { %v6516_v27 = vpop.eup %6515 }
0x24b5   :  { %v4506_v56 = vmul.f32 %v6516_v27, %v4482_v25 }
0x24b7   :  { %v4515_v3 = vmul.f32 %v5374_v33, %v4506_v56 }
0x24b9   :  { %v4524_v9 = vadd.f32 %v5375_v41, %v4515_v3 }
0x24bb   :  { %v4526_v12 = vpack.c.bf16 %v4524_v9, %v4524_v9 }
0x24bd   :  { %5394 = vmatmul.mubr.msk.bf16.gmra.mxu0 %vm72_vm1, %v4526_v12 }
0x24ec   :  { %v4629_v16 = vpop.f32.mrf.mxu0 }
0x24ed   :  { %v4630_v18 = vadd.f32 %v4629_v16, %v4542_v31 }
0x24ee   :  { %v4631_v13 = vpop.f32.mrf.mxu0 }
0x24ef   :  { %v4652_v19 = vmul.f32 0.044715, %v4630_v18  ;;  %v4632_v36 = vadd.f32 %v4631_v13, %v4546_v43  ;;  %v4646_v15 = vmul.f32 0.5, %v4630_v18 }
0x24f0   :  { %v4633_v17 = vpop.f32.mrf.mxu0 }
0x24f1   :  { %v4658_v8 = vmul.f32 %v4652_v19, %v4630_v18  ;;  %v4653_v6 = vmul.f32 0.044715, %v4632_v36  ;;  %v4634_v5 = vadd.f32 %v4633_v17, %v4542_v31  ;;  %v4647_v54 = vmul.f32 0.5, %v4632_v36 }
0x24f2   :  { %v4635_v10 = vpop.f32.mrf.mxu0 }
0x24f3   :  { %v4664_v11 = vmul.f32 %v4658_v8, %v4630_v18  ;;  %v4659_v40 = vmul.f32 %v4653_v6, %v4632_v36  ;;  %v4654_v14 = vmul.f32 0.044715, %v4634_v5  ;;  %v4636_v7 = vadd.f32 %v4635_v10, %v4546_v43 }
0x24f4   :  { %v4648_v47 = vmul.f32 0.5, %v4634_v5 }
0x24f5   :  { %v4670_v20 = vadd.f32 %v4664_v11, %v4630_v18  ;;  %v4665_v21 = vmul.f32 %v4659_v40, %v4632_v36  ;;  %v4660_v50 = vmul.f32 %v4654_v14, %v4634_v5  ;;  %v4655_v22 = vmul.f32 0.044715, %v4636_v7  ;;  %v5428_v40 = vld [vmem:[%s7680_s16 + $0x1] ss:$0 sm:$0xff] }
0x24f6   :  { %v4649_v37 = vmul.f32 0.5, %v4636_v7 }
0x24f7   :  { %v4666_v61 = vmul.f32 %v4660_v50, %v4634_v5  ;;  %v4661_v62 = vmul.f32 %v4655_v22, %v4636_v7  ;;  %v4671_v24 = vadd.f32 %v4665_v21, %v4632_v36  ;;  %v4676_v25 = vmul.f32 0.7978846, %v4670_v20 }
0x24f9   :  { %v4672_v23 = vadd.f32 %v4666_v61, %v4634_v5  ;;  %v4667_v26 = vmul.f32 %v4661_v62, %v4636_v7  ;;  %v4677_v30 = vmul.f32 0.7978846, %v4671_v24 }
0x24fb   :  { %v4678_v32 = vmul.f32 0.7978846, %v4672_v23  ;;  %v4673_v33 = vadd.f32 %v4667_v26, %v4636_v7  ;;  %6517 = vtanh.f32 %v4677_v30 }
0x24fc   :  { %6519 = vtanh.f32 %v4676_v25 }
0x24fd   :  { %6521 = vtanh.f32 %v4678_v32  ;;  %v4679_v34 = vmul.f32 0.7978846, %v4673_v33 }
0x24ff   :  { %6523 = vtanh.f32 %v4679_v34 }
0x2508   :  { %v6518_v0 = vpop.eup %6517 }
0x2509   :  { %v6520_v38 = vpop.eup %6519  ;;  %v4689_v42 = vadd.f32 1.0, %v6518_v0 }
0x250a   :  { %v6522_v41 = vpop.eup %6521  ;;  %v4688_v48 = vadd.f32 1.0, %v6520_v38 }
0x250b   :  { %v4690_v28 = vadd.f32 1.0, %v6522_v41  ;;  %v4695_v1 = vmul.f32 %v4689_v42, %v4647_v54 }
0x250c   :  { %v6524_v44 = vpop.eup %6523  ;;  %v4694_v2 = vmul.f32 %v4688_v48, %v4646_v15 }
0x250d   :  { %v4691_v39 = vadd.f32 1.0, %v6524_v44  ;;  %v4696_v51 = vmul.f32 %v4690_v28, %v4648_v47 }
0x250f   :  { %v4697_v29 = vmul.f32 %v4691_v39, %v4649_v37  ;;  %v4700_v52 = vpack.c.bf16 %v4696_v51, %v4694_v2 }
0x2511   :  { %v4701_v49 = vpack.c.bf16 %v4697_v29, %v4695_v1  ;;  %v5445_v29 = vld [vmem:[%s7681_s17] ss:$0 sm:$0xff] }
0x2513   :  { %4873 = vmatprep.mubr.bf16.mxu1 %v4701_v49  ;;  %v5446_v49 = vld [vmem:[%s7682_s18] ss:$0 sm:$0xff] }
0x2514   :  { %4874 = vmatmul.mubr.bf16.vlgmr.msra.gmra.mxu1 %v4700_v52 }
0x257d   :  { %v4639_v35 = vpop.f32.mrf.mxu0 }
0x257e   :  { %v4640_v58 = vadd.f32 %v4639_v35, %v4542_v31 }
0x257f   :  { %v4641_v53 = vpop.f32.mrf.mxu0 }
0x2580   :  { %v4656_v57 = vmul.f32 0.044715, %v4640_v58  ;;  %v4642_v4 = vadd.f32 %v4641_v53, %v4546_v43  ;;  %v4650_v31 = vmul.f32 0.5, %v4640_v58 }
0x2581   :  { %v4643_v59 = vpop.f32.mrf.mxu0 }
0x2582   :  { %v4662_v63 = vmul.f32 %v4656_v57, %v4640_v58  ;;  %v4657_v46 = vmul.f32 0.044715, %v4642_v4  ;;  %v4651_v17 = vmul.f32 0.5, %v4642_v4 }
0x2583   :  { %v4644_v27 = vpop.f32.mrf.mxu0 }
0x2584   :  { %v4663_v56 = vmul.f32 %v4657_v46, %v4642_v4  ;;  %v4668_v3 = vmul.f32 %v4662_v63, %v4640_v58 }
0x2586   :  { %v4669_v9 = vmul.f32 %v4663_v56, %v4642_v4  ;;  %v4674_v12 = vadd.f32 %v4668_v3, %v4640_v58 }
0x2588   :  { %v4675_v55 = vadd.f32 %v4669_v9, %v4642_v4  ;;  %v4680_v16 = vmul.f32 0.7978846, %v4674_v12 }
0x258a   :  { %v4681_v18 = vmul.f32 0.7978846, %v4675_v55  ;;  %6525 = vtanh.f32 %v4680_v16 }
0x258c   :  { %6527 = vtanh.f32 %v4681_v18 }
0x2597   :  { %v6526_v13 = vpop.eup %6525 }
0x2598   :  { %v4692_v19 = vadd.f32 1.0, %v6526_v13 }
0x2599   :  { %v6528_v36 = vpop.eup %6527 }
0x259a   :  { %v4693_v8 = vadd.f32 1.0, %v6528_v36  ;;  %v4698_v43 = vmul.f32 %v4692_v19, %v4650_v31 }
0x259c   :  { %v4699_v6 = vmul.f32 %v4693_v8, %v4651_v17  ;;  %v4702_v10 = vpack.c.bf16 %v4698_v43, %v4698_v43 }
0x259e   :  { %v4703_v5 = vpack.c.bf16 %v4699_v6, %v4699_v6 }
0x25a0   :  { %4881 = vmatprep.mubr.bf16.mxu1 %v4703_v5 }
0x25a1   :  { %4882 = vmatmul.mubr.bf16.gmra.mxu1 %v4702_v10 }
0x25d4   :  { %v5723_v11 = vpop.f32.mrf.mxu1 }
0x25d6   :  { %v5724_v14 = vpop.f32.mrf.mxu1 }
0x25d7   :  { %v5725_v7 = vadd.f32 %v5724_v14, %v5723_v11 }
0x25d8   :  { %v5726_v20 = vpop.f32.mrf.mxu1 }
0x25d9   :  { %v4876_v21 = vadd.f32 %v5725_v7, %v5428_v40 }
0x25da   :  { %v5727_v50 = vpop.f32.mrf.mxu1 }
0x25db   :  { %v5728_v22 = vadd.f32 %v5727_v50, %v5726_v20  ;;  %v4888_v61 = vadd.f32 %v4876_v21, %v7541_v45 }
0x25dd   :  { %v4879_v62 = vadd.f32 %v5728_v22, %v5428_v40  ;;  %v4892_v24 = vsel %vm72_vm1, %v4888_v61, 0.0 }
0x25de   :  { %4893 = vadd.xlane.f32.xlu0 %v4892_v24 }
0x25df   :  { %v4889_v25 = vadd.f32 %v4879_v62, %v7547_v60 }
0x25e1   :  { %v4895_v23 = vsel %vm72_vm1, %v4889_v25, 0.0 }
0x25e2   :  { %4896 = vadd.xlane.f32.xlu1 %v4895_v23 }
0x2661   :  { %v5729_v26 = vpop.f32.mrf.mxu1 }
0x2663   :  { %v5730_v30 = vpop.f32.mrf.mxu1 }
0x2665   :  { %v5732_v32 = vpop.f32.mrf.mxu1 }
0x2667   :  { %v5733_v33 = vpop.f32.mrf.mxu1  ;;  %v4894_v34 = vpop.xlane.xlu0 %4893 }
0x2668   :  { %v4898_v0 = vmul.f32 0.015625, %v4894_v34 }
0x266a   :  { %v4900_v38 = vsub.f32 %v4888_v61, %v4898_v0 }
0x266b   :  { %v4897_v41 = vpop.xlane.xlu1 %4896 }
0x266c   :  { %v4899_v42 = vmul.f32 0.015625, %v4897_v41  ;;  %v4902_v28 = vmul.f32 %v4900_v38, %v4900_v38 }
0x266e   :  { %v4901_v45 = vsub.f32 %v4889_v25, %v4899_v42  ;;  %v4904_v44 = vsel %vm72_vm1, %v4902_v28, 0.0 }
0x266f   :  { %4905 = vadd.xlane.f32.xlu0 %v4904_v44 }
0x2670   :  { %v4903_v47 = vmul.f32 %v4901_v45, %v4901_v45 }
0x2672   :  { %v4907_v60 = vsel %vm72_vm1, %v4903_v47, 0.0 }
0x2673   :  { %4908 = vadd.xlane.f32.xlu1 %v4907_v60 }
0x26f8   :  { %v4906_v48 = vpop.xlane.xlu0 %4905 }
0x26f9   :  { %v4910_v54 = vmul.f32 0.015625, %v4906_v48 }
0x26fb   :  { %v4912_v37 = vadd.f32 1e-05, %v4910_v54 }
0x26fc   :  { %v4909_v39 = vpop.xlane.xlu1 %4908 }
0x26fd   :  { %6529 = vrsqrt.f32 %v4912_v37  ;;  %v4911_v15 = vmul.f32 0.015625, %v4909_v39 }
0x26ff   :  { %v4913_v51 = vadd.f32 1e-05, %v4911_v15 }
0x2701   :  { %6531 = vrsqrt.f32 %v4913_v51 }
0x270a   :  { %v6530_v1 = vpop.eup %6529 }
0x270b   :  { %v4916_v2 = vmul.f32 %v6530_v1, %v4900_v38 }
0x270d   :  { %v4924_v52 = vmul.f32 %v5445_v29, %v4916_v2 }
0x270e   :  { %v6532_v35 = vpop.eup %6531 }
0x270f   :  { %v4917_v58 = vmul.f32 %v6532_v35, %v4901_v45  ;;  %v4932_v53 = vadd.f32 %v5446_v49, %v4924_v52 }
0x2711   :  { %v4925_v57 = vmul.f32 %v5445_v29, %v4917_v58  ;;  %4934 = vst.msk [vmem:[#allocation3] sm:$0x1] %vm67_vm0, %v4932_v53 }
0x2713   :  { %v4933_v4 = vadd.f32 %v5446_v49, %v4925_v57 }
0x2715   :  { %4936 = vst.msk [vmem:[#allocation3] sm:$0x2] %vm4935_vm7, %v4933_v4 }
0x2716   :  { %6550 = shalt.err (!%p6547_p4)
}
0x2717   :  { %4946 = dma.vmem_to_hbm [thread:$0]  %s4944_s25, 32, %s7683_s19, [#allocation4]  }
0x2718   :  { %6559 = dma.done.wait [#allocation4], 32  }
0x2719   :  { %6560 = vsyncadd [#allocation4], 4294967264 }
0x271a   :  { %4950 = vsyncpa [#allocation4], 1 }

</bundles_post_ra>
